<compile_context>
chip_gen: v6e
topology: v6e:2x2x1
jax: 0.10.0
libtpu: 0.0.40
codegen_flags: <defaults>
</compile_context>

<pallas_src>
import functools

import jax
import jax.numpy as jnp
from jax.experimental import pallas as pl
from jax.experimental.pallas import tpu as pltpu


def _bottleneck_kernel(x_ref, w1_ref, w2_ref, w3_ref,
                       g1_ref, b1_ref, g2_ref, b2_ref, g3_ref, b3_ref,
                       out_ref, hpad_ref, *, B, H, W, Cmid, eps):
    """Fused Bottleneck forward.

    x_ref   : (B*H*W, Cin)        flattened NHWC input (lane-dense, Cin=128)
    w1_ref  : (Cin, Cmid)         conv1 (1x1) as a matmul
    w2_ref  : (9*Cmid, Cmid)      conv2 (3x3) taps stacked as (dy,dx,i) x o
    w3_ref  : (Cmid, Cout)        conv3 (1x1) as a matmul
    g*/b*   : (1, C)              BN affine params
    out_ref : (B*H*W, Cout)
    hpad_ref: (B, H+2, W+2, Cmid) VMEM scratch for the zero-padded stage-1 output
    """
    M = B * H * W

    def bn(a, g_ref, b_ref):
        # training-mode BatchNorm2d: per-channel batch stats, biased variance
        mean = jnp.mean(a, axis=0, keepdims=True)
        var = jnp.mean((a - mean) ** 2, axis=0, keepdims=True)
        return (a - mean) * jax.lax.rsqrt(var + eps) * g_ref[...] + b_ref[...]

    # ---- stage 1: 1x1 conv (pointwise matmul) + BN1 + ReLU -------------------
    h1 = jnp.dot(x_ref[...], w1_ref[...], preferred_element_type=jnp.float32)
    h1 = jnp.maximum(bn(h1, g1_ref, b1_ref), 0.0)                 # (M, Cmid)

    # ---- stage 2: 3x3 "same" conv (stride 1) + BN2 + ReLU --------------------
    # Zero-padded intermediate lives in a VMEM scratch (no XLA pad, no extra
    # HBM array); the conv is 9 shifted (M,Cmid)@(Cmid,Cmid) MXU matmuls, which
    # keeps vreg pressure low at this problem size.
    hpad_ref[...] = jnp.zeros((B, H + 2, W + 2, Cmid), jnp.float32)
    hpad_ref[:, 1:H + 1, 1:W + 1, :] = h1.reshape(B, H, W, Cmid)

    acc = jnp.zeros((M, Cmid), jnp.float32)
    for dy in range(3):
        for dx in range(3):
            patch = hpad_ref[:, dy:dy + H, dx:dx + W, :].reshape(M, Cmid)
            k = (dy * 3 + dx) * Cmid
            acc = acc + jnp.dot(patch, w2_ref[k:k + Cmid, :],
                                preferred_element_type=jnp.float32)
    h2 = jnp.maximum(bn(acc, g2_ref, b2_ref), 0.0)                # (M, Cmid)

    # ---- stage 3: 1x1 conv + BN3 + residual + ReLU ---------------------------
    y = jnp.dot(h2, w3_ref[...], preferred_element_type=jnp.float32)
    y = bn(y, g3_ref, b3_ref)
    y = y + x_ref[...]                                            # += identity
    out_ref[...] = jnp.maximum(y, 0.0)                            # (M, Cout), lane-dense


def bottleneck_forward(x_nchw, params, *, eps=1e-5):
    """Bottleneck.forward with stride=1, i_downsample=None. NCHW in/out."""
    B, Cin, H, W = x_nchw.shape
    Cmid = params["conv1_w"].shape[0]        # out_channels
    Cout = params["conv3_w"].shape[0]        # out_channels * expansion
    assert Cout == Cin, "residual path (i_downsample=None) needs in == out*expansion"

    # NCHW -> NHWC -> (B*H*W, C) lane-dense slab (XLA glue at the boundary).
    x_flat = jnp.transpose(x_nchw, (0, 2, 3, 1)).reshape(B * H * W, Cin)
    x_flat = x_flat.astype(jnp.float32)

    # One-time weight repacks into matmul-ready matrices (outside the kernel).
    w1 = params["conv1_w"].reshape(Cmid, Cin).T.astype(jnp.float32)            # (Cin, Cmid)
    w2 = jnp.transpose(params["conv2_w"], (2, 3, 1, 0))                        # OIHW -> HWIO
    w2 = w2.reshape(9 * Cmid, Cmid).astype(jnp.float32)                        # (9*Cmid, Cmid)
    w3 = params["conv3_w"].reshape(Cout, Cmid).T.astype(jnp.float32)           # (Cmid, Cout)

    def c2(v):
        return v.reshape(1, -1).astype(jnp.float32)

    kernel = functools.partial(_bottleneck_kernel,
                               B=B, H=H, W=W, Cmid=Cmid, eps=eps)
    vmem = pl.BlockSpec(memory_space=pltpu.MemorySpace.VMEM)

    out_flat = pl.pallas_call(
        kernel,
        out_shape=jax.ShapeDtypeStruct((B * H * W, Cout), jnp.float32),
        in_specs=[vmem] * 10,
        out_specs=vmem,
        scratch_shapes=[pltpu.VMEM((B, H + 2, W + 2, Cmid), jnp.float32)],
    )(x_flat, w1, w2, w3,
      c2(params["bn1_gamma"]), c2(params["bn1_beta"]),
      c2(params["bn2_gamma"]), c2(params["bn2_beta"]),
      c2(params["bn3_gamma"]), c2(params["bn3_beta"]))

    return jnp.transpose(out_flat.reshape(B, H, W, Cout), (0, 3, 1, 2))  # -> NCHW


def _reference_forward(x, params, eps=1e-5):
    """Pure-JAX (XLA) reference of the same forward pass, for a sanity check."""
    def bn(a, g, b):
        m = jnp.mean(a, axis=(0, 2, 3), keepdims=True)
        v = jnp.mean((a - m) ** 2, axis=(0, 2, 3), keepdims=True)
        return (a - m) * jax.lax.rsqrt(v + eps) * g[None, :, None, None] \
            + b[None, :, None, None]

    def conv(a, w, pad):
        return jax.lax.conv_general_dilated(
            a, w, window_strides=(1, 1), padding=[(pad, pad), (pad, pad)],
            dimension_numbers=("NCHW", "OIHW", "NCHW"),
            precision=jax.lax.Precision.HIGHEST)

    identity = x
    h = jax.nn.relu(bn(conv(x, params["conv1_w"], 0),
                       params["bn1_gamma"], params["bn1_beta"]))
    h = jax.nn.relu(bn(conv(h, params["conv2_w"], 1),
                       params["bn2_gamma"], params["bn2_beta"]))
    h = bn(conv(h, params["conv3_w"], 0),
           params["bn3_gamma"], params["bn3_beta"])
    return jax.nn.relu(h + identity)


if __name__ == "__main__":
    key = jax.random.PRNGKey(0)
    B, H, W = 2, 16, 16
    Cmid = 32                 # out_channels
    Cin = Cmid * 4            # in_channels == out_channels * expansion (residual path)
    Cout = Cin
    ks = jax.random.split(key, 10)

    x = jax.random.normal(ks[0], (B, Cin, H, W), jnp.float32)
    params = {
        # PyTorch layouts: Conv2d weight is (O, I, kH, kW)
        "conv1_w": 0.1 * jax.random.normal(ks[1], (Cmid, Cin, 1, 1), jnp.float32),
        "conv2_w": 0.1 * jax.random.normal(ks[2], (Cmid, Cmid, 3, 3), jnp.float32),
        "conv3_w": 0.1 * jax.random.normal(ks[3], (Cout, Cmid, 1, 1), jnp.float32),
        "bn1_gamma": 1.0 + 0.1 * jax.random.normal(ks[4], (Cmid,), jnp.float32),
        "bn1_beta": 0.1 * jax.random.normal(ks[5], (Cmid,), jnp.float32),
        "bn2_gamma": 1.0 + 0.1 * jax.random.normal(ks[6], (Cmid,), jnp.float32),
        "bn2_beta": 0.1 * jax.random.normal(ks[7], (Cmid,), jnp.float32),
        "bn3_gamma": 1.0 + 0.1 * jax.random.normal(ks[8], (Cout,), jnp.float32),
        "bn3_beta": 0.1 * jax.random.normal(ks[9], (Cout,), jnp.float32),
    }

    out = jax.jit(bottleneck_forward)(x, params)
    jax.block_until_ready(out)

    ref = jax.jit(_reference_forward)(x, params)
    jax.block_until_ready(ref)

    assert out.shape == (B, Cin, H, W)
    assert bool(jnp.all(out >= 0.0))                      # final ReLU
    max_err = float(jnp.max(jnp.abs(out - ref)))
    assert bool(jnp.allclose(out, ref, atol=2e-2, rtol=2e-2)), max_err
    # TODO(synk): BatchNorm running-stat buffer updates (training-mode side effect)
    # are not modeled; they do not affect the forward output.
    print("KERNEL_OK")
</pallas_src>

<mosaic_0001>
module attributes {stable_mosaic.version = 11 : i64} {
  func.func @_bottleneck_kernel(%arg0: memref<512x128xf32, #tpu.memory_space<vmem>>, %arg1: memref<128x32xf32, #tpu.memory_space<vmem>>, %arg2: memref<288x32xf32, #tpu.memory_space<vmem>>, %arg3: memref<32x128xf32, #tpu.memory_space<vmem>>, %arg4: memref<1x32xf32, #tpu.memory_space<vmem>>, %arg5: memref<1x32xf32, #tpu.memory_space<vmem>>, %arg6: memref<1x32xf32, #tpu.memory_space<vmem>>, %arg7: memref<1x32xf32, #tpu.memory_space<vmem>>, %arg8: memref<1x128xf32, #tpu.memory_space<vmem>>, %arg9: memref<1x128xf32, #tpu.memory_space<vmem>>, %arg10: memref<512x128xf32, #tpu.memory_space<vmem>>, %arg11: memref<2x18x18x32xf32, #tpu.memory_space<vmem>>) attributes {dimension_semantics = [], scalar_prefetch = 0 : i64, scratch_operands = 1 : i64, tpu.core_type = #tpu.core_type<tc>} {
    %c0 = arith.constant 0 : index
    %c0_0 = arith.constant 0 : index
    %0 = vector.load %arg0[%c0, %c0_0] : memref<512x128xf32, #tpu.memory_space<vmem>>, vector<512x128xf32>
    %c0_1 = arith.constant 0 : index
    %c0_2 = arith.constant 0 : index
    %1 = vector.load %arg1[%c0_1, %c0_2] : memref<128x32xf32, #tpu.memory_space<vmem>>, vector<128x32xf32>
    %cst = arith.constant dense<0.000000e+00> : vector<512x32xf32>
    %2 = tpu.matmul %0, %1, %cst {dimension_numbers = #tpu.dot_dimension_numbers<[1], [0], [0], [1], [0, 0, 1, 1], [], []>} : vector<512x128xf32>, vector<128x32xf32>, vector<512x32xf32> -> vector<512x32xf32>
    %cst_3 = arith.constant dense<0.000000e+00> : vector<32xf32>
    %3 = vector.multi_reduction <add>, %2, %cst_3 [0] : vector<512x32xf32> to vector<32xf32>
    %4 = vector.shape_cast %3 : vector<32xf32> to vector<1x32xf32>
    %cst_4 = arith.constant 5.120000e+02 : f32
    %5 = vector.broadcast %cst_4 : f32 to vector<1x32xf32>
    %6 = arith.divf %4, %5 : vector<1x32xf32>
    %7 = vector.broadcast %6 : vector<1x32xf32> to vector<512x32xf32>
    %8 = arith.subf %2, %7 : vector<512x32xf32>
    %9 = arith.mulf %8, %8 : vector<512x32xf32>
    %cst_5 = arith.constant dense<0.000000e+00> : vector<32xf32>
    %10 = vector.multi_reduction <add>, %9, %cst_5 [0] : vector<512x32xf32> to vector<32xf32>
    %11 = vector.shape_cast %10 : vector<32xf32> to vector<1x32xf32>
    %cst_6 = arith.constant 5.120000e+02 : f32
    %12 = vector.broadcast %cst_6 : f32 to vector<1x32xf32>
    %13 = arith.divf %11, %12 : vector<1x32xf32>
    %14 = vector.broadcast %6 : vector<1x32xf32> to vector<512x32xf32>
    %15 = arith.subf %2, %14 : vector<512x32xf32>
    %cst_7 = arith.constant 9.99999974E-6 : f32
    %16 = vector.broadcast %cst_7 : f32 to vector<1x32xf32>
    %17 = arith.addf %13, %16 : vector<1x32xf32>
    %18 = math.rsqrt %17 : vector<1x32xf32>
    %19 = vector.broadcast %18 : vector<1x32xf32> to vector<512x32xf32>
    %20 = arith.mulf %15, %19 : vector<512x32xf32>
    %c0_8 = arith.constant 0 : index
    %c0_9 = arith.constant 0 : index
    %21 = vector.load %arg4[%c0_8, %c0_9] : memref<1x32xf32, #tpu.memory_space<vmem>>, vector<1x32xf32>
    %22 = vector.broadcast %21 : vector<1x32xf32> to vector<512x32xf32>
    %23 = arith.mulf %20, %22 : vector<512x32xf32>
    %c0_10 = arith.constant 0 : index
    %c0_11 = arith.constant 0 : index
    %24 = vector.load %arg5[%c0_10, %c0_11] : memref<1x32xf32, #tpu.memory_space<vmem>>, vector<1x32xf32>
    %25 = vector.broadcast %24 : vector<1x32xf32> to vector<512x32xf32>
    %26 = arith.addf %23, %25 : vector<512x32xf32>
    %cst_12 = arith.constant 0.000000e+00 : f32
    %27 = vector.broadcast %cst_12 : f32 to vector<512x32xf32>
    %28 = arith.maximumf %26, %27 : vector<512x32xf32>
    %cst_13 = arith.constant 0.000000e+00 : f32
    %29 = vector.broadcast %cst_13 : f32 to vector<2x18x18x32xf32>
    %c0_14 = arith.constant 0 : index
    %c0_15 = arith.constant 0 : index
    %c0_16 = arith.constant 0 : index
    %c0_17 = arith.constant 0 : index
    %30 = vector.load %arg11[%c0_14, %c0_15, %c0_16, %c0_17] : memref<2x18x18x32xf32, #tpu.memory_space<vmem>>, vector<2x18x18x32xf32>
    tpu.vector_store %arg11[%c0_14, %c0_15, %c0_16, %c0_17], %29 {strides = array<i32>} : memref<2x18x18x32xf32, #tpu.memory_space<vmem>>, vector<2x18x18x32xf32>,
    %31 = vector.shape_cast %28 : vector<512x32xf32> to vector<2x16x16x32xf32>
    %c0_18 = arith.constant 0 : index
    %c1 = arith.constant 1 : index
    %c1_19 = arith.constant 1 : index
    %c0_20 = arith.constant 0 : index
    %32 = vector.load %arg11[%c0_18, %c1, %c1_19, %c0_20] : memref<2x18x18x32xf32, #tpu.memory_space<vmem>>, vector<2x16x16x32xf32>
    tpu.vector_store %arg11[%c0_18, %c1, %c1_19, %c0_20], %31 {strides = array<i32>} : memref<2x18x18x32xf32, #tpu.memory_space<vmem>>, vector<2x16x16x32xf32>,
    %cst_21 = arith.constant 0.000000e+00 : f32
    %33 = vector.broadcast %cst_21 : f32 to vector<512x32xf32>
    %c0_22 = arith.constant 0 : index
    %c0_23 = arith.constant 0 : index
    %c0_24 = arith.constant 0 : index
    %c0_25 = arith.constant 0 : index
    %34 = vector.load %arg11[%c0_22, %c0_23, %c0_24, %c0_25] : memref<2x18x18x32xf32, #tpu.memory_space<vmem>>, vector<2x16x16x32xf32>
    %35 = vector.shape_cast %34 : vector<2x16x16x32xf32> to vector<512x32xf32>
    %c0_26 = arith.constant 0 : index
    %c0_27 = arith.constant 0 : index
    %36 = vector.load %arg2[%c0_26, %c0_27] : memref<288x32xf32, #tpu.memory_space<vmem>>, vector<32x32xf32>
    %cst_28 = arith.constant dense<0.000000e+00> : vector<512x32xf32>
    %37 = tpu.matmul %35, %36, %cst_28 {dimension_numbers = #tpu.dot_dimension_numbers<[1], [0], [0], [1], [0, 0, 1, 1], [], []>} : vector<512x32xf32>, vector<32x32xf32>, vector<512x32xf32> -> vector<512x32xf32>
    %38 = arith.addf %33, %37 : vector<512x32xf32>
    %c0_29 = arith.constant 0 : index
    %c0_30 = arith.constant 0 : index
    %c1_31 = arith.constant 1 : index
    %c0_32 = arith.constant 0 : index
    %39 = vector.load %arg11[%c0_29, %c0_30, %c1_31, %c0_32] : memref<2x18x18x32xf32, #tpu.memory_space<vmem>>, vector<2x16x16x32xf32>
    %40 = vector.shape_cast %39 : vector<2x16x16x32xf32> to vector<512x32xf32>
    %c32 = arith.constant 32 : index
    %c0_33 = arith.constant 0 : index
    %41 = vector.load %arg2[%c32, %c0_33] : memref<288x32xf32, #tpu.memory_space<vmem>>, vector<32x32xf32>
    %cst_34 = arith.constant dense<0.000000e+00> : vector<512x32xf32>
    %42 = tpu.matmul %40, %41, %cst_34 {dimension_numbers = #tpu.dot_dimension_numbers<[1], [0], [0], [1], [0, 0, 1, 1], [], []>} : vector<512x32xf32>, vector<32x32xf32>, vector<512x32xf32> -> vector<512x32xf32>
    %43 = arith.addf %38, %42 : vector<512x32xf32>
    %c0_35 = arith.constant 0 : index
    %c0_36 = arith.constant 0 : index
    %c2 = arith.constant 2 : index
    %c0_37 = arith.constant 0 : index
    %44 = vector.load %arg11[%c0_35, %c0_36, %c2, %c0_37] : memref<2x18x18x32xf32, #tpu.memory_space<vmem>>, vector<2x16x16x32xf32>
    %45 = vector.shape_cast %44 : vector<2x16x16x32xf32> to vector<512x32xf32>
    %c64 = arith.constant 64 : index
    %c0_38 = arith.constant 0 : index
    %46 = vector.load %arg2[%c64, %c0_38] : memref<288x32xf32, #tpu.memory_space<vmem>>, vector<32x32xf32>
    %cst_39 = arith.constant dense<0.000000e+00> : vector<512x32xf32>
    %47 = tpu.matmul %45, %46, %cst_39 {dimension_numbers = #tpu.dot_dimension_numbers<[1], [0], [0], [1], [0, 0, 1, 1], [], []>} : vector<512x32xf32>, vector<32x32xf32>, vector<512x32xf32> -> vector<512x32xf32>
    %48 = arith.addf %43, %47 : vector<512x32xf32>
    %c0_40 = arith.constant 0 : index
    %c1_41 = arith.constant 1 : index
    %c0_42 = arith.constant 0 : index
    %c0_43 = arith.constant 0 : index
    %49 = vector.load %arg11[%c0_40, %c1_41, %c0_42, %c0_43] : memref<2x18x18x32xf32, #tpu.memory_space<vmem>>, vector<2x16x16x32xf32>
    %50 = vector.shape_cast %49 : vector<2x16x16x32xf32> to vector<512x32xf32>
    %c96 = arith.constant 96 : index
    %c0_44 = arith.constant 0 : index
    %51 = vector.load %arg2[%c96, %c0_44] : memref<288x32xf32, #tpu.memory_space<vmem>>, vector<32x32xf32>
    %cst_45 = arith.constant dense<0.000000e+00> : vector<512x32xf32>
    %52 = tpu.matmul %50, %51, %cst_45 {dimension_numbers = #tpu.dot_dimension_numbers<[1], [0], [0], [1], [0, 0, 1, 1], [], []>} : vector<512x32xf32>, vector<32x32xf32>, vector<512x32xf32> -> vector<512x32xf32>
    %53 = arith.addf %48, %52 : vector<512x32xf32>
    %c0_46 = arith.constant 0 : index
    %c1_47 = arith.constant 1 : index
    %c1_48 = arith.constant 1 : index
    %c0_49 = arith.constant 0 : index
    %54 = vector.load %arg11[%c0_46, %c1_47, %c1_48, %c0_49] : memref<2x18x18x32xf32, #tpu.memory_space<vmem>>, vector<2x16x16x32xf32>
    %55 = vector.shape_cast %54 : vector<2x16x16x32xf32> to vector<512x32xf32>
    %c128 = arith.constant 128 : index
    %c0_50 = arith.constant 0 : index
    %56 = vector.load %arg2[%c128, %c0_50] : memref<288x32xf32, #tpu.memory_space<vmem>>, vector<32x32xf32>
    %cst_51 = arith.constant dense<0.000000e+00> : vector<512x32xf32>
    %57 = tpu.matmul %55, %56, %cst_51 {dimension_numbers = #tpu.dot_dimension_numbers<[1], [0], [0], [1], [0, 0, 1, 1], [], []>} : vector<512x32xf32>, vector<32x32xf32>, vector<512x32xf32> -> vector<512x32xf32>
    %58 = arith.addf %53, %57 : vector<512x32xf32>
    %c0_52 = arith.constant 0 : index
    %c1_53 = arith.constant 1 : index
    %c2_54 = arith.constant 2 : index
    %c0_55 = arith.constant 0 : index
    %59 = vector.load %arg11[%c0_52, %c1_53, %c2_54, %c0_55] : memref<2x18x18x32xf32, #tpu.memory_space<vmem>>, vector<2x16x16x32xf32>
    %60 = vector.shape_cast %59 : vector<2x16x16x32xf32> to vector<512x32xf32>
    %c160 = arith.constant 160 : index
    %c0_56 = arith.constant 0 : index
    %61 = vector.load %arg2[%c160, %c0_56] : memref<288x32xf32, #tpu.memory_space<vmem>>, vector<32x32xf32>
    %cst_57 = arith.constant dense<0.000000e+00> : vector<512x32xf32>
    %62 = tpu.matmul %60, %61, %cst_57 {dimension_numbers = #tpu.dot_dimension_numbers<[1], [0], [0], [1], [0, 0, 1, 1], [], []>} : vector<512x32xf32>, vector<32x32xf32>, vector<512x32xf32> -> vector<512x32xf32>
    %63 = arith.addf %58, %62 : vector<512x32xf32>
    %c0_58 = arith.constant 0 : index
    %c2_59 = arith.constant 2 : index
    %c0_60 = arith.constant 0 : index
    %c0_61 = arith.constant 0 : index
    %64 = vector.load %arg11[%c0_58, %c2_59, %c0_60, %c0_61] : memref<2x18x18x32xf32, #tpu.memory_space<vmem>>, vector<2x16x16x32xf32>
    %65 = vector.shape_cast %64 : vector<2x16x16x32xf32> to vector<512x32xf32>
    %c192 = arith.constant 192 : index
    %c0_62 = arith.constant 0 : index
    %66 = vector.load %arg2[%c192, %c0_62] : memref<288x32xf32, #tpu.memory_space<vmem>>, vector<32x32xf32>
    %cst_63 = arith.constant dense<0.000000e+00> : vector<512x32xf32>
    %67 = tpu.matmul %65, %66, %cst_63 {dimension_numbers = #tpu.dot_dimension_numbers<[1], [0], [0], [1], [0, 0, 1, 1], [], []>} : vector<512x32xf32>, vector<32x32xf32>, vector<512x32xf32> -> vector<512x32xf32>
    %68 = arith.addf %63, %67 : vector<512x32xf32>
    %c0_64 = arith.constant 0 : index
    %c2_65 = arith.constant 2 : index
    %c1_66 = arith.constant 1 : index
    %c0_67 = arith.constant 0 : index
    %69 = vector.load %arg11[%c0_64, %c2_65, %c1_66, %c0_67] : memref<2x18x18x32xf32, #tpu.memory_space<vmem>>, vector<2x16x16x32xf32>
    %70 = vector.shape_cast %69 : vector<2x16x16x32xf32> to vector<512x32xf32>
    %c224 = arith.constant 224 : index
    %c0_68 = arith.constant 0 : index
    %71 = vector.load %arg2[%c224, %c0_68] : memref<288x32xf32, #tpu.memory_space<vmem>>, vector<32x32xf32>
    %cst_69 = arith.constant dense<0.000000e+00> : vector<512x32xf32>
    %72 = tpu.matmul %70, %71, %cst_69 {dimension_numbers = #tpu.dot_dimension_numbers<[1], [0], [0], [1], [0, 0, 1, 1], [], []>} : vector<512x32xf32>, vector<32x32xf32>, vector<512x32xf32> -> vector<512x32xf32>
    %73 = arith.addf %68, %72 : vector<512x32xf32>
    %c0_70 = arith.constant 0 : index
    %c2_71 = arith.constant 2 : index
    %c2_72 = arith.constant 2 : index
    %c0_73 = arith.constant 0 : index
    %74 = vector.load %arg11[%c0_70, %c2_71, %c2_72, %c0_73] : memref<2x18x18x32xf32, #tpu.memory_space<vmem>>, vector<2x16x16x32xf32>
    %75 = vector.shape_cast %74 : vector<2x16x16x32xf32> to vector<512x32xf32>
    %c256 = arith.constant 256 : index
    %c0_74 = arith.constant 0 : index
    %76 = vector.load %arg2[%c256, %c0_74] : memref<288x32xf32, #tpu.memory_space<vmem>>, vector<32x32xf32>
    %cst_75 = arith.constant dense<0.000000e+00> : vector<512x32xf32>
    %77 = tpu.matmul %75, %76, %cst_75 {dimension_numbers = #tpu.dot_dimension_numbers<[1], [0], [0], [1], [0, 0, 1, 1], [], []>} : vector<512x32xf32>, vector<32x32xf32>, vector<512x32xf32> -> vector<512x32xf32>
    %78 = arith.addf %73, %77 : vector<512x32xf32>
    %cst_76 = arith.constant dense<0.000000e+00> : vector<32xf32>
    %79 = vector.multi_reduction <add>, %78, %cst_76 [0] : vector<512x32xf32> to vector<32xf32>
    %80 = vector.shape_cast %79 : vector<32xf32> to vector<1x32xf32>
    %cst_77 = arith.constant 5.120000e+02 : f32
    %81 = vector.broadcast %cst_77 : f32 to vector<1x32xf32>
    %82 = arith.divf %80, %81 : vector<1x32xf32>
    %83 = vector.broadcast %82 : vector<1x32xf32> to vector<512x32xf32>
    %84 = arith.subf %78, %83 : vector<512x32xf32>
    %85 = arith.mulf %84, %84 : vector<512x32xf32>
    %cst_78 = arith.constant dense<0.000000e+00> : vector<32xf32>
    %86 = vector.multi_reduction <add>, %85, %cst_78 [0] : vector<512x32xf32> to vector<32xf32>
    %87 = vector.shape_cast %86 : vector<32xf32> to vector<1x32xf32>
    %cst_79 = arith.constant 5.120000e+02 : f32
    %88 = vector.broadcast %cst_79 : f32 to vector<1x32xf32>
    %89 = arith.divf %87, %88 : vector<1x32xf32>
    %90 = vector.broadcast %82 : vector<1x32xf32> to vector<512x32xf32>
    %91 = arith.subf %78, %90 : vector<512x32xf32>
    %cst_80 = arith.constant 9.99999974E-6 : f32
    %92 = vector.broadcast %cst_80 : f32 to vector<1x32xf32>
    %93 = arith.addf %89, %92 : vector<1x32xf32>
    %94 = math.rsqrt %93 : vector<1x32xf32>
    %95 = vector.broadcast %94 : vector<1x32xf32> to vector<512x32xf32>
    %96 = arith.mulf %91, %95 : vector<512x32xf32>
    %c0_81 = arith.constant 0 : index
    %c0_82 = arith.constant 0 : index
    %97 = vector.load %arg6[%c0_81, %c0_82] : memref<1x32xf32, #tpu.memory_space<vmem>>, vector<1x32xf32>
    %98 = vector.broadcast %97 : vector<1x32xf32> to vector<512x32xf32>
    %99 = arith.mulf %96, %98 : vector<512x32xf32>
    %c0_83 = arith.constant 0 : index
    %c0_84 = arith.constant 0 : index
    %100 = vector.load %arg7[%c0_83, %c0_84] : memref<1x32xf32, #tpu.memory_space<vmem>>, vector<1x32xf32>
    %101 = vector.broadcast %100 : vector<1x32xf32> to vector<512x32xf32>
    %102 = arith.addf %99, %101 : vector<512x32xf32>
    %cst_85 = arith.constant 0.000000e+00 : f32
    %103 = vector.broadcast %cst_85 : f32 to vector<512x32xf32>
    %104 = arith.maximumf %102, %103 : vector<512x32xf32>
    %c0_86 = arith.constant 0 : index
    %c0_87 = arith.constant 0 : index
    %105 = vector.load %arg3[%c0_86, %c0_87] : memref<32x128xf32, #tpu.memory_space<vmem>>, vector<32x128xf32>
    %cst_88 = arith.constant dense<0.000000e+00> : vector<512x128xf32>
    %106 = tpu.matmul %104, %105, %cst_88 {dimension_numbers = #tpu.dot_dimension_numbers<[1], [0], [0], [1], [0, 0, 1, 1], [], []>} : vector<512x32xf32>, vector<32x128xf32>, vector<512x128xf32> -> vector<512x128xf32>
    %cst_89 = arith.constant dense<0.000000e+00> : vector<128xf32>
    %107 = vector.multi_reduction <add>, %106, %cst_89 [0] : vector<512x128xf32> to vector<128xf32>
    %108 = vector.shape_cast %107 : vector<128xf32> to vector<1x128xf32>
    %cst_90 = arith.constant 5.120000e+02 : f32
    %109 = vector.broadcast %cst_90 : f32 to vector<1x128xf32>
    %110 = arith.divf %108, %109 : vector<1x128xf32>
    %111 = vector.broadcast %110 : vector<1x128xf32> to vector<512x128xf32>
    %112 = arith.subf %106, %111 : vector<512x128xf32>
    %113 = arith.mulf %112, %112 : vector<512x128xf32>
    %cst_91 = arith.constant dense<0.000000e+00> : vector<128xf32>
    %114 = vector.multi_reduction <add>, %113, %cst_91 [0] : vector<512x128xf32> to vector<128xf32>
    %115 = vector.shape_cast %114 : vector<128xf32> to vector<1x128xf32>
    %cst_92 = arith.constant 5.120000e+02 : f32
    %116 = vector.broadcast %cst_92 : f32 to vector<1x128xf32>
    %117 = arith.divf %115, %116 : vector<1x128xf32>
    %118 = vector.broadcast %110 : vector<1x128xf32> to vector<512x128xf32>
    %119 = arith.subf %106, %118 : vector<512x128xf32>
    %cst_93 = arith.constant 9.99999974E-6 : f32
    %120 = vector.broadcast %cst_93 : f32 to vector<1x128xf32>
    %121 = arith.addf %117, %120 : vector<1x128xf32>
    %122 = math.rsqrt %121 : vector<1x128xf32>
    %123 = vector.broadcast %122 : vector<1x128xf32> to vector<512x128xf32>
    %124 = arith.mulf %119, %123 : vector<512x128xf32>
    %c0_94 = arith.constant 0 : index
    %c0_95 = arith.constant 0 : index
    %125 = vector.load %arg8[%c0_94, %c0_95] : memref<1x128xf32, #tpu.memory_space<vmem>>, vector<1x128xf32>
    %126 = vector.broadcast %125 : vector<1x128xf32> to vector<512x128xf32>
    %127 = arith.mulf %124, %126 : vector<512x128xf32>
    %c0_96 = arith.constant 0 : index
    %c0_97 = arith.constant 0 : index
    %128 = vector.load %arg9[%c0_96, %c0_97] : memref<1x128xf32, #tpu.memory_space<vmem>>, vector<1x128xf32>
    %129 = vector.broadcast %128 : vector<1x128xf32> to vector<512x128xf32>
    %130 = arith.addf %127, %129 : vector<512x128xf32>
    %c0_98 = arith.constant 0 : index
    %c0_99 = arith.constant 0 : index
    %131 = vector.load %arg0[%c0_98, %c0_99] : memref<512x128xf32, #tpu.memory_space<vmem>>, vector<512x128xf32>
    %132 = arith.addf %130, %131 : vector<512x128xf32>
    %cst_100 = arith.constant 0.000000e+00 : f32
    %133 = vector.broadcast %cst_100 : f32 to vector<512x128xf32>
    %134 = arith.maximumf %132, %133 : vector<512x128xf32>
    %c0_101 = arith.constant 0 : index
    %c0_102 = arith.constant 0 : index
    %135 = vector.load %arg10[%c0_101, %c0_102] : memref<512x128xf32, #tpu.memory_space<vmem>>, vector<512x128xf32>
    tpu.vector_store %arg10[%c0_101, %c0_102], %134 {strides = array<i32>} : memref<512x128xf32, #tpu.memory_space<vmem>>, vector<512x128xf32>,
    return
  }
}

</mosaic_0001>

<bundles_post_ra>
// kernel: bottleneck_forward.1
= control target key start
LH: loop header
LB: loop body
LE: loop exit
PB: predicated region body
PF: predicated region fallthrough
CT: control target
= control target key end

     0   :  { %s19994_s0 = inlined_call_operand.vmem [shape: f32[512,128], index: 0, kind: input, shape index: {}]   ;;  %s19995_s1 = inlined_call_operand.vmem [shape: f32[128,32], index: 1, kind: input, shape index: {}]   ;;  %s19996_s2 = inlined_call_operand.vmem [shape: f32[288,32], index: 2, kind: input, shape index: {}]   ;;  %s19997_s3 = inlined_call_operand.vmem [shape: f32[32,128], index: 3, kind: input, shape index: {}]   ;;  %s19998_s4 = inlined_call_operand.vmem [shape: f32[1,32], index: 4, kind: input, shape index: {}]   ;;  %s19999_s5 = inlined_call_operand.vmem [shape: f32[1,32], index: 5, kind: input, shape index: {}]   ;;  %s20000_s6 = inlined_call_operand.vmem [shape: f32[1,32], index: 6, kind: input, shape index: {}]   ;;  %s20001_s7 = inlined_call_operand.vmem [shape: f32[1,32], index: 7, kind: input, shape index: {}]   ;;  %s20002_s8 = inlined_call_operand.vmem [shape: f32[1,128], index: 8, kind: input, shape index: {}]   ;;  %s20003_s9 = inlined_call_operand.vmem [shape: f32[1,128], index: 9, kind: input, shape index: {}]   ;;  %s20004_s10 = inlined_call_operand.hbm [shape: f32[512,128], index: 10, kind: output, shape index: {}]  }
   0x1   :  { %v115_v0 = vld [vmem:[%s19995_s1 + $0x78] sm:$0xff]  ;;  %v114_v1 = vld [vmem:[%s19995_s1 + $0x70] sm:$0xff]  ;;  %v113_v2 = vld [vmem:[%s19995_s1 + $0x68] sm:$0xff] }
   0x2   :  { %11002 = vmatprep.subr.mxu0 %v115_v0  ;;  %v112_v3 = vld [vmem:[%s19995_s1 + $0x60] sm:$0xff]  ;;  %v111_v5 = vld [vmem:[%s19995_s1 + $0x58] sm:$0xff]  ;;  %v110_v6 = vld [vmem:[%s19995_s1 + $0x50] sm:$0xff] }
   0x3   :  { %11003 = vmatpush3.msra.mxu0 %v115_v0  ;;  %v36_v4 = vld [vmem:[%s19994_s0] sm:$0xff]  ;;  %v109_v7 = vld [vmem:[%s19995_s1 + $0x48] sm:$0xff]  ;;  %v107_v9 = vld [vmem:[%s19995_s1 + $0x38] sm:$0xff] }
   0x4   :  { %11004 = vmatprep.subr.mxu0 %v114_v1  ;;  %11034 = vmatprep.mubr.f32.mxu0 %v36_v4  ;;  %v108_v8 = vld [vmem:[%s19995_s1 + $0x40] sm:$0xff]  ;;  %v106_v10 = vld [vmem:[%s19995_s1 + $0x30] sm:$0xff]  ;;  %v105_v11 = vld [vmem:[%s19995_s1 + $0x28] sm:$0xff] }
   0x5   :  { %11005 = vmatpush3.msra.mxu0 %v114_v1  ;;  %v104_v12 = vld [vmem:[%s19995_s1 + $0x20] sm:$0xff]  ;;  %v103_v13 = vld [vmem:[%s19995_s1 + $0x18] sm:$0xff]  ;;  %v102_v14 = vld [vmem:[%s19995_s1 + $0x10] sm:$0xff] }
   0x6   :  { %11006 = vmatprep.subr.mxu0 %v113_v2  ;;  %v101_v15 = vld [vmem:[%s19995_s1 + $0x8] sm:$0xff] }
   0x7   :  { %11007 = vmatpush3.msra.mxu0 %v113_v2 }
   0x8   :  { %11008 = vmatprep.subr.mxu0 %v112_v3 }
   0x9   :  { %11009 = vmatpush3.msra.mxu0 %v112_v3 }
   0xa   :  { %11010 = vmatprep.subr.mxu0 %v111_v5 }
   0xb   :  { %11011 = vmatpush3.msra.mxu0 %v111_v5 }
   0xc   :  { %11012 = vmatprep.subr.mxu0 %v110_v6 }
   0xd   :  { %11013 = vmatpush3.msra.mxu0 %v110_v6 }
   0xe   :  { %11014 = vmatprep.subr.mxu0 %v109_v7 }
   0xf   :  { %11015 = vmatpush3.msra.mxu0 %v109_v7 }
  0x10   :  { %11016 = vmatprep.subr.mxu0 %v108_v8 }
  0x11   :  { %11017 = vmatpush3.msra.mxu0 %v108_v8 }
  0x12   :  { %11018 = vmatprep.subr.mxu0 %v107_v9 }
  0x13   :  { %11019 = vmatpush3.msra.mxu0 %v107_v9 }
  0x14   :  { %11020 = vmatprep.subr.mxu0 %v106_v10 }
  0x15   :  { %11021 = vmatpush3.msra.mxu0 %v106_v10 }
  0x16   :  { %11022 = vmatprep.subr.mxu0 %v105_v11 }
  0x17   :  { %11023 = vmatpush3.msra.mxu0 %v105_v11 }
  0x18   :  { %11024 = vmatprep.subr.mxu0 %v104_v12 }
  0x19   :  { %11025 = vmatpush3.msra.mxu0 %v104_v12 }
  0x1a   :  { %11026 = vmatprep.subr.mxu0 %v103_v13 }
  0x1b   :  { %11027 = vmatpush3.msra.mxu0 %v103_v13 }
  0x1c   :  { %15 = vsyncpa [#allocation4], 0  ;;  %11028 = vmatprep.subr.mxu0 %v102_v14  ;;  %v100_v16 = vld [vmem:[%s19995_s1] sm:$0xff]  ;;  %v37_v17 = vld [vmem:[%s19994_s0 + $0x8] sm:$0xff]  ;;  %vm501_vm0 = vcmask 261120   ;;  %vm1173_vm1 = vcmask 254976  }
  0x1d   :  { %11029 = vmatpush3.msra.mxu0 %v102_v14  ;;  %v38_v18 = vld [vmem:[%s19994_s0 + $0x10] sm:$0xff]  ;;  %v39_v19 = vld [vmem:[%s19994_s0 + $0x18] sm:$0xff]  ;;  %v40_v20 = vld [vmem:[%s19994_s0 + $0x20] sm:$0xff]  ;;  %v12210_v53 = vmov 0.0  }
  0x1e   :  { %11030 = vmatprep.subr.mxu0 %v101_v15  ;;  %v41_v21 = vld [vmem:[%s19994_s0 + $0x28] sm:$0xff]  ;;  %v42_v22 = vld [vmem:[%s19994_s0 + $0x30] sm:$0xff]  ;;  %v43_v23 = vld [vmem:[%s19994_s0 + $0x38] sm:$0xff]  ;;  %1176 = vst.msk [vmem:[#allocation2 + $0x20] sm:$0xff] %vm501_vm0, %v12210_v53 }
  0x1f   :  { %11031 = vmatpush3.msra.mxu0 %v101_v15  ;;  %v44_v24 = vld [vmem:[%s19994_s0 + $0x40] sm:$0xff]  ;;  %v45_v25 = vld [vmem:[%s19994_s0 + $0x48] sm:$0xff]  ;;  %v46_v26 = vld [vmem:[%s19994_s0 + $0x50] sm:$0xff]  ;;  %1177 = vst.msk [vmem:[#allocation2 + $0x28] sm:$0x3] %vm1173_vm1, %v12210_v53 }
  0x20   :  { %11032 = vmatprep.subr.mxu0 %v100_v16  ;;  %v47_v27 = vld [vmem:[%s19994_s0 + $0x58] sm:$0xff]  ;;  %v48_v28 = vld [vmem:[%s19994_s0 + $0x60] sm:$0xff]  ;;  %v49_v29 = vld [vmem:[%s19994_s0 + $0x68] sm:$0xff]  ;;  %1171 = vst.msk [vmem:[#allocation2] sm:$0xff] %vm501_vm0, %v12210_v53 }
  0x21   :  { %11033 = vmatpush3.msra.mxu0 %v100_v16  ;;  %v50_v30 = vld [vmem:[%s19994_s0 + $0x70] sm:$0xff]  ;;  %v51_v31 = vld [vmem:[%s19994_s0 + $0x78] sm:$0xff]  ;;  %v52_v32 = vld [vmem:[%s19994_s0 + $0x80] sm:$0xff]  ;;  %1172 = vst.msk [vmem:[#allocation2 + $0x8] sm:$0xff] %vm501_vm0, %v12210_v53 }
  0x22   :  { %11035 = vmatmul.mubr.f32.vlgmr.msra.gmra.mxu0 %v37_v17  ;;  %v53_v33 = vld [vmem:[%s19994_s0 + $0x88] sm:$0xff]  ;;  %v54_v34 = vld [vmem:[%s19994_s0 + $0x90] sm:$0xff]  ;;  %v55_v35 = vld [vmem:[%s19994_s0 + $0x98] sm:$0xff]  ;;  %1174 = vst.msk [vmem:[#allocation2 + $0x10] sm:$0x3] %vm1173_vm1, %v12210_v53 }
  0x23   :  { %11037 = vmatprep.mubr.f32.mxu0 %v38_v18  ;;  %v56_v36 = vld [vmem:[%s19994_s0 + $0xa0] sm:$0xff]  ;;  %v57_v37 = vld [vmem:[%s19994_s0 + $0xa8] sm:$0xff]  ;;  %v58_v38 = vld [vmem:[%s19994_s0 + $0xb0] sm:$0xff]  ;;  %1175 = vst.msk [vmem:[#allocation2 + $0x18] sm:$0xff] %vm501_vm0, %v12210_v53 }
  0x24   :  { %v59_v39 = vld [vmem:[%s19994_s0 + $0xb8] sm:$0xff]  ;;  %v60_v40 = vld [vmem:[%s19994_s0 + $0xc0] sm:$0xff]  ;;  %v61_v41 = vld [vmem:[%s19994_s0 + $0xc8] sm:$0xff]  ;;  %1178 = vst.msk [vmem:[#allocation2 + $0x30] sm:$0xff] %vm501_vm0, %v12210_v53 }
  0x25   :  { %v62_v42 = vld [vmem:[%s19994_s0 + $0xd0] sm:$0xff]  ;;  %v63_v43 = vld [vmem:[%s19994_s0 + $0xd8] sm:$0xff]  ;;  %v64_v44 = vld [vmem:[%s19994_s0 + $0xe0] sm:$0xff]  ;;  %1179 = vst.msk [vmem:[#allocation2 + $0x38] sm:$0xff] %vm501_vm0, %v12210_v53 }
  0x26   :  { %11038 = vmatmul.mubr.f32.gmra.mxu0 %v39_v19  ;;  %v65_v45 = vld [vmem:[%s19994_s0 + $0xe8] sm:$0xff]  ;;  %v66_v46 = vld [vmem:[%s19994_s0 + $0xf0] sm:$0xff]  ;;  %v67_v47 = vld [vmem:[%s19994_s0 + $0xf8] sm:$0xff]  ;;  %1180 = vst.msk [vmem:[#allocation2 + $0x40] sm:$0x3] %vm1173_vm1, %v12210_v53 }
  0x27   :  { %11040 = vmatprep.mubr.f32.mxu0 %v40_v20  ;;  %v68_v48 = vld [vmem:[%s19994_s0 + $0x100] sm:$0xff]  ;;  %v69_v49 = vld [vmem:[%s19994_s0 + $0x108] sm:$0xff]  ;;  %v70_v50 = vld [vmem:[%s19994_s0 + $0x110] sm:$0xff]  ;;  %1181 = vst.msk [vmem:[#allocation2 + $0x48] sm:$0xff] %vm501_vm0, %v12210_v53 }
  0x28   :  { %v12425_v51 = vld [vmem:[%s19994_s0 + $0x118] sm:$0xff]  ;;  %v12430_v52 = vld [vmem:[%s19994_s0 + $0x120] sm:$0xff]  ;;  %1182 = vst.msk [vmem:[#allocation2 + $0x50] sm:$0xff] %vm501_vm0, %v12210_v53  ;;  %1184 = vst.msk [vmem:[#allocation2 + $0x60] sm:$0xff] %vm501_vm0, %v12210_v53 }
  0x29   :  { %1183 = vst.msk [vmem:[#allocation2 + $0x58] sm:$0x3] %vm1173_vm1, %v12210_v53  ;;  %1186 = vst.msk [vmem:[#allocation2 + $0x70] sm:$0x3] %vm1173_vm1, %v12210_v53  ;;  %v73_v54 = vld [vmem:[%s19994_s0 + $0x128] sm:$0xff]  ;;  %v74_v55 = vld [vmem:[%s19994_s0 + $0x130] sm:$0xff] }
  0x2a   :  { %11041 = vmatmul.mubr.f32.gmra.mxu0 %v41_v21  ;;  %1185 = vst.msk [vmem:[#allocation2 + $0x68] sm:$0xff] %vm501_vm0, %v12210_v53  ;;  %1187 = vst.msk [vmem:[#allocation2 + $0x78] sm:$0xff] %vm501_vm0, %v12210_v53  ;;  %v75_v56 = vld [vmem:[%s19994_s0 + $0x138] sm:$0xff]  ;;  %v76_v57 = vld [vmem:[%s19994_s0 + $0x140] sm:$0xff] }
  0x2b   :  { %11043 = vmatprep.mubr.f32.mxu0 %v42_v22  ;;  %1188 = vst.msk [vmem:[#allocation2 + $0x80] sm:$0xff] %vm501_vm0, %v12210_v53  ;;  %1190 = vst.msk [vmem:[#allocation2 + $0x90] sm:$0xff] %vm501_vm0, %v12210_v53  ;;  %v77_v58 = vld [vmem:[%s19994_s0 + $0x148] sm:$0xff]  ;;  %v78_v59 = vld [vmem:[%s19994_s0 + $0x150] sm:$0xff] }
  0x2c   :  { %1189 = vst.msk [vmem:[#allocation2 + $0x88] sm:$0x3] %vm1173_vm1, %v12210_v53  ;;  %1192 = vst.msk [vmem:[#allocation2 + $0xa0] sm:$0x3] %vm1173_vm1, %v12210_v53  ;;  %v79_v60 = vld [vmem:[%s19994_s0 + $0x158] sm:$0xff]  ;;  %v80_v61 = vld [vmem:[%s19994_s0 + $0x160] sm:$0xff] }
  0x2d   :  { %1191 = vst.msk [vmem:[#allocation2 + $0x98] sm:$0xff] %vm501_vm0, %v12210_v53  ;;  %1193 = vst.msk [vmem:[#allocation2 + $0xa8] sm:$0xff] %vm501_vm0, %v12210_v53  ;;  %v81_v62 = vld [vmem:[%s19994_s0 + $0x168] sm:$0xff]  ;;  %v82_v63 = vld [vmem:[%s19994_s0 + $0x170] sm:$0xff] }
  0x2e   :  { %11044 = vmatmul.mubr.f32.gmra.mxu0 %v43_v23  ;;  %1194 = vst.msk [vmem:[#allocation2 + $0xb0] sm:$0xff] %vm501_vm0, %v12210_v53  ;;  %1196 = vst.msk [vmem:[#allocation2 + $0xc0] sm:$0xff] %vm501_vm0, %v12210_v53  ;;  %v83_v0 = vld [vmem:[%s19994_s0 + $0x178] sm:$0xff]  ;;  %v84_v1 = vld [vmem:[%s19994_s0 + $0x180] sm:$0xff] }
  0x2f   :  { %11046 = vmatprep.mubr.f32.mxu0 %v44_v24  ;;  %1195 = vst.msk [vmem:[#allocation2 + $0xb8] sm:$0x3] %vm1173_vm1, %v12210_v53  ;;  %1198 = vst.msk [vmem:[#allocation2 + $0xd0] sm:$0x3] %vm1173_vm1, %v12210_v53  ;;  %v85_v2 = vld [vmem:[%s19994_s0 + $0x188] sm:$0xff]  ;;  %v86_v3 = vld [vmem:[%s19994_s0 + $0x190] sm:$0xff] }
  0x30   :  { %1197 = vst.msk [vmem:[#allocation2 + $0xc8] sm:$0xff] %vm501_vm0, %v12210_v53  ;;  %1199 = vst.msk [vmem:[#allocation2 + $0xd8] sm:$0xff] %vm501_vm0, %v12210_v53  ;;  %v87_v4 = vld [vmem:[%s19994_s0 + $0x198] sm:$0xff]  ;;  %v88_v5 = vld [vmem:[%s19994_s0 + $0x1a0] sm:$0xff] }
  0x31   :  { %1200 = vst.msk [vmem:[#allocation2 + $0xe0] sm:$0xff] %vm501_vm0, %v12210_v53  ;;  %1202 = vst.msk [vmem:[#allocation2 + $0xf0] sm:$0xff] %vm501_vm0, %v12210_v53  ;;  %v89_v6 = vld [vmem:[%s19994_s0 + $0x1a8] sm:$0xff]  ;;  %v90_v7 = vld [vmem:[%s19994_s0 + $0x1b0] sm:$0xff] }
  0x32   :  { %11047 = vmatmul.mubr.f32.gmra.mxu0 %v45_v25  ;;  %1201 = vst.msk [vmem:[#allocation2 + $0xe8] sm:$0x3] %vm1173_vm1, %v12210_v53  ;;  %1204 = vst.msk [vmem:[#allocation2 + $0x100] sm:$0x3] %vm1173_vm1, %v12210_v53  ;;  %v91_v8 = vld [vmem:[%s19994_s0 + $0x1b8] sm:$0xff]  ;;  %v92_v9 = vld [vmem:[%s19994_s0 + $0x1c0] sm:$0xff] }
  0x33   :  { %11049 = vmatprep.mubr.f32.mxu0 %v46_v26  ;;  %1203 = vst.msk [vmem:[#allocation2 + $0xf8] sm:$0xff] %vm501_vm0, %v12210_v53  ;;  %1205 = vst.msk [vmem:[#allocation2 + $0x108] sm:$0xff] %vm501_vm0, %v12210_v53  ;;  %v93_v10 = vld [vmem:[%s19994_s0 + $0x1c8] sm:$0xff]  ;;  %v94_v11 = vld [vmem:[%s19994_s0 + $0x1d0] sm:$0xff] }
  0x34   :  { %1206 = vst.msk [vmem:[#allocation2 + $0x110] sm:$0xff] %vm501_vm0, %v12210_v53  ;;  %1208 = vst.msk [vmem:[#allocation2 + $0x120] sm:$0xff] %vm501_vm0, %v12210_v53  ;;  %v95_v12 = vld [vmem:[%s19994_s0 + $0x1d8] sm:$0xff]  ;;  %v96_v13 = vld [vmem:[%s19994_s0 + $0x1e0] sm:$0xff] }
  0x35   :  { %1207 = vst.msk [vmem:[#allocation2 + $0x118] sm:$0x3] %vm1173_vm1, %v12210_v53  ;;  %1210 = vst.msk [vmem:[#allocation2 + $0x130] sm:$0x3] %vm1173_vm1, %v12210_v53  ;;  %v97_v14 = vld [vmem:[%s19994_s0 + $0x1e8] sm:$0xff]  ;;  %v98_v15 = vld [vmem:[%s19994_s0 + $0x1f0] sm:$0xff] }
  0x36   :  { %11050 = vmatmul.mubr.f32.gmra.mxu0 %v47_v27  ;;  %1209 = vst.msk [vmem:[#allocation2 + $0x128] sm:$0xff] %vm501_vm0, %v12210_v53  ;;  %1211 = vst.msk [vmem:[#allocation2 + $0x138] sm:$0xff] %vm501_vm0, %v12210_v53  ;;  %v99_v16 = vld [vmem:[%s19994_s0 + $0x1f8] sm:$0xff] }
  0x37   :  { %11052 = vmatprep.mubr.f32.mxu0 %v48_v28  ;;  %1212 = vst.msk [vmem:[#allocation2 + $0x140] sm:$0xff] %vm501_vm0, %v12210_v53  ;;  %1214 = vst.msk [vmem:[#allocation2 + $0x150] sm:$0xff] %vm501_vm0, %v12210_v53 }
  0x38   :  { %1213 = vst.msk [vmem:[#allocation2 + $0x148] sm:$0x3] %vm1173_vm1, %v12210_v53  ;;  %1216 = vst.msk [vmem:[#allocation2 + $0x160] sm:$0x3] %vm1173_vm1, %v12210_v53 }
  0x39   :  { %1215 = vst.msk [vmem:[#allocation2 + $0x158] sm:$0xff] %vm501_vm0, %v12210_v53  ;;  %1217 = vst.msk [vmem:[#allocation2 + $0x168] sm:$0xff] %vm501_vm0, %v12210_v53 }
  0x3a   :  { %11053 = vmatmul.mubr.f32.gmra.mxu0 %v49_v29  ;;  %1218 = vst.msk [vmem:[#allocation2 + $0x170] sm:$0xff] %vm501_vm0, %v12210_v53  ;;  %1220 = vst.msk [vmem:[#allocation2 + $0x180] sm:$0xff] %vm501_vm0, %v12210_v53 }
  0x3b   :  { %11055 = vmatprep.mubr.f32.mxu0 %v50_v30  ;;  %1219 = vst.msk [vmem:[#allocation2 + $0x178] sm:$0x3] %vm1173_vm1, %v12210_v53  ;;  %1222 = vst.msk [vmem:[#allocation2 + $0x190] sm:$0x3] %vm1173_vm1, %v12210_v53 }
  0x3c   :  { %1221 = vst.msk [vmem:[#allocation2 + $0x188] sm:$0xff] %vm501_vm0, %v12210_v53  ;;  %1223 = vst.msk [vmem:[#allocation2 + $0x198] sm:$0xff] %vm501_vm0, %v12210_v53 }
  0x3d   :  { %1224 = vst.msk [vmem:[#allocation2 + $0x1a0] sm:$0xff] %vm501_vm0, %v12210_v53  ;;  %1226 = vst.msk [vmem:[#allocation2 + $0x1b0] sm:$0xff] %vm501_vm0, %v12210_v53 }
  0x3e   :  { %11056 = vmatmul.mubr.f32.gmra.mxu0 %v51_v31  ;;  %1225 = vst.msk [vmem:[#allocation2 + $0x1a8] sm:$0x3] %vm1173_vm1, %v12210_v53  ;;  %1228 = vst.msk [vmem:[#allocation2 + $0x1c0] sm:$0x3] %vm1173_vm1, %v12210_v53 }
  0x3f   :  { %11058 = vmatprep.mubr.f32.mxu0 %v52_v32  ;;  %1227 = vst.msk [vmem:[#allocation2 + $0x1b8] sm:$0xff] %vm501_vm0, %v12210_v53  ;;  %1229 = vst.msk [vmem:[#allocation2 + $0x1c8] sm:$0xff] %vm501_vm0, %v12210_v53 }
  0x40   :  { %1230 = vst.msk [vmem:[#allocation2 + $0x1d0] sm:$0xff] %vm501_vm0, %v12210_v53  ;;  %1232 = vst.msk [vmem:[#allocation2 + $0x1e0] sm:$0xff] %vm501_vm0, %v12210_v53 }
  0x41   :  { %1231 = vst.msk [vmem:[#allocation2 + $0x1d8] sm:$0x3] %vm1173_vm1, %v12210_v53  ;;  %1234 = vst.msk [vmem:[#allocation2 + $0x1f0] sm:$0x3] %vm1173_vm1, %v12210_v53 }
  0x42   :  { %11059 = vmatmul.mubr.f32.gmra.mxu0 %v53_v33  ;;  %1233 = vst.msk [vmem:[#allocation2 + $0x1e8] sm:$0xff] %vm501_vm0, %v12210_v53  ;;  %1235 = vst.msk [vmem:[#allocation2 + $0x1f8] sm:$0xff] %vm501_vm0, %v12210_v53 }
  0x43   :  { %11061 = vmatprep.mubr.f32.mxu0 %v54_v34  ;;  %1236 = vst.msk [vmem:[#allocation2 + $0x200] sm:$0xff] %vm501_vm0, %v12210_v53  ;;  %1238 = vst.msk [vmem:[#allocation2 + $0x210] sm:$0xff] %vm501_vm0, %v12210_v53 }
  0x44   :  { %1237 = vst.msk [vmem:[#allocation2 + $0x208] sm:$0x3] %vm1173_vm1, %v12210_v53  ;;  %1240 = vst.msk [vmem:[#allocation2 + $0x220] sm:$0x3] %vm1173_vm1, %v12210_v53 }
  0x45   :  { %1239 = vst.msk [vmem:[#allocation2 + $0x218] sm:$0xff] %vm501_vm0, %v12210_v53  ;;  %1241 = vst.msk [vmem:[#allocation2 + $0x228] sm:$0xff] %vm501_vm0, %v12210_v53 }
  0x46   :  { %11062 = vmatmul.mubr.f32.gmra.mxu0 %v55_v35  ;;  %1242 = vst.msk [vmem:[#allocation2 + $0x230] sm:$0xff] %vm501_vm0, %v12210_v53  ;;  %1244 = vst.msk [vmem:[#allocation2 + $0x240] sm:$0xff] %vm501_vm0, %v12210_v53 }
  0x47   :  { %11064 = vmatprep.mubr.f32.mxu0 %v56_v36  ;;  %1243 = vst.msk [vmem:[#allocation2 + $0x238] sm:$0x3] %vm1173_vm1, %v12210_v53  ;;  %1246 = vst.msk [vmem:[#allocation2 + $0x250] sm:$0x3] %vm1173_vm1, %v12210_v53 }
  0x48   :  { %1245 = vst.msk [vmem:[#allocation2 + $0x248] sm:$0xff] %vm501_vm0, %v12210_v53  ;;  %1247 = vst.msk [vmem:[#allocation2 + $0x258] sm:$0xff] %vm501_vm0, %v12210_v53 }
  0x49   :  { %1248 = vst.msk [vmem:[#allocation2 + $0x260] sm:$0xff] %vm501_vm0, %v12210_v53  ;;  %1250 = vst.msk [vmem:[#allocation2 + $0x270] sm:$0xff] %vm501_vm0, %v12210_v53 }
  0x4a   :  { %11065 = vmatmul.mubr.f32.gmra.mxu0 %v57_v37  ;;  %1249 = vst.msk [vmem:[#allocation2 + $0x268] sm:$0x3] %vm1173_vm1, %v12210_v53  ;;  %1252 = vst.msk [vmem:[#allocation2 + $0x280] sm:$0x3] %vm1173_vm1, %v12210_v53 }
  0x4b   :  { %11067 = vmatprep.mubr.f32.mxu0 %v58_v38  ;;  %1251 = vst.msk [vmem:[#allocation2 + $0x278] sm:$0xff] %vm501_vm0, %v12210_v53  ;;  %1253 = vst.msk [vmem:[#allocation2 + $0x288] sm:$0xff] %vm501_vm0, %v12210_v53 }
  0x4c   :  { %1254 = vst.msk [vmem:[#allocation2 + $0x290] sm:$0xff] %vm501_vm0, %v12210_v53  ;;  %1256 = vst.msk [vmem:[#allocation2 + $0x2a0] sm:$0xff] %vm501_vm0, %v12210_v53 }
  0x4d   :  { %1255 = vst.msk [vmem:[#allocation2 + $0x298] sm:$0x3] %vm1173_vm1, %v12210_v53  ;;  %1258 = vst.msk [vmem:[#allocation2 + $0x2b0] sm:$0x3] %vm1173_vm1, %v12210_v53 }
  0x4e   :  { %11068 = vmatmul.mubr.f32.gmra.mxu0 %v59_v39  ;;  %1257 = vst.msk [vmem:[#allocation2 + $0x2a8] sm:$0xff] %vm501_vm0, %v12210_v53  ;;  %1259 = vst.msk [vmem:[#allocation2 + $0x2b8] sm:$0xff] %vm501_vm0, %v12210_v53 }
  0x4f   :  { %11070 = vmatprep.mubr.f32.mxu0 %v60_v40  ;;  %1260 = vst.msk [vmem:[#allocation2 + $0x2c0] sm:$0xff] %vm501_vm0, %v12210_v53  ;;  %1262 = vst.msk [vmem:[#allocation2 + $0x2d0] sm:$0xff] %vm501_vm0, %v12210_v53 }
  0x50   :  { %1261 = vst.msk [vmem:[#allocation2 + $0x2c8] sm:$0x3] %vm1173_vm1, %v12210_v53  ;;  %1264 = vst.msk [vmem:[#allocation2 + $0x2e0] sm:$0x3] %vm1173_vm1, %v12210_v53 }
  0x51   :  { %1263 = vst.msk [vmem:[#allocation2 + $0x2d8] sm:$0xff] %vm501_vm0, %v12210_v53  ;;  %1265 = vst.msk [vmem:[#allocation2 + $0x2e8] sm:$0xff] %vm501_vm0, %v12210_v53 }
  0x52   :  { %11071 = vmatmul.mubr.f32.gmra.mxu0 %v61_v41  ;;  %1266 = vst.msk [vmem:[#allocation2 + $0x2f0] sm:$0xff] %vm501_vm0, %v12210_v53  ;;  %1268 = vst.msk [vmem:[#allocation2 + $0x300] sm:$0xff] %vm501_vm0, %v12210_v53 }
  0x53   :  { %11073 = vmatprep.mubr.f32.mxu0 %v62_v42  ;;  %1267 = vst.msk [vmem:[#allocation2 + $0x2f8] sm:$0x3] %vm1173_vm1, %v12210_v53  ;;  %1270 = vst.msk [vmem:[#allocation2 + $0x310] sm:$0x3] %vm1173_vm1, %v12210_v53 }
  0x54   :  { %1269 = vst.msk [vmem:[#allocation2 + $0x308] sm:$0xff] %vm501_vm0, %v12210_v53  ;;  %1271 = vst.msk [vmem:[#allocation2 + $0x318] sm:$0xff] %vm501_vm0, %v12210_v53 }
  0x55   :  { %1272 = vst.msk [vmem:[#allocation2 + $0x320] sm:$0xff] %vm501_vm0, %v12210_v53  ;;  %1274 = vst.msk [vmem:[#allocation2 + $0x330] sm:$0xff] %vm501_vm0, %v12210_v53 }
  0x56   :  { %11074 = vmatmul.mubr.f32.gmra.mxu0 %v63_v43  ;;  %1273 = vst.msk [vmem:[#allocation2 + $0x328] sm:$0x3] %vm1173_vm1, %v12210_v53  ;;  %1276 = vst.msk [vmem:[#allocation2 + $0x340] sm:$0x3] %vm1173_vm1, %v12210_v53 }
  0x57   :  { %11076 = vmatprep.mubr.f32.mxu0 %v64_v44  ;;  %1275 = vst.msk [vmem:[#allocation2 + $0x338] sm:$0xff] %vm501_vm0, %v12210_v53  ;;  %1277 = vst.msk [vmem:[#allocation2 + $0x348] sm:$0xff] %vm501_vm0, %v12210_v53 }
  0x58   :  { %1278 = vst.msk [vmem:[#allocation2 + $0x350] sm:$0xff] %vm501_vm0, %v12210_v53 }
  0x59   :  { %1279 = vst.msk [vmem:[#allocation2 + $0x358] sm:$0x3] %vm1173_vm1, %v12210_v53 }
  0x5a   :  { %11077 = vmatmul.mubr.f32.gmra.mxu0 %v65_v45 }
  0x5b   :  { %11079 = vmatprep.mubr.f32.mxu0 %v66_v46 }
  0x5e   :  { %11080 = vmatmul.mubr.f32.gmra.mxu0 %v67_v47 }
  0x5f   :  { %11082 = vmatprep.mubr.f32.mxu0 %v68_v48 }
  0x62   :  { %11083 = vmatmul.mubr.f32.gmra.mxu0 %v69_v49 }
  0x63   :  { %11085 = vmatprep.mubr.f32.mxu0 %v70_v50 }
  0x66   :  { %11086 = vmatmul.mubr.f32.gmra.mxu0 %v12425_v51 }
  0x67   :  { %11088 = vmatprep.mubr.f32.mxu0 %v12430_v52 }
  0x6a   :  { %11089 = vmatmul.mubr.f32.gmra.mxu0 %v73_v54 }
  0x6b   :  { %11091 = vmatprep.mubr.f32.mxu0 %v74_v55 }
  0x6e   :  { %11092 = vmatmul.mubr.f32.gmra.mxu0 %v75_v56 }
  0x6f   :  { %11094 = vmatprep.mubr.f32.mxu0 %v76_v57 }
  0x72   :  { %11095 = vmatmul.mubr.f32.gmra.mxu0 %v77_v58 }
  0x73   :  { %11097 = vmatprep.mubr.f32.mxu0 %v78_v59 }
  0x76   :  { %11098 = vmatmul.mubr.f32.gmra.mxu0 %v79_v60 }
  0x77   :  { %11100 = vmatprep.mubr.f32.mxu0 %v80_v61 }
  0x7a   :  { %11101 = vmatmul.mubr.f32.gmra.mxu0 %v81_v62 }
  0x7b   :  { %11103 = vmatprep.mubr.f32.mxu0 %v82_v63 }
  0x7e   :  { %11104 = vmatmul.mubr.f32.gmra.mxu0 %v83_v0 }
  0x7f   :  { %11106 = vmatprep.mubr.f32.mxu0 %v84_v1 }
  0x82   :  { %11107 = vmatmul.mubr.f32.gmra.mxu0 %v85_v2 }
  0x83   :  { %11109 = vmatprep.mubr.f32.mxu0 %v86_v3 }
  0x86   :  { %11110 = vmatmul.mubr.f32.gmra.mxu0 %v87_v4 }
  0x87   :  { %11112 = vmatprep.mubr.f32.mxu0 %v88_v5 }
  0x8a   :  { %11113 = vmatmul.mubr.f32.gmra.mxu0 %v89_v6 }
  0x8b   :  { %11115 = vmatprep.mubr.f32.mxu0 %v90_v7 }
  0x8e   :  { %11116 = vmatmul.mubr.f32.gmra.mxu0 %v91_v8 }
  0x8f   :  { %11118 = vmatprep.mubr.f32.mxu0 %v92_v9 }
  0x92   :  { %11119 = vmatmul.mubr.f32.gmra.mxu0 %v93_v10 }
  0x93   :  { %11121 = vmatprep.mubr.f32.mxu0 %v94_v11 }
  0x96   :  { %11122 = vmatmul.mubr.f32.gmra.mxu0 %v95_v12 }
  0x97   :  { %11124 = vmatprep.mubr.f32.mxu0 %v96_v13 }
  0x9a   :  { %11125 = vmatmul.mubr.f32.gmra.mxu0 %v97_v14 }
  0x9b   :  { %11127 = vmatprep.mubr.f32.mxu0 %v98_v15 }
  0x9e   :  { %11128 = vmatmul.mubr.f32.gmra.mxu0 %v99_v16 }
  0xe2   :  { %v12731_v17 = vpop.f32.mrf.mxu0 }
  0xe3   :  { %v503_v21 = vsel %vm501_vm0, %v12731_v17, 0.0 }
  0xe4   :  { %v12733_v18 = vpop.f32.mrf.mxu0 }
  0xe5   :  { %v502_v19 = vsel %vm501_vm0, %v12733_v18, 0.0 }
  0xe6   :  { %v12737_v20 = vpop.f32.mrf.mxu0  ;;  %v504_v22 = vadd.f32 %v503_v21, %v502_v19 }
  0xe7   :  { %v507_v27 = vsel %vm501_vm0, %v12737_v20, 0.0 }
  0xe8   :  { %v12741_v23 = vpop.f32.mrf.mxu0 }
  0xe9   :  { %v505_v24 = vsel %vm501_vm0, %v12741_v23, 0.0 }
  0xea   :  { %v506_v25 = vadd.f32 %v505_v24, %v504_v22  ;;  %v12745_v26 = vpop.f32.mrf.mxu0 }
  0xeb   :  { %v511_v33 = vsel %vm501_vm0, %v12745_v26, 0.0 }
  0xec   :  { %v508_v28 = vadd.f32 %v507_v27, %v506_v25  ;;  %v12749_v29 = vpop.f32.mrf.mxu0 }
  0xed   :  { %v509_v30 = vsel %vm501_vm0, %v12749_v29, 0.0 }
  0xee   :  { %v510_v31 = vadd.f32 %v509_v30, %v508_v28  ;;  %v12753_v32 = vpop.f32.mrf.mxu0 }
  0xef   :  { %v515_v39 = vsel %vm501_vm0, %v12753_v32, 0.0 }
  0xf0   :  { %v12757_v34 = vpop.f32.mrf.mxu0  ;;  %v512_v35 = vadd.f32 %v511_v33, %v510_v31 }
  0xf1   :  { %v513_v36 = vsel %vm501_vm0, %v12757_v34, 0.0 }
  0xf2   :  { %v514_v37 = vadd.f32 %v513_v36, %v512_v35  ;;  %v12761_v38 = vpop.f32.mrf.mxu0 }
  0xf3   :  { %v519_v45 = vsel %vm501_vm0, %v12761_v38, 0.0 }
  0xf4   :  { %v12765_v40 = vpop.f32.mrf.mxu0  ;;  %v516_v41 = vadd.f32 %v515_v39, %v514_v37 }
  0xf5   :  { %v517_v42 = vsel %vm501_vm0, %v12765_v40, 0.0 }
  0xf6   :  { %v518_v43 = vadd.f32 %v517_v42, %v516_v41  ;;  %v12769_v44 = vpop.f32.mrf.mxu0 }
  0xf7   :  { %v523_v51 = vsel %vm501_vm0, %v12769_v44, 0.0 }
  0xf8   :  { %v12773_v46 = vpop.f32.mrf.mxu0  ;;  %v520_v47 = vadd.f32 %v519_v45, %v518_v43 }
  0xf9   :  { %v521_v48 = vsel %vm501_vm0, %v12773_v46, 0.0 }
  0xfa   :  { %v522_v49 = vadd.f32 %v521_v48, %v520_v47  ;;  %v12777_v50 = vpop.f32.mrf.mxu0 }
  0xfb   :  { %v527_v57 = vsel %vm501_vm0, %v12777_v50, 0.0 }
  0xfc   :  { %v12781_v52 = vpop.f32.mrf.mxu0  ;;  %v524_v53 = vadd.f32 %v523_v51, %v522_v49 }
  0xfd   :  { %v525_v54 = vsel %vm501_vm0, %v12781_v52, 0.0 }
  0xfe   :  { %v526_v55 = vadd.f32 %v525_v54, %v524_v53  ;;  %v12785_v56 = vpop.f32.mrf.mxu0 }
  0xff   :  { %v531_v63 = vsel %vm501_vm0, %v12785_v56, 0.0 }
 0x100   :  { %v12789_v58 = vpop.f32.mrf.mxu0  ;;  %v528_v59 = vadd.f32 %v527_v57, %v526_v55 }
 0x101   :  { %v529_v60 = vsel %vm501_vm0, %v12789_v58, 0.0 }
 0x102   :  { %v530_v61 = vadd.f32 %v529_v60, %v528_v59  ;;  %v12793_v62 = vpop.f32.mrf.mxu0 }
 0x103   :  { %v535_v5 = vsel %vm501_vm0, %v12793_v62, 0.0 }
 0x104   :  { %v12797_v0 = vpop.f32.mrf.mxu0  ;;  %v532_v1 = vadd.f32 %v531_v63, %v530_v61 }
 0x105   :  { %v533_v2 = vsel %vm501_vm0, %v12797_v0, 0.0 }
 0x106   :  { %v534_v3 = vadd.f32 %v533_v2, %v532_v1  ;;  %v12801_v4 = vpop.f32.mrf.mxu0 }
 0x107   :  { %v539_v11 = vsel %vm501_vm0, %v12801_v4, 0.0 }
 0x108   :  { %v12805_v6 = vpop.f32.mrf.mxu0  ;;  %v536_v7 = vadd.f32 %v535_v5, %v534_v3 }
 0x109   :  { %v537_v8 = vsel %vm501_vm0, %v12805_v6, 0.0 }
 0x10a   :  { %v538_v9 = vadd.f32 %v537_v8, %v536_v7  ;;  %v12809_v10 = vpop.f32.mrf.mxu0 }
 0x10b   :  { %v543_v19 = vsel %vm501_vm0, %v12809_v10, 0.0 }
 0x10c   :  { %v12813_v12 = vpop.f32.mrf.mxu0  ;;  %v540_v13 = vadd.f32 %v539_v11, %v538_v9 }
 0x10d   :  { %v541_v14 = vsel %vm501_vm0, %v12813_v12, 0.0 }
 0x10e   :  { %v542_v15 = vadd.f32 %v541_v14, %v540_v13  ;;  %v12817_v16 = vpop.f32.mrf.mxu0 }
 0x10f   :  { %v547_v28 = vsel %vm501_vm0, %v12817_v16, 0.0 }
 0x110   :  { %v12821_v21 = vpop.f32.mrf.mxu0  ;;  %v544_v22 = vadd.f32 %v543_v19, %v542_v15 }
 0x111   :  { %v545_v24 = vsel %vm501_vm0, %v12821_v21, 0.0 }
 0x112   :  { %v546_v25 = vadd.f32 %v545_v24, %v544_v22  ;;  %v12825_v27 = vpop.f32.mrf.mxu0 }
 0x113   :  { %v551_v37 = vsel %vm501_vm0, %v12825_v27, 0.0 }
 0x114   :  { %v12829_v30 = vpop.f32.mrf.mxu0  ;;  %v548_v31 = vadd.f32 %v547_v28, %v546_v25 }
 0x115   :  { %v549_v33 = vsel %vm501_vm0, %v12829_v30, 0.0 }
 0x116   :  { %v550_v35 = vadd.f32 %v549_v33, %v548_v31  ;;  %v12833_v36 = vpop.f32.mrf.mxu0 }
 0x117   :  { %v555_v47 = vsel %vm501_vm0, %v12833_v36, 0.0 }
 0x118   :  { %v12837_v39 = vpop.f32.mrf.mxu0  ;;  %v552_v41 = vadd.f32 %v551_v37, %v550_v35 }
 0x119   :  { %v553_v42 = vsel %vm501_vm0, %v12837_v39, 0.0 }
 0x11a   :  { %v554_v43 = vadd.f32 %v553_v42, %v552_v41  ;;  %v12841_v45 = vpop.f32.mrf.mxu0 }
 0x11b   :  { %v559_v55 = vsel %vm501_vm0, %v12841_v45, 0.0 }
 0x11c   :  { %v12845_v48 = vpop.f32.mrf.mxu0  ;;  %v556_v49 = vadd.f32 %v555_v47, %v554_v43 }
 0x11d   :  { %v557_v51 = vsel %vm501_vm0, %v12845_v48, 0.0 }
 0x11e   :  { %v558_v53 = vadd.f32 %v557_v51, %v556_v49  ;;  %v12849_v54 = vpop.f32.mrf.mxu0 }
 0x11f   :  { %v563_v1 = vsel %vm501_vm0, %v12849_v54, 0.0 }
 0x120   :  { %v12853_v57 = vpop.f32.mrf.mxu0  ;;  %v560_v59 = vadd.f32 %v559_v55, %v558_v53 }
 0x121   :  { %v561_v60 = vsel %vm501_vm0, %v12853_v57, 0.0 }
 0x122   :  { %v562_v61 = vadd.f32 %v561_v60, %v560_v59  ;;  %v12857_v63 = vpop.f32.mrf.mxu0 }
 0x123   :  { %v567_v9 = vsel %vm501_vm0, %v12857_v63, 0.0 }
 0x124   :  { %v12861_v2 = vpop.f32.mrf.mxu0  ;;  %v564_v3 = vadd.f32 %v563_v1, %v562_v61 }
 0x125   :  { %v565_v5 = vsel %vm501_vm0, %v12861_v2, 0.0 }
 0x126   :  { %v566_v7 = vadd.f32 %v565_v5, %v564_v3  ;;  %v12865_v8 = vpop.f32.mrf.mxu0 }
 0x127   :  { %v571_v22 = vsel %vm501_vm0, %v12865_v8, 0.0 }
 0x128   :  { %v12869_v11 = vpop.f32.mrf.mxu0  ;;  %v568_v13 = vadd.f32 %v567_v9, %v566_v7 }
 0x129   :  { %v569_v14 = vsel %vm501_vm0, %v12869_v11, 0.0 }
 0x12a   :  { %v570_v15 = vadd.f32 %v569_v14, %v568_v13  ;;  %v12873_v19 = vpop.f32.mrf.mxu0 }
 0x12b   :  { %v575_v35 = vsel %vm501_vm0, %v12873_v19, 0.0 }
 0x12c   :  { %v12877_v24 = vpop.f32.mrf.mxu0  ;;  %v572_v25 = vadd.f32 %v571_v22, %v570_v15 }
 0x12d   :  { %v573_v28 = vsel %vm501_vm0, %v12877_v24, 0.0 }
 0x12e   :  { %v574_v31 = vadd.f32 %v573_v28, %v572_v25  ;;  %v12881_v33 = vpop.f32.mrf.mxu0 }
 0x12f   :  { %20171 = vst [vmem:[#allocation6_spill] sm:$0xff] %v12881_v33  ;;  %v579_v49 = vsel %vm501_vm0, %v12881_v33, 0.0 }
 0x130   :  { %v12885_v37 = vpop.f32.mrf.mxu0  ;;  %v576_v41 = vadd.f32 %v575_v35, %v574_v31 }
 0x131   :  { %v577_v42 = vsel %vm501_vm0, %v12885_v37, 0.0 }
 0x132   :  { %v578_v43 = vadd.f32 %v577_v42, %v576_v41  ;;  %v12889_v47 = vpop.f32.mrf.mxu0 }
 0x133   :  { %20172 = vst [vmem:[#allocation7_spill] sm:$0xff] %v12889_v47  ;;  %v583_v61 = vsel %vm501_vm0, %v12889_v47, 0.0 }
 0x134   :  { %v12893_v51 = vpop.f32.mrf.mxu0  ;;  %v580_v53 = vadd.f32 %v579_v49, %v578_v43 }
 0x135   :  { %20173 = vst [vmem:[#allocation8_spill] sm:$0xff] %v12893_v51  ;;  %v581_v55 = vsel %vm501_vm0, %v12893_v51, 0.0 }
 0x136   :  { %v582_v59 = vadd.f32 %v581_v55, %v580_v53  ;;  %v12897_v60 = vpop.f32.mrf.mxu0 }
 0x137   :  { %20174 = vst [vmem:[#allocation9_spill] sm:$0xff] %v12897_v60  ;;  %v587_v13 = vsel %vm501_vm0, %v12897_v60, 0.0 }
 0x138   :  { %v12901_v1 = vpop.f32.mrf.mxu0  ;;  %v584_v3 = vadd.f32 %v583_v61, %v582_v59 }
 0x139   :  { %20175 = vst [vmem:[#allocation10_spill] sm:$0xff] %v12901_v1  ;;  %v585_v5 = vsel %vm501_vm0, %v12901_v1, 0.0 }
 0x13a   :  { %v586_v7 = vadd.f32 %v585_v5, %v584_v3  ;;  %v12905_v9 = vpop.f32.mrf.mxu0 }
 0x13b   :  { %20176 = vst [vmem:[#allocation11_spill] sm:$0xff] %v12905_v9  ;;  %v591_v31 = vsel %vm501_vm0, %v12905_v9, 0.0 }
 0x13c   :  { %v12909_v14 = vpop.f32.mrf.mxu0  ;;  %v588_v15 = vadd.f32 %v587_v13, %v586_v7 }
 0x13d   :  { %20177 = vst [vmem:[#allocation12_spill] sm:$0xff] %v12909_v14  ;;  %v589_v22 = vsel %vm501_vm0, %v12909_v14, 0.0 }
 0x13e   :  { %v590_v25 = vadd.f32 %v589_v22, %v588_v15  ;;  %v12913_v28 = vpop.f32.mrf.mxu0 }
 0x13f   :  { %v595_v53 = vsel %vm501_vm0, %v12913_v28, 0.0 }
 0x140   :  { %v12917_v35 = vpop.f32.mrf.mxu0  ;;  %v592_v41 = vadd.f32 %v591_v31, %v590_v25 }
 0x141   :  { %20178 = vst [vmem:[#allocation13_spill] sm:$0xff] %v12917_v35  ;;  %v593_v42 = vsel %vm501_vm0, %v12917_v35, 0.0 }
 0x142   :  { %v594_v43 = vadd.f32 %v593_v42, %v592_v41  ;;  %v11108_v49 = vpop.f32.mrf.mxu0 }
 0x143   :  { %v599_v7 = vsel %vm501_vm0, %v11108_v49, 0.0 }
 0x144   :  { %v12923_v55 = vpop.f32.mrf.mxu0  ;;  %v596_v59 = vadd.f32 %v595_v53, %v594_v43 }
 0x145   :  { %20179 = vst [vmem:[#allocation14_spill] sm:$0xff] %v12923_v55  ;;  %v597_v61 = vsel %vm501_vm0, %v12923_v55, 0.0 }
 0x146   :  { %v598_v3 = vadd.f32 %v597_v61, %v596_v59  ;;  %v11111_v5 = vpop.f32.mrf.mxu0 }
 0x147   :  { %v603_v41 = vsel %vm501_vm0, %v11111_v5, 0.0 }
 0x148   :  { %v12928_v13 = vpop.f32.mrf.mxu0  ;;  %v600_v15 = vadd.f32 %v599_v7, %v598_v3 }
 0x149   :  { %20180 = vst [vmem:[#allocation15_spill] sm:$0xff] %v12928_v13  ;;  %v601_v22 = vsel %vm501_vm0, %v12928_v13, 0.0 }
 0x14a   :  { %v602_v25 = vadd.f32 %v601_v22, %v600_v15  ;;  %v11114_v31 = vpop.f32.mrf.mxu0 }
 0x14b   :  { %v607_v55 = vsel %vm501_vm0, %v11114_v31, 0.0 }
 0x14c   :  { %v12933_v42 = vpop.f32.mrf.mxu0  ;;  %v604_v43 = vadd.f32 %v603_v41, %v602_v25 }
 0x14d   :  { %20181 = vst [vmem:[#allocation16_spill] sm:$0xff] %v12933_v42  ;;  %v605_v53 = vsel %vm501_vm0, %v12933_v42, 0.0 }
 0x14e   :  { %v606_v59 = vadd.f32 %v605_v53, %v604_v43  ;;  %v11117_v61 = vpop.f32.mrf.mxu0 }
 0x14f   :  { %v611_v13 = vsel %vm501_vm0, %v11117_v61, 0.0 }
 0x150   :  { %v12938_v35 = vpop.f32.mrf.mxu0  ;;  %v608_v3 = vadd.f32 %v607_v55, %v606_v59 }
 0x151   :  { %20182 = vst [vmem:[#allocation17_spill] sm:$0xff] %v12938_v35  ;;  %v609_v7 = vsel %vm501_vm0, %v12938_v35, 0.0 }
 0x152   :  { %v610_v15 = vadd.f32 %v609_v7, %v608_v3  ;;  %v11120_v22 = vpop.f32.mrf.mxu0 }
 0x153   :  { %v615_v42 = vsel %vm501_vm0, %v11120_v22, 0.0 }
 0x154   :  { %v12943_v9 = vpop.f32.mrf.mxu0  ;;  %v612_v25 = vadd.f32 %v611_v13, %v610_v15 }
 0x155   :  { %20183 = vst [vmem:[#allocation18_spill] sm:$0xff] %v12943_v9  ;;  %v613_v41 = vsel %vm501_vm0, %v12943_v9, 0.0 }
 0x156   :  { %v614_v43 = vadd.f32 %v613_v41, %v612_v25  ;;  %v11123_v53 = vpop.f32.mrf.mxu0 }
 0x157   :  { %v619_v35 = vsel %vm501_vm0, %v11123_v53, 0.0 }
 0x158   :  { %v12948_v14 = vpop.f32.mrf.mxu0  ;;  %v616_v55 = vadd.f32 %v615_v42, %v614_v43 }
 0x159   :  { %20184 = vst [vmem:[#allocation19_spill] sm:$0xff] %v12948_v14  ;;  %v617_v59 = vsel %vm501_vm0, %v12948_v14, 0.0 }
 0x15a   :  { %v618_v3 = vadd.f32 %v617_v59, %v616_v55  ;;  %v11126_v7 = vpop.f32.mrf.mxu0 }
 0x15b   :  { %v623_v9 = vsel %vm501_vm0, %v11126_v7, 0.0 }
 0x15c   :  { %v12953_v60 = vpop.f32.mrf.mxu0  ;;  %v620_v13 = vadd.f32 %v619_v35, %v618_v3 }
 0x15d   :  { %20185 = vst [vmem:[#allocation20_spill] sm:$0xff] %v12953_v60  ;;  %v621_v15 = vsel %vm501_vm0, %v12953_v60, 0.0 }
 0x15e   :  { %v622_v25 = vadd.f32 %v621_v15, %v620_v13  ;;  %v11129_v41 = vpop.f32.mrf.mxu0 }
 0x15f   :  { %v627_v59 = vsel %vm501_vm0, %v11129_v41, 0.0 }
 0x160   :  { %v12958_v1 = vpop.f32.mrf.mxu0  ;;  %v624_v42 = vadd.f32 %v623_v9, %v622_v25 }
 0x161   :  { %v625_v43 = vsel %vm501_vm0, %v12958_v1, 0.0 }
 0x162   :  { %v626_v55 = vadd.f32 %v625_v43, %v624_v42 }
 0x164   :  { %v628_v14 = vadd.f32 %v627_v59, %v626_v55 }
 0x166   :  { %v629_v47 = vrot.slane %v628_v14, 4 }
 0x168   :  { %v630_v51 = vadd.f32 %v629_v47, %v628_v14 }
 0x16a   :  { %v631_v35 = vrot.slane %v630_v51, 2 }
 0x16c   :  { %v632_v3 = vadd.f32 %v631_v35, %v630_v51 }
 0x16e   :  { %v633_v33 = vrot.slane %v632_v3, 1 }
 0x170   :  { %v634_v60 = vadd.f32 %v633_v33, %v632_v3 }
 0x172   :  { %v12963_v13 = vmul.f32 0.001953125, %v634_v60 }
 0x174   :  { %v12967_v15 = vsub.f32 %v12913_v28, %v12963_v13  ;;  %v12970_v9 = vsub.f32 %v11108_v49, %v12963_v13  ;;  %v12973_v25 = vsub.f32 %v11111_v5, %v12963_v13  ;;  %v12976_v42 = vsub.f32 %v11114_v31, %v12963_v13 }
 0x175   :  { %v12979_v47 = vsub.f32 %v11117_v61, %v12963_v13  ;;  %v12982_v33 = vsub.f32 %v11120_v22, %v12963_v13  ;;  %v12985_v51 = vsub.f32 %v11123_v53, %v12963_v13  ;;  %v12988_v60 = vsub.f32 %v11126_v7, %v12963_v13 }
 0x176   :  { %20186 = vst [vmem:[#allocation21_spill] sm:$0xff] %v12970_v9  ;;  %20187 = vst [vmem:[#allocation22_spill] sm:$0xff] %v12973_v25  ;;  %v12991_v14 = vsub.f32 %v11129_v41, %v12963_v13  ;;  %v12995_v28 = vsub.f32 %v12733_v18, %v12963_v13  ;;  %v12999_v49 = vsub.f32 %v12731_v17, %v12963_v13 }
 0x177   :  { %20188 = vst [vmem:[#allocation23_spill] sm:$0xff] %v12976_v42  ;;  %20189 = vst [vmem:[#allocation24_spill] sm:$0xff] %v12979_v47  ;;  %v13003_v5 = vsub.f32 %v12741_v23, %v12963_v13  ;;  %v13007_v31 = vsub.f32 %v12737_v20, %v12963_v13  ;;  %v13015_v18 = vsub.f32 %v12749_v29, %v12963_v13 }
 0x178   :  { %20190 = vst [vmem:[#allocation25_spill] sm:$0xff] %v12985_v51  ;;  %20191 = vst [vmem:[#allocation26_spill] sm:$0xff] %v12991_v14  ;;  %v701_v61 = vmul.f32 %v12995_v28, %v12995_v28  ;;  %v702_v22 = vmul.f32 %v12999_v49, %v12999_v49  ;;  %v13021_v23 = vsub.f32 %v12745_v26, %v12963_v13 }
 0x179   :  { %v703_v17 = vmul.f32 %v13003_v5, %v13003_v5  ;;  %v704_v20 = vmul.f32 %v13007_v31, %v13007_v31  ;;  %v13029_v43 = vsub.f32 %v12757_v34, %v12963_v13  ;;  %v705_v29 = vmul.f32 %v13015_v18, %v13015_v18 }
 0x17a   :  { %v765_v53 = vsel %vm501_vm0, %v701_v61, 0.0  ;;  %v766_v7 = vsel %vm501_vm0, %v702_v22, 0.0  ;;  %v13036_v26 = vsub.f32 %v12753_v32, %v12963_v13  ;;  %v706_v35 = vmul.f32 %v13021_v23, %v13021_v23 }
 0x17b   :  { %v767_v41 = vadd.f32 %v766_v7, %v765_v53  ;;  %v768_v55 = vsel %vm501_vm0, %v703_v17, 0.0  ;;  %v770_v3 = vsel %vm501_vm0, %v704_v20, 0.0  ;;  %v13043_v34 = vsub.f32 %v12765_v40, %v12963_v13 }
 0x17c   :  { %v707_v22 = vmul.f32 %v13029_v43, %v13029_v43  ;;  %v772_v17 = vsel %vm501_vm0, %v705_v29, 0.0  ;;  %v13050_v32 = vsub.f32 %v12761_v38, %v12963_v13  ;;  %v708_v7 = vmul.f32 %v13036_v26, %v13036_v26 }
 0x17d   :  { %v769_v59 = vadd.f32 %v768_v55, %v767_v41  ;;  %v774_v20 = vsel %vm501_vm0, %v706_v35, 0.0  ;;  %v13057_v40 = vsub.f32 %v12773_v46, %v12963_v13  ;;  %v709_v55 = vmul.f32 %v13043_v34, %v13043_v34 }
 0x17e   :  { %v776_v29 = vsel %vm501_vm0, %v707_v22, 0.0  ;;  %v13064_v38 = vsub.f32 %v12769_v44, %v12963_v13  ;;  %v778_v35 = vsel %vm501_vm0, %v708_v7, 0.0  ;;  %v13071_v46 = vsub.f32 %v12781_v52, %v12963_v13 }
 0x17f   :  { %v771_v61 = vadd.f32 %v770_v3, %v769_v59  ;;  %v710_v3 = vmul.f32 %v13050_v32, %v13050_v32  ;;  %v780_v22 = vsel %vm501_vm0, %v709_v55, 0.0  ;;  %v13078_v44 = vsub.f32 %v12777_v50, %v12963_v13 }
 0x180   :  { %v13085_v52 = vsub.f32 %v12789_v58, %v12963_v13  ;;  %v13092_v50 = vsub.f32 %v12785_v56, %v12963_v13  ;;  %v13099_v58 = vsub.f32 %v12797_v0, %v12963_v13  ;;  %v13106_v56 = vsub.f32 %v12793_v62, %v12963_v13 }
 0x181   :  { %v773_v53 = vadd.f32 %v772_v17, %v771_v61  ;;  %v711_v17 = vmul.f32 %v13057_v40, %v13057_v40  ;;  %v782_v7 = vsel %vm501_vm0, %v710_v3, 0.0  ;;  %v13113_v0 = vsub.f32 %v12805_v6, %v12963_v13 }
 0x182   :  { %v13120_v62 = vsub.f32 %v12801_v4, %v12963_v13  ;;  %v13127_v6 = vsub.f32 %v12813_v12, %v12963_v13  ;;  %v13134_v4 = vsub.f32 %v12809_v10, %v12963_v13  ;;  %v13141_v12 = vsub.f32 %v12821_v21, %v12963_v13 }
 0x183   :  { %v775_v41 = vadd.f32 %v774_v20, %v773_v53  ;;  %v712_v20 = vmul.f32 %v13064_v38, %v13064_v38  ;;  %v784_v55 = vsel %vm501_vm0, %v711_v17, 0.0  ;;  %v13148_v10 = vsub.f32 %v12817_v16, %v12963_v13 }
 0x184   :  { %v13155_v21 = vsub.f32 %v12829_v30, %v12963_v13  ;;  %v13162_v16 = vsub.f32 %v12825_v27, %v12963_v13  ;;  %v13169_v30 = vsub.f32 %v12837_v39, %v12963_v13  ;;  %v13176_v27 = vsub.f32 %v12833_v36, %v12963_v13 }
 0x185   :  { %v777_v59 = vadd.f32 %v776_v29, %v775_v41  ;;  %v713_v29 = vmul.f32 %v13071_v46, %v13071_v46  ;;  %v786_v3 = vsel %vm501_vm0, %v712_v20, 0.0  ;;  %v13183_v39 = vsub.f32 %v12845_v48, %v12963_v13 }
 0x186   :  { %v13190_v36 = vsub.f32 %v12841_v45, %v12963_v13  ;;  %v13197_v48 = vsub.f32 %v12853_v57, %v12963_v13  ;;  %v13204_v45 = vsub.f32 %v12849_v54, %v12963_v13  ;;  %v13211_v57 = vsub.f32 %v12861_v2, %v12963_v13 }
 0x187   :  { %v779_v61 = vadd.f32 %v778_v35, %v777_v59  ;;  %v714_v35 = vmul.f32 %v13078_v44, %v13078_v44  ;;  %v788_v17 = vsel %vm501_vm0, %v713_v29, 0.0  ;;  %v13218_v54 = vsub.f32 %v12857_v63, %v12963_v13 }
 0x188   :  { %v13225_v2 = vsub.f32 %v12869_v11, %v12963_v13  ;;  %v13232_v63 = vsub.f32 %v12865_v8, %v12963_v13  ;;  %v13239_v11 = vsub.f32 %v12877_v24, %v12963_v13  ;;  %v13246_v8 = vsub.f32 %v12873_v19, %v12963_v13 }
 0x189   :  { %v781_v53 = vadd.f32 %v780_v22, %v779_v61  ;;  %v715_v22 = vmul.f32 %v13085_v52, %v13085_v52  ;;  %v790_v20 = vsel %vm501_vm0, %v714_v35, 0.0  ;;  %v13253_v24 = vsub.f32 %v12885_v37, %v12963_v13 }
 0x18a   :  { %20192 = vst [vmem:[#allocation27_spill] sm:$0xff] %v13239_v11  ;;  %20193 = vst [vmem:[#allocation28_spill] sm:$0xff] %v13246_v8 }
 0x18b   :  { %v783_v41 = vadd.f32 %v782_v7, %v781_v53  ;;  %v716_v7 = vmul.f32 %v13092_v50, %v13092_v50  ;;  %v792_v29 = vsel %vm501_vm0, %v715_v22, 0.0  ;;  %20194 = vst [vmem:[#allocation29_spill] sm:$0xff] %v13253_v24 }
 0x18d   :  { %v785_v59 = vadd.f32 %v784_v55, %v783_v41  ;;  %v717_v55 = vmul.f32 %v13099_v58, %v13099_v58  ;;  %v794_v35 = vsel %vm501_vm0, %v716_v7, 0.0 }
 0x18f   :  { %v787_v61 = vadd.f32 %v786_v3, %v785_v59  ;;  %v718_v3 = vmul.f32 %v13106_v56, %v13106_v56  ;;  %v796_v22 = vsel %vm501_vm0, %v717_v55, 0.0 }
 0x191   :  { %v789_v53 = vadd.f32 %v788_v17, %v787_v61  ;;  %v719_v17 = vmul.f32 %v13113_v0, %v13113_v0  ;;  %v798_v7 = vsel %vm501_vm0, %v718_v3, 0.0 }
 0x193   :  { %v791_v41 = vadd.f32 %v790_v20, %v789_v53  ;;  %v720_v20 = vmul.f32 %v13120_v62, %v13120_v62  ;;  %v800_v55 = vsel %vm501_vm0, %v719_v17, 0.0 }
 0x195   :  { %v793_v59 = vadd.f32 %v792_v29, %v791_v41  ;;  %v721_v29 = vmul.f32 %v13127_v6, %v13127_v6  ;;  %v802_v3 = vsel %vm501_vm0, %v720_v20, 0.0 }
 0x197   :  { %v795_v61 = vadd.f32 %v794_v35, %v793_v59  ;;  %v722_v35 = vmul.f32 %v13134_v4, %v13134_v4  ;;  %v804_v17 = vsel %vm501_vm0, %v721_v29, 0.0 }
 0x199   :  { %v797_v53 = vadd.f32 %v796_v22, %v795_v61  ;;  %v723_v22 = vmul.f32 %v13141_v12, %v13141_v12  ;;  %v806_v20 = vsel %vm501_vm0, %v722_v35, 0.0 }
 0x19b   :  { %v799_v41 = vadd.f32 %v798_v7, %v797_v53  ;;  %v724_v7 = vmul.f32 %v13148_v10, %v13148_v10  ;;  %v808_v29 = vsel %vm501_vm0, %v723_v22, 0.0 }
 0x19d   :  { %v801_v59 = vadd.f32 %v800_v55, %v799_v41  ;;  %v725_v55 = vmul.f32 %v13155_v21, %v13155_v21  ;;  %v810_v35 = vsel %vm501_vm0, %v724_v7, 0.0 }
 0x19f   :  { %v803_v61 = vadd.f32 %v802_v3, %v801_v59  ;;  %v726_v3 = vmul.f32 %v13162_v16, %v13162_v16  ;;  %v812_v22 = vsel %vm501_vm0, %v725_v55, 0.0 }
 0x1a1   :  { %v805_v53 = vadd.f32 %v804_v17, %v803_v61  ;;  %v727_v17 = vmul.f32 %v13169_v30, %v13169_v30  ;;  %v814_v7 = vsel %vm501_vm0, %v726_v3, 0.0 }
 0x1a3   :  { %v807_v41 = vadd.f32 %v806_v20, %v805_v53  ;;  %v728_v20 = vmul.f32 %v13176_v27, %v13176_v27  ;;  %v816_v55 = vsel %vm501_vm0, %v727_v17, 0.0 }
 0x1a5   :  { %v809_v59 = vadd.f32 %v808_v29, %v807_v41  ;;  %v729_v29 = vmul.f32 %v13183_v39, %v13183_v39  ;;  %v818_v3 = vsel %vm501_vm0, %v728_v20, 0.0 }
 0x1a7   :  { %v811_v61 = vadd.f32 %v810_v35, %v809_v59  ;;  %v730_v35 = vmul.f32 %v13190_v36, %v13190_v36  ;;  %v820_v17 = vsel %vm501_vm0, %v729_v29, 0.0 }
 0x1a9   :  { %v813_v53 = vadd.f32 %v812_v22, %v811_v61  ;;  %v731_v22 = vmul.f32 %v13197_v48, %v13197_v48  ;;  %v822_v20 = vsel %vm501_vm0, %v730_v35, 0.0 }
 0x1ab   :  { %v815_v41 = vadd.f32 %v814_v7, %v813_v53  ;;  %v732_v7 = vmul.f32 %v13204_v45, %v13204_v45  ;;  %v824_v29 = vsel %vm501_vm0, %v731_v22, 0.0 }
 0x1ad   :  { %v817_v59 = vadd.f32 %v816_v55, %v815_v41  ;;  %v733_v55 = vmul.f32 %v13211_v57, %v13211_v57  ;;  %v826_v35 = vsel %vm501_vm0, %v732_v7, 0.0 }
 0x1af   :  { %v819_v61 = vadd.f32 %v818_v3, %v817_v59  ;;  %v734_v3 = vmul.f32 %v13218_v54, %v13218_v54  ;;  %v828_v22 = vsel %vm501_vm0, %v733_v55, 0.0 }
 0x1b1   :  { %v821_v53 = vadd.f32 %v820_v17, %v819_v61  ;;  %v735_v17 = vmul.f32 %v13225_v2, %v13225_v2  ;;  %v830_v7 = vsel %vm501_vm0, %v734_v3, 0.0 }
 0x1b3   :  { %v823_v41 = vadd.f32 %v822_v20, %v821_v53  ;;  %v736_v20 = vmul.f32 %v13232_v63, %v13232_v63  ;;  %v832_v55 = vsel %vm501_vm0, %v735_v17, 0.0 }
 0x1b5   :  { %v825_v59 = vadd.f32 %v824_v29, %v823_v41  ;;  %v737_v29 = vmul.f32 %v13239_v11, %v13239_v11  ;;  %v834_v3 = vsel %vm501_vm0, %v736_v20, 0.0 }
 0x1b7   :  { %v827_v61 = vadd.f32 %v826_v35, %v825_v59  ;;  %v20195_v35 = vld [vmem:[#allocation6_spill] sm:$0xff]  ;;  %v836_v17 = vsel %vm501_vm0, %v737_v29, 0.0 }
 0x1b8   :  { %v13260_v19 = vsub.f32 %v20195_v35, %v12963_v13 }
 0x1b9   :  { %v829_v53 = vadd.f32 %v828_v22, %v827_v61  ;;  %v738_v61 = vmul.f32 %v13246_v8, %v13246_v8 }
 0x1ba   :  { %20196 = vst [vmem:[#allocation6_spill] sm:$0xff] %v13260_v19  ;;  %v740_v8 = vmul.f32 %v13260_v19, %v13260_v19 }
 0x1bb   :  { %v831_v41 = vadd.f32 %v830_v7, %v829_v53  ;;  %v20197_v53 = vld [vmem:[#allocation8_spill] sm:$0xff]  ;;  %v739_v7 = vmul.f32 %v13253_v24, %v13253_v24  ;;  %v838_v20 = vsel %vm501_vm0, %v738_v61, 0.0 }
 0x1bc   :  { %v13267_v37 = vsub.f32 %v20197_v53, %v12963_v13  ;;  %v842_v61 = vsel %vm501_vm0, %v740_v8, 0.0 }
 0x1bd   :  { %v833_v59 = vadd.f32 %v832_v55, %v831_v41  ;;  %v20199_v55 = vld [vmem:[#allocation7_spill] sm:$0xff]  ;;  %v840_v29 = vsel %vm501_vm0, %v739_v7, 0.0 }
 0x1be   :  { %20198 = vst [vmem:[#allocation8_spill] sm:$0xff] %v13267_v37  ;;  %v13274_v35 = vsub.f32 %v20199_v55, %v12963_v13  ;;  %v741_v24 = vmul.f32 %v13267_v37, %v13267_v37 }
 0x1bf   :  { %v835_v22 = vadd.f32 %v834_v3, %v833_v59  ;;  %v20201_v3 = vld [vmem:[#allocation10_spill] sm:$0xff] }
 0x1c0   :  { %20200 = vst [vmem:[#allocation7_spill] sm:$0xff] %v13274_v35  ;;  %v13281_v53 = vsub.f32 %v20201_v3, %v12963_v13  ;;  %v742_v19 = vmul.f32 %v13274_v35, %v13274_v35  ;;  %v844_v7 = vsel %vm501_vm0, %v741_v24, 0.0 }
 0x1c1   :  { %v837_v41 = vadd.f32 %v836_v17, %v835_v22  ;;  %v20203_v17 = vld [vmem:[#allocation9_spill] sm:$0xff] }
 0x1c2   :  { %20202 = vst [vmem:[#allocation10_spill] sm:$0xff] %v13281_v53  ;;  %v13288_v55 = vsub.f32 %v20203_v17, %v12963_v13  ;;  %v743_v37 = vmul.f32 %v13281_v53, %v13281_v53  ;;  %v846_v8 = vsel %vm501_vm0, %v742_v19, 0.0 }
 0x1c3   :  { %v839_v59 = vadd.f32 %v838_v20, %v837_v41  ;;  %v20205_v20 = vld [vmem:[#allocation12_spill] sm:$0xff] }
 0x1c4   :  { %20204 = vst [vmem:[#allocation9_spill] sm:$0xff] %v13288_v55  ;;  %v13295_v3 = vsub.f32 %v20205_v20, %v12963_v13  ;;  %v744_v35 = vmul.f32 %v13288_v55, %v13288_v55  ;;  %v848_v24 = vsel %vm501_vm0, %v743_v37, 0.0  ;;  %v20209_v55 = vld [vmem:[#allocation14_spill] sm:$0xff]  ;;  %v748_v37 = vmul.f32 %v12967_v15, %v12967_v15 }
 0x1c5   :  { %v841_v22 = vadd.f32 %v840_v29, %v839_v59  ;;  %v20206_v29 = vld [vmem:[#allocation11_spill] sm:$0xff]  ;;  %v13319_v19 = vsub.f32 %v20209_v55, %v12963_v13 }
 0x1c6   :  { %v13302_v17 = vsub.f32 %v20206_v29, %v12963_v13  ;;  %v745_v53 = vmul.f32 %v13295_v3, %v13295_v3  ;;  %v850_v29 = vsel %vm501_vm0, %v744_v35, 0.0 }
 0x1c7   :  { %v843_v41 = vadd.f32 %v842_v61, %v841_v22  ;;  %v20208_v61 = vld [vmem:[#allocation13_spill] sm:$0xff]  ;;  %v749_v55 = vmul.f32 %v13319_v19, %v13319_v19 }
 0x1c8   :  { %20207 = vst [vmem:[#allocation12_spill] sm:$0xff] %v13302_v17  ;;  %v13309_v20 = vsub.f32 %v20208_v61, %v12963_v13 }
 0x1c9   :  { %v845_v59 = vadd.f32 %v844_v7, %v843_v41  ;;  %v746_v7 = vmul.f32 %v13302_v17, %v13302_v17  ;;  %v20210_v17 = vld [vmem:[#allocation15_spill] sm:$0xff] }
 0x1ca   :  { %v13329_v35 = vsub.f32 %v20210_v17, %v12963_v13  ;;  %v1479_v17 = vld [vmem:[%s19996_s2 + $0x30] sm:$0xff] }
 0x1cb   :  { %v847_v22 = vadd.f32 %v846_v8, %v845_v59  ;;  %v747_v59 = vmul.f32 %v13309_v20, %v13309_v20  ;;  %v852_v8 = vsel %vm501_vm0, %v745_v53, 0.0  ;;  %v1480_v53 = vld [vmem:[%s19996_s2 + $0x38] sm:$0xff] }
 0x1cc   :  { %20211 = vst [vmem:[#allocation11_spill] sm:$0xff] %v13329_v35  ;;  %11130 = vmatprep.subr.mxu0 %v1480_v53  ;;  %12170 = vmatprep.subr.mxu1 %v1480_v53 }
 0x1cd   :  { %v849_v41 = vadd.f32 %v848_v24, %v847_v22  ;;  %v854_v22 = vsel %vm501_vm0, %v746_v7, 0.0  ;;  %v750_v7 = vmul.f32 %v12970_v9, %v12970_v9  ;;  %11131 = vmatpush3.msra.mxu0 %v1480_v53  ;;  %12174 = vmatpush3.msra.mxu1 %v1480_v53  ;;  %v1413_v53 = vld [vmem:[#allocation2 + $0x1] sm:$0xff] }
 0x1ce   :  { %11132 = vmatprep.subr.mxu0 %v1479_v17  ;;  %12171 = vmatprep.subr.mxu1 %v1479_v17 }
 0x1cf   :  { %v851_v11 = vadd.f32 %v850_v29, %v849_v41  ;;  %v856_v41 = vsel %vm501_vm0, %v747_v59, 0.0  ;;  %v858_v29 = vsel %vm501_vm0, %v748_v37, 0.0  ;;  %v20212_v59 = vld [vmem:[#allocation16_spill] sm:$0xff]  ;;  %11133 = vmatpush3.msra.mxu0 %v1479_v17  ;;  %v1478_v37 = vld [vmem:[%s19996_s2 + $0x28] sm:$0xff]  ;;  %12175 = vmatpush3.msra.mxu1 %v1479_v17  ;;  %v13363_v17 = vld [vmem:[%s19996_s2 + $0x18] sm:$0xff] }
 0x1d0   :  { %11134 = vmatprep.subr.mxu0 %v1478_v37  ;;  %12172 = vmatprep.subr.mxu1 %v1478_v37  ;;  %20213 = vst [vmem:[#allocation13_spill] sm:$0xff] %v13363_v17 }
 0x1d1   :  { %v853_v61 = vadd.f32 %v852_v8, %v851_v11  ;;  %11135 = vmatpush3.msra.mxu0 %v1478_v37  ;;  %11138 = vmatprep.mubr.msk.f32.mxu0 %vm501_vm0, %v1413_v53 }
 0x1d2   :  { %12176 = vmatpush3.msra.mxu1 %v1478_v37  ;;  %v754_v37 = vmul.f32 %v12976_v42, %v12976_v42 }
 0x1d3   :  { %v855_v24 = vadd.f32 %v854_v22, %v853_v61  ;;  %v13345_v61 = vsub.f32 %v20212_v59, %v12963_v13  ;;  %v751_v22 = vmul.f32 %v13329_v35, %v13329_v35  ;;  %v862_v59 = vsel %vm501_vm0, %v750_v7, 0.0 }
 0x1d5   :  { %v857_v11 = vadd.f32 %v856_v41, %v855_v24  ;;  %v860_v24 = vsel %vm501_vm0, %v749_v55, 0.0  ;;  %v1477_v41 = vld [vmem:[%s19996_s2 + $0x20] sm:$0xff]  ;;  %v1414_v55 = vld [vmem:[#allocation2 + $0x9] sm:$0xff]  ;;  %v864_v7 = vsel %vm501_vm0, %v751_v22, 0.0 }
 0x1d6   :  { %11136 = vmatprep.subr.mxu0 %v1477_v41  ;;  %12173 = vmatprep.subr.mxu1 %v1477_v41 }
 0x1d7   :  { %v859_v8 = vadd.f32 %v858_v29, %v857_v11  ;;  %v752_v29 = vmul.f32 %v12973_v25, %v12973_v25  ;;  %v753_v25 = vmul.f32 %v13345_v61, %v13345_v61  ;;  %11137 = vmatpush3.msra.mxu0 %v1477_v41  ;;  %12177 = vmatpush3.msra.mxu1 %v1477_v41 }
 0x1d8   :  { %11139 = vmatmul.mubr.msk.f32.vlgmr.msra.gmra.mxu0 %vm501_vm0, %v1414_v55  ;;  %11234 = vmatprep.subr.mxu1 %v13363_v17  ;;  %v756_v41 = vmul.f32 %v12979_v47, %v12979_v47  ;;  %v870_v55 = vsel %vm501_vm0, %v754_v37, 0.0  ;;  %v20218_v47 = vld [vmem:[#allocation20_spill] sm:$0xff] }
 0x1d9   :  { %v861_v11 = vadd.f32 %v860_v24, %v859_v8  ;;  %v20214_v8 = vld [vmem:[#allocation17_spill] sm:$0xff]  ;;  %v13399_v37 = vsub.f32 %v20218_v47, %v12963_v13 }
 0x1da   :  { %v13367_v24 = vsub.f32 %v20214_v8, %v12963_v13  ;;  %v20215_v8 = vld [vmem:[#allocation18_spill] sm:$0xff] }
 0x1db   :  { %v863_v35 = vadd.f32 %v862_v59, %v861_v11  ;;  %v866_v11 = vsel %vm501_vm0, %v752_v29, 0.0  ;;  %v13379_v9 = vsub.f32 %v20215_v8, %v12963_v13  ;;  %v20216_v29 = vld [vmem:[#allocation19_spill] sm:$0xff] }
 0x1dc   :  { %v755_v22 = vmul.f32 %v13367_v24, %v13367_v24  ;;  %v13389_v17 = vsub.f32 %v20216_v29, %v12963_v13 }
 0x1dd   :  { %v865_v53 = vadd.f32 %v864_v7, %v863_v35  ;;  %v868_v35 = vsel %vm501_vm0, %v753_v25, 0.0  ;;  %v758_v25 = vmul.f32 %v12982_v33, %v12982_v33 }
 0x1de   :  { %20217 = vst [vmem:[#allocation14_spill] sm:$0xff] %v13389_v17 }
 0x1df   :  { %v867_v59 = vadd.f32 %v866_v11, %v865_v53  ;;  %v757_v53 = vmul.f32 %v13379_v9, %v13379_v9  ;;  %v872_v11 = vsel %vm501_vm0, %v755_v22, 0.0  ;;  %v760_v22 = vmul.f32 %v12985_v51, %v12985_v51 }
 0x1e1   :  { %v869_v7 = vadd.f32 %v868_v35, %v867_v59  ;;  %v874_v59 = vsel %vm501_vm0, %v756_v41, 0.0  ;;  %v699_v41 = vsub.f32 %v12958_v1, %v12963_v13  ;;  %v2702_v1 = vld [vmem:[%s19996_s2 + $0x58] sm:$0xff]  ;;  %v764_v13 = vmul.f32 %v12991_v14, %v12991_v14 }
 0x1e2   :  { %11338 = vmatprep.subr.mxu0 %v2702_v1 }
 0x1e3   :  { %v871_v42 = vadd.f32 %v870_v55, %v869_v7  ;;  %v759_v7 = vmul.f32 %v13389_v17, %v13389_v17  ;;  %v876_v55 = vsel %vm501_vm0, %v757_v53, 0.0  ;;  %v762_v17 = vmul.f32 %v12988_v60, %v12988_v60  ;;  %11339 = vmatpush3.msra.mxu0 %v2702_v1  ;;  %v2699_v1 = vld [vmem:[%s19996_s2 + $0x40] sm:$0xff] }
 0x1e4   :  { %v882_v53 = vsel %vm501_vm0, %v760_v22, 0.0 }
 0x1e5   :  { %v873_v8 = vadd.f32 %v872_v11, %v871_v42  ;;  %v878_v42 = vsel %vm501_vm0, %v758_v25, 0.0  ;;  %v880_v47 = vsel %vm501_vm0, %v759_v7, 0.0  ;;  %v886_v7 = vsel %vm501_vm0, %v762_v17, 0.0 }
 0x1e7   :  { %v875_v35 = vadd.f32 %v874_v59, %v873_v8  ;;  %v761_v8 = vmul.f32 %v13399_v37, %v13399_v37 }
 0x1e9   :  { %v877_v29 = vadd.f32 %v876_v55, %v875_v35  ;;  %v763_v55 = vmul.f32 %v699_v41, %v699_v41  ;;  %v884_v51 = vsel %vm501_vm0, %v761_v8, 0.0 }
 0x1eb   :  { %v879_v11 = vadd.f32 %v878_v42, %v877_v29  ;;  %v888_v42 = vsel %vm501_vm0, %v763_v55, 0.0  ;;  %v2700_v55 = vld [vmem:[%s19996_s2 + $0x48] sm:$0xff] }
 0x1ed   :  { %v881_v59 = vadd.f32 %v880_v47, %v879_v11  ;;  %v890_v11 = vsel %vm501_vm0, %v764_v13, 0.0 }
 0x1ef   :  { %v883_v35 = vadd.f32 %v882_v53, %v881_v59  ;;  %v2701_v53 = vld [vmem:[%s19996_s2 + $0x50] sm:$0xff] }
 0x1f0   :  { %11340 = vmatprep.subr.mxu0 %v2701_v53 }
 0x1f1   :  { %v885_v25 = vadd.f32 %v884_v51, %v883_v35  ;;  %11341 = vmatpush3.msra.mxu0 %v2701_v53 }
 0x1f2   :  { %11342 = vmatprep.subr.mxu0 %v2700_v55 }
 0x1f3   :  { %v887_v29 = vadd.f32 %v886_v7, %v885_v25  ;;  %11343 = vmatpush3.msra.mxu0 %v2700_v55  ;;  %v20222_v55 = vld [vmem:[#allocation29_spill] sm:$0xff] }
 0x1f4   :  { %11344 = vmatprep.subr.mxu0 %v2699_v1 }
 0x1f5   :  { %v889_v22 = vadd.f32 %v888_v42, %v887_v29  ;;  %11345 = vmatpush3.msra.mxu0 %v2699_v1  ;;  %v13438_v29 = vld [vmem:[%s19998_s4] ss:$0 sm:$0xff]  ;;  %v20224_v1 = vld [vmem:[#allocation8_spill] sm:$0xff] }
 0x1f7   :  { %v891_v47 = vadd.f32 %v890_v11, %v889_v22 }
 0x1f9   :  { %v892_v8 = vrot.slane %v891_v47, 4 }
 0x1fb   :  { %v893_v51 = vadd.f32 %v892_v8, %v891_v47  ;;  %v13456_v47 = vld [vmem:[%s19999_s5] ss:$0 sm:$0xff] }
 0x1fc   :  { %20219 = vst [vmem:[#allocation15_spill] sm:$0xff] %v13456_v47 }
 0x1fd   :  { %v894_v59 = vrot.slane %v893_v51, 2 }
 0x1ff   :  { %v895_v35 = vadd.f32 %v894_v59, %v893_v51 }
 0x201   :  { %v896_v17 = vrot.slane %v895_v35, 1 }
 0x203   :  { %v897_v14 = vadd.f32 %v896_v17, %v895_v35  ;;  %v20220_v35 = vld [vmem:[#allocation27_spill] sm:$0xff]  ;;  %v20221_v17 = vld [vmem:[#allocation28_spill] sm:$0xff] }
 0x205   :  { %v898_v25 = vmul.f32 0.001953125, %v897_v14 }
 0x207   :  { %v899_v13 = vadd.f32 1e-05, %v898_v25  ;;  %v20223_v25 = vld [vmem:[#allocation6_spill] sm:$0xff] }
 0x209   :  { %12182 = vrsqrt.f32 %v899_v13  ;;  %v20225_v13 = vld [vmem:[#allocation7_spill] sm:$0xff] }
 0x216   :  { %v13433_v7 = vpop.eup %12182 }
 0x217   :  { %v963_v42 = vmul.f32 %v13433_v7, %v699_v41  ;;  %v13443_v14 = vmul.f32 %v13433_v7, %v12995_v28  ;;  %v13447_v22 = vmul.f32 %v13433_v7, %v12999_v49  ;;  %v13451_v11 = vmul.f32 %v13433_v7, %v13003_v5 }
 0x218   :  { %v13460_v41 = vmul.f32 %v13433_v7, %v13007_v31  ;;  %v13464_v28 = vmul.f32 %v13433_v7, %v13015_v18  ;;  %v13468_v49 = vmul.f32 %v13433_v7, %v13021_v23  ;;  %v13472_v5 = vmul.f32 %v13433_v7, %v13029_v43 }
 0x219   :  { %v1034_v8 = vmul.f32 %v13438_v29, %v963_v42  ;;  %v13477_v51 = vmul.f32 %v13433_v7, %v13036_v26  ;;  %v13481_v31 = vmul.f32 %v13433_v7, %v13043_v34  ;;  %v13485_v18 = vmul.f32 %v13433_v7, %v13050_v32 }
 0x21a   :  { %v13489_v23 = vmul.f32 %v13433_v7, %v13057_v40  ;;  %v13493_v43 = vmul.f32 %v13433_v7, %v13064_v38  ;;  %v13497_v26 = vmul.f32 %v13433_v7, %v13071_v46  ;;  %v13501_v34 = vmul.f32 %v13433_v7, %v13078_v44 }
 0x21b   :  { %v1105_v59 = vadd.f32 %v13456_v47, %v1034_v8  ;;  %v13506_v32 = vmul.f32 %v13433_v7, %v13085_v52  ;;  %v13510_v40 = vmul.f32 %v13433_v7, %v13092_v50  ;;  %v13514_v38 = vmul.f32 %v13433_v7, %v13099_v58  ;;  %v20226_v8 = vld [vmem:[#allocation10_spill] sm:$0xff]  ;;  %v20233_v47 = vld [vmem:[#allocation11_spill] sm:$0xff] }
 0x21c   :  { %v13518_v46 = vmul.f32 %v13433_v7, %v13106_v56  ;;  %v13522_v44 = vmul.f32 %v13433_v7, %v13113_v0  ;;  %v13526_v52 = vmul.f32 %v13433_v7, %v13120_v62  ;;  %v13530_v50 = vmul.f32 %v13433_v7, %v13127_v6 }
 0x21d   :  { %v1169_v53 = vmax.f32 %v1105_v59, 0.0  ;;  %v13534_v58 = vmul.f32 %v13433_v7, %v13134_v4  ;;  %v13538_v56 = vmul.f32 %v13433_v7, %v13141_v12  ;;  %v13542_v0 = vmul.f32 %v13433_v7, %v13148_v10 }
 0x21e   :  { %v13546_v62 = vmul.f32 %v13433_v7, %v13155_v21  ;;  %v13550_v6 = vmul.f32 %v13433_v7, %v13162_v16  ;;  %v13554_v4 = vmul.f32 %v13433_v7, %v13169_v30  ;;  %v13558_v12 = vmul.f32 %v13433_v7, %v13176_v27 }
 0x21f   :  { %1343 = vst.msk [vmem:[#allocation2 + $0x331] sm:$0xff] %vm501_vm0, %v1169_v53  ;;  %v13563_v10 = vmul.f32 %v13433_v7, %v13183_v39  ;;  %v13567_v21 = vmul.f32 %v13433_v7, %v13190_v36  ;;  %v13571_v16 = vmul.f32 %v13433_v7, %v13197_v48  ;;  %v13575_v30 = vmul.f32 %v13433_v7, %v13204_v45  ;;  %v20227_v53 = vld [vmem:[#allocation9_spill] sm:$0xff] }
 0x220   :  { %v13579_v27 = vmul.f32 %v13433_v7, %v13211_v57  ;;  %v13583_v39 = vmul.f32 %v13433_v7, %v13218_v54  ;;  %v13587_v36 = vmul.f32 %v13433_v7, %v13225_v2  ;;  %v13591_v48 = vmul.f32 %v13433_v7, %v13232_v63 }
 0x221   :  { %v13595_v45 = vmul.f32 %v13433_v7, %v20220_v35  ;;  %v13599_v57 = vmul.f32 %v13433_v7, %v20221_v17  ;;  %v13603_v54 = vmul.f32 %v13433_v7, %v20222_v55  ;;  %v13607_v2 = vmul.f32 %v13433_v7, %v20223_v25  ;;  %v20228_v55 = vld [vmem:[#allocation12_spill] sm:$0xff] }
 0x222   :  { %v13611_v63 = vmul.f32 %v13433_v7, %v20224_v1  ;;  %v13615_v42 = vmul.f32 %v13433_v7, %v20225_v13  ;;  %v13619_v59 = vmul.f32 %v13433_v7, %v20226_v8  ;;  %v13623_v35 = vmul.f32 %v13433_v7, %v20227_v53  ;;  %v20231_v53 = vld [vmem:[#allocation21_spill] sm:$0xff] }
 0x223   :  { %v13627_v17 = vmul.f32 %v13433_v7, %v13295_v3  ;;  %v13631_v25 = vmul.f32 %v13433_v7, %v20228_v55  ;;  %v13635_v1 = vmul.f32 %v13433_v7, %v13309_v20  ;;  %v13639_v13 = vmul.f32 %v13433_v7, %v12967_v15 }
 0x224   :  { %v13643_v8 = vmul.f32 %v13433_v7, %v13319_v19  ;;  %v13647_v3 = vmul.f32 %v13433_v7, %v20231_v53  ;;  %v13651_v55 = vmul.f32 %v13433_v7, %v20233_v47  ;;  %v13659_v15 = vmul.f32 %v13433_v7, %v13345_v61 }
 0x225   :  { %20229 = vst [vmem:[#allocation16_spill] sm:$0xff] %v13631_v25  ;;  %20230 = vst [vmem:[#allocation17_spill] sm:$0xff] %v13639_v13  ;;  %v20234_v25 = vld [vmem:[#allocation22_spill] sm:$0xff]  ;;  %v20235_v13 = vld [vmem:[#allocation23_spill] sm:$0xff]  ;;  %v13667_v53 = vmul.f32 %v13433_v7, %v13367_v24  ;;  %v13680_v61 = vmul.f32 %v13433_v7, %v13379_v9  ;;  %v13701_v9 = vmul.f32 %v13433_v7, %v12988_v60 }
 0x226   :  { %20232 = vst [vmem:[#allocation18_spill] sm:$0xff] %v13647_v3  ;;  %v13655_v20 = vmul.f32 %v13433_v7, %v20234_v25  ;;  %v13663_v19 = vmul.f32 %v13433_v7, %v20235_v13  ;;  %v20238_v3 = vld [vmem:[#allocation24_spill] sm:$0xff]  ;;  %v13676_v25 = vld [vmem:[%s19996_s2 + $0x98] sm:$0xff]  ;;  %v13684_v13 = vmul.f32 %v13433_v7, %v12982_v33  ;;  %v20244_v33 = vld [vmem:[#allocation26_spill] sm:$0xff]  ;;  %v13721_v60 = vmul.f32 %v13438_v29, %v13460_v41 }
 0x227   :  { %20237 = vst [vmem:[#allocation20_spill] sm:$0xff] %v13667_v53  ;;  %v13671_v47 = vmul.f32 %v13433_v7, %v20238_v3  ;;  %20240 = vst [vmem:[#allocation28_spill] sm:$0xff] %v13676_v25  ;;  %v20243_v53 = vld [vmem:[#allocation25_spill] sm:$0xff]  ;;  %11546 = vmatprep.subr.mxu0 %v13676_v25  ;;  %v13741_v41 = vmul.f32 %v13438_v29, %v13481_v31  ;;  %v13761_v31 = vmul.f32 %v13438_v29, %v13501_v34 }
 0x228   :  { %20236 = vst [vmem:[#allocation19_spill] sm:$0xff] %v13663_v19  ;;  %20241 = vst [vmem:[#allocation29_spill] sm:$0xff] %v13684_v13  ;;  %v20242_v19 = vld [vmem:[#allocation14_spill] sm:$0xff]  ;;  %v13692_v3 = vmul.f32 %v13433_v7, %v20243_v53  ;;  %v13705_v13 = vmul.f32 %v13433_v7, %v20244_v33  ;;  %v13713_v53 = vmul.f32 %v13438_v29, %v13447_v22 }
 0x229   :  { %20239 = vst [vmem:[#allocation27_spill] sm:$0xff] %v13671_v47  ;;  %v13688_v24 = vmul.f32 %v13433_v7, %v20242_v19  ;;  %v13697_v47 = vmul.f32 %v13433_v7, %v13399_v37  ;;  %v13709_v19 = vmul.f32 %v13438_v29, %v13443_v14  ;;  %v13717_v37 = vmul.f32 %v13438_v29, %v13451_v11 }
 0x22a   :  { %v13725_v7 = vmul.f32 %v13438_v29, %v13464_v28  ;;  %v13729_v14 = vmul.f32 %v13438_v29, %v13468_v49  ;;  %v13733_v22 = vmul.f32 %v13438_v29, %v13472_v5  ;;  %v13737_v11 = vmul.f32 %v13438_v29, %v13477_v51 }
 0x22b   :  { %v13745_v28 = vmul.f32 %v13438_v29, %v13485_v18  ;;  %v13749_v49 = vmul.f32 %v13438_v29, %v13489_v23  ;;  %v13753_v5 = vmul.f32 %v13438_v29, %v13493_v43  ;;  %v13757_v51 = vmul.f32 %v13438_v29, %v13497_v26 }
 0x22c   :  { %v13765_v18 = vmul.f32 %v13438_v29, %v13506_v32  ;;  %v13769_v23 = vmul.f32 %v13438_v29, %v13510_v40  ;;  %v13773_v43 = vmul.f32 %v13438_v29, %v13514_v38  ;;  %v13777_v26 = vmul.f32 %v13438_v29, %v13518_v46  ;;  %v20246_v33 = vld [vmem:[#allocation16_spill] sm:$0xff]  ;;  %v20247_v25 = vld [vmem:[#allocation17_spill] sm:$0xff] }
 0x22d   :  { %v13781_v34 = vmul.f32 %v13438_v29, %v13522_v44  ;;  %v13785_v32 = vmul.f32 %v13438_v29, %v13526_v52  ;;  %v13789_v40 = vmul.f32 %v13438_v29, %v13530_v50  ;;  %v13793_v38 = vmul.f32 %v13438_v29, %v13534_v58 }
 0x22e   :  { %v13797_v46 = vmul.f32 %v13438_v29, %v13538_v56  ;;  %v13801_v44 = vmul.f32 %v13438_v29, %v13542_v0  ;;  %v13805_v52 = vmul.f32 %v13438_v29, %v13546_v62  ;;  %v13809_v50 = vmul.f32 %v13438_v29, %v13550_v6 }
 0x22f   :  { %v13813_v58 = vmul.f32 %v13438_v29, %v13554_v4  ;;  %v13817_v56 = vmul.f32 %v13438_v29, %v13558_v12  ;;  %v13821_v0 = vmul.f32 %v13438_v29, %v13563_v10  ;;  %v13825_v62 = vmul.f32 %v13438_v29, %v13567_v21 }
 0x230   :  { %v13829_v6 = vmul.f32 %v13438_v29, %v13571_v16  ;;  %v13833_v4 = vmul.f32 %v13438_v29, %v13575_v30  ;;  %v13837_v12 = vmul.f32 %v13438_v29, %v13579_v27  ;;  %v13841_v10 = vmul.f32 %v13438_v29, %v13583_v39 }
 0x231   :  { %v13845_v21 = vmul.f32 %v13438_v29, %v13587_v36  ;;  %v13849_v16 = vmul.f32 %v13438_v29, %v13591_v48  ;;  %v13853_v30 = vmul.f32 %v13438_v29, %v13595_v45  ;;  %v13857_v27 = vmul.f32 %v13438_v29, %v13599_v57 }
 0x232   :  { %v13861_v39 = vmul.f32 %v13438_v29, %v13603_v54  ;;  %v13865_v36 = vmul.f32 %v13438_v29, %v13607_v2  ;;  %v13869_v48 = vmul.f32 %v13438_v29, %v13611_v63  ;;  %v13873_v45 = vmul.f32 %v13438_v29, %v13615_v42 }
 0x233   :  { %v13877_v57 = vmul.f32 %v13438_v29, %v13619_v59  ;;  %v13881_v54 = vmul.f32 %v13438_v29, %v13623_v35  ;;  %v13885_v2 = vmul.f32 %v13438_v29, %v13627_v17  ;;  %v13889_v63 = vmul.f32 %v13438_v29, %v20246_v33 }
 0x234   :  { %v13893_v42 = vmul.f32 %v13438_v29, %v13635_v1  ;;  %v13897_v59 = vmul.f32 %v13438_v29, %v20247_v25  ;;  %v13901_v35 = vmul.f32 %v13438_v29, %v13643_v8  ;;  %v13909_v33 = vmul.f32 %v13438_v29, %v13651_v55 }
 0x235   :  { %20245 = vst [vmem:[#allocation6_spill] sm:$0xff] %v13881_v54  ;;  %v20250_v54 = vld [vmem:[#allocation18_spill] sm:$0xff]  ;;  %v13913_v1 = vmul.f32 %v13438_v29, %v13655_v20  ;;  %v13917_v25 = vmul.f32 %v13438_v29, %v13659_v15  ;;  %v13933_v20 = vmul.f32 %v13438_v29, %v13680_v61  ;;  %v13953_v61 = vmul.f32 %v13438_v29, %v13701_v9 }
 0x236   :  { %20248 = vst [vmem:[#allocation8_spill] sm:$0xff] %v13897_v59  ;;  %20249 = vst [vmem:[#allocation7_spill] sm:$0xff] %v13901_v35  ;;  %v13905_v17 = vmul.f32 %v13438_v29, %v20250_v54  ;;  %v20253_v59 = vld [vmem:[#allocation19_spill] sm:$0xff]  ;;  %v20254_v35 = vld [vmem:[#allocation20_spill] sm:$0xff] }
 0x237   :  { %20252 = vst [vmem:[#allocation9_spill] sm:$0xff] %v13913_v1  ;;  %v13921_v8 = vmul.f32 %v13438_v29, %v20253_v59  ;;  %v13925_v54 = vmul.f32 %v13438_v29, %v20254_v35  ;;  %v20256_v1 = vld [vmem:[#allocation29_spill] sm:$0xff]  ;;  %v13941_v59 = vmul.f32 %v13438_v29, %v13688_v24  ;;  %v13945_v35 = vmul.f32 %v13438_v29, %v13692_v3 }
 0x238   :  { %20251 = vst [vmem:[#allocation10_spill] sm:$0xff] %v13905_v17  ;;  %v20255_v17 = vld [vmem:[#allocation27_spill] sm:$0xff]  ;;  %v13937_v15 = vmul.f32 %v13438_v29, %v20256_v1  ;;  %v13957_v1 = vmul.f32 %v13438_v29, %v13705_v13 }
 0x239   :  { %v13929_v55 = vmul.f32 %v13438_v29, %v20255_v17  ;;  %v13949_v17 = vmul.f32 %v13438_v29, %v13697_v47 }
 0x23a   :  { %20257 = vst [vmem:[#allocation12_spill] sm:$0xff] %v13937_v15  ;;  %v20258_v15 = vld [vmem:[#allocation15_spill] sm:$0xff] }
 0x23b   :  { %v13961_v24 = vadd.f32 %v20258_v15, %v13709_v19  ;;  %v13965_v3 = vadd.f32 %v20258_v15, %v13713_v53  ;;  %v13969_v47 = vadd.f32 %v20258_v15, %v13717_v37  ;;  %v13973_v9 = vadd.f32 %v20258_v15, %v13721_v60 }
 0x23c   :  { %v13977_v29 = vadd.f32 %v20258_v15, %v13725_v7  ;;  %v13981_v13 = vadd.f32 %v20258_v15, %v13729_v14  ;;  %v13985_v19 = vadd.f32 %v20258_v15, %v13733_v22  ;;  %v13989_v53 = vadd.f32 %v20258_v15, %v13737_v11 }
 0x23d   :  { %v13993_v37 = vadd.f32 %v20258_v15, %v13741_v41  ;;  %v13997_v60 = vadd.f32 %v20258_v15, %v13745_v28  ;;  %v14001_v7 = vadd.f32 %v20258_v15, %v13749_v49  ;;  %v14005_v14 = vadd.f32 %v20258_v15, %v13753_v5 }
 0x23e   :  { %v14009_v22 = vadd.f32 %v20258_v15, %v13757_v51  ;;  %v14013_v11 = vadd.f32 %v20258_v15, %v13761_v31  ;;  %v14017_v41 = vadd.f32 %v20258_v15, %v13765_v18  ;;  %v14021_v28 = vadd.f32 %v20258_v15, %v13769_v23 }
 0x23f   :  { %v14025_v49 = vadd.f32 %v20258_v15, %v13773_v43  ;;  %v14029_v5 = vadd.f32 %v20258_v15, %v13777_v26  ;;  %v14033_v51 = vadd.f32 %v20258_v15, %v13781_v34  ;;  %v14037_v31 = vadd.f32 %v20258_v15, %v13785_v32 }
 0x240   :  { %v14041_v18 = vadd.f32 %v20258_v15, %v13789_v40  ;;  %v14045_v23 = vadd.f32 %v20258_v15, %v13793_v38  ;;  %v14049_v43 = vadd.f32 %v20258_v15, %v13797_v46  ;;  %v14053_v26 = vadd.f32 %v20258_v15, %v13801_v44 }
 0x241   :  { %v14057_v34 = vadd.f32 %v20258_v15, %v13805_v52  ;;  %v14061_v32 = vadd.f32 %v20258_v15, %v13809_v50  ;;  %v14065_v40 = vadd.f32 %v20258_v15, %v13813_v58  ;;  %v14069_v38 = vadd.f32 %v20258_v15, %v13817_v56 }
 0x242   :  { %v14073_v46 = vadd.f32 %v20258_v15, %v13821_v0  ;;  %v14077_v44 = vadd.f32 %v20258_v15, %v13825_v62  ;;  %v14081_v52 = vadd.f32 %v20258_v15, %v13829_v6  ;;  %v14085_v50 = vadd.f32 %v20258_v15, %v13833_v4 }
 0x243   :  { %v14089_v58 = vadd.f32 %v20258_v15, %v13837_v12  ;;  %v14093_v56 = vadd.f32 %v20258_v15, %v13841_v10  ;;  %v14097_v0 = vadd.f32 %v20258_v15, %v13845_v21  ;;  %v14101_v62 = vadd.f32 %v20258_v15, %v13849_v16 }
 0x244   :  { %v14105_v6 = vadd.f32 %v20258_v15, %v13853_v30  ;;  %v14109_v4 = vadd.f32 %v20258_v15, %v13857_v27  ;;  %v14113_v12 = vadd.f32 %v20258_v15, %v13861_v39  ;;  %v14117_v10 = vadd.f32 %v20258_v15, %v13865_v36  ;;  %v20261_v27 = vld [vmem:[#allocation6_spill] sm:$0xff] }
 0x245   :  { %v14121_v21 = vadd.f32 %v20258_v15, %v13869_v48  ;;  %v14125_v16 = vadd.f32 %v20258_v15, %v13873_v45  ;;  %v14129_v30 = vadd.f32 %v20258_v15, %v13877_v57  ;;  %v14133_v39 = vadd.f32 %v20258_v15, %v20261_v27 }
 0x246   :  { %v14137_v36 = vadd.f32 %v20258_v15, %v13885_v2  ;;  %v14141_v48 = vadd.f32 %v20258_v15, %v13889_v63  ;;  %v14145_v45 = vadd.f32 %v20258_v15, %v13893_v42  ;;  %v14161_v63 = vadd.f32 %v20258_v15, %v13909_v33 }
 0x247   :  { %20259 = vst [vmem:[#allocation21_spill] sm:$0xff] %v14125_v16  ;;  %20260 = vst [vmem:[#allocation11_spill] sm:$0xff] %v14129_v30  ;;  %v20264_v16 = vld [vmem:[#allocation8_spill] sm:$0xff]  ;;  %v20265_v30 = vld [vmem:[#allocation7_spill] sm:$0xff]  ;;  %v14181_v33 = vadd.f32 %v20258_v15, %v13929_v55  ;;  %v14201_v55 = vadd.f32 %v20258_v15, %v13949_v17  ;;  %v1112_v17 = vmax.f32 %v13981_v13, 0.0  ;;  %v1123_v13 = vmax.f32 %v14025_v49, 0.0 }
 0x248   :  { %20262 = vst [vmem:[#allocation22_spill] sm:$0xff] %v14133_v39  ;;  %20263 = vst [vmem:[#allocation23_spill] sm:$0xff] %v14141_v48  ;;  %v14149_v57 = vadd.f32 %v20258_v15, %v20264_v16  ;;  %v14153_v27 = vadd.f32 %v20258_v15, %v20265_v30  ;;  %v20266_v39 = vld [vmem:[#allocation10_spill] sm:$0xff]  ;;  %v20267_v48 = vld [vmem:[#allocation9_spill] sm:$0xff]  ;;  %v14169_v16 = vadd.f32 %v20258_v15, %v13917_v25  ;;  %v1134_v49 = vmax.f32 %v14069_v38, 0.0 }
 0x249   :  { %v14157_v2 = vadd.f32 %v20258_v15, %v20266_v39  ;;  %v14165_v42 = vadd.f32 %v20258_v15, %v20267_v48  ;;  %v14173_v30 = vadd.f32 %v20258_v15, %v13921_v8  ;;  %v14177_v39 = vadd.f32 %v20258_v15, %v13925_v54  ;;  %20273 = vst [vmem:[#allocation16_spill] sm:$0xff] %v14201_v55 }
 0x24a   :  { %v14185_v48 = vadd.f32 %v20258_v15, %v13933_v20  ;;  %v14193_v8 = vadd.f32 %v20258_v15, %v13941_v59  ;;  %v14197_v54 = vadd.f32 %v20258_v15, %v13945_v35  ;;  %v14205_v20 = vadd.f32 %v20258_v15, %v13953_v61  ;;  %1286 = vst.msk [vmem:[#allocation2 + $0x51] sm:$0xff] %vm501_vm0, %v1112_v17 }
 0x24b   :  { %20268 = vst [vmem:[#allocation24_spill] sm:$0xff] %v14165_v42  ;;  %v20269_v42 = vld [vmem:[#allocation12_spill] sm:$0xff]  ;;  %v1108_v59 = vmax.f32 %v13965_v3, 0.0  ;;  %v1110_v35 = vmax.f32 %v13973_v9, 0.0  ;;  %v1113_v55 = vmax.f32 %v13985_v19, 0.0  ;;  %v1114_v61 = vmax.f32 %v13989_v53, 0.0 }
 0x24c   :  { %v14189_v25 = vadd.f32 %v20258_v15, %v20269_v42  ;;  %20271 = vst [vmem:[#allocation25_spill] sm:$0xff] %v14193_v8  ;;  %20272 = vst [vmem:[#allocation26_spill] sm:$0xff] %v14197_v54  ;;  %v14209_v42 = vadd.f32 %v20258_v15, %v13957_v1  ;;  %v1109_v8 = vmax.f32 %v13969_v47, 0.0  ;;  %v1111_v54 = vmax.f32 %v13977_v29, 0.0 }
 0x24d   :  { %20274 = vst [vmem:[#allocation17_spill] sm:$0xff] %v14205_v20  ;;  %v1115_v20 = vmax.f32 %v13993_v37, 0.0  ;;  %v1116_v15 = vmax.f32 %v13997_v60, 0.0  ;;  %v1117_v1 = vmax.f32 %v14001_v7, 0.0  ;;  %1282 = vst.msk [vmem:[#allocation2 + $0x21] sm:$0xff] %vm501_vm0, %v1108_v59  ;;  %v1119_v3 = vmax.f32 %v14009_v22, 0.0 }
 0x24e   :  { %20270 = vst [vmem:[#allocation14_spill] sm:$0xff] %v14189_v25  ;;  %v1107_v25 = vmax.f32 %v13961_v24, 0.0  ;;  %1283 = vst.msk [vmem:[#allocation2 + $0x31] sm:$0xff] %vm501_vm0, %v1109_v8  ;;  %v1118_v24 = vmax.f32 %v14005_v14, 0.0  ;;  %v1120_v47 = vmax.f32 %v14013_v11, 0.0  ;;  %v1121_v9 = vmax.f32 %v14017_v41, 0.0 }
 0x24f   :  { %1284 = vst.msk [vmem:[#allocation2 + $0x39] sm:$0xff] %vm501_vm0, %v1110_v35  ;;  %1285 = vst.msk [vmem:[#allocation2 + $0x49] sm:$0xff] %vm501_vm0, %v1111_v54  ;;  %v1122_v29 = vmax.f32 %v14021_v28, 0.0  ;;  %v1124_v19 = vmax.f32 %v14029_v5, 0.0  ;;  %v1125_v53 = vmax.f32 %v14033_v51, 0.0  ;;  %v1126_v37 = vmax.f32 %v14037_v31, 0.0 }
 0x250   :  { %1281 = vst.msk [vmem:[#allocation2 + $0x19] sm:$0xff] %vm501_vm0, %v1107_v25  ;;  %1287 = vst.msk [vmem:[#allocation2 + $0x61] sm:$0xff] %vm501_vm0, %v1113_v55  ;;  %v1127_v60 = vmax.f32 %v14041_v18, 0.0  ;;  %v1128_v7 = vmax.f32 %v14045_v23, 0.0  ;;  %v1129_v14 = vmax.f32 %v14049_v43, 0.0  ;;  %v1130_v22 = vmax.f32 %v14053_v26, 0.0 }
 0x251   :  { %1288 = vst.msk [vmem:[#allocation2 + $0x69] sm:$0xff] %vm501_vm0, %v1114_v61  ;;  %1289 = vst.msk [vmem:[#allocation2 + $0x79] sm:$0xff] %vm501_vm0, %v1115_v20  ;;  %v1131_v11 = vmax.f32 %v14057_v34, 0.0  ;;  %v1132_v41 = vmax.f32 %v14061_v32, 0.0  ;;  %v1133_v28 = vmax.f32 %v14065_v40, 0.0  ;;  %v1135_v5 = vmax.f32 %v14073_v46, 0.0 }
 0x252   :  { %1290 = vst.msk [vmem:[#allocation2 + $0x81] sm:$0xff] %vm501_vm0, %v1116_v15  ;;  %1291 = vst.msk [vmem:[#allocation2 + $0x91] sm:$0xff] %vm501_vm0, %v1117_v1  ;;  %v1136_v51 = vmax.f32 %v14077_v44, 0.0  ;;  %v1137_v31 = vmax.f32 %v14081_v52, 0.0  ;;  %v1138_v18 = vmax.f32 %v14085_v50, 0.0  ;;  %v1139_v23 = vmax.f32 %v14089_v58, 0.0 }
 0x253   :  { %1292 = vst.msk [vmem:[#allocation2 + $0x99] sm:$0xff] %vm501_vm0, %v1118_v24  ;;  %1293 = vst.msk [vmem:[#allocation2 + $0xa9] sm:$0xff] %vm501_vm0, %v1119_v3  ;;  %v1140_v43 = vmax.f32 %v14093_v56, 0.0  ;;  %v1141_v26 = vmax.f32 %v14097_v0, 0.0  ;;  %v1142_v34 = vmax.f32 %v14101_v62, 0.0  ;;  %v1143_v32 = vmax.f32 %v14105_v6, 0.0 }
 0x254   :  { %1294 = vst.msk [vmem:[#allocation2 + $0xb1] sm:$0xff] %vm501_vm0, %v1120_v47  ;;  %1295 = vst.msk [vmem:[#allocation2 + $0xc1] sm:$0xff] %vm501_vm0, %v1121_v9  ;;  %v1144_v40 = vmax.f32 %v14109_v4, 0.0  ;;  %v1145_v38 = vmax.f32 %v14113_v12, 0.0  ;;  %v14283_v44 = vld [vmem:[#allocation2 + $0x21] sm:$0xff]  ;;  %v1146_v52 = vmax.f32 %v14117_v10, 0.0 }
 0x255   :  { %1296 = vst.msk [vmem:[#allocation2 + $0xc9] sm:$0xff] %vm501_vm0, %v1122_v29  ;;  %1297 = vst.msk [vmem:[#allocation2 + $0xd9] sm:$0xff] %vm501_vm0, %v1123_v13  ;;  %v1147_v50 = vmax.f32 %v14121_v21, 0.0  ;;  %v20275_v58 = vld [vmem:[#allocation21_spill] sm:$0xff]  ;;  %v20276_v0 = vld [vmem:[#allocation11_spill] sm:$0xff]  ;;  %v1151_v12 = vmax.f32 %v14137_v36, 0.0 }
 0x256   :  { %1298 = vst.msk [vmem:[#allocation2 + $0xe1] sm:$0xff] %vm501_vm0, %v1124_v19  ;;  %1299 = vst.msk [vmem:[#allocation2 + $0xf1] sm:$0xff] %vm501_vm0, %v1125_v53  ;;  %v1148_v56 = vmax.f32 %v20275_v58, 0.0  ;;  %v1149_v62 = vmax.f32 %v20276_v0, 0.0  ;;  %v20277_v6 = vld [vmem:[#allocation22_spill] sm:$0xff]  ;;  %v20278_v10 = vld [vmem:[#allocation23_spill] sm:$0xff] }
 0x257   :  { %1300 = vst.msk [vmem:[#allocation2 + $0xf9] sm:$0xff] %vm501_vm0, %v1126_v37  ;;  %1301 = vst.msk [vmem:[#allocation2 + $0x109] sm:$0xff] %vm501_vm0, %v1127_v60  ;;  %v14281_v46 = vld [vmem:[#allocation2 + $0x19] sm:$0xff]  ;;  %v1150_v4 = vmax.f32 %v20277_v6, 0.0  ;;  %v1152_v21 = vmax.f32 %v20278_v10, 0.0  ;;  %v1153_v25 = vmax.f32 %v14145_v45, 0.0 }
 0x258   :  { %1302 = vst.msk [vmem:[#allocation2 + $0x111] sm:$0xff] %vm501_vm0, %v1128_v7  ;;  %1303 = vst.msk [vmem:[#allocation2 + $0x121] sm:$0xff] %vm501_vm0, %v1129_v14  ;;  %11141 = vmatprep.mubr.msk.f32.mxu0 %vm501_vm0, %v14281_v46  ;;  %v14305_v8 = vld [vmem:[#allocation2 + $0x31] sm:$0xff]  ;;  %v1154_v54 = vmax.f32 %v14149_v57, 0.0  ;;  %v1155_v36 = vmax.f32 %v14153_v27, 0.0  ;;  %v1156_v55 = vmax.f32 %v14157_v2, 0.0 }
 0x259   :  { %1304 = vst.msk [vmem:[#allocation2 + $0x129] sm:$0xff] %vm501_vm0, %v1130_v22  ;;  %1305 = vst.msk [vmem:[#allocation2 + $0x139] sm:$0xff] %vm501_vm0, %v1131_v11  ;;  %11142 = vmatmul.mubr.msk.f32.gmra.mxu0 %vm501_vm0, %v14283_v44  ;;  %v1157_v45 = vmax.f32 %v14161_v63, 0.0  ;;  %v20279_v20 = vld [vmem:[#allocation24_spill] sm:$0xff]  ;;  %v1159_v57 = vmax.f32 %v14169_v16, 0.0  ;;  %v1160_v27 = vmax.f32 %v14173_v30, 0.0 }
 0x25a   :  { %1306 = vst.msk [vmem:[#allocation2 + $0x141] sm:$0xff] %vm501_vm0, %v1132_v41  ;;  %1307 = vst.msk [vmem:[#allocation2 + $0x151] sm:$0xff] %vm501_vm0, %v1133_v28  ;;  %11144 = vmatprep.mubr.msk.f32.mxu0 %vm501_vm0, %v14305_v8  ;;  %v1158_v59 = vmax.f32 %v20279_v20, 0.0  ;;  %v1161_v2 = vmax.f32 %v14177_v39, 0.0  ;;  %v1162_v63 = vmax.f32 %v14181_v33, 0.0  ;;  %v1163_v35 = vmax.f32 %v14185_v48, 0.0 }
 0x25b   :  { %1308 = vst.msk [vmem:[#allocation2 + $0x159] sm:$0xff] %vm501_vm0, %v1134_v49  ;;  %1309 = vst.msk [vmem:[#allocation2 + $0x169] sm:$0xff] %vm501_vm0, %v1135_v5  ;;  %v20280_v17 = vld [vmem:[#allocation14_spill] sm:$0xff]  ;;  %v20281_v15 = vld [vmem:[#allocation25_spill] sm:$0xff]  ;;  %v1170_v9 = vmax.f32 %v14209_v42, 0.0 }
 0x25c   :  { %1310 = vst.msk [vmem:[#allocation2 + $0x171] sm:$0xff] %vm501_vm0, %v1136_v51  ;;  %1311 = vst.msk [vmem:[#allocation2 + $0x181] sm:$0xff] %vm501_vm0, %v1137_v31  ;;  %v1164_v61 = vmax.f32 %v20280_v17, 0.0  ;;  %v1165_v16 = vmax.f32 %v20281_v15, 0.0  ;;  %v14333_v30 = vld [vmem:[#allocation2 + $0x39] sm:$0xff]  ;;  %v14335_v39 = vld [vmem:[#allocation2 + $0x49] sm:$0xff] }
 0x25d   :  { %1312 = vst.msk [vmem:[#allocation2 + $0x189] sm:$0xff] %vm501_vm0, %v1138_v18  ;;  %1313 = vst.msk [vmem:[#allocation2 + $0x1c9] sm:$0xff] %vm501_vm0, %v1139_v23  ;;  %v20282_v1 = vld [vmem:[#allocation26_spill] sm:$0xff]  ;;  %v20283_v24 = vld [vmem:[#allocation16_spill] sm:$0xff]  ;;  %11145 = vmatmul.mubr.msk.f32.gmra.mxu0 %vm501_vm0, %v14333_v30 }
 0x25e   :  { %1314 = vst.msk [vmem:[#allocation2 + $0x1d1] sm:$0xff] %vm501_vm0, %v1140_v43  ;;  %1315 = vst.msk [vmem:[#allocation2 + $0x1e1] sm:$0xff] %vm501_vm0, %v1141_v26  ;;  %v1166_v33 = vmax.f32 %v20282_v1, 0.0  ;;  %v1167_v48 = vmax.f32 %v20283_v24, 0.0  ;;  %v20284_v3 = vld [vmem:[#allocation17_spill] sm:$0xff]  ;;  %11147 = vmatprep.mubr.msk.f32.mxu0 %vm501_vm0, %v14335_v39  ;;  %v1411_v42 = vld [vmem:[%s19996_s2 + $0x10] sm:$0xff] }
 0x25f   :  { %1316 = vst.msk [vmem:[#allocation2 + $0x1e9] sm:$0xff] %vm501_vm0, %v1142_v34  ;;  %1317 = vst.msk [vmem:[#allocation2 + $0x1f9] sm:$0xff] %vm501_vm0, %v1143_v32  ;;  %v1168_v47 = vmax.f32 %v20284_v3, 0.0  ;;  %v20285_v53 = vld [vmem:[#allocation13_spill] sm:$0xff]  ;;  %v1410_v60 = vld [vmem:[%s19996_s2 + $0x8] sm:$0xff] }
 0x260   :  { %1318 = vst.msk [vmem:[#allocation2 + $0x201] sm:$0xff] %vm501_vm0, %v1144_v40  ;;  %1319 = vst.msk [vmem:[#allocation2 + $0x211] sm:$0xff] %vm501_vm0, %v1145_v38  ;;  %v1439_v29 = vld [vmem:[#allocation2 + $0x139] sm:$0xff]  ;;  %v14364_v37 = vld [vmem:[#allocation2 + $0x51] sm:$0xff] }
 0x261   :  { %1320 = vst.msk [vmem:[#allocation2 + $0x219] sm:$0xff] %vm501_vm0, %v1146_v52  ;;  %1321 = vst.msk [vmem:[#allocation2 + $0x229] sm:$0xff] %vm501_vm0, %v1147_v50  ;;  %v1440_v13 = vld [vmem:[#allocation2 + $0x141] sm:$0xff]  ;;  %11177 = vmatprep.mubr.msk.f32.mxu1 %vm501_vm0, %v1439_v29  ;;  %v1441_v19 = vld [vmem:[#allocation2 + $0x151] sm:$0xff]  ;;  %11148 = vmatmul.mubr.msk.f32.gmra.mxu0 %vm501_vm0, %v14364_v37 }
 0x262   :  { %1322 = vst.msk [vmem:[#allocation2 + $0x231] sm:$0xff] %vm501_vm0, %v1148_v56  ;;  %1323 = vst.msk [vmem:[#allocation2 + $0x241] sm:$0xff] %vm501_vm0, %v1149_v62  ;;  %11178 = vmatmul.mubr.msk.f32.vlgmr.msra.gmra.mxu1 %vm501_vm0, %v1440_v13  ;;  %v14371_v7 = vld [vmem:[#allocation2 + $0x61] sm:$0xff]  ;;  %v1442_v14 = vld [vmem:[#allocation2 + $0x159] sm:$0xff] }
 0x263   :  { %1324 = vst.msk [vmem:[#allocation2 + $0x249] sm:$0xff] %vm501_vm0, %v1150_v4  ;;  %1325 = vst.msk [vmem:[#allocation2 + $0x259] sm:$0xff] %vm501_vm0, %v1151_v12  ;;  %11235 = vmatpush3.msra.mxu1 %v20285_v53  ;;  %11180 = vmatprep.mubr.msk.f32.mxu1 %vm501_vm0, %v1441_v19  ;;  %v1409_v22 = vld [vmem:[%s19996_s2] sm:$0xff]  ;;  %v1443_v11 = vld [vmem:[#allocation2 + $0x169] sm:$0xff] }
 0x264   :  { %1326 = vst.msk [vmem:[#allocation2 + $0x261] sm:$0xff] %vm501_vm0, %v1152_v21  ;;  %1327 = vst.msk [vmem:[#allocation2 + $0x271] sm:$0xff] %vm501_vm0, %v1153_v25  ;;  %11236 = vmatprep.subr.mxu1 %v1411_v42  ;;  %11150 = vmatprep.mubr.msk.f32.mxu0 %vm501_vm0, %v14371_v7  ;;  %v14380_v41 = vld [vmem:[#allocation2 + $0x69] sm:$0xff]  ;;  %v14385_v28 = vld [vmem:[%s19996_s2 + $0x78] sm:$0xff] }
 0x265   :  { %1328 = vst.msk [vmem:[#allocation2 + $0x279] sm:$0xff] %vm501_vm0, %v1154_v54  ;;  %1329 = vst.msk [vmem:[#allocation2 + $0x289] sm:$0xff] %vm501_vm0, %v1155_v36  ;;  %11237 = vmatpush3.msra.mxu1 %v1411_v42  ;;  %v1445_v49 = vld [vmem:[#allocation2 + $0x1b1] sm:$0xff]  ;;  %11151 = vmatmul.mubr.msk.f32.gmra.mxu0 %vm501_vm0, %v14380_v41  ;;  %v14389_v5 = vld [vmem:[#allocation2 + $0x79] sm:$0xff] }
 0x266   :  { %1330 = vst.msk [vmem:[#allocation2 + $0x291] sm:$0xff] %vm501_vm0, %v1156_v55  ;;  %1331 = vst.msk [vmem:[#allocation2 + $0x2a1] sm:$0xff] %vm501_vm0, %v1157_v45  ;;  %11181 = vmatmul.mubr.msk.f32.gmra.mxu1 %vm501_vm0, %v1442_v14  ;;  %11238 = vmatprep.subr.mxu1 %v1410_v60  ;;  %v1444_v51 = vld [vmem:[#allocation2 + $0x171] sm:$0xff]  ;;  %v1446_v31 = vld [vmem:[#allocation2 + $0x1b9] sm:$0xff] }
 0x267   :  { %1332 = vst.msk [vmem:[#allocation2 + $0x2a9] sm:$0xff] %vm501_vm0, %v1158_v59  ;;  %1333 = vst.msk [vmem:[#allocation2 + $0x2b9] sm:$0xff] %vm501_vm0, %v1159_v57  ;;  %11183 = vmatprep.mubr.msk.f32.mxu1 %vm501_vm0, %v1443_v11  ;;  %11239 = vmatpush3.msra.mxu1 %v1410_v60  ;;  %v14396_v18 = vld [vmem:[#allocation2 + $0x81] sm:$0xff]  ;;  %v14400_v23 = vld [vmem:[#allocation2 + $0x91] sm:$0xff] }
 0x268   :  { %1334 = vst.msk [vmem:[#allocation2 + $0x2c1] sm:$0xff] %vm501_vm0, %v1160_v27  ;;  %1335 = vst.msk [vmem:[#allocation2 + $0x2d1] sm:$0xff] %vm501_vm0, %v1161_v2  ;;  %11240 = vmatprep.subr.mxu1 %v1409_v22  ;;  %11153 = vmatprep.mubr.msk.f32.mxu0 %vm501_vm0, %v14389_v5  ;;  %v1447_v43 = vld [vmem:[#allocation2 + $0x1c9] sm:$0xff]  ;;  %v14406_v26 = vld [vmem:[#allocation2 + $0x99] sm:$0xff] }
 0x269   :  { %1336 = vst.msk [vmem:[#allocation2 + $0x2d9] sm:$0xff] %vm501_vm0, %v1162_v63  ;;  %1337 = vst.msk [vmem:[#allocation2 + $0x2e9] sm:$0xff] %vm501_vm0, %v1163_v35  ;;  %11241 = vmatpush3.msra.mxu1 %v1409_v22  ;;  %11154 = vmatmul.mubr.msk.f32.gmra.mxu0 %vm501_vm0, %v14396_v18  ;;  %v14410_v34 = vld [vmem:[#allocation2 + $0xa9] sm:$0xff]  ;;  %v1448_v32 = vld [vmem:[#allocation2 + $0x1d1] sm:$0xff] }
 0x26a   :  { %1338 = vst.msk [vmem:[#allocation2 + $0x2f1] sm:$0xff] %vm501_vm0, %v1164_v61  ;;  %1339 = vst.msk [vmem:[#allocation2 + $0x301] sm:$0xff] %vm501_vm0, %v1165_v16  ;;  %11184 = vmatmul.mubr.msk.f32.gmra.mxu1 %vm501_vm0, %v1444_v51  ;;  %11442 = vmatprep.subr.mxu1 %v14385_v28  ;;  %v1449_v40 = vld [vmem:[#allocation2 + $0x1e1] sm:$0xff]  ;;  %v14416_v38 = vld [vmem:[#allocation2 + $0xb1] sm:$0xff] }
 0x26b   :  { %1340 = vst.msk [vmem:[#allocation2 + $0x309] sm:$0xff] %vm501_vm0, %v1166_v33  ;;  %1341 = vst.msk [vmem:[#allocation2 + $0x319] sm:$0xff] %vm501_vm0, %v1167_v48  ;;  %11186 = vmatprep.mubr.msk.f32.mxu1 %vm501_vm0, %v1445_v49  ;;  %11156 = vmatprep.mubr.msk.f32.mxu0 %vm501_vm0, %v14400_v23  ;;  %v14420_v52 = vld [vmem:[#allocation2 + $0xc1] sm:$0xff]  ;;  %v1450_v50 = vld [vmem:[#allocation2 + $0x1e9] sm:$0xff] }
 0x26c   :  { %1342 = vst.msk [vmem:[#allocation2 + $0x321] sm:$0xff] %vm501_vm0, %v1168_v47  ;;  %1344 = vst.msk [vmem:[#allocation2 + $0x339] sm:$0xff] %vm501_vm0, %v1170_v9  ;;  %v1451_v58 = vld [vmem:[#allocation2 + $0x1f9] sm:$0xff]  ;;  %v14426_v56 = vld [vmem:[#allocation2 + $0xc9] sm:$0xff] }
 0x26d   :  { %11157 = vmatmul.mubr.msk.f32.gmra.mxu0 %vm501_vm0, %v14406_v26  ;;  %v14430_v0 = vld [vmem:[#allocation2 + $0xd9] sm:$0xff]  ;;  %v1452_v62 = vld [vmem:[#allocation2 + $0x201] sm:$0xff]  ;;  %v1453_v6 = vld [vmem:[#allocation2 + $0x211] sm:$0xff] }
 0x26e   :  { %11187 = vmatmul.mubr.msk.f32.gmra.mxu1 %vm501_vm0, %v1446_v31  ;;  %11159 = vmatprep.mubr.msk.f32.mxu0 %vm501_vm0, %v14410_v34  ;;  %v14436_v4 = vld [vmem:[#allocation2 + $0xe1] sm:$0xff]  ;;  %v14440_v12 = vld [vmem:[#allocation2 + $0xf1] sm:$0xff]  ;;  %v1454_v10 = vld [vmem:[#allocation2 + $0x219] sm:$0xff] }
 0x26f   :  { %11189 = vmatprep.mubr.msk.f32.mxu1 %vm501_vm0, %v1447_v43  ;;  %v1455_v21 = vld [vmem:[#allocation2 + $0x229] sm:$0xff]  ;;  %v14446_v25 = vld [vmem:[#allocation2 + $0xf9] sm:$0xff]  ;;  %v1456_v36 = vld [vmem:[#allocation2 + $0x231] sm:$0xff] }
 0x270   :  { %v14450_v54 = vld [vmem:[#allocation2 + $0x109] sm:$0xff]  ;;  %v1457_v55 = vld [vmem:[#allocation2 + $0x241] sm:$0xff]  ;;  %v14456_v45 = vld [vmem:[#allocation2 + $0x111] sm:$0xff] }
 0x271   :  { %11160 = vmatmul.mubr.msk.f32.gmra.mxu0 %vm501_vm0, %v14416_v38  ;;  %v14460_v20 = vld [vmem:[#allocation2 + $0x121] sm:$0xff]  ;;  %v1458_v59 = vld [vmem:[#allocation2 + $0x249] sm:$0xff]  ;;  %v1459_v57 = vld [vmem:[#allocation2 + $0x259] sm:$0xff] }
 0x272   :  { %11190 = vmatmul.mubr.msk.f32.gmra.mxu1 %vm501_vm0, %v1448_v32  ;;  %11162 = vmatprep.mubr.msk.f32.mxu0 %vm501_vm0, %v14420_v52  ;;  %v2635_v27 = vld [vmem:[#allocation2 + $0x2] sm:$0xff]  ;;  %v2636_v35 = vld [vmem:[#allocation2 + $0xa] sm:$0xff]  ;;  %v2637_v15 = vld [vmem:[#allocation2 + $0x1a] sm:$0xff] }
 0x273   :  { %11192 = vmatprep.mubr.msk.f32.mxu1 %vm501_vm0, %v1449_v40  ;;  %v14466_v2 = vld [vmem:[#allocation2 + $0x129] sm:$0xff]  ;;  %v1460_v63 = vld [vmem:[#allocation2 + $0x261] sm:$0xff]  ;;  %v1461_v17 = vld [vmem:[#allocation2 + $0x271] sm:$0xff] }
 0x274   :  { %v4119_v61 = vld [vmem:[%s19996_s2 + $0x90] sm:$0xff]  ;;  %v1462_v16 = vld [vmem:[#allocation2 + $0x279] sm:$0xff]  ;;  %v4118_v33 = vld [vmem:[%s19996_s2 + $0x88] sm:$0xff] }
 0x275   :  { %11163 = vmatmul.mubr.msk.f32.gmra.mxu0 %vm501_vm0, %v14426_v56  ;;  %v20286_v1 = vld [vmem:[#allocation28_spill] sm:$0xff]  ;;  %v2638_v48 = vld [vmem:[#allocation2 + $0x22] sm:$0xff]  ;;  %v2640_v29 = vld [vmem:[#allocation2 + $0x3a] sm:$0xff] }
 0x276   :  { %11193 = vmatmul.mubr.msk.f32.gmra.mxu1 %vm501_vm0, %v1450_v50  ;;  %11165 = vmatprep.mubr.msk.f32.mxu0 %vm501_vm0, %v14430_v0  ;;  %v1463_v24 = vld [vmem:[#allocation2 + $0x289] sm:$0xff]  ;;  %v2639_v3 = vld [vmem:[#allocation2 + $0x32] sm:$0xff]  ;;  %v1465_v9 = vld [vmem:[#allocation2 + $0x2a1] sm:$0xff] }
 0x277   :  { %11195 = vmatprep.mubr.msk.f32.mxu1 %vm501_vm0, %v1451_v58  ;;  %v1464_v47 = vld [vmem:[#allocation2 + $0x291] sm:$0xff]  ;;  %v1466_v42 = vld [vmem:[#allocation2 + $0x2a9] sm:$0xff]  ;;  %v4117_v19 = vld [vmem:[%s19996_s2 + $0x80] sm:$0xff] }
 0x278   :  { %v2641_v13 = vld [vmem:[#allocation2 + $0x4a] sm:$0xff]  ;;  %v1467_v53 = vld [vmem:[#allocation2 + $0x2b9] sm:$0xff]  ;;  %v2643_v14 = vld [vmem:[#allocation2 + $0x62] sm:$0xff] }
 0x279   :  { %11166 = vmatmul.mubr.msk.f32.gmra.mxu0 %vm501_vm0, %v14436_v4  ;;  %v2642_v60 = vld [vmem:[#allocation2 + $0x52] sm:$0xff]  ;;  %v1468_v22 = vld [vmem:[#allocation2 + $0x2c1] sm:$0xff]  ;;  %v2644_v49 = vld [vmem:[#allocation2 + $0x6a] sm:$0xff] }
 0x27a   :  { %11196 = vmatmul.mubr.msk.f32.gmra.mxu1 %vm501_vm0, %v1452_v62  ;;  %11168 = vmatprep.mubr.msk.f32.mxu0 %vm501_vm0, %v14440_v12  ;;  %v1469_v11 = vld [vmem:[#allocation2 + $0x2d1] sm:$0xff]  ;;  %v2645_v51 = vld [vmem:[#allocation2 + $0x7a] sm:$0xff]  ;;  %v1471_v43 = vld [vmem:[#allocation2 + $0x2e9] sm:$0xff] }
 0x27b   :  { %11198 = vmatprep.mubr.msk.f32.mxu1 %vm501_vm0, %v1453_v6  ;;  %v1470_v31 = vld [vmem:[#allocation2 + $0x2d9] sm:$0xff]  ;;  %v2646_v32 = vld [vmem:[#allocation2 + $0x82] sm:$0xff]  ;;  %v1472_v50 = vld [vmem:[#allocation2 + $0x2f1] sm:$0xff] }
 0x27c   :  { %v2647_v40 = vld [vmem:[#allocation2 + $0x92] sm:$0xff]  ;;  %v1473_v58 = vld [vmem:[#allocation2 + $0x301] sm:$0xff]  ;;  %v2649_v6 = vld [vmem:[#allocation2 + $0xaa] sm:$0xff] }
 0x27d   :  { %11169 = vmatmul.mubr.msk.f32.gmra.mxu0 %vm501_vm0, %v14446_v25  ;;  %v2648_v62 = vld [vmem:[#allocation2 + $0x9a] sm:$0xff] }
 0x27e   :  { %11199 = vmatmul.mubr.msk.f32.gmra.mxu1 %vm501_vm0, %v1454_v10  ;;  %11171 = vmatprep.mubr.msk.f32.mxu0 %vm501_vm0, %v14450_v54  ;;  %v1474_v10 = vld [vmem:[#allocation2 + $0x309] sm:$0xff] }
 0x27f   :  { %11201 = vmatprep.mubr.msk.f32.mxu1 %vm501_vm0, %v1455_v21  ;;  %v1475_v21 = vld [vmem:[#allocation2 + $0x319] sm:$0xff] }
 0x281   :  { %11172 = vmatmul.mubr.msk.f32.gmra.mxu0 %vm501_vm0, %v14456_v45 }
 0x282   :  { %11202 = vmatmul.mubr.msk.f32.gmra.mxu1 %vm501_vm0, %v1456_v36  ;;  %11174 = vmatprep.mubr.msk.f32.mxu0 %vm501_vm0, %v14460_v20  ;;  %v2650_v36 = vld [vmem:[#allocation2 + $0xb2] sm:$0xff] }
 0x283   :  { %11204 = vmatprep.mubr.msk.f32.mxu1 %vm501_vm0, %v1457_v55  ;;  %v1345_v55 = vld [vmem:[#allocation2] sm:$0xff] }
 0x285   :  { %11175 = vmatmul.mubr.msk.f32.gmra.mxu0 %vm501_vm0, %v14466_v2 }
 0x286   :  { %11205 = vmatmul.mubr.msk.f32.gmra.mxu1 %vm501_vm0, %v1458_v59  ;;  %11346 = vmatprep.mubr.msk.f32.mxu0 %vm501_vm0, %v2635_v27  ;;  %v2651_v59 = vld [vmem:[#allocation2 + $0xc2] sm:$0xff] }
 0x287   :  { %11207 = vmatprep.mubr.msk.f32.mxu1 %vm501_vm0, %v1459_v57  ;;  %v1476_v57 = vld [vmem:[#allocation2 + $0x321] sm:$0xff] }
 0x288   :  { %v1346_v27 = vld [vmem:[#allocation2 + $0x8] sm:$0xff] }
 0x289   :  { %11347 = vmatmul.mubr.msk.f32.vlgmr.msra.gmra.mxu0 %vm501_vm0, %v2636_v35  ;;  %v2653_v35 = vld [vmem:[#allocation2 + $0xda] sm:$0xff] }
 0x28a   :  { %11208 = vmatmul.mubr.msk.f32.gmra.mxu1 %vm501_vm0, %v1460_v63  ;;  %11349 = vmatprep.mubr.msk.f32.mxu0 %vm501_vm0, %v2637_v15  ;;  %v2652_v63 = vld [vmem:[#allocation2 + $0xca] sm:$0xff]  ;;  %v2654_v15 = vld [vmem:[#allocation2 + $0xe2] sm:$0xff] }
 0x28b   :  { %11210 = vmatprep.mubr.msk.f32.mxu1 %vm501_vm0, %v1461_v17  ;;  %11547 = vmatpush3.msra.mxu0 %v20286_v1  ;;  %v3410_v17 = vld [vmem:[%s19996_s2 + $0x70] sm:$0xff] }
 0x28c   :  { %11548 = vmatprep.subr.mxu0 %v4119_v61  ;;  %v2655_v1 = vld [vmem:[#allocation2 + $0xf2] sm:$0xff] }
 0x28d   :  { %11549 = vmatpush3.msra.mxu0 %v4119_v61  ;;  %v14521_v61 = vld [vmem:[#allocation2 + $0x18] sm:$0xff] }
 0x28e   :  { %11211 = vmatmul.mubr.msk.f32.gmra.mxu1 %vm501_vm0, %v1462_v16  ;;  %11350 = vmatmul.mubr.msk.f32.gmra.mxu0 %vm501_vm0, %v2638_v48  ;;  %v3409_v16 = vld [vmem:[%s19996_s2 + $0x68] sm:$0xff]  ;;  %v2656_v48 = vld [vmem:[#allocation2 + $0xfa] sm:$0xff] }
 0x28f   :  { %11213 = vmatprep.mubr.msk.f32.mxu1 %vm501_vm0, %v1463_v24  ;;  %11550 = vmatprep.subr.mxu0 %v4118_v33  ;;  %v14538_v24 = vld [vmem:[#allocation2 + $0x30] sm:$0xff] }
 0x290   :  { %11352 = vmatprep.mubr.msk.f32.mxu0 %vm501_vm0, %v2639_v3  ;;  %11551 = vmatpush3.msra.mxu0 %v4118_v33  ;;  %v14530_v33 = vld [vmem:[#allocation2 + $0x20] sm:$0xff]  ;;  %v14545_v3 = vld [vmem:[%s19996_s2 + $0xb8] sm:$0xff] }
 0x291   :  { %11552 = vmatprep.subr.mxu0 %v4117_v19 }
 0x292   :  { %11214 = vmatmul.mubr.msk.f32.gmra.mxu1 %vm501_vm0, %v1464_v47  ;;  %11353 = vmatmul.mubr.msk.f32.gmra.mxu0 %vm501_vm0, %v2640_v29  ;;  %v2657_v47 = vld [vmem:[#allocation2 + $0x10a] sm:$0xff]  ;;  %v14553_v29 = vld [vmem:[#allocation2 + $0x38] sm:$0xff] }
 0x293   :  { %11216 = vmatprep.mubr.msk.f32.mxu1 %vm501_vm0, %v1465_v9  ;;  %11355 = vmatprep.mubr.msk.f32.mxu0 %vm501_vm0, %v2641_v13  ;;  %v14551_v9 = vld [vmem:[%s19996_s2 + $0xd8] sm:$0xff]  ;;  %v14558_v13 = vld [vmem:[#allocation2 + $0x48] sm:$0xff] }
 0x294   :  { %11553 = vmatpush3.msra.mxu0 %v4117_v19  ;;  %v2659_v19 = vld [vmem:[#allocation2 + $0x122] sm:$0xff] }
 0x295   :  { %11754 = vmatprep.subr.mxu0 %v14551_v9 }
 0x296   :  { %11217 = vmatmul.mubr.msk.f32.gmra.mxu1 %vm501_vm0, %v1466_v42  ;;  %11356 = vmatmul.mubr.msk.f32.gmra.mxu0 %vm501_vm0, %v2642_v60  ;;  %v2658_v42 = vld [vmem:[#allocation2 + $0x112] sm:$0xff]  ;;  %v14570_v60 = vld [vmem:[#allocation2 + $0x60] sm:$0xff] }
 0x297   :  { %11219 = vmatprep.mubr.msk.f32.mxu1 %vm501_vm0, %v1467_v53  ;;  %11358 = vmatprep.mubr.msk.f32.mxu0 %vm501_vm0, %v2643_v14  ;;  %v14565_v53 = vld [vmem:[#allocation2 + $0x50] sm:$0xff] }
 0x298   :  { %v2660_v14 = vld [vmem:[#allocation2 + $0x12a] sm:$0xff] }
 0x29a   :  { %11220 = vmatmul.mubr.msk.f32.gmra.mxu1 %vm501_vm0, %v1468_v22  ;;  %11359 = vmatmul.mubr.msk.f32.gmra.mxu0 %vm501_vm0, %v2644_v49  ;;  %v2661_v22 = vld [vmem:[#allocation2 + $0x13a] sm:$0xff] }
 0x29b   :  { %11222 = vmatprep.mubr.msk.f32.mxu1 %vm501_vm0, %v1469_v11  ;;  %11361 = vmatprep.mubr.msk.f32.mxu0 %vm501_vm0, %v2645_v51  ;;  %v14575_v11 = vld [vmem:[#allocation2 + $0x68] sm:$0xff]  ;;  %v14580_v49 = vld [vmem:[#allocation2 + $0x78] sm:$0xff] }
 0x29c   :  { %v2662_v51 = vld [vmem:[#allocation2 + $0x142] sm:$0xff] }
 0x29e   :  { %11223 = vmatmul.mubr.msk.f32.gmra.mxu1 %vm501_vm0, %v1470_v31  ;;  %11362 = vmatmul.mubr.msk.f32.gmra.mxu0 %vm501_vm0, %v2646_v32  ;;  %v2663_v31 = vld [vmem:[#allocation2 + $0x152] sm:$0xff] }
 0x29f   :  { %11225 = vmatprep.mubr.msk.f32.mxu1 %vm501_vm0, %v1471_v43  ;;  %11364 = vmatprep.mubr.msk.f32.mxu0 %vm501_vm0, %v2647_v40  ;;  %v14585_v43 = vld [vmem:[#allocation2 + $0x80] sm:$0xff]  ;;  %v14590_v32 = vld [vmem:[#allocation2 + $0x90] sm:$0xff] }
 0x2a0   :  { %v2664_v40 = vld [vmem:[#allocation2 + $0x15a] sm:$0xff] }
 0x2a2   :  { %11226 = vmatmul.mubr.msk.f32.gmra.mxu1 %vm501_vm0, %v1472_v50  ;;  %11365 = vmatmul.mubr.msk.f32.gmra.mxu0 %vm501_vm0, %v2648_v62  ;;  %v2665_v50 = vld [vmem:[#allocation2 + $0x16a] sm:$0xff] }
 0x2a3   :  { %11228 = vmatprep.mubr.msk.f32.mxu1 %vm501_vm0, %v1473_v58  ;;  %11367 = vmatprep.mubr.msk.f32.mxu0 %vm501_vm0, %v2649_v6  ;;  %v14595_v58 = vld [vmem:[#allocation2 + $0x98] sm:$0xff]  ;;  %v14600_v62 = vld [vmem:[#allocation2 + $0xa8] sm:$0xff] }
 0x2a4   :  { %v2667_v6 = vld [vmem:[#allocation2 + $0x1b2] sm:$0xff] }
 0x2a6   :  { %11229 = vmatmul.mubr.msk.f32.gmra.mxu1 %vm501_vm0, %v1474_v10  ;;  %11368 = vmatmul.mubr.msk.f32.gmra.mxu0 %vm501_vm0, %v2650_v36  ;;  %v2666_v10 = vld [vmem:[#allocation2 + $0x172] sm:$0xff]  ;;  %v2668_v36 = vld [vmem:[#allocation2 + $0x1ba] sm:$0xff] }
 0x2a7   :  { %11231 = vmatprep.mubr.msk.f32.mxu1 %vm501_vm0, %v1475_v21  ;;  %11370 = vmatprep.mubr.msk.f32.mxu0 %vm501_vm0, %v2651_v59  ;;  %v14605_v21 = vld [vmem:[#allocation2 + $0xb0] sm:$0xff] }
 0x2a8   :  { %v2669_v59 = vld [vmem:[#allocation2 + $0x1ca] sm:$0xff] }
 0x2aa   :  { %11232 = vmatmul.mubr.msk.f32.gmra.mxu1 %vm501_vm0, %v1476_v57  ;;  %11371 = vmatmul.mubr.msk.f32.gmra.mxu0 %vm501_vm0, %v2652_v63  ;;  %v14615_v57 = vld [vmem:[#allocation2 + $0xc8] sm:$0xff]  ;;  %v2670_v63 = vld [vmem:[#allocation2 + $0x1d2] sm:$0xff] }
 0x2ab   :  { %11242 = vmatprep.mubr.msk.f32.mxu1 %vm501_vm0, %v1345_v55  ;;  %11373 = vmatprep.mubr.msk.f32.mxu0 %vm501_vm0, %v2653_v35  ;;  %v14610_v55 = vld [vmem:[#allocation2 + $0xc0] sm:$0xff] }
 0x2ac   :  { %v2671_v35 = vld [vmem:[#allocation2 + $0x1e2] sm:$0xff] }
 0x2ae   :  { %11243 = vmatmul.mubr.msk.f32.vlgmr.msra.gmra.mxu1 %vm501_vm0, %v1346_v27  ;;  %11374 = vmatmul.mubr.msk.f32.gmra.mxu0 %vm501_vm0, %v2654_v15  ;;  %v14620_v27 = vld [vmem:[#allocation2 + $0xd8] sm:$0xff]  ;;  %v14630_v15 = vld [vmem:[#allocation2 + $0xf0] sm:$0xff] }
 0x2af   :  { %11443 = vmatpush3.msra.mxu1 %v14385_v28  ;;  %11245 = vmatprep.mubr.msk.f32.mxu1 %vm501_vm0, %v14521_v61  ;;  %v3408_v28 = vld [vmem:[%s19996_s2 + $0x60] sm:$0xff] }
 0x2b0   :  { %11444 = vmatprep.subr.mxu1 %v3410_v17  ;;  %11376 = vmatprep.mubr.msk.f32.mxu0 %vm501_vm0, %v2655_v1  ;;  %v2673_v1 = vld [vmem:[#allocation2 + $0x1fa] sm:$0xff] }
 0x2b1   :  { %11445 = vmatpush3.msra.mxu1 %v3410_v17  ;;  %v14625_v17 = vld [vmem:[#allocation2 + $0xe0] sm:$0xff] }
 0x2b2   :  { %11246 = vmatmul.mubr.msk.f32.gmra.mxu1 %vm501_vm0, %v14530_v33  ;;  %11446 = vmatprep.subr.mxu1 %v3409_v16 }
 0x2b3   :  { %11248 = vmatprep.mubr.msk.f32.mxu1 %vm501_vm0, %v14538_v24  ;;  %11447 = vmatpush3.msra.mxu1 %v3409_v16  ;;  %v2672_v16 = vld [vmem:[#allocation2 + $0x1ea] sm:$0xff] }
 0x2b4   :  { %11377 = vmatmul.mubr.msk.f32.gmra.mxu0 %vm501_vm0, %v2656_v48  ;;  %11448 = vmatprep.subr.mxu1 %v3408_v28  ;;  %v14640_v48 = vld [vmem:[#allocation2 + $0x108] sm:$0xff] }
 0x2b5   :  { %11379 = vmatprep.mubr.msk.f32.mxu0 %vm501_vm0, %v2657_v47  ;;  %11449 = vmatpush3.msra.mxu1 %v3408_v28  ;;  %v14635_v28 = vld [vmem:[#allocation2 + $0xf8] sm:$0xff]  ;;  %v2674_v47 = vld [vmem:[#allocation2 + $0x202] sm:$0xff] }
 0x2b6   :  { %11249 = vmatmul.mubr.msk.f32.gmra.mxu1 %vm501_vm0, %v14553_v29  ;;  %11650 = vmatprep.subr.mxu1 %v14545_v3 }
 0x2b7   :  { %11251 = vmatprep.mubr.msk.f32.mxu1 %vm501_vm0, %v14558_v13 }
 0x2b8   :  { %11380 = vmatmul.mubr.msk.f32.gmra.mxu0 %vm501_vm0, %v2658_v42  ;;  %v2675_v42 = vld [vmem:[#allocation2 + $0x212] sm:$0xff] }
 0x2b9   :  { %11382 = vmatprep.mubr.msk.f32.mxu0 %vm501_vm0, %v2659_v19  ;;  %v14645_v19 = vld [vmem:[#allocation2 + $0x110] sm:$0xff] }
 0x2ba   :  { %11252 = vmatmul.mubr.msk.f32.gmra.mxu1 %vm501_vm0, %v14565_v53 }
 0x2bb   :  { %11254 = vmatprep.mubr.msk.f32.mxu1 %vm501_vm0, %v14570_v60 }
 0x2bc   :  { %11383 = vmatmul.mubr.msk.f32.gmra.mxu0 %vm501_vm0, %v2660_v14  ;;  %v14650_v14 = vld [vmem:[#allocation2 + $0x120] sm:$0xff] }
 0x2bd   :  { %11385 = vmatprep.mubr.msk.f32.mxu0 %vm501_vm0, %v2661_v22  ;;  %v2676_v22 = vld [vmem:[#allocation2 + $0x21a] sm:$0xff] }
 0x2be   :  { %11255 = vmatmul.mubr.msk.f32.gmra.mxu1 %vm501_vm0, %v14575_v11 }
 0x2bf   :  { %11257 = vmatprep.mubr.msk.f32.mxu1 %vm501_vm0, %v14580_v49 }
 0x2c0   :  { %11386 = vmatmul.mubr.msk.f32.gmra.mxu0 %vm501_vm0, %v2662_v51  ;;  %v2677_v51 = vld [vmem:[#allocation2 + $0x22a] sm:$0xff] }
 0x2c1   :  { %11388 = vmatprep.mubr.msk.f32.mxu0 %vm501_vm0, %v2663_v31  ;;  %v14655_v31 = vld [vmem:[#allocation2 + $0x128] sm:$0xff] }
 0x2c2   :  { %11258 = vmatmul.mubr.msk.f32.gmra.mxu1 %vm501_vm0, %v14585_v43 }
 0x2c3   :  { %11260 = vmatprep.mubr.msk.f32.mxu1 %vm501_vm0, %v14590_v32 }
 0x2c4   :  { %11389 = vmatmul.mubr.msk.f32.gmra.mxu0 %vm501_vm0, %v2664_v40  ;;  %v14660_v40 = vld [vmem:[#allocation2 + $0x138] sm:$0xff] }
 0x2c5   :  { %11391 = vmatprep.mubr.msk.f32.mxu0 %vm501_vm0, %v2665_v50  ;;  %v2678_v50 = vld [vmem:[#allocation2 + $0x232] sm:$0xff] }
 0x2c6   :  { %11261 = vmatmul.mubr.msk.f32.gmra.mxu1 %vm501_vm0, %v14595_v58 }
 0x2c7   :  { %11263 = vmatprep.mubr.msk.f32.mxu1 %vm501_vm0, %v14600_v62 }
 0x2c8   :  { %11392 = vmatmul.mubr.msk.f32.gmra.mxu0 %vm501_vm0, %v2666_v10  ;;  %v14665_v10 = vld [vmem:[#allocation2 + $0x140] sm:$0xff] }
 0x2c9   :  { %11394 = vmatprep.mubr.msk.f32.mxu0 %vm501_vm0, %v2667_v6  ;;  %v2679_v6 = vld [vmem:[#allocation2 + $0x242] sm:$0xff] }
 0x2ca   :  { %11264 = vmatmul.mubr.msk.f32.gmra.mxu1 %vm501_vm0, %v14605_v21 }
 0x2cb   :  { %11266 = vmatprep.mubr.msk.f32.mxu1 %vm501_vm0, %v14610_v55 }
 0x2cc   :  { %11395 = vmatmul.mubr.msk.f32.gmra.mxu0 %vm501_vm0, %v2668_v36  ;;  %v14670_v36 = vld [vmem:[#allocation2 + $0x150] sm:$0xff] }
 0x2cd   :  { %11397 = vmatprep.mubr.msk.f32.mxu0 %vm501_vm0, %v2669_v59  ;;  %v2680_v59 = vld [vmem:[#allocation2 + $0x24a] sm:$0xff] }
 0x2ce   :  { %11267 = vmatmul.mubr.msk.f32.gmra.mxu1 %vm501_vm0, %v14615_v57 }
 0x2cf   :  { %11269 = vmatprep.mubr.msk.f32.mxu1 %vm501_vm0, %v14620_v27 }
 0x2d0   :  { %11398 = vmatmul.mubr.msk.f32.gmra.mxu0 %vm501_vm0, %v2670_v63  ;;  %v2681_v63 = vld [vmem:[#allocation2 + $0x25a] sm:$0xff] }
 0x2d1   :  { %11400 = vmatprep.mubr.msk.f32.mxu0 %vm501_vm0, %v2671_v35  ;;  %v14675_v35 = vld [vmem:[#allocation2 + $0x158] sm:$0xff] }
 0x2d2   :  { %11270 = vmatmul.mubr.msk.f32.gmra.mxu1 %vm501_vm0, %v14625_v17 }
 0x2d3   :  { %11272 = vmatprep.mubr.msk.f32.mxu1 %vm501_vm0, %v14630_v15 }
 0x2d4   :  { %11401 = vmatmul.mubr.msk.f32.gmra.mxu0 %vm501_vm0, %v2672_v16  ;;  %v14680_v16 = vld [vmem:[#allocation2 + $0x168] sm:$0xff] }
 0x2d5   :  { %11403 = vmatprep.mubr.msk.f32.mxu0 %vm501_vm0, %v2673_v1  ;;  %v2682_v1 = vld [vmem:[#allocation2 + $0x262] sm:$0xff] }
 0x2d6   :  { %11273 = vmatmul.mubr.msk.f32.gmra.mxu1 %vm501_vm0, %v14635_v28 }
 0x2d7   :  { %11275 = vmatprep.mubr.msk.f32.mxu1 %vm501_vm0, %v14640_v48 }
 0x2d8   :  { %11404 = vmatmul.mubr.msk.f32.gmra.mxu0 %vm501_vm0, %v2674_v47  ;;  %v1377_v47 = vld [vmem:[#allocation2 + $0x1b0] sm:$0xff] }
 0x2d9   :  { %11406 = vmatprep.mubr.msk.f32.mxu0 %vm501_vm0, %v2675_v42  ;;  %v2683_v42 = vld [vmem:[#allocation2 + $0x272] sm:$0xff] }
 0x2da   :  { %11276 = vmatmul.mubr.msk.f32.gmra.mxu1 %vm501_vm0, %v14645_v19 }
 0x2db   :  { %11278 = vmatprep.mubr.msk.f32.mxu1 %vm501_vm0, %v14650_v14 }
 0x2dc   :  { %11407 = vmatmul.mubr.msk.f32.gmra.mxu0 %vm501_vm0, %v2676_v22  ;;  %v14685_v22 = vld [vmem:[#allocation2 + $0x170] sm:$0xff] }
 0x2dd   :  { %11409 = vmatprep.mubr.msk.f32.mxu0 %vm501_vm0, %v2677_v51  ;;  %v1378_v51 = vld [vmem:[#allocation2 + $0x1b8] sm:$0xff] }
 0x2de   :  { %11279 = vmatmul.mubr.msk.f32.gmra.mxu1 %vm501_vm0, %v14655_v31 }
 0x2df   :  { %11281 = vmatprep.mubr.msk.f32.mxu1 %vm501_vm0, %v14660_v40 }
 0x2e0   :  { %11410 = vmatmul.mubr.msk.f32.gmra.mxu0 %vm501_vm0, %v2678_v50  ;;  %v2684_v50 = vld [vmem:[#allocation2 + $0x27a] sm:$0xff] }
 0x2e1   :  { %11412 = vmatprep.mubr.msk.f32.mxu0 %vm501_vm0, %v2679_v6  ;;  %v2685_v6 = vld [vmem:[#allocation2 + $0x28a] sm:$0xff] }
 0x2e2   :  { %11282 = vmatmul.mubr.msk.f32.gmra.mxu1 %vm501_vm0, %v14665_v10 }
 0x2e3   :  { %11284 = vmatprep.mubr.msk.f32.mxu1 %vm501_vm0, %v14670_v36 }
 0x2e4   :  { %11413 = vmatmul.mubr.msk.f32.gmra.mxu0 %vm501_vm0, %v2680_v59  ;;  %v14694_v59 = vld [vmem:[#allocation2 + $0x1c8] sm:$0xff] }
 0x2e5   :  { %11415 = vmatprep.mubr.msk.f32.mxu0 %vm501_vm0, %v2681_v63  ;;  %v2686_v63 = vld [vmem:[#allocation2 + $0x292] sm:$0xff] }
 0x2e6   :  { %11285 = vmatmul.mubr.msk.f32.gmra.mxu1 %vm501_vm0, %v14675_v35 }
 0x2e7   :  { %11287 = vmatprep.mubr.msk.f32.mxu1 %vm501_vm0, %v14680_v16 }
 0x2e8   :  { %11416 = vmatmul.mubr.msk.f32.gmra.mxu0 %vm501_vm0, %v2682_v1  ;;  %v2687_v1 = vld [vmem:[#allocation2 + $0x2a2] sm:$0xff] }
 0x2e9   :  { %11418 = vmatprep.mubr.msk.f32.mxu0 %vm501_vm0, %v2683_v42  ;;  %v14699_v42 = vld [vmem:[#allocation2 + $0x1d0] sm:$0xff] }
 0x2ea   :  { %11288 = vmatmul.mubr.msk.f32.gmra.mxu1 %vm501_vm0, %v14685_v22  ;;  %20287 = vst [vmem:[#allocation18_spill] sm:$0xff] %v14699_v42 }
 0x2eb   :  { %11290 = vmatprep.mubr.msk.f32.mxu1 %vm501_vm0, %v1377_v47  ;;  %v14704_v47 = vld [vmem:[#allocation2 + $0x1e0] sm:$0xff] }
 0x2ec   :  { %11419 = vmatmul.mubr.msk.f32.gmra.mxu0 %vm501_vm0, %v2684_v50  ;;  %20288 = vst [vmem:[#allocation19_spill] sm:$0xff] %v14704_v47  ;;  %v2689_v50 = vld [vmem:[#allocation2 + $0x2ba] sm:$0xff] }
 0x2ed   :  { %11421 = vmatprep.mubr.msk.f32.mxu0 %vm501_vm0, %v2685_v6  ;;  %v14709_v6 = vld [vmem:[#allocation2 + $0x1e8] sm:$0xff] }
 0x2ee   :  { %11291 = vmatmul.mubr.msk.f32.gmra.mxu1 %vm501_vm0, %v1378_v51  ;;  %v2688_v51 = vld [vmem:[#allocation2 + $0x2aa] sm:$0xff]  ;;  %20289 = vst [vmem:[#allocation20_spill] sm:$0xff] %v14709_v6 }
 0x2ef   :  { %11293 = vmatprep.mubr.msk.f32.mxu1 %vm501_vm0, %v14694_v59 }
 0x2f0   :  { %11422 = vmatmul.mubr.msk.f32.gmra.mxu0 %vm501_vm0, %v2686_v63  ;;  %v14714_v63 = vld [vmem:[#allocation2 + $0x1f8] sm:$0xff] }
 0x2f1   :  { %11424 = vmatprep.mubr.msk.f32.mxu0 %vm501_vm0, %v2687_v1  ;;  %20290 = vst [vmem:[#allocation27_spill] sm:$0xff] %v14714_v63  ;;  %v2690_v1 = vld [vmem:[#allocation2 + $0x2c2] sm:$0xff] }
 0x2f2   :  { %11294 = vmatmul.mubr.msk.f32.gmra.mxu1 %vm501_vm0, %v14699_v42  ;;  %v14719_v42 = vld [vmem:[#allocation2 + $0x200] sm:$0xff] }
 0x2f3   :  { %11296 = vmatprep.mubr.msk.f32.mxu1 %vm501_vm0, %v14704_v47  ;;  %v2691_v47 = vld [vmem:[#allocation2 + $0x2d2] sm:$0xff]  ;;  %20291 = vst [vmem:[#allocation29_spill] sm:$0xff] %v14719_v42 }
 0x2f4   :  { %11425 = vmatmul.mubr.msk.f32.gmra.mxu0 %vm501_vm0, %v2688_v51  ;;  %v14724_v51 = vld [vmem:[#allocation2 + $0x210] sm:$0xff] }
 0x2f5   :  { %11427 = vmatprep.mubr.msk.f32.mxu0 %vm501_vm0, %v2689_v50  ;;  %20292 = vst [vmem:[#allocation15_spill] sm:$0xff] %v14724_v51  ;;  %v2692_v50 = vld [vmem:[#allocation2 + $0x2da] sm:$0xff] }
 0x2f6   :  { %11297 = vmatmul.mubr.msk.f32.gmra.mxu1 %vm501_vm0, %v14709_v6  ;;  %v14729_v6 = vld [vmem:[#allocation2 + $0x218] sm:$0xff] }
 0x2f7   :  { %11299 = vmatprep.mubr.msk.f32.mxu1 %vm501_vm0, %v14714_v63  ;;  %v2693_v63 = vld [vmem:[#allocation2 + $0x2ea] sm:$0xff]  ;;  %20293 = vst [vmem:[#allocation6_spill] sm:$0xff] %v14729_v6 }
 0x2f8   :  { %11428 = vmatmul.mubr.msk.f32.gmra.mxu0 %vm501_vm0, %v2690_v1  ;;  %v2694_v1 = vld [vmem:[#allocation2 + $0x2f2] sm:$0xff] }
 0x2f9   :  { %11430 = vmatprep.mubr.msk.f32.mxu0 %vm501_vm0, %v2691_v47  ;;  %v14734_v47 = vld [vmem:[#allocation2 + $0x228] sm:$0xff] }
 0x2fa   :  { %11300 = vmatmul.mubr.msk.f32.gmra.mxu1 %vm501_vm0, %v14719_v42  ;;  %20294 = vst [vmem:[#allocation8_spill] sm:$0xff] %v14734_v47  ;;  %v14739_v42 = vld [vmem:[#allocation2 + $0x230] sm:$0xff] }
 0x2fb   :  { %11302 = vmatprep.mubr.msk.f32.mxu1 %vm501_vm0, %v14724_v51  ;;  %v2695_v51 = vld [vmem:[#allocation2 + $0x302] sm:$0xff] }
 0x2fc   :  { %11431 = vmatmul.mubr.msk.f32.gmra.mxu0 %vm501_vm0, %v2692_v50  ;;  %v2696_v50 = vld [vmem:[#allocation2 + $0x30a] sm:$0xff] }
 0x2fd   :  { %11433 = vmatprep.mubr.msk.f32.mxu0 %vm501_vm0, %v2693_v63  ;;  %v14744_v63 = vld [vmem:[#allocation2 + $0x240] sm:$0xff] }
 0x2fe   :  { %11303 = vmatmul.mubr.msk.f32.gmra.mxu1 %vm501_vm0, %v14729_v6  ;;  %20295 = vst [vmem:[#allocation7_spill] sm:$0xff] %v14744_v63  ;;  %v14749_v6 = vld [vmem:[#allocation2 + $0x248] sm:$0xff] }
 0x2ff   :  { %11305 = vmatprep.mubr.msk.f32.mxu1 %vm501_vm0, %v14734_v47  ;;  %v2697_v47 = vld [vmem:[#allocation2 + $0x31a] sm:$0xff] }
 0x300   :  { %11434 = vmatmul.mubr.msk.f32.gmra.mxu0 %vm501_vm0, %v2694_v1  ;;  %v2698_v1 = vld [vmem:[#allocation2 + $0x322] sm:$0xff] }
 0x301   :  { %11436 = vmatprep.mubr.msk.f32.mxu0 %vm501_vm0, %v2695_v51  ;;  %v14754_v51 = vld [vmem:[#allocation2 + $0x258] sm:$0xff] }
 0x302   :  { %11306 = vmatmul.mubr.msk.f32.gmra.mxu1 %vm501_vm0, %v14739_v42 }
 0x303   :  { %11308 = vmatprep.mubr.msk.f32.mxu1 %vm501_vm0, %v14744_v63  ;;  %v14759_v63 = vld [vmem:[#allocation2 + $0x260] sm:$0xff] }
 0x304   :  { %11437 = vmatmul.mubr.msk.f32.gmra.mxu0 %vm501_vm0, %v2696_v50  ;;  %v5538_v50 = vld [vmem:[%s19996_s2 + $0xd0] sm:$0xff] }
 0x305   :  { %11439 = vmatprep.mubr.msk.f32.mxu0 %vm501_vm0, %v2697_v47  ;;  %v14765_v47 = vld [vmem:[#allocation2 + $0x270] sm:$0xff] }
 0x306   :  { %11309 = vmatmul.mubr.msk.f32.gmra.mxu1 %vm501_vm0, %v14749_v6  ;;  %20296 = vst [vmem:[#allocation10_spill] sm:$0xff] %v14765_v47 }
 0x307   :  { %11311 = vmatprep.mubr.msk.f32.mxu1 %vm501_vm0, %v14754_v51 }
 0x308   :  { %11440 = vmatmul.mubr.msk.f32.gmra.mxu0 %vm501_vm0, %v2698_v1  ;;  %v14774_v1 = vld [vmem:[#allocation2 + $0x278] sm:$0xff] }
 0x309   :  { %11554 = vmatprep.mubr.msk.f32.mxu0 %vm501_vm0, %v14281_v46  ;;  %v5537_v46 = vld [vmem:[%s19996_s2 + $0xc8] sm:$0xff] }
 0x30a   :  { %11312 = vmatmul.mubr.msk.f32.gmra.mxu1 %vm501_vm0, %v14759_v63 }
 0x30b   :  { %11314 = vmatprep.mubr.msk.f32.mxu1 %vm501_vm0, %v14765_v47  ;;  %v14784_v47 = vld [vmem:[#allocation2 + $0x288] sm:$0xff] }
 0x30c   :  { %11555 = vmatmul.mubr.msk.f32.vlgmr.msra.gmra.mxu0 %vm501_vm0, %v14283_v44  ;;  %v5536_v44 = vld [vmem:[%s19996_s2 + $0xc0] sm:$0xff] }
 0x30d   :  { %11557 = vmatprep.mubr.msk.f32.mxu0 %vm501_vm0, %v14305_v8  ;;  %11755 = vmatpush3.msra.mxu0 %v14551_v9  ;;  %v14793_v8 = vld [vmem:[#allocation2 + $0x290] sm:$0xff]  ;;  %v14799_v9 = vld [vmem:[#allocation2 + $0x2a0] sm:$0xff] }
 0x30e   :  { %11315 = vmatmul.mubr.msk.f32.gmra.mxu1 %vm501_vm0, %v14774_v1  ;;  %11756 = vmatprep.subr.mxu0 %v5538_v50 }
 0x30f   :  { %11317 = vmatprep.mubr.msk.f32.mxu1 %vm501_vm0, %v14784_v47  ;;  %11757 = vmatpush3.msra.mxu0 %v5538_v50  ;;  %v14807_v50 = vld [vmem:[#allocation2 + $0x2a8] sm:$0xff] }
 0x310   :  { %11558 = vmatmul.mubr.msk.f32.gmra.mxu0 %vm501_vm0, %v14333_v30  ;;  %11758 = vmatprep.subr.mxu0 %v5537_v46  ;;  %v14805_v30 = vpop.f32.mrf.mxu0 }
 0x311   :  { %11560 = vmatprep.mubr.msk.f32.mxu0 %vm501_vm0, %v14335_v39  ;;  %11759 = vmatpush3.msra.mxu0 %v5537_v46  ;;  %v14813_v39 = vld [vmem:[#allocation2 + $0x2b8] sm:$0xff] }
 0x312   :  { %11318 = vmatmul.mubr.msk.f32.gmra.mxu1 %vm501_vm0, %v14793_v8  ;;  %11760 = vmatprep.subr.mxu0 %v5536_v44  ;;  %20297 = vst [vmem:[#allocation9_spill] sm:$0xff] %v14813_v39  ;;  %v14819_v46 = vpop.f32.mrf.mxu0 }
 0x313   :  { %11320 = vmatprep.mubr.msk.f32.mxu1 %vm501_vm0, %v14799_v9  ;;  %11761 = vmatpush3.msra.mxu0 %v5536_v44 }
 0x314   :  { %11561 = vmatmul.mubr.msk.f32.gmra.mxu0 %vm501_vm0, %v14364_v37  ;;  %v14821_v37 = vld [vmem:[#allocation2 + $0x2c0] sm:$0xff] }
 0x315   :  { %11563 = vmatprep.mubr.msk.f32.mxu0 %vm501_vm0, %v14371_v7  ;;  %20298 = vst [vmem:[#allocation12_spill] sm:$0xff] %v14821_v37  ;;  %v14827_v7 = vld [vmem:[#allocation2 + $0x2d0] sm:$0xff] }
 0x316   :  { %11321 = vmatmul.mubr.msk.f32.gmra.mxu1 %vm501_vm0, %v14807_v50  ;;  %20299 = vst [vmem:[#allocation21_spill] sm:$0xff] %v14827_v7 }
 0x317   :  { %11323 = vmatprep.mubr.msk.f32.mxu1 %vm501_vm0, %v14813_v39 }
 0x318   :  { %11564 = vmatmul.mubr.msk.f32.gmra.mxu0 %vm501_vm0, %v14380_v41  ;;  %v14835_v41 = vld [vmem:[#allocation2 + $0x2d8] sm:$0xff] }
 0x319   :  { %11566 = vmatprep.mubr.msk.f32.mxu0 %vm501_vm0, %v14389_v5  ;;  %v14831_v44 = vpop.f32.mrf.mxu0  ;;  %20300 = vst [vmem:[#allocation11_spill] sm:$0xff] %v14835_v41  ;;  %v14841_v5 = vld [vmem:[#allocation2 + $0x2e8] sm:$0xff] }
 0x31a   :  { %11324 = vmatmul.mubr.msk.f32.gmra.mxu1 %vm501_vm0, %v14821_v37  ;;  %20301 = vst [vmem:[#allocation22_spill] sm:$0xff] %v14841_v5 }
 0x31b   :  { %11326 = vmatprep.mubr.msk.f32.mxu1 %vm501_vm0, %v14827_v7  ;;  %v14843_v37 = vpop.f32.mrf.mxu0 }
 0x31c   :  { %11567 = vmatmul.mubr.msk.f32.gmra.mxu0 %vm501_vm0, %v14396_v18  ;;  %v14851_v18 = vld [vmem:[#allocation2 + $0x2f0] sm:$0xff] }
 0x31d   :  { %11569 = vmatprep.mubr.msk.f32.mxu0 %vm501_vm0, %v14400_v23  ;;  %v14847_v7 = vpop.f32.mrf.mxu0  ;;  %20302 = vst [vmem:[#allocation23_spill] sm:$0xff] %v14851_v18 }
 0x31e   :  { %11327 = vmatmul.mubr.msk.f32.gmra.mxu1 %vm501_vm0, %v14835_v41  ;;  %v14859_v41 = vld [vmem:[#allocation2 + $0x300] sm:$0xff] }
 0x31f   :  { %11329 = vmatprep.mubr.msk.f32.mxu1 %vm501_vm0, %v14841_v5  ;;  %20304 = vst [vmem:[#allocation14_spill] sm:$0xff] %v14859_v41  ;;  %v14861_v39 = vpop.f32.mrf.mxu0 }
 0x320   :  { %11570 = vmatmul.mubr.msk.f32.gmra.mxu0 %vm501_vm0, %v14406_v26 }
 0x321   :  { %11572 = vmatprep.mubr.msk.f32.mxu0 %vm501_vm0, %v14410_v34  ;;  %v14867_v26 = vpop.f32.mrf.mxu0  ;;  %v14871_v34 = vld [vmem:[#allocation2 + $0x308] sm:$0xff] }
 0x322   :  { %v14855_v23 = vpop.f32.mrf.mxu1  ;;  %11330 = vmatmul.mubr.msk.f32.gmra.mxu1 %vm501_vm0, %v14851_v18  ;;  %20306 = vst [vmem:[#allocation26_spill] sm:$0xff] %v14871_v34  ;;  %v14879_v18 = vld [vmem:[#allocation2 + $0x318] sm:$0xff] }
 0x323   :  { %20303 = vst [vmem:[#allocation24_spill] sm:$0xff] %v14855_v23  ;;  %11332 = vmatprep.mubr.msk.f32.mxu1 %vm501_vm0, %v14859_v41  ;;  %20308 = vst [vmem:[#allocation17_spill] sm:$0xff] %v14879_v18  ;;  %v14881_v41 = vpop.f32.mrf.mxu0 }
 0x324   :  { %v14865_v5 = vpop.f32.mrf.mxu1  ;;  %11573 = vmatmul.mubr.msk.f32.gmra.mxu0 %vm501_vm0, %v14416_v38 }
 0x325   :  { %20305 = vst [vmem:[#allocation25_spill] sm:$0xff] %v14865_v5  ;;  %11575 = vmatprep.mubr.msk.f32.mxu0 %vm501_vm0, %v14420_v52  ;;  %v14887_v38 = vpop.f32.mrf.mxu0  ;;  %v14891_v52 = vld [vmem:[#allocation2 + $0x320] sm:$0xff] }
 0x326   :  { %v14875_v23 = vpop.f32.mrf.mxu1  ;;  %11333 = vmatmul.mubr.msk.f32.gmra.mxu1 %vm501_vm0, %v14871_v34  ;;  %20310 = vst [vmem:[#allocation28_spill] sm:$0xff] %v14891_v52 }
 0x327   :  { %20307 = vst [vmem:[#allocation16_spill] sm:$0xff] %v14875_v23  ;;  %11335 = vmatprep.mubr.msk.f32.mxu1 %vm501_vm0, %v14879_v18  ;;  %v14899_v34 = vpop.f32.mrf.mxu0 }
 0x328   :  { %v14885_v5 = vpop.f32.mrf.mxu1  ;;  %11576 = vmatmul.mubr.msk.f32.gmra.mxu0 %vm501_vm0, %v14426_v56  ;;  %v4828_v56 = vld [vmem:[%s19996_s2 + $0xb0] sm:$0xff] }
 0x329   :  { %20309 = vst [vmem:[#allocation13_spill] sm:$0xff] %v14885_v5  ;;  %11578 = vmatprep.mubr.msk.f32.mxu0 %vm501_vm0, %v14430_v0  ;;  %v14905_v18 = vpop.f32.mrf.mxu0 }
 0x32a   :  { %v14895_v23 = vpop.f32.mrf.mxu1  ;;  %11336 = vmatmul.mubr.msk.f32.gmra.mxu1 %vm501_vm0, %v14891_v52 }
 0x32b   :  { %20311 = vst [vmem:[#allocation30_spill] sm:$0xff] %v14895_v23  ;;  %11450 = vmatprep.mubr.msk.f32.mxu1 %vm501_vm0, %v14521_v61  ;;  %v14918_v61 = vpop.f32.mrf.mxu0 }
 0x32c   :  { %v14903_v5 = vpop.f32.mrf.mxu1  ;;  %11579 = vmatmul.mubr.msk.f32.gmra.mxu0 %vm501_vm0, %v14436_v4  ;;  %v4827_v4 = vld [vmem:[%s19996_s2 + $0xa8] sm:$0xff] }
 0x32d   :  { %20312 = vst [vmem:[#allocation31_spill] sm:$0xff] %v14903_v5  ;;  %11581 = vmatprep.mubr.msk.f32.mxu0 %vm501_vm0, %v14440_v12  ;;  %v14928_v5 = vpop.f32.mrf.mxu0 }
 0x32e   :  { %v14914_v0 = vpop.f32.mrf.mxu1  ;;  %11451 = vmatmul.mubr.msk.f32.vlgmr.msra.gmra.mxu1 %vm501_vm0, %v14530_v33  ;;  %v4826_v33 = vld [vmem:[%s19996_s2 + $0xa0] sm:$0xff] }
 0x32f   :  { %20313 = vst [vmem:[#allocation32_spill] sm:$0xff] %v14914_v0  ;;  %11651 = vmatpush3.msra.mxu1 %v14545_v3  ;;  %11453 = vmatprep.mubr.msk.f32.mxu1 %vm501_vm0, %v14538_v24  ;;  %v14941_v3 = vpop.f32.mrf.mxu0  ;;  %v20351_v0 = vld [vmem:[#allocation19_spill] sm:$0xff] }
 0x330   :  { %v14926_v12 = vpop.f32.mrf.mxu1  ;;  %11582 = vmatmul.mubr.msk.f32.gmra.mxu0 %vm501_vm0, %v14446_v25  ;;  %11652 = vmatprep.subr.mxu1 %v4828_v56  ;;  %v14948_v25 = vld [vmem:[%s19996_s2 + $0xf8] sm:$0xff] }
 0x331   :  { %20314 = vst [vmem:[#allocation33_spill] sm:$0xff] %v14926_v12  ;;  %11584 = vmatprep.mubr.msk.f32.mxu0 %vm501_vm0, %v14450_v54  ;;  %11653 = vmatpush3.msra.mxu1 %v4828_v56  ;;  %20316 = vst [vmem:[#allocation35_spill] sm:$0xff] %v14948_v25  ;;  %v14952_v56 = vpop.f32.mrf.mxu0 }
 0x332   :  { %v14937_v24 = vpop.f32.mrf.mxu1  ;;  %11454 = vmatmul.mubr.msk.f32.gmra.mxu1 %vm501_vm0, %v14553_v29  ;;  %11654 = vmatprep.subr.mxu1 %v4827_v4  ;;  %v14959_v29 = vld [vmem:[%s19996_s2 + $0x118] sm:$0xff] }
 0x333   :  { %20315 = vst [vmem:[#allocation34_spill] sm:$0xff] %v14937_v24  ;;  %11456 = vmatprep.mubr.msk.f32.mxu1 %vm501_vm0, %v14558_v13  ;;  %11655 = vmatpush3.msra.mxu1 %v4827_v4  ;;  %v14967_v4 = vpop.f32.mrf.mxu0 }
 0x334   :  { %v14950_v54 = vpop.f32.mrf.mxu1  ;;  %11585 = vmatmul.mubr.msk.f32.gmra.mxu0 %vm501_vm0, %v14456_v45  ;;  %11656 = vmatprep.subr.mxu1 %v4826_v33 }
 0x335   :  { %20317 = vst [vmem:[#allocation36_spill] sm:$0xff] %v14950_v54  ;;  %11587 = vmatprep.mubr.msk.f32.mxu0 %vm501_vm0, %v14460_v20  ;;  %11657 = vmatpush3.msra.mxu1 %v4826_v33  ;;  %v14975_v54 = vpop.f32.mrf.mxu0  ;;  %v4077_v20 = vld [vmem:[#allocation2 + $0x139] sm:$0xff] }
 0x336   :  { %v14963_v13 = vpop.f32.mrf.mxu1  ;;  %11457 = vmatmul.mubr.msk.f32.gmra.mxu1 %vm501_vm0, %v14565_v53  ;;  %11858 = vmatprep.subr.mxu1 %v14948_v25 }
 0x337   :  { %20318 = vst [vmem:[#allocation37_spill] sm:$0xff] %v14963_v13  ;;  %11459 = vmatprep.mubr.msk.f32.mxu1 %vm501_vm0, %v14570_v60  ;;  %11962 = vmatprep.subr.mxu0 %v14959_v29  ;;  %v14984_v33 = vpop.f32.mrf.mxu0  ;;  %v4078_v60 = vld [vmem:[#allocation2 + $0x141] sm:$0xff] }
 0x338   :  { %v14973_v45 = vpop.f32.mrf.mxu1  ;;  %11588 = vmatmul.mubr.msk.f32.gmra.mxu0 %vm501_vm0, %v14466_v2  ;;  %v4079_v2 = vld [vmem:[#allocation2 + $0x151] sm:$0xff] }
 0x339   :  { %20319 = vst [vmem:[#allocation38_spill] sm:$0xff] %v14973_v45  ;;  %11590 = vmatprep.mubr.msk.f32.mxu0 %vm501_vm0, %v4077_v20  ;;  %v14990_v13 = vpop.f32.mrf.mxu0 }
 0x33a   :  { %v14980_v53 = vpop.f32.mrf.mxu1  ;;  %11460 = vmatmul.mubr.msk.f32.gmra.mxu1 %vm501_vm0, %v14575_v11 }
 0x33b   :  { %20320 = vst [vmem:[#allocation39_spill] sm:$0xff] %v14980_v53  ;;  %11462 = vmatprep.mubr.msk.f32.mxu1 %vm501_vm0, %v14580_v49  ;;  %v14998_v11 = vpop.f32.mrf.mxu0  ;;  %v4080_v49 = vld [vmem:[#allocation2 + $0x159] sm:$0xff] }
 0x33c   :  { %v14988_v45 = vpop.f32.mrf.mxu1  ;;  %11591 = vmatmul.mubr.msk.f32.gmra.mxu0 %vm501_vm0, %v4078_v60  ;;  %v4081_v60 = vld [vmem:[#allocation2 + $0x169] sm:$0xff] }
 0x33d   :  { %20321 = vst [vmem:[#allocation40_spill] sm:$0xff] %v14988_v45  ;;  %11593 = vmatprep.mubr.msk.f32.mxu0 %vm501_vm0, %v4079_v2  ;;  %v15004_v45 = vpop.f32.mrf.mxu0 }
 0x33e   :  { %v14994_v20 = vpop.f32.mrf.mxu1  ;;  %11463 = vmatmul.mubr.msk.f32.gmra.mxu1 %vm501_vm0, %v14585_v43 }
 0x33f   :  { %20322 = vst [vmem:[#allocation41_spill] sm:$0xff] %v14994_v20  ;;  %11465 = vmatprep.mubr.msk.f32.mxu1 %vm501_vm0, %v14590_v32  ;;  %v15012_v43 = vpop.f32.mrf.mxu0  ;;  %v4082_v32 = vld [vmem:[#allocation2 + $0x171] sm:$0xff] }
 0x340   :  { %v15002_v53 = vpop.f32.mrf.mxu1  ;;  %11594 = vmatmul.mubr.msk.f32.gmra.mxu0 %vm501_vm0, %v4080_v49  ;;  %v4083_v49 = vld [vmem:[#allocation2 + $0x181] sm:$0xff] }
 0x341   :  { %20323 = vst [vmem:[#allocation42_spill] sm:$0xff] %v15002_v53  ;;  %11596 = vmatprep.mubr.msk.f32.mxu0 %vm501_vm0, %v4081_v60  ;;  %v15018_v53 = vpop.f32.mrf.mxu0 }
 0x342   :  { %v15008_v2 = vpop.f32.mrf.mxu1  ;;  %11466 = vmatmul.mubr.msk.f32.gmra.mxu1 %vm501_vm0, %v14595_v58 }
 0x343   :  { %20324 = vst [vmem:[#allocation43_spill] sm:$0xff] %v15008_v2  ;;  %11468 = vmatprep.mubr.msk.f32.mxu1 %vm501_vm0, %v14600_v62  ;;  %v15026_v58 = vpop.f32.mrf.mxu0  ;;  %v4084_v62 = vld [vmem:[#allocation2 + $0x189] sm:$0xff] }
 0x344   :  { %v15016_v20 = vpop.f32.mrf.mxu1  ;;  %11597 = vmatmul.mubr.msk.f32.gmra.mxu0 %vm501_vm0, %v4082_v32  ;;  %v4085_v32 = vld [vmem:[#allocation2 + $0x1c9] sm:$0xff] }
 0x345   :  { %20325 = vst [vmem:[#allocation44_spill] sm:$0xff] %v15016_v20  ;;  %11599 = vmatprep.mubr.msk.f32.mxu0 %vm501_vm0, %v4083_v49  ;;  %v15032_v20 = vpop.f32.mrf.mxu0 }
 0x346   :  { %v15022_v60 = vpop.f32.mrf.mxu1  ;;  %11469 = vmatmul.mubr.msk.f32.gmra.mxu1 %vm501_vm0, %v14605_v21  ;;  %20328 = vst [vmem:[#allocation47_spill] sm:$0xff] %v15032_v20 }
 0x347   :  { %20326 = vst [vmem:[#allocation45_spill] sm:$0xff] %v15022_v60  ;;  %11471 = vmatprep.mubr.msk.f32.mxu1 %vm501_vm0, %v14610_v55  ;;  %v15040_v21 = vpop.f32.mrf.mxu0  ;;  %v4086_v55 = vld [vmem:[#allocation2 + $0x1d1] sm:$0xff] }
 0x348   :  { %v15030_v2 = vpop.f32.mrf.mxu1  ;;  %11600 = vmatmul.mubr.msk.f32.gmra.mxu0 %vm501_vm0, %v4084_v62  ;;  %20330 = vst [vmem:[#allocation49_spill] sm:$0xff] %v15040_v21  ;;  %v4087_v62 = vld [vmem:[#allocation2 + $0x1e1] sm:$0xff]  ;;  %v20352_v21 = vld [vmem:[#allocation20_spill] sm:$0xff] }
 0x349   :  { %20327 = vst [vmem:[#allocation46_spill] sm:$0xff] %v15030_v2  ;;  %11602 = vmatprep.mubr.msk.f32.mxu0 %vm501_vm0, %v4085_v32  ;;  %v15046_v2 = vpop.f32.mrf.mxu0 }
 0x34a   :  { %v15036_v49 = vpop.f32.mrf.mxu1  ;;  %11472 = vmatmul.mubr.msk.f32.gmra.mxu1 %vm501_vm0, %v14615_v57 }
 0x34b   :  { %20329 = vst [vmem:[#allocation48_spill] sm:$0xff] %v15036_v49  ;;  %11474 = vmatprep.mubr.msk.f32.mxu1 %vm501_vm0, %v14620_v27  ;;  %v15054_v57 = vpop.f32.mrf.mxu0  ;;  %v4088_v27 = vld [vmem:[#allocation2 + $0x1e9] sm:$0xff] }
 0x34c   :  { %v15044_v60 = vpop.f32.mrf.mxu1  ;;  %11603 = vmatmul.mubr.msk.f32.gmra.mxu0 %vm501_vm0, %v4086_v55  ;;  %v4089_v55 = vld [vmem:[#allocation2 + $0x1f9] sm:$0xff] }
 0x34d   :  { %20331 = vst [vmem:[#allocation50_spill] sm:$0xff] %v15044_v60  ;;  %11605 = vmatprep.mubr.msk.f32.mxu0 %vm501_vm0, %v4087_v62 }
 0x34e   :  { %v15050_v32 = vpop.f32.mrf.mxu1  ;;  %11475 = vmatmul.mubr.msk.f32.gmra.mxu1 %vm501_vm0, %v14625_v17  ;;  %v15060_v60 = vpop.f32.mrf.mxu0 }
 0x34f   :  { %20332 = vst [vmem:[#allocation51_spill] sm:$0xff] %v15050_v32  ;;  %11477 = vmatprep.mubr.msk.f32.mxu1 %vm501_vm0, %v14630_v15  ;;  %v4090_v15 = vld [vmem:[#allocation2 + $0x201] sm:$0xff] }
 0x350   :  { %v15058_v49 = vpop.f32.mrf.mxu1  ;;  %11606 = vmatmul.mubr.msk.f32.gmra.mxu0 %vm501_vm0, %v4088_v27  ;;  %v15068_v17 = vpop.f32.mrf.mxu0  ;;  %v4091_v27 = vld [vmem:[#allocation2 + $0x211] sm:$0xff] }
 0x351   :  { %20333 = vst [vmem:[#allocation52_spill] sm:$0xff] %v15058_v49  ;;  %11608 = vmatprep.mubr.msk.f32.mxu0 %vm501_vm0, %v4089_v55 }
 0x352   :  { %v15064_v62 = vpop.f32.mrf.mxu1  ;;  %11478 = vmatmul.mubr.msk.f32.gmra.mxu1 %vm501_vm0, %v14635_v28  ;;  %v15074_v49 = vpop.f32.mrf.mxu0 }
 0x353   :  { %20334 = vst [vmem:[#allocation53_spill] sm:$0xff] %v15064_v62  ;;  %11480 = vmatprep.mubr.msk.f32.mxu1 %vm501_vm0, %v14640_v48  ;;  %v4092_v48 = vld [vmem:[#allocation2 + $0x219] sm:$0xff] }
 0x354   :  { %v15072_v32 = vpop.f32.mrf.mxu1  ;;  %11609 = vmatmul.mubr.msk.f32.gmra.mxu0 %vm501_vm0, %v4090_v15  ;;  %v15082_v28 = vpop.f32.mrf.mxu0  ;;  %v4093_v15 = vld [vmem:[#allocation2 + $0x229] sm:$0xff] }
 0x355   :  { %20335 = vst [vmem:[#allocation54_spill] sm:$0xff] %v15072_v32  ;;  %11611 = vmatprep.mubr.msk.f32.mxu0 %vm501_vm0, %v4091_v27 }
 0x356   :  { %v15078_v55 = vpop.f32.mrf.mxu1  ;;  %11481 = vmatmul.mubr.msk.f32.gmra.mxu1 %vm501_vm0, %v14645_v19  ;;  %v15088_v32 = vpop.f32.mrf.mxu0 }
 0x357   :  { %20336 = vst [vmem:[#allocation55_spill] sm:$0xff] %v15078_v55  ;;  %11483 = vmatprep.mubr.msk.f32.mxu1 %vm501_vm0, %v14650_v14  ;;  %v4094_v14 = vld [vmem:[#allocation2 + $0x231] sm:$0xff] }
 0x358   :  { %v15086_v62 = vpop.f32.mrf.mxu1  ;;  %11612 = vmatmul.mubr.msk.f32.gmra.mxu0 %vm501_vm0, %v4092_v48  ;;  %v15096_v19 = vpop.f32.mrf.mxu0  ;;  %v4095_v48 = vld [vmem:[#allocation2 + $0x241] sm:$0xff] }
 0x359   :  { %20337 = vst [vmem:[#allocation56_spill] sm:$0xff] %v15086_v62  ;;  %11614 = vmatprep.mubr.msk.f32.mxu0 %vm501_vm0, %v4093_v15 }
 0x35a   :  { %v15092_v27 = vpop.f32.mrf.mxu1  ;;  %11484 = vmatmul.mubr.msk.f32.gmra.mxu1 %vm501_vm0, %v14655_v31  ;;  %v15102_v62 = vpop.f32.mrf.mxu0 }
 0x35b   :  { %20338 = vst [vmem:[#allocation57_spill] sm:$0xff] %v15092_v27  ;;  %11486 = vmatprep.mubr.msk.f32.mxu1 %vm501_vm0, %v14660_v40  ;;  %v4096_v40 = vld [vmem:[#allocation2 + $0x249] sm:$0xff] }
 0x35c   :  { %v15100_v55 = vpop.f32.mrf.mxu1  ;;  %11615 = vmatmul.mubr.msk.f32.gmra.mxu0 %vm501_vm0, %v4094_v14  ;;  %v15110_v31 = vpop.f32.mrf.mxu0  ;;  %v4097_v14 = vld [vmem:[#allocation2 + $0x259] sm:$0xff] }
 0x35d   :  { %20339 = vst [vmem:[#allocation58_spill] sm:$0xff] %v15100_v55  ;;  %11617 = vmatprep.mubr.msk.f32.mxu0 %vm501_vm0, %v4095_v48 }
 0x35e   :  { %v15106_v15 = vpop.f32.mrf.mxu1  ;;  %11487 = vmatmul.mubr.msk.f32.gmra.mxu1 %vm501_vm0, %v14665_v10  ;;  %v15116_v55 = vpop.f32.mrf.mxu0 }
 0x35f   :  { %20340 = vst [vmem:[#allocation59_spill] sm:$0xff] %v15106_v15  ;;  %11489 = vmatprep.mubr.msk.f32.mxu1 %vm501_vm0, %v14670_v36  ;;  %v4098_v36 = vld [vmem:[#allocation2 + $0x261] sm:$0xff] }
 0x360   :  { %v15114_v27 = vpop.f32.mrf.mxu1  ;;  %11618 = vmatmul.mubr.msk.f32.gmra.mxu0 %vm501_vm0, %v4096_v40  ;;  %v15124_v10 = vpop.f32.mrf.mxu0  ;;  %v4099_v40 = vld [vmem:[#allocation2 + $0x271] sm:$0xff] }
 0x361   :  { %20341 = vst [vmem:[#allocation60_spill] sm:$0xff] %v15114_v27  ;;  %11620 = vmatprep.mubr.msk.f32.mxu0 %vm501_vm0, %v4097_v14 }
 0x362   :  { %v15120_v48 = vpop.f32.mrf.mxu1  ;;  %11490 = vmatmul.mubr.msk.f32.gmra.mxu1 %vm501_vm0, %v14675_v35  ;;  %v15130_v27 = vpop.f32.mrf.mxu0  ;;  %v15138_v35 = vld [vmem:[#allocation2 + $0x180] sm:$0xff] }
 0x363   :  { %20342 = vst [vmem:[#allocation61_spill] sm:$0xff] %v15120_v48  ;;  %11492 = vmatprep.mubr.msk.f32.mxu1 %vm501_vm0, %v14680_v16  ;;  %20345 = vst [vmem:[#allocation64_spill] sm:$0xff] %v15138_v35  ;;  %v4100_v16 = vld [vmem:[#allocation2 + $0x279] sm:$0xff] }
 0x364   :  { %v15128_v15 = vpop.f32.mrf.mxu1  ;;  %11621 = vmatmul.mubr.msk.f32.gmra.mxu0 %vm501_vm0, %v4098_v36  ;;  %v15140_v48 = vpop.f32.mrf.mxu0  ;;  %v4101_v36 = vld [vmem:[#allocation2 + $0x289] sm:$0xff] }
 0x365   :  { %20343 = vst [vmem:[#allocation62_spill] sm:$0xff] %v15128_v15  ;;  %11623 = vmatprep.mubr.msk.f32.mxu0 %vm501_vm0, %v4099_v40  ;;  %v15149_v40 = vld [vmem:[#allocation2 + $0x188] sm:$0xff] }
 0x366   :  { %v15134_v14 = vpop.f32.mrf.mxu1  ;;  %11493 = vmatmul.mubr.msk.f32.gmra.mxu1 %vm501_vm0, %v14685_v22  ;;  %v15146_v24 = vpop.f32.mrf.mxu0  ;;  %20347 = vst [vmem:[#allocation66_spill] sm:$0xff] %v15149_v40 }
 0x367   :  { %20344 = vst [vmem:[#allocation63_spill] sm:$0xff] %v15134_v14  ;;  %11495 = vmatprep.mubr.msk.f32.mxu1 %vm501_vm0, %v15138_v35 }
 0x368   :  { %v15144_v15 = vpop.f32.mrf.mxu1  ;;  %11624 = vmatmul.mubr.msk.f32.gmra.mxu0 %vm501_vm0, %v4100_v16  ;;  %v15156_v14 = vpop.f32.mrf.mxu0  ;;  %v4103_v16 = vld [vmem:[#allocation2 + $0x2a1] sm:$0xff] }
 0x369   :  { %20346 = vst [vmem:[#allocation65_spill] sm:$0xff] %v15144_v15  ;;  %11626 = vmatprep.mubr.msk.f32.mxu0 %vm501_vm0, %v4101_v36  ;;  %v4102_v15 = vld [vmem:[#allocation2 + $0x291] sm:$0xff] }
 0x36a   :  { %v15152_v22 = vpop.f32.mrf.mxu1  ;;  %11496 = vmatmul.mubr.msk.f32.gmra.mxu1 %vm501_vm0, %v15149_v40  ;;  %v15162_v12 = vpop.f32.mrf.mxu0 }
 0x36b   :  { %20348 = vst [vmem:[#allocation67_spill] sm:$0xff] %v15152_v22  ;;  %11498 = vmatprep.mubr.msk.f32.mxu1 %vm501_vm0, %v14694_v59  ;;  %v20350_v22 = vld [vmem:[#allocation18_spill] sm:$0xff]  ;;  %v4104_v59 = vld [vmem:[#allocation2 + $0x2a9] sm:$0xff] }
 0x36c   :  { %v15160_v35 = vpop.f32.mrf.mxu1  ;;  %11627 = vmatmul.mubr.msk.f32.gmra.mxu0 %vm501_vm0, %v4102_v15  ;;  %v15168_v40 = vpop.f32.mrf.mxu0  ;;  %v4105_v15 = vld [vmem:[#allocation2 + $0x2b9] sm:$0xff] }
 0x36d   :  { %20349 = vst [vmem:[#allocation68_spill] sm:$0xff] %v15160_v35  ;;  %11629 = vmatprep.mubr.msk.f32.mxu0 %vm501_vm0, %v4103_v16 }
 0x36e   :  { %v11244_v36 = vpop.f32.mrf.mxu1  ;;  %11499 = vmatmul.mubr.msk.f32.gmra.mxu1 %vm501_vm0, %v20350_v22  ;;  %v15173_v23 = vpop.f32.mrf.mxu0 }
 0x36f   :  { %v2322_v25 = vadd.f32 %v11244_v36, %v14805_v30  ;;  %11501 = vmatprep.mubr.msk.f32.mxu1 %vm501_vm0, %v20351_v0  ;;  %v20353_v36 = vld [vmem:[#allocation27_spill] sm:$0xff] }
 0x370   :  { %v2316_v35 = vpop.f32.mrf.mxu1  ;;  %11630 = vmatmul.mubr.msk.f32.gmra.mxu0 %vm501_vm0, %v4104_v59  ;;  %v15183_v30 = vpop.f32.mrf.mxu0  ;;  %v4106_v59 = vld [vmem:[#allocation2 + $0x2c1] sm:$0xff] }
 0x371   :  { %v2317_v16 = vadd.f32 %v2316_v35, %v14819_v46  ;;  %11632 = vmatprep.mubr.msk.f32.mxu0 %vm501_vm0, %v4105_v15  ;;  %v15179_v22 = vadd.f32 %v15046_v2, %v2322_v25  ;;  %v4107_v25 = vld [vmem:[#allocation2 + $0x2d1] sm:$0xff] }
 0x372   :  { %v11247_v52 = vpop.f32.mrf.mxu1  ;;  %11502 = vmatmul.mubr.msk.f32.gmra.mxu1 %vm501_vm0, %v20352_v21 }
 0x373   :  { %v2332_v0 = vadd.f32 %v11247_v52, %v14831_v44  ;;  %11504 = vmatprep.mubr.msk.f32.mxu1 %vm501_vm0, %v20353_v36  ;;  %v15189_v20 = vadd.f32 %v15054_v57, %v2317_v16  ;;  %v20354_v52 = vld [vmem:[#allocation29_spill] sm:$0xff]  ;;  %v20355_v16 = vld [vmem:[#allocation15_spill] sm:$0xff] }
 0x374   :  { %v2326_v46 = vpop.f32.mrf.mxu1  ;;  %v15191_v35 = vpop.f32.mrf.mxu0  ;;  %11633 = vmatmul.mubr.msk.f32.gmra.mxu0 %vm501_vm0, %v4106_v59  ;;  %v4108_v36 = vld [vmem:[#allocation2 + $0x2d9] sm:$0xff] }
 0x375   :  { %v2327_v2 = vadd.f32 %v2326_v46, %v14843_v37  ;;  %11635 = vmatprep.mubr.msk.f32.mxu0 %vm501_vm0, %v4107_v25  ;;  %v15197_v21 = vadd.f32 %v15060_v60, %v2332_v0  ;;  %v4109_v60 = vld [vmem:[#allocation2 + $0x2e9] sm:$0xff] }
 0x376   :  { %v11250_v44 = vpop.f32.mrf.mxu1  ;;  %11505 = vmatmul.mubr.msk.f32.gmra.mxu1 %vm501_vm0, %v20354_v52  ;;  %v15201_v15 = vpop.f32.mrf.mxu0 }
 0x377   :  { %v2342_v57 = vadd.f32 %v11250_v44, %v14847_v7  ;;  %11507 = vmatprep.mubr.msk.f32.mxu1 %vm501_vm0, %v20355_v16  ;;  %v15207_v59 = vadd.f32 %v15068_v17, %v2327_v2  ;;  %v20356_v44 = vld [vmem:[#allocation6_spill] sm:$0xff]  ;;  %v20357_v2 = vld [vmem:[#allocation8_spill] sm:$0xff] }
 0x378   :  { %v2336_v37 = vpop.f32.mrf.mxu1  ;;  %v15209_v46 = vpop.f32.mrf.mxu0  ;;  %11636 = vmatmul.mubr.msk.f32.gmra.mxu0 %vm501_vm0, %v4108_v36  ;;  %v4110_v16 = vld [vmem:[#allocation2 + $0x2f1] sm:$0xff] }
 0x379   :  { %v2337_v0 = vadd.f32 %v2336_v37, %v14861_v39  ;;  %11638 = vmatprep.mubr.msk.f32.mxu0 %vm501_vm0, %v4109_v60  ;;  %v15215_v25 = vadd.f32 %v15074_v49, %v2342_v57  ;;  %v4111_v49 = vld [vmem:[#allocation2 + $0x301] sm:$0xff] }
 0x37a   :  { %v11253_v7 = vpop.f32.mrf.mxu1  ;;  %11508 = vmatmul.mubr.msk.f32.gmra.mxu1 %vm501_vm0, %v20356_v44  ;;  %v15219_v52 = vpop.f32.mrf.mxu0  ;;  %v4112_v44 = vld [vmem:[#allocation2 + $0x309] sm:$0xff] }
 0x37b   :  { %v2352_v17 = vadd.f32 %v11253_v7, %v14867_v26  ;;  %11510 = vmatprep.mubr.msk.f32.mxu1 %vm501_vm0, %v20357_v2  ;;  %v15225_v36 = vadd.f32 %v15082_v28, %v2337_v0  ;;  %v20358_v0 = vld [vmem:[#allocation7_spill] sm:$0xff] }
 0x37c   :  { %v2346_v39 = vpop.f32.mrf.mxu1  ;;  %v15227_v37 = vpop.f32.mrf.mxu0  ;;  %11639 = vmatmul.mubr.msk.f32.gmra.mxu0 %vm501_vm0, %v4110_v16 }
 0x37d   :  { %v2347_v57 = vadd.f32 %v2346_v39, %v14881_v41  ;;  %11641 = vmatprep.mubr.msk.f32.mxu0 %vm501_vm0, %v4111_v49  ;;  %v15233_v60 = vadd.f32 %v15088_v32, %v2352_v17  ;;  %v4113_v32 = vld [vmem:[#allocation2 + $0x319] sm:$0xff]  ;;  %v4114_v49 = vld [vmem:[#allocation2 + $0x321] sm:$0xff] }
 0x37e   :  { %v11256_v26 = vpop.f32.mrf.mxu1  ;;  %11511 = vmatmul.mubr.msk.f32.gmra.mxu1 %vm501_vm0, %v14739_v42  ;;  %v15237_v7 = vpop.f32.mrf.mxu0 }
 0x37f   :  { %v2362_v28 = vadd.f32 %v11256_v26, %v14887_v38  ;;  %11513 = vmatprep.mubr.msk.f32.mxu1 %vm501_vm0, %v20358_v0  ;;  %v15243_v2 = vadd.f32 %v15096_v19, %v2347_v57  ;;  %v20359_v0 = vld [vmem:[#allocation10_spill] sm:$0xff] }
 0x380   :  { %v2356_v41 = vpop.f32.mrf.mxu1  ;;  %v15245_v16 = vpop.f32.mrf.mxu0  ;;  %11642 = vmatmul.mubr.msk.f32.gmra.mxu0 %vm501_vm0, %v4112_v44  ;;  %v4116_v44 = vld [vmem:[#allocation2 + $0x339] sm:$0xff] }
 0x381   :  { %v2357_v17 = vadd.f32 %v2356_v41, %v14899_v34  ;;  %11644 = vmatprep.mubr.msk.f32.mxu0 %vm501_vm0, %v4113_v32  ;;  %v15251_v42 = vadd.f32 %v15102_v62, %v2362_v28  ;;  %v4115_v62 = vld [vmem:[#allocation2 + $0x331] sm:$0xff] }
 0x382   :  { %v11259_v38 = vpop.f32.mrf.mxu1  ;;  %11514 = vmatmul.mubr.msk.f32.gmra.mxu1 %vm501_vm0, %v14749_v6  ;;  %v15255_v39 = vpop.f32.mrf.mxu0 }
 0x383   :  { %v2372_v19 = vadd.f32 %v11259_v38, %v14905_v18  ;;  %11516 = vmatprep.mubr.msk.f32.mxu1 %vm501_vm0, %v14754_v51  ;;  %v15261_v57 = vadd.f32 %v15110_v31, %v2357_v17 }
 0x384   :  { %v2366_v34 = vpop.f32.mrf.mxu1  ;;  %v15263_v26 = vpop.f32.mrf.mxu0  ;;  %11645 = vmatmul.mubr.msk.f32.gmra.mxu0 %vm501_vm0, %v4114_v49 }
 0x385   :  { %v2367_v28 = vadd.f32 %v2366_v34, %v14918_v61  ;;  %11647 = vmatprep.mubr.msk.f32.mxu0 %vm501_vm0, %v4115_v62  ;;  %v15269_v6 = vadd.f32 %v15116_v55, %v2372_v19  ;;  %v5472_v55 = vld [vmem:[#allocation2 + $0x30] sm:$0xff]  ;;  %v5473_v19 = vld [vmem:[#allocation2 + $0x38] sm:$0xff] }
 0x386   :  { %v11262_v18 = vpop.f32.mrf.mxu1  ;;  %11517 = vmatmul.mubr.msk.f32.gmra.mxu1 %vm501_vm0, %v14759_v63  ;;  %v15273_v51 = vpop.f32.mrf.mxu0 }
 0x387   :  { %v2382_v31 = vadd.f32 %v11262_v18, %v14928_v5  ;;  %11519 = vmatprep.mubr.msk.f32.mxu1 %vm501_vm0, %v20359_v0  ;;  %v15279_v41 = vadd.f32 %v15124_v10, %v2367_v28 }
 0x388   :  { %v2376_v61 = vpop.f32.mrf.mxu1  ;;  %v15281_v32 = vpop.f32.mrf.mxu0  ;;  %11648 = vmatmul.mubr.msk.f32.gmra.mxu0 %vm501_vm0, %v4116_v44 }
 0x389   :  { %v2377_v17 = vadd.f32 %v2376_v61, %v14941_v3  ;;  %11762 = vmatprep.mubr.msk.f32.mxu0 %vm501_vm0, %v5472_v55  ;;  %v15287_v63 = vadd.f32 %v15130_v27, %v2382_v31  ;;  %v6956_v3 = vld [vmem:[%s19996_s2 + $0x110] sm:$0xff]  ;;  %v20360_v55 = vld [vmem:[#allocation9_spill] sm:$0xff] }
 0x38a   :  { %v11265_v5 = vpop.f32.mrf.mxu1  ;;  %11520 = vmatmul.mubr.msk.f32.gmra.mxu1 %vm501_vm0, %v14774_v1  ;;  %v15291_v38 = vpop.f32.mrf.mxu0  ;;  %v5474_v1 = vld [vmem:[#allocation2 + $0x48] sm:$0xff] }
 0x38b   :  { %v2392_v10 = vadd.f32 %v11265_v5, %v14952_v56  ;;  %11522 = vmatprep.mubr.msk.f32.mxu1 %vm501_vm0, %v14784_v47  ;;  %v15300_v49 = vadd.f32 %v15140_v48, %v2377_v17  ;;  %v6955_v47 = vld [vmem:[%s19996_s2 + $0x108] sm:$0xff] }
 0x38c   :  { %v2386_v27 = vpop.f32.mrf.mxu1  ;;  %v15302_v34 = vpop.f32.mrf.mxu0  ;;  %11763 = vmatmul.mubr.msk.f32.vlgmr.msra.gmra.mxu0 %vm501_vm0, %v5473_v19  ;;  %v5477_v17 = vld [vmem:[#allocation2 + $0x68] sm:$0xff] }
 0x38d   :  { %v2387_v62 = vadd.f32 %v2386_v27, %v14967_v4  ;;  %11765 = vmatprep.mubr.msk.f32.mxu0 %vm501_vm0, %v5474_v1  ;;  %11963 = vmatpush3.msra.mxu0 %v14959_v29  ;;  %v15312_v56 = vadd.f32 %v15146_v24, %v2392_v10  ;;  %v5475_v29 = vld [vmem:[#allocation2 + $0x50] sm:$0xff]  ;;  %v6954_v24 = vld [vmem:[%s19996_s2 + $0x100] sm:$0xff]  ;;  %v5478_v10 = vld [vmem:[#allocation2 + $0x78] sm:$0xff] }
 0x38e   :  { %v11268_v48 = vpop.f32.mrf.mxu1  ;;  %11523 = vmatmul.mubr.msk.f32.gmra.mxu1 %vm501_vm0, %v14793_v8  ;;  %v15316_v28 = vpop.f32.mrf.mxu0  ;;  %11964 = vmatprep.subr.mxu0 %v6956_v3  ;;  %v5476_v8 = vld [vmem:[#allocation2 + $0x60] sm:$0xff]  ;;  %v20362_v1 = vld [vmem:[#allocation21_spill] sm:$0xff] }
 0x38f   :  { %v2402_v4 = vadd.f32 %v11268_v48, %v14975_v54  ;;  %11525 = vmatprep.mubr.msk.f32.mxu1 %vm501_vm0, %v14799_v9  ;;  %11965 = vmatpush3.msra.mxu0 %v6956_v3  ;;  %v15322_v18 = vadd.f32 %v15156_v14, %v2387_v62  ;;  %v20361_v3 = vld [vmem:[#allocation12_spill] sm:$0xff]  ;;  %v5479_v62 = vld [vmem:[#allocation2 + $0x80] sm:$0xff] }
 0x390   :  { %v2396_v31 = vpop.f32.mrf.mxu1  ;;  %v15327_v0 = vpop.f32.mrf.mxu0  ;;  %11766 = vmatmul.mubr.msk.f32.gmra.mxu0 %vm501_vm0, %v5475_v29  ;;  %11966 = vmatprep.subr.mxu0 %v6955_v47 }
 0x391   :  { %v2397_v54 = vadd.f32 %v2396_v31, %v14984_v33  ;;  %11768 = vmatprep.mubr.msk.f32.mxu0 %vm501_vm0, %v5476_v8  ;;  %11967 = vmatpush3.msra.mxu0 %v6955_v47  ;;  %v15333_v9 = vadd.f32 %v15162_v12, %v2402_v4  ;;  %v20364_v8 = vld [vmem:[#allocation22_spill] sm:$0xff] }
 0x392   :  { %v11271_v14 = vpop.f32.mrf.mxu1  ;;  %11526 = vmatmul.mubr.msk.f32.gmra.mxu1 %vm501_vm0, %v14807_v50  ;;  %v15337_v44 = vpop.f32.mrf.mxu0  ;;  %11968 = vmatprep.subr.mxu0 %v6954_v24 }
 0x393   :  { %v2412_v61 = vadd.f32 %v11271_v14, %v14990_v13  ;;  %11528 = vmatprep.mubr.msk.f32.mxu1 %vm501_vm0, %v20360_v55  ;;  %v15343_v33 = vadd.f32 %v15168_v40, %v2397_v54  ;;  %11969 = vmatpush3.msra.mxu0 %v6954_v24  ;;  %v20363_v24 = vld [vmem:[#allocation11_spill] sm:$0xff]  ;;  %v5481_v54 = vld [vmem:[#allocation2 + $0x98] sm:$0xff] }
 0x394   :  { %v2406_v5 = vpop.f32.mrf.mxu1  ;;  %v15345_v12 = vpop.f32.mrf.mxu0  ;;  %11769 = vmatmul.mubr.msk.f32.gmra.mxu0 %vm501_vm0, %v5477_v17 }
 0x395   :  { %v2407_v50 = vadd.f32 %v2406_v5, %v14998_v11  ;;  %11771 = vmatprep.mubr.msk.f32.mxu0 %vm501_vm0, %v5478_v10  ;;  %v15351_v13 = vadd.f32 %v15173_v23, %v2412_v61  ;;  %v5480_v23 = vld [vmem:[#allocation2 + $0x90] sm:$0xff]  ;;  %v20367_v5 = vld [vmem:[#allocation23_spill] sm:$0xff] }
 0x396   :  { %v11274_v19 = vpop.f32.mrf.mxu1  ;;  %11529 = vmatmul.mubr.msk.f32.gmra.mxu1 %vm501_vm0, %v20361_v3  ;;  %v15355_v40 = vpop.f32.mrf.mxu0  ;;  %v5483_v3 = vld [vmem:[#allocation2 + $0xb0] sm:$0xff] }
 0x397   :  { %v2422_v27 = vadd.f32 %v11274_v19, %v15004_v45  ;;  %11531 = vmatprep.mubr.msk.f32.mxu1 %vm501_vm0, %v20362_v1  ;;  %v15361_v47 = vadd.f32 %v15183_v30, %v2407_v50  ;;  %v20369_v19 = vld [vmem:[#allocation14_spill] sm:$0xff] }
 0x398   :  { %v2416_v11 = vpop.f32.mrf.mxu1  ;;  %v15363_v48 = vpop.f32.mrf.mxu0  ;;  %11772 = vmatmul.mubr.msk.f32.gmra.mxu0 %vm501_vm0, %v5479_v62  ;;  %v20371_v62 = vld [vmem:[#allocation49_spill] sm:$0xff] }
 0x399   :  { %v2417_v4 = vadd.f32 %v2416_v11, %v15012_v43  ;;  %11774 = vmatprep.mubr.msk.f32.mxu0 %vm501_vm0, %v5480_v23  ;;  %v15369_v29 = vadd.f32 %v15191_v35, %v2422_v27  ;;  %v5482_v35 = vld [vmem:[#allocation2 + $0xa8] sm:$0xff] }
 0x39a   :  { %v11277_v45 = vpop.f32.mrf.mxu1  ;;  %11532 = vmatmul.mubr.msk.f32.gmra.mxu1 %vm501_vm0, %v20363_v24  ;;  %v15373_v31 = vpop.f32.mrf.mxu0 }
 0x39b   :  { %v2432_v30 = vadd.f32 %v11277_v45, %v15018_v53  ;;  %11534 = vmatprep.mubr.msk.f32.mxu1 %vm501_vm0, %v20364_v8  ;;  %v15379_v14 = vadd.f32 %v15201_v15, %v2417_v4  ;;  %v20368_v15 = vld [vmem:[#allocation47_spill] sm:$0xff]  ;;  %v20373_v45 = vld [vmem:[#allocation26_spill] sm:$0xff]  ;;  %v20375_v8 = vld [vmem:[#allocation17_spill] sm:$0xff] }
 0x39c   :  { %v2426_v43 = vpop.f32.mrf.mxu1  ;;  %v15381_v61 = vpop.f32.mrf.mxu0  ;;  %11775 = vmatmul.mubr.msk.f32.gmra.mxu0 %vm501_vm0, %v5481_v54  ;;  %v5485_v54 = vld [vmem:[#allocation2 + $0xc8] sm:$0xff] }
 0x39d   :  { %20365 = vst [vmem:[#allocation18_spill] sm:$0xff] %v15379_v14  ;;  %v2427_v55 = vadd.f32 %v2426_v43, %v15026_v58  ;;  %11777 = vmatprep.mubr.msk.f32.mxu0 %vm501_vm0, %v5482_v35  ;;  %v15387_v17 = vadd.f32 %v15209_v46, %v2432_v30  ;;  %v5484_v46 = vld [vmem:[#allocation2 + $0xc0] sm:$0xff] }
 0x39e   :  { %v11280_v53 = vpop.f32.mrf.mxu1  ;;  %11535 = vmatmul.mubr.msk.f32.gmra.mxu1 %vm501_vm0, %v20367_v5  ;;  %v15391_v10 = vpop.f32.mrf.mxu0  ;;  %v5503_v14 = vld [vmem:[#allocation2 + $0x1a0] sm:$0xff] }
 0x39f   :  { %20366 = vst [vmem:[#allocation19_spill] sm:$0xff] %v15387_v17  ;;  %v2442_v50 = vadd.f32 %v11280_v53, %v20368_v15  ;;  %11537 = vmatprep.mubr.msk.f32.mxu1 %vm501_vm0, %v20369_v19  ;;  %v15397_v27 = vadd.f32 %v15219_v52, %v2427_v55  ;;  %v20374_v52 = vld [vmem:[#allocation24_spill] sm:$0xff]  ;;  %v20377_v53 = vld [vmem:[#allocation25_spill] sm:$0xff] }
 0x3a0   :  { %v2436_v58 = vpop.f32.mrf.mxu1  ;;  %v15399_v1 = vpop.f32.mrf.mxu0  ;;  %11778 = vmatmul.mubr.msk.f32.gmra.mxu0 %vm501_vm0, %v5483_v3  ;;  %v20379_v19 = vld [vmem:[#allocation28_spill] sm:$0xff] }
 0x3a1   :  { %20370 = vst [vmem:[#allocation20_spill] sm:$0xff] %v15397_v27  ;;  %v2437_v11 = vadd.f32 %v2436_v58, %v20371_v62  ;;  %11780 = vmatprep.mubr.msk.f32.mxu0 %vm501_vm0, %v5484_v46  ;;  %v15405_v23 = vadd.f32 %v15227_v37, %v2442_v50  ;;  %v5486_v37 = vld [vmem:[#allocation2 + $0xd8] sm:$0xff]  ;;  %v15427_v3 = vld [vmem:[#allocation2 + $0x330] sm:$0xff]  ;;  %v5487_v62 = vld [vmem:[#allocation2 + $0xe0] sm:$0xff] }
 0x3a2   :  { %v11283_v4 = vpop.f32.mrf.mxu1  ;;  %11538 = vmatmul.mubr.msk.f32.gmra.mxu1 %vm501_vm0, %v20373_v45  ;;  %v15409_v24 = vpop.f32.mrf.mxu0  ;;  %v20380_v58 = vld [vmem:[#allocation16_spill] sm:$0xff]  ;;  %v15577_v27 = vld [vmem:[#allocation2 + $0x9a] sm:$0xff] }
 0x3a3   :  { %20372 = vst [vmem:[#allocation27_spill] sm:$0xff] %v15405_v23  ;;  %v2452_v30 = vadd.f32 %v11283_v4, %v20374_v52  ;;  %11540 = vmatprep.mubr.msk.f32.mxu1 %vm501_vm0, %v20375_v8  ;;  %v15415_v43 = vadd.f32 %v15237_v7, %v2437_v11  ;;  %v5488_v45 = vld [vmem:[#allocation2 + $0xf0] sm:$0xff]  ;;  %v20382_v52 = vld [vmem:[#allocation13_spill] sm:$0xff]  ;;  %v15555_v23 = vld [vmem:[#allocation2 + $0x82] sm:$0xff] }
 0x3a4   :  { %v2446_v35 = vpop.f32.mrf.mxu1  ;;  %v15417_v55 = vpop.f32.mrf.mxu0  ;;  %11781 = vmatmul.mubr.msk.f32.gmra.mxu0 %vm501_vm0, %v5485_v54  ;;  %v15441_v8 = vld [vmem:[#allocation2 + $0x338] sm:$0xff]  ;;  %20409 = vst [vmem:[#allocation24_spill] sm:$0xff] %v15577_v27  ;;  %v20410_v17 = vld [vmem:[#allocation64_spill] sm:$0xff] }
 0x3a5   :  { %20376 = vst [vmem:[#allocation29_spill] sm:$0xff] %v15415_v43  ;;  %v2447_v5 = vadd.f32 %v2446_v35, %v20377_v53  ;;  %11783 = vmatprep.mubr.msk.f32.mxu0 %vm501_vm0, %v5486_v37  ;;  %v15423_v15 = vadd.f32 %v15245_v16, %v2452_v30  ;;  %v20384_v53 = vld [vmem:[#allocation30_spill] sm:$0xff] }
 0x3a6   :  { %v11286_v50 = vpop.f32.mrf.mxu1  ;;  %11541 = vmatmul.mubr.msk.f32.gmra.mxu1 %vm501_vm0, %v20379_v19  ;;  %v15429_v7 = vpop.f32.mrf.mxu0 }
 0x3a7   :  { %20378 = vst [vmem:[#allocation15_spill] sm:$0xff] %v15423_v15  ;;  %v2462_v46 = vadd.f32 %v11286_v50, %v20380_v58  ;;  %11543 = vmatprep.mubr.msk.f32.mxu1 %vm501_vm0, %v15427_v3  ;;  %v15435_v11 = vadd.f32 %v15255_v39, %v2447_v5  ;;  %v4762_v39 = vld [vmem:[#allocation2 + $0x1a] sm:$0xff]  ;;  %v15511_v15 = vld [vmem:[#allocation2 + $0x52] sm:$0xff] }
 0x3a8   :  { %v2456_v4 = vpop.f32.mrf.mxu1  ;;  %v15437_v16 = vpop.f32.mrf.mxu0  ;;  %11784 = vmatmul.mubr.msk.f32.gmra.mxu0 %vm501_vm0, %v5487_v62  ;;  %v5489_v50 = vld [vmem:[#allocation2 + $0xf8] sm:$0xff] }
 0x3a9   :  { %20381 = vst [vmem:[#allocation6_spill] sm:$0xff] %v15435_v11  ;;  %v2457_v30 = vadd.f32 %v2456_v4, %v20382_v52  ;;  %11786 = vmatprep.mubr.msk.f32.mxu0 %vm501_vm0, %v5488_v45  ;;  %v15445_v54 = vadd.f32 %v15263_v26, %v2462_v46  ;;  %v5490_v26 = vld [vmem:[#allocation2 + $0x108] sm:$0xff]  ;;  %v6247_v52 = vld [vmem:[%s19996_s2 + $0xf0] sm:$0xff] }
 0x3aa   :  { %v11289_v35 = vpop.f32.mrf.mxu1  ;;  %11544 = vmatmul.mubr.msk.f32.gmra.mxu1 %vm501_vm0, %v15441_v8  ;;  %v15449_v37 = vpop.f32.mrf.mxu0  ;;  %v20386_v46 = vld [vmem:[#allocation31_spill] sm:$0xff] }
 0x3ab   :  { %20383 = vst [vmem:[#allocation8_spill] sm:$0xff] %v15445_v54  ;;  %v2472_v5 = vadd.f32 %v11289_v35, %v20384_v53  ;;  %11658 = vmatprep.mubr.msk.f32.mxu1 %vm501_vm0, %v4762_v39  ;;  %v15454_v19 = vadd.f32 %v15273_v51, %v2457_v30  ;;  %v4763_v45 = vld [vmem:[#allocation2 + $0x22] sm:$0xff]  ;;  %v15468_v30 = vld [vmem:[#allocation2 + $0x32] sm:$0xff] }
 0x3ac   :  { %v2466_v58 = vpop.f32.mrf.mxu1  ;;  %v15456_v62 = vpop.f32.mrf.mxu0  ;;  %11787 = vmatmul.mubr.msk.f32.gmra.mxu0 %vm501_vm0, %v5489_v50  ;;  %v20388_v53 = vld [vmem:[#allocation32_spill] sm:$0xff] }
 0x3ad   :  { %20385 = vst [vmem:[#allocation7_spill] sm:$0xff] %v15454_v19  ;;  %v2467_v4 = vadd.f32 %v2466_v58, %v20386_v46  ;;  %11789 = vmatprep.mubr.msk.f32.mxu0 %vm501_vm0, %v5490_v26  ;;  %v15465_v35 = vadd.f32 %v15281_v32, %v2472_v5  ;;  %v20389_v58 = vld [vmem:[#allocation35_spill] sm:$0xff]  ;;  %v5491_v26 = vld [vmem:[#allocation2 + $0x110] sm:$0xff]  ;;  %v6245_v19 = vld [vmem:[%s19996_s2 + $0xe0] sm:$0xff] }
 0x3ae   :  { %v11292_v51 = vpop.f32.mrf.mxu1  ;;  %11659 = vmatmul.mubr.msk.f32.vlgmr.msra.gmra.mxu1 %vm501_vm0, %v4763_v45  ;;  %v15470_v39 = vpop.f32.mrf.mxu0  ;;  %v6246_v32 = vld [vmem:[%s19996_s2 + $0xe8] sm:$0xff]  ;;  %v20395_v54 = vld [vmem:[#allocation36_spill] sm:$0xff] }
 0x3af   :  { %20387 = vst [vmem:[#allocation10_spill] sm:$0xff] %v15465_v35  ;;  %v2482_v50 = vadd.f32 %v11292_v51, %v20388_v53  ;;  %11859 = vmatpush3.msra.mxu1 %v20389_v58  ;;  %11661 = vmatprep.mubr.msk.f32.mxu1 %vm501_vm0, %v15468_v30  ;;  %v15480_v5 = vadd.f32 %v15291_v38, %v2467_v4  ;;  %v5492_v35 = vld [vmem:[#allocation2 + $0x120] sm:$0xff]  ;;  %v20391_v51 = vld [vmem:[#allocation33_spill] sm:$0xff] }
 0x3b0   :  { %v2476_v46 = vpop.f32.mrf.mxu1  ;;  %v15482_v45 = vpop.f32.mrf.mxu0  ;;  %11790 = vmatmul.mubr.msk.f32.gmra.mxu0 %vm501_vm0, %v5491_v26  ;;  %11860 = vmatprep.subr.mxu1 %v6247_v52  ;;  %v15486_v58 = vld [vmem:[#allocation2 + $0x3a] sm:$0xff]  ;;  %v15497_v26 = vld [vmem:[#allocation2 + $0x4a] sm:$0xff] }
 0x3b1   :  { %20390 = vst [vmem:[#allocation9_spill] sm:$0xff] %v15480_v5  ;;  %v2477_v53 = vadd.f32 %v2476_v46, %v20391_v51  ;;  %11792 = vmatprep.mubr.msk.f32.mxu0 %vm501_vm0, %v5492_v35  ;;  %11861 = vmatpush3.msra.mxu1 %v6247_v52  ;;  %v15493_v38 = vadd.f32 %v15302_v34, %v2482_v50  ;;  %v20393_v46 = vld [vmem:[#allocation34_spill] sm:$0xff]  ;;  %v5493_v52 = vld [vmem:[#allocation2 + $0x128] sm:$0xff] }
 0x3b2   :  { %v11295_v4 = vpop.f32.mrf.mxu1  ;;  %11662 = vmatmul.mubr.msk.f32.gmra.mxu1 %vm501_vm0, %v15486_v58  ;;  %v15499_v5 = vpop.f32.mrf.mxu0  ;;  %11862 = vmatprep.subr.mxu1 %v6246_v32 }
 0x3b3   :  { %20392 = vst [vmem:[#allocation12_spill] sm:$0xff] %v15493_v38  ;;  %v2492_v51 = vadd.f32 %v11295_v4, %v20393_v46  ;;  %11664 = vmatprep.mubr.msk.f32.mxu1 %vm501_vm0, %v15497_v26  ;;  %11863 = vmatpush3.msra.mxu1 %v6246_v32  ;;  %v15505_v35 = vadd.f32 %v15316_v28, %v2477_v53  ;;  %v5494_v38 = vld [vmem:[#allocation2 + $0x138] sm:$0xff]  ;;  %v15519_v28 = vld [vmem:[#allocation2 + $0x62] sm:$0xff] }
 0x3b4   :  { %v2486_v34 = vpop.f32.mrf.mxu1  ;;  %v15507_v50 = vpop.f32.mrf.mxu0  ;;  %11793 = vmatmul.mubr.msk.f32.gmra.mxu0 %vm501_vm0, %v5493_v52  ;;  %11864 = vmatprep.subr.mxu1 %v6245_v19  ;;  %v20397_v46 = vld [vmem:[#allocation37_spill] sm:$0xff] }
 0x3b5   :  { %20394 = vst [vmem:[#allocation21_spill] sm:$0xff] %v15505_v35  ;;  %v2487_v11 = vadd.f32 %v2486_v34, %v20395_v54  ;;  %11795 = vmatprep.mubr.msk.f32.mxu0 %vm501_vm0, %v5494_v38  ;;  %11865 = vmatpush3.msra.mxu1 %v6245_v19  ;;  %v15515_v4 = vadd.f32 %v15327_v0, %v2492_v51  ;;  %v5495_v54 = vld [vmem:[#allocation2 + $0x140] sm:$0xff]  ;;  %v5496_v51 = vld [vmem:[#allocation2 + $0x150] sm:$0xff] }
 0x3b6   :  { %v11298_v32 = vpop.f32.mrf.mxu1  ;;  %11665 = vmatmul.mubr.msk.f32.gmra.mxu1 %vm501_vm0, %v15511_v15  ;;  %v15521_v53 = vpop.f32.mrf.mxu0  ;;  %v20399_v34 = vld [vmem:[#allocation38_spill] sm:$0xff]  ;;  %v15533_v35 = vld [vmem:[#allocation2 + $0x6a] sm:$0xff] }
 0x3b7   :  { %20396 = vst [vmem:[#allocation11_spill] sm:$0xff] %v15515_v4  ;;  %v2502_v52 = vadd.f32 %v11298_v32, %v20397_v46  ;;  %11667 = vmatprep.mubr.msk.f32.mxu1 %vm501_vm0, %v15519_v28  ;;  %v15527_v38 = vadd.f32 %v15337_v44, %v2487_v11  ;;  %v15541_v44 = vld [vmem:[#allocation2 + $0x7a] sm:$0xff] }
 0x3b8   :  { %v2496_v19 = vpop.f32.mrf.mxu1  ;;  %v15529_v0 = vpop.f32.mrf.mxu0  ;;  %11796 = vmatmul.mubr.msk.f32.gmra.mxu0 %vm501_vm0, %v5495_v54 }
 0x3b9   :  { %20398 = vst [vmem:[#allocation22_spill] sm:$0xff] %v15527_v38  ;;  %v2497_v4 = vadd.f32 %v2496_v19, %v20399_v34  ;;  %11798 = vmatprep.mubr.msk.f32.mxu0 %vm501_vm0, %v5496_v51  ;;  %v15537_v32 = vadd.f32 %v15345_v12, %v2502_v52  ;;  %v20401_v38 = vld [vmem:[#allocation39_spill] sm:$0xff]  ;;  %v5497_v19 = vld [vmem:[#allocation2 + $0x158] sm:$0xff] }
 0x3ba   :  { %v11301_v46 = vpop.f32.mrf.mxu1  ;;  %11668 = vmatmul.mubr.msk.f32.gmra.mxu1 %vm501_vm0, %v15533_v35  ;;  %v15543_v11 = vpop.f32.mrf.mxu0  ;;  %v5498_v52 = vld [vmem:[#allocation2 + $0x168] sm:$0xff] }
 0x3bb   :  { %20400 = vst [vmem:[#allocation23_spill] sm:$0xff] %v15537_v32  ;;  %v2512_v54 = vadd.f32 %v11301_v46, %v20401_v38  ;;  %11670 = vmatprep.mubr.msk.f32.mxu1 %vm501_vm0, %v15541_v44  ;;  %v15549_v34 = vadd.f32 %v15355_v40, %v2497_v4  ;;  %v20403_v32 = vld [vmem:[#allocation40_spill] sm:$0xff] }
 0x3bc   :  { %v2506_v51 = vpop.f32.mrf.mxu1  ;;  %v15551_v12 = vpop.f32.mrf.mxu0  ;;  %11799 = vmatmul.mubr.msk.f32.gmra.mxu0 %vm501_vm0, %v5497_v19  ;;  %v15563_v40 = vld [vmem:[#allocation2 + $0x92] sm:$0xff] }
 0x3bd   :  { %20402 = vst [vmem:[#allocation47_spill] sm:$0xff] %v15549_v34  ;;  %v2507_v43 = vadd.f32 %v2506_v51, %v20403_v32  ;;  %11801 = vmatprep.mubr.msk.f32.mxu0 %vm501_vm0, %v5498_v52  ;;  %v15559_v38 = vadd.f32 %v15363_v48, %v2512_v54  ;;  %20405 = vst [vmem:[#allocation49_spill] sm:$0xff] %v15563_v40  ;;  %v20406_v34 = vld [vmem:[#allocation41_spill] sm:$0xff]  ;;  %v5499_v32 = vld [vmem:[#allocation2 + $0x170] sm:$0xff] }
 0x3be   :  { %v11304_v46 = vpop.f32.mrf.mxu1  ;;  %11671 = vmatmul.mubr.msk.f32.gmra.mxu1 %vm501_vm0, %v15555_v23  ;;  %v15565_v4 = vpop.f32.mrf.mxu0  ;;  %v20408_v54 = vld [vmem:[#allocation42_spill] sm:$0xff] }
 0x3bf   :  { %20404 = vst [vmem:[#allocation14_spill] sm:$0xff] %v15559_v38  ;;  %v2522_v19 = vadd.f32 %v11304_v46, %v20406_v34  ;;  %11673 = vmatprep.mubr.msk.f32.mxu1 %vm501_vm0, %v15563_v40  ;;  %v15571_v51 = vadd.f32 %v15373_v31, %v2507_v43  ;;  %v15586_v31 = vld [vmem:[#allocation2 + $0xaa] sm:$0xff] }
 0x3c0   :  { %v2516_v52 = vpop.f32.mrf.mxu1  ;;  %v15573_v48 = vpop.f32.mrf.mxu0  ;;  %11802 = vmatmul.mubr.msk.f32.gmra.mxu0 %vm501_vm0, %v5499_v32  ;;  %20412 = vst [vmem:[#allocation25_spill] sm:$0xff] %v15586_v31  ;;  %v20413_v32 = vld [vmem:[#allocation43_spill] sm:$0xff] }
 0x3c1   :  { %20407 = vst [vmem:[#allocation26_spill] sm:$0xff] %v15571_v51  ;;  %v2517_v38 = vadd.f32 %v2516_v52, %v20408_v54  ;;  %11804 = vmatprep.mubr.msk.f32.mxu0 %vm501_vm0, %v20410_v17  ;;  %v15582_v34 = vadd.f32 %v15381_v61, %v2522_v19  ;;  %v5502_v51 = vld [vmem:[#allocation2 + $0x198] sm:$0xff]  ;;  %v20415_v19 = vld [vmem:[#allocation66_spill] sm:$0xff]  ;;  %v20416_v54 = vld [vmem:[#allocation44_spill] sm:$0xff] }
 0x3c2   :  { %v11307_v46 = vpop.f32.mrf.mxu1  ;;  %11674 = vmatmul.mubr.msk.f32.gmra.mxu1 %vm501_vm0, %v15577_v27  ;;  %v15588_v43 = vpop.f32.mrf.mxu0  ;;  %v15601_v27 = vld [vmem:[#allocation2 + $0xb2] sm:$0xff] }
 0x3c3   :  { %20411 = vst [vmem:[#allocation17_spill] sm:$0xff] %v15582_v34  ;;  %v2532_v40 = vadd.f32 %v11307_v46, %v20413_v32  ;;  %11676 = vmatprep.mubr.msk.f32.mxu1 %vm501_vm0, %v15586_v31  ;;  %v15594_v52 = vadd.f32 %v15391_v10, %v2517_v38  ;;  %20417 = vst [vmem:[#allocation16_spill] sm:$0xff] %v15601_v27  ;;  %v15609_v10 = vld [vmem:[#allocation2 + $0xc2] sm:$0xff] }
 0x3c4   :  { %v2526_v17 = vpop.f32.mrf.mxu1  ;;  %v15596_v61 = vpop.f32.mrf.mxu0  ;;  %11805 = vmatmul.mubr.msk.f32.gmra.mxu0 %vm501_vm0, %v20415_v19  ;;  %20419 = vst [vmem:[#allocation30_spill] sm:$0xff] %v15609_v10 }
 0x3c5   :  { %20414 = vst [vmem:[#allocation28_spill] sm:$0xff] %v15594_v52  ;;  %v2527_v34 = vadd.f32 %v2526_v17, %v20416_v54  ;;  %11807 = vmatprep.mubr.msk.f32.mxu0 %vm501_vm0, %v5502_v51  ;;  %v15605_v46 = vadd.f32 %v15399_v1, %v2532_v40  ;;  %v20420_v52 = vld [vmem:[#allocation45_spill] sm:$0xff]  ;;  %v5504_v1 = vld [vmem:[#allocation2 + $0x1e0] sm:$0xff] }
 0x3c6   :  { %v11310_v32 = vpop.f32.mrf.mxu1  ;;  %11677 = vmatmul.mubr.msk.f32.gmra.mxu1 %vm501_vm0, %v15601_v27  ;;  %v15611_v38 = vpop.f32.mrf.mxu0  ;;  %v20422_v40 = vld [vmem:[#allocation46_spill] sm:$0xff]  ;;  %v15623_v27 = vld [vmem:[#allocation2 + $0xca] sm:$0xff] }
 0x3c7   :  { %20418 = vst [vmem:[#allocation13_spill] sm:$0xff] %v15605_v46  ;;  %v2542_v19 = vadd.f32 %v11310_v32, %v20420_v52  ;;  %11679 = vmatprep.mubr.msk.f32.mxu1 %vm501_vm0, %v15609_v10  ;;  %v15617_v17 = vadd.f32 %v15409_v24, %v2527_v34  ;;  %20423 = vst [vmem:[#allocation32_spill] sm:$0xff] %v15623_v27  ;;  %v15631_v24 = vld [vmem:[#allocation2 + $0xda] sm:$0xff]  ;;  %v15645_v10 = vld [vmem:[#allocation2 + $0xe2] sm:$0xff] }
 0x3c8   :  { %v2536_v51 = vpop.f32.mrf.mxu1  ;;  %v15619_v54 = vpop.f32.mrf.mxu0  ;;  %11808 = vmatmul.mubr.msk.f32.gmra.mxu0 %vm501_vm0, %v5503_v14  ;;  %20425 = vst [vmem:[#allocation33_spill] sm:$0xff] %v15631_v24  ;;  %20429 = vst [vmem:[#allocation36_spill] sm:$0xff] %v15645_v10 }
 0x3c9   :  { %20421 = vst [vmem:[#allocation31_spill] sm:$0xff] %v15617_v17  ;;  %v2537_v46 = vadd.f32 %v2536_v51, %v20422_v40  ;;  %11810 = vmatprep.mubr.msk.f32.mxu0 %vm501_vm0, %v5504_v1  ;;  %v15627_v52 = vadd.f32 %v15417_v55, %v2542_v19  ;;  %v20426_v17 = vld [vmem:[#allocation48_spill] sm:$0xff]  ;;  %v5505_v51 = vld [vmem:[#allocation2 + $0x1e8] sm:$0xff]  ;;  %v5506_v19 = vld [vmem:[#allocation2 + $0x1f8] sm:$0xff] }
 0x3ca   :  { %v11313_v32 = vpop.f32.mrf.mxu1  ;;  %11680 = vmatmul.mubr.msk.f32.gmra.mxu1 %vm501_vm0, %v15623_v27  ;;  %v15633_v34 = vpop.f32.mrf.mxu0 }
 0x3cb   :  { %20424 = vst [vmem:[#allocation35_spill] sm:$0xff] %v15627_v52  ;;  %v2552_v14 = vadd.f32 %v11313_v32, %v20426_v17  ;;  %11682 = vmatprep.mubr.msk.f32.mxu1 %vm501_vm0, %v15631_v24  ;;  %v15639_v40 = vadd.f32 %v15429_v7, %v2537_v46  ;;  %v20428_v52 = vld [vmem:[#allocation50_spill] sm:$0xff]  ;;  %v15653_v7 = vld [vmem:[#allocation2 + $0xf2] sm:$0xff] }
 0x3cc   :  { %v2546_v1 = vpop.f32.mrf.mxu1  ;;  %v15641_v55 = vpop.f32.mrf.mxu0  ;;  %11811 = vmatmul.mubr.msk.f32.gmra.mxu0 %vm501_vm0, %v5505_v51  ;;  %20431 = vst [vmem:[#allocation38_spill] sm:$0xff] %v15653_v7  ;;  %v15667_v24 = vld [vmem:[#allocation2 + $0xfa] sm:$0xff] }
 0x3cd   :  { %20427 = vst [vmem:[#allocation34_spill] sm:$0xff] %v15639_v40  ;;  %v2547_v27 = vadd.f32 %v2546_v1, %v20428_v52  ;;  %11813 = vmatprep.mubr.msk.f32.mxu0 %vm501_vm0, %v5506_v19  ;;  %v15649_v17 = vadd.f32 %v15437_v16, %v2552_v14  ;;  %v20432_v40 = vld [vmem:[#allocation51_spill] sm:$0xff]  ;;  %v5507_v52 = vld [vmem:[#allocation2 + $0x200] sm:$0xff]  ;;  %v5508_v14 = vld [vmem:[#allocation2 + $0x210] sm:$0xff] }
 0x3ce   :  { %v11316_v32 = vpop.f32.mrf.mxu1  ;;  %11683 = vmatmul.mubr.msk.f32.gmra.mxu1 %vm501_vm0, %v15645_v10  ;;  %v15655_v46 = vpop.f32.mrf.mxu0  ;;  %20435 = vst [vmem:[#allocation40_spill] sm:$0xff] %v15667_v24 }
 0x3cf   :  { %20430 = vst [vmem:[#allocation37_spill] sm:$0xff] %v15649_v17  ;;  %v2562_v51 = vadd.f32 %v11316_v32, %v20432_v40  ;;  %11685 = vmatprep.mubr.msk.f32.mxu1 %vm501_vm0, %v15653_v7  ;;  %v15661_v1 = vadd.f32 %v15449_v37, %v2547_v27  ;;  %v20434_v17 = vld [vmem:[#allocation52_spill] sm:$0xff] }
 0x3d0   :  { %v2556_v19 = vpop.f32.mrf.mxu1  ;;  %v15663_v16 = vpop.f32.mrf.mxu0  ;;  %11814 = vmatmul.mubr.msk.f32.gmra.mxu0 %vm501_vm0, %v5507_v52  ;;  %v15675_v27 = vld [vmem:[#allocation2 + $0x10a] sm:$0xff]  ;;  %v15689_v7 = vld [vmem:[#allocation2 + $0x112] sm:$0xff] }
 0x3d1   :  { %20433 = vst [vmem:[#allocation39_spill] sm:$0xff] %v15661_v1  ;;  %v2557_v10 = vadd.f32 %v2556_v19, %v20434_v17  ;;  %11816 = vmatprep.mubr.msk.f32.mxu0 %vm501_vm0, %v5508_v14  ;;  %v15671_v40 = vadd.f32 %v15456_v62, %v2562_v51  ;;  %20437 = vst [vmem:[#allocation42_spill] sm:$0xff] %v15675_v27  ;;  %v20438_v1 = vld [vmem:[#allocation53_spill] sm:$0xff]  ;;  %v5510_v51 = vld [vmem:[#allocation2 + $0x228] sm:$0xff] }
 0x3d2   :  { %v11319_v32 = vpop.f32.mrf.mxu1  ;;  %11686 = vmatmul.mubr.msk.f32.gmra.mxu1 %vm501_vm0, %v15667_v24  ;;  %v15677_v37 = vpop.f32.mrf.mxu0  ;;  %v5509_v17 = vld [vmem:[#allocation2 + $0x218] sm:$0xff]  ;;  %20441 = vst [vmem:[#allocation43_spill] sm:$0xff] %v15689_v7 }
 0x3d3   :  { %20436 = vst [vmem:[#allocation41_spill] sm:$0xff] %v15671_v40  ;;  %v2572_v52 = vadd.f32 %v11319_v32, %v20438_v1  ;;  %11688 = vmatprep.mubr.msk.f32.mxu1 %vm501_vm0, %v15675_v27  ;;  %v15683_v19 = vadd.f32 %v15470_v39, %v2557_v10  ;;  %v20440_v40 = vld [vmem:[#allocation54_spill] sm:$0xff]  ;;  %v15711_v27 = vld [vmem:[#allocation2 + $0x12a] sm:$0xff] }
 0x3d4   :  { %v2566_v14 = vpop.f32.mrf.mxu1  ;;  %v15685_v62 = vpop.f32.mrf.mxu0  ;;  %11817 = vmatmul.mubr.msk.f32.gmra.mxu0 %vm501_vm0, %v5509_v17  ;;  %v15697_v39 = vld [vmem:[#allocation2 + $0x122] sm:$0xff]  ;;  %20447 = vst [vmem:[#allocation46_spill] sm:$0xff] %v15711_v27 }
 0x3d5   :  { %20439 = vst [vmem:[#allocation64_spill] sm:$0xff] %v15683_v19  ;;  %v2567_v24 = vadd.f32 %v2566_v14, %v20440_v40  ;;  %11819 = vmatprep.mubr.msk.f32.mxu0 %vm501_vm0, %v5510_v51  ;;  %v15693_v1 = vadd.f32 %v15482_v45, %v2572_v52  ;;  %20443 = vst [vmem:[#allocation44_spill] sm:$0xff] %v15697_v39  ;;  %v20444_v19 = vld [vmem:[#allocation55_spill] sm:$0xff]  ;;  %v5511_v40 = vld [vmem:[#allocation2 + $0x230] sm:$0xff] }
 0x3d6   :  { %v11322_v32 = vpop.f32.mrf.mxu1  ;;  %11689 = vmatmul.mubr.msk.f32.gmra.mxu1 %vm501_vm0, %v15689_v7  ;;  %v15699_v10 = vpop.f32.mrf.mxu0  ;;  %v5512_v52 = vld [vmem:[#allocation2 + $0x240] sm:$0xff] }
 0x3d7   :  { %20442 = vst [vmem:[#allocation66_spill] sm:$0xff] %v15693_v1  ;;  %v2582_v17 = vadd.f32 %v11322_v32, %v20444_v19  ;;  %11691 = vmatprep.mubr.msk.f32.mxu1 %vm501_vm0, %v15697_v39  ;;  %v15705_v14 = vadd.f32 %v15499_v5, %v2567_v24  ;;  %v20446_v1 = vld [vmem:[#allocation56_spill] sm:$0xff]  ;;  %v15719_v5 = vld [vmem:[#allocation2 + $0x13a] sm:$0xff]  ;;  %v15733_v39 = vld [vmem:[#allocation2 + $0x142] sm:$0xff] }
 0x3d8   :  { %v2576_v51 = vpop.f32.mrf.mxu1  ;;  %v15707_v45 = vpop.f32.mrf.mxu0  ;;  %11820 = vmatmul.mubr.msk.f32.gmra.mxu0 %vm501_vm0, %v5511_v40  ;;  %20449 = vst [vmem:[#allocation50_spill] sm:$0xff] %v15719_v5  ;;  %20453 = vst [vmem:[#allocation52_spill] sm:$0xff] %v15733_v39 }
 0x3d9   :  { %20445 = vst [vmem:[#allocation45_spill] sm:$0xff] %v15705_v14  ;;  %v2577_v7 = vadd.f32 %v2576_v51, %v20446_v1  ;;  %11822 = vmatprep.mubr.msk.f32.mxu0 %vm501_vm0, %v5512_v52  ;;  %v15715_v19 = vadd.f32 %v15507_v50, %v2582_v17  ;;  %v20450_v14 = vld [vmem:[#allocation57_spill] sm:$0xff]  ;;  %v5513_v1 = vld [vmem:[#allocation2 + $0x248] sm:$0xff] }
 0x3da   :  { %v11325_v32 = vpop.f32.mrf.mxu1  ;;  %11692 = vmatmul.mubr.msk.f32.gmra.mxu1 %vm501_vm0, %v15711_v27  ;;  %v15721_v24 = vpop.f32.mrf.mxu0  ;;  %v5514_v17 = vld [vmem:[#allocation2 + $0x258] sm:$0xff] }
 0x3db   :  { %20448 = vst [vmem:[#allocation48_spill] sm:$0xff] %v15715_v19  ;;  %v2592_v40 = vadd.f32 %v11325_v32, %v20450_v14  ;;  %11694 = vmatprep.mubr.msk.f32.mxu1 %vm501_vm0, %v15719_v5  ;;  %v15727_v51 = vadd.f32 %v15521_v53, %v2577_v7  ;;  %v20452_v19 = vld [vmem:[#allocation58_spill] sm:$0xff]  ;;  %v15741_v53 = vld [vmem:[#allocation2 + $0x152] sm:$0xff] }
 0x3dc   :  { %v2586_v52 = vpop.f32.mrf.mxu1  ;;  %v15729_v50 = vpop.f32.mrf.mxu0  ;;  %11823 = vmatmul.mubr.msk.f32.gmra.mxu0 %vm501_vm0, %v5513_v1  ;;  %20455 = vst [vmem:[#allocation54_spill] sm:$0xff] %v15741_v53  ;;  %v15755_v5 = vld [vmem:[#allocation2 + $0x15a] sm:$0xff] }
 0x3dd   :  { %20451 = vst [vmem:[#allocation51_spill] sm:$0xff] %v15727_v51  ;;  %v2587_v27 = vadd.f32 %v2586_v52, %v20452_v19  ;;  %11825 = vmatprep.mubr.msk.f32.mxu0 %vm501_vm0, %v5514_v17  ;;  %v15737_v14 = vadd.f32 %v15529_v0, %v2592_v40  ;;  %v20456_v51 = vld [vmem:[#allocation59_spill] sm:$0xff]  ;;  %v5515_v19 = vld [vmem:[#allocation2 + $0x260] sm:$0xff]  ;;  %v5516_v40 = vld [vmem:[#allocation2 + $0x270] sm:$0xff] }
 0x3de   :  { %v11328_v32 = vpop.f32.mrf.mxu1  ;;  %11695 = vmatmul.mubr.msk.f32.gmra.mxu1 %vm501_vm0, %v15733_v39  ;;  %v15743_v7 = vpop.f32.mrf.mxu0  ;;  %20459 = vst [vmem:[#allocation56_spill] sm:$0xff] %v15755_v5 }
 0x3df   :  { %20454 = vst [vmem:[#allocation53_spill] sm:$0xff] %v15737_v14  ;;  %v2602_v1 = vadd.f32 %v11328_v32, %v20456_v51  ;;  %11697 = vmatprep.mubr.msk.f32.mxu1 %vm501_vm0, %v15741_v53  ;;  %v15749_v52 = vadd.f32 %v15543_v11, %v2587_v27  ;;  %v20458_v14 = vld [vmem:[#allocation60_spill] sm:$0xff] }
 0x3e0   :  { %v2596_v17 = vpop.f32.mrf.mxu1  ;;  %v15751_v0 = vpop.f32.mrf.mxu0  ;;  %11826 = vmatmul.mubr.msk.f32.gmra.mxu0 %vm501_vm0, %v5515_v19  ;;  %v15763_v11 = vld [vmem:[#allocation2 + $0x16a] sm:$0xff]  ;;  %v15777_v53 = vld [vmem:[#allocation2 + $0x172] sm:$0xff] }
 0x3e1   :  { %20457 = vst [vmem:[#allocation55_spill] sm:$0xff] %v15749_v52  ;;  %v2597_v39 = vadd.f32 %v2596_v17, %v20458_v14  ;;  %11828 = vmatprep.mubr.msk.f32.mxu0 %vm501_vm0, %v5516_v40  ;;  %v15759_v51 = vadd.f32 %v15551_v12, %v2602_v1  ;;  %20461 = vst [vmem:[#allocation58_spill] sm:$0xff] %v15763_v11  ;;  %v20462_v52 = vld [vmem:[#allocation61_spill] sm:$0xff]  ;;  %v5518_v1 = vld [vmem:[#allocation2 + $0x288] sm:$0xff] }
 0x3e2   :  { %v11331_v32 = vpop.f32.mrf.mxu1  ;;  %11698 = vmatmul.mubr.msk.f32.gmra.mxu1 %vm501_vm0, %v15755_v5  ;;  %v15765_v27 = vpop.f32.mrf.mxu0  ;;  %v5517_v14 = vld [vmem:[#allocation2 + $0x278] sm:$0xff]  ;;  %20465 = vst [vmem:[#allocation60_spill] sm:$0xff] %v15777_v53 }
 0x3e3   :  { %20460 = vst [vmem:[#allocation57_spill] sm:$0xff] %v15759_v51  ;;  %v2612_v19 = vadd.f32 %v11331_v32, %v20462_v52  ;;  %11700 = vmatprep.mubr.msk.f32.mxu1 %vm501_vm0, %v15763_v11  ;;  %v15771_v17 = vadd.f32 %v15565_v4, %v2597_v39  ;;  %v20464_v51 = vld [vmem:[#allocation62_spill] sm:$0xff]  ;;  %v15799_v11 = vld [vmem:[#allocation2 + $0x18a] sm:$0xff] }
 0x3e4   :  { %v2606_v40 = vpop.f32.mrf.mxu1  ;;  %v15773_v12 = vpop.f32.mrf.mxu0  ;;  %11829 = vmatmul.mubr.msk.f32.gmra.mxu0 %vm501_vm0, %v5517_v14  ;;  %v15785_v4 = vld [vmem:[#allocation2 + $0x182] sm:$0xff] }
 0x3e5   :  { %20463 = vst [vmem:[#allocation59_spill] sm:$0xff] %v15771_v17  ;;  %v2607_v5 = vadd.f32 %v2606_v40, %v20464_v51  ;;  %11831 = vmatprep.mubr.msk.f32.mxu0 %vm501_vm0, %v5518_v1  ;;  %v15781_v52 = vadd.f32 %v15573_v48, %v2612_v19  ;;  %20467 = vst [vmem:[#allocation62_spill] sm:$0xff] %v15785_v4  ;;  %v20468_v17 = vld [vmem:[#allocation63_spill] sm:$0xff]  ;;  %v5519_v51 = vld [vmem:[#allocation2 + $0x290] sm:$0xff] }
 0x3e6   :  { %v11334_v32 = vpop.f32.mrf.mxu1  ;;  %11701 = vmatmul.mubr.msk.f32.gmra.mxu1 %vm501_vm0, %v15777_v53  ;;  %v15787_v39 = vpop.f32.mrf.mxu0  ;;  %v5520_v19 = vld [vmem:[#allocation2 + $0x2a0] sm:$0xff] }
 0x3e7   :  { %20466 = vst [vmem:[#allocation61_spill] sm:$0xff] %v15781_v52  ;;  %v2622_v14 = vadd.f32 %v11334_v32, %v20468_v17  ;;  %11703 = vmatprep.mubr.msk.f32.mxu1 %vm501_vm0, %v15785_v4  ;;  %v15793_v40 = vadd.f32 %v15588_v43, %v2607_v5  ;;  %v20470_v52 = vld [vmem:[#allocation65_spill] sm:$0xff]  ;;  %v4794_v43 = vld [vmem:[#allocation2 + $0x1ca] sm:$0xff] }
 0x3e8   :  { %v2616_v1 = vpop.f32.mrf.mxu1  ;;  %v15795_v48 = vpop.f32.mrf.mxu0  ;;  %11832 = vmatmul.mubr.msk.f32.gmra.mxu0 %vm501_vm0, %v5519_v51  ;;  %20471 = vst [vmem:[#allocation65_spill] sm:$0xff] %v15799_v11  ;;  %v5521_v51 = vld [vmem:[#allocation2 + $0x2a8] sm:$0xff] }
 0x3e9   :  { %20469 = vst [vmem:[#allocation63_spill] sm:$0xff] %v15793_v40  ;;  %v2617_v53 = vadd.f32 %v2616_v1, %v20470_v52  ;;  %11834 = vmatprep.mubr.msk.f32.mxu0 %vm501_vm0, %v5520_v19  ;;  %v15803_v17 = vadd.f32 %v15596_v61, %v2622_v14  ;;  %v20473_v40 = vld [vmem:[#allocation67_spill] sm:$0xff]  ;;  %v5522_v61 = vld [vmem:[#allocation2 + $0x2b8] sm:$0xff]  ;;  %v20474_v14 = vld [vmem:[#allocation68_spill] sm:$0xff] }
 0x3ea   :  { %v11337_v32 = vpop.f32.mrf.mxu1  ;;  %11704 = vmatmul.mubr.msk.f32.gmra.mxu1 %vm501_vm0, %v15799_v11  ;;  %v15807_v5 = vpop.f32.mrf.mxu0  ;;  %v4795_v11 = vld [vmem:[#allocation2 + $0x1d2] sm:$0xff] }
 0x3eb   :  { %20472 = vst [vmem:[#allocation69_spill] sm:$0xff] %v15803_v17  ;;  %v2632_v4 = vadd.f32 %v11337_v32, %v20473_v40  ;;  %11706 = vmatprep.mubr.msk.f32.mxu1 %vm501_vm0, %v4794_v43  ;;  %v15812_v52 = vadd.f32 %v15611_v38, %v2617_v53  ;;  %v15823_v32 = vld [vmem:[#allocation2 + $0x1e2] sm:$0xff] }
 0x3ec   :  { %v2626_v1 = vpop.f32.mrf.mxu1  ;;  %v15814_v19 = vpop.f32.mrf.mxu0  ;;  %11835 = vmatmul.mubr.msk.f32.gmra.mxu0 %vm501_vm0, %v5521_v51  ;;  %v5523_v43 = vld [vmem:[#allocation2 + $0x2c0] sm:$0xff] }
 0x3ed   :  { %v2627_v17 = vadd.f32 %v2626_v1, %v20474_v14  ;;  %11837 = vmatprep.mubr.msk.f32.mxu0 %vm501_vm0, %v5522_v61  ;;  %v15820_v31 = vadd.f32 %v15619_v54, %v2632_v4  ;;  %v5524_v54 = vld [vmem:[#allocation2 + $0x2d0] sm:$0xff] }
 0x3ee   :  { %v11452_v40 = vpop.f32.mrf.mxu1  ;;  %11707 = vmatmul.mubr.msk.f32.gmra.mxu1 %vm501_vm0, %v4795_v11  ;;  %v15825_v38 = vpop.f32.mrf.mxu0  ;;  %v15837_v4 = vld [vmem:[#allocation2 + $0x1ea] sm:$0xff] }
 0x3ef   :  { %v3990_v53 = vadd.f32 %v11452_v40, %v15179_v22  ;;  %11709 = vmatprep.mubr.msk.f32.mxu1 %vm501_vm0, %v15823_v32  ;;  %v15831_v51 = vadd.f32 %v15633_v34, %v2627_v17  ;;  %v15845_v34 = vld [vmem:[#allocation2 + $0x1fa] sm:$0xff] }
 0x3f0   :  { %v3670_v1 = vpop.f32.mrf.mxu1  ;;  %v15833_v61 = vpop.f32.mrf.mxu0  ;;  %11838 = vmatmul.mubr.msk.f32.gmra.mxu0 %vm501_vm0, %v5523_v43 }
 0x3f1   :  { %v3989_v11 = vadd.f32 %v3670_v1, %v15189_v20  ;;  %11840 = vmatprep.mubr.msk.f32.mxu0 %vm501_vm0, %v5524_v54  ;;  %v15841_v22 = vadd.f32 %v15641_v55, %v3990_v53  ;;  %v5525_v20 = vld [vmem:[#allocation2 + $0x2d8] sm:$0xff]  ;;  %v5526_v53 = vld [vmem:[#allocation2 + $0x2e8] sm:$0xff] }
 0x3f2   :  { %v11455_v14 = vpop.f32.mrf.mxu1  ;;  %11710 = vmatmul.mubr.msk.f32.gmra.mxu1 %vm501_vm0, %v15837_v4  ;;  %v15847_v17 = vpop.f32.mrf.mxu0 }
 0x3f3   :  { %20475 = vst [vmem:[#allocation67_spill] sm:$0xff] %v15841_v22  ;;  %v3992_v40 = vadd.f32 %v11455_v14, %v15197_v21  ;;  %11712 = vmatprep.mubr.msk.f32.mxu1 %vm501_vm0, %v15845_v34  ;;  %v15853_v43 = vadd.f32 %v15655_v46, %v3989_v11  ;;  %v15859_v22 = vld [vmem:[#allocation2 + $0x202] sm:$0xff]  ;;  %v15867_v46 = vld [vmem:[#allocation2 + $0x212] sm:$0xff] }
 0x3f4   :  { %v3680_v1 = vpop.f32.mrf.mxu1  ;;  %v15855_v55 = vpop.f32.mrf.mxu0  ;;  %11841 = vmatmul.mubr.msk.f32.gmra.mxu0 %vm501_vm0, %v5525_v20 }
 0x3f5   :  { %20476 = vst [vmem:[#allocation68_spill] sm:$0xff] %v15853_v43  ;;  %v3991_v54 = vadd.f32 %v3680_v1, %v15207_v59  ;;  %11843 = vmatprep.mubr.msk.f32.mxu0 %vm501_vm0, %v5526_v53  ;;  %v15863_v21 = vadd.f32 %v15663_v16, %v3992_v40  ;;  %v5527_v59 = vld [vmem:[#allocation2 + $0x2f0] sm:$0xff]  ;;  %v5528_v40 = vld [vmem:[#allocation2 + $0x300] sm:$0xff] }
 0x3f6   :  { %v11458_v14 = vpop.f32.mrf.mxu1  ;;  %11713 = vmatmul.mubr.msk.f32.gmra.mxu1 %vm501_vm0, %v15859_v22  ;;  %v15869_v11 = vpop.f32.mrf.mxu0  ;;  %v15881_v43 = vld [vmem:[#allocation2 + $0x21a] sm:$0xff] }
 0x3f7   :  { %20477 = vst [vmem:[#allocation70_spill] sm:$0xff] %v15863_v21  ;;  %v3994_v20 = vadd.f32 %v11458_v14, %v15215_v25  ;;  %11715 = vmatprep.mubr.msk.f32.mxu1 %vm501_vm0, %v15867_v46  ;;  %v15875_v1 = vadd.f32 %v15677_v37, %v3991_v54  ;;  %v15889_v37 = vld [vmem:[#allocation2 + $0x22a] sm:$0xff] }
 0x3f8   :  { %v3690_v53 = vpop.f32.mrf.mxu1  ;;  %v15877_v16 = vpop.f32.mrf.mxu0  ;;  %11844 = vmatmul.mubr.msk.f32.gmra.mxu0 %vm501_vm0, %v5527_v59 }
 0x3f9   :  { %20478 = vst [vmem:[#allocation71_spill] sm:$0xff] %v15875_v1  ;;  %v3993_v21 = vadd.f32 %v3690_v53, %v15225_v36  ;;  %11846 = vmatprep.mubr.msk.f32.mxu0 %vm501_vm0, %v5528_v40  ;;  %v15885_v25 = vadd.f32 %v15685_v62, %v3994_v20  ;;  %v5529_v36 = vld [vmem:[#allocation2 + $0x308] sm:$0xff]  ;;  %v5530_v20 = vld [vmem:[#allocation2 + $0x318] sm:$0xff] }
 0x3fa   :  { %v11461_v14 = vpop.f32.mrf.mxu1  ;;  %11716 = vmatmul.mubr.msk.f32.gmra.mxu1 %vm501_vm0, %v15881_v43  ;;  %v15891_v54 = vpop.f32.mrf.mxu0  ;;  %v15903_v1 = vld [vmem:[#allocation2 + $0x232] sm:$0xff] }
 0x3fb   :  { %20479 = vst [vmem:[#allocation72_spill] sm:$0xff] %v15885_v25  ;;  %v3996_v59 = vadd.f32 %v11461_v14, %v15233_v60  ;;  %11718 = vmatprep.mubr.msk.f32.mxu1 %vm501_vm0, %v15889_v37  ;;  %v15897_v53 = vadd.f32 %v15699_v10, %v3993_v21  ;;  %v15911_v10 = vld [vmem:[#allocation2 + $0x242] sm:$0xff] }
 0x3fc   :  { %v3700_v40 = vpop.f32.mrf.mxu1  ;;  %v15899_v62 = vpop.f32.mrf.mxu0  ;;  %11847 = vmatmul.mubr.msk.f32.gmra.mxu0 %vm501_vm0, %v5529_v36 }
 0x3fd   :  { %v3995_v25 = vadd.f32 %v3700_v40, %v15243_v2  ;;  %11849 = vmatprep.mubr.msk.f32.mxu0 %vm501_vm0, %v5530_v20  ;;  %v15907_v60 = vadd.f32 %v15707_v45, %v3996_v59  ;;  %v5531_v2 = vld [vmem:[#allocation2 + $0x320] sm:$0xff] }
 0x3fe   :  { %v11464_v14 = vpop.f32.mrf.mxu1  ;;  %11719 = vmatmul.mubr.msk.f32.gmra.mxu1 %vm501_vm0, %v15903_v1  ;;  %v15913_v21 = vpop.f32.mrf.mxu0 }
 0x3ff   :  { %20480 = vst [vmem:[#allocation73_spill] sm:$0xff] %v15907_v60  ;;  %v3998_v36 = vadd.f32 %v11464_v14, %v15251_v42  ;;  %11721 = vmatprep.mubr.msk.f32.mxu1 %vm501_vm0, %v15911_v10  ;;  %v15919_v40 = vadd.f32 %v15721_v24, %v3995_v25  ;;  %v15925_v60 = vld [vmem:[#allocation2 + $0x24a] sm:$0xff]  ;;  %v15934_v24 = vld [vmem:[#allocation2 + $0x25a] sm:$0xff] }
 0x400   :  { %v3710_v20 = vpop.f32.mrf.mxu1  ;;  %v15921_v45 = vpop.f32.mrf.mxu0  ;;  %11850 = vmatmul.mubr.msk.f32.gmra.mxu0 %vm501_vm0, %v5531_v2 }
 0x401   :  { %20481 = vst [vmem:[#allocation74_spill] sm:$0xff] %v15919_v40  ;;  %v3997_v59 = vadd.f32 %v3710_v20, %v15261_v57  ;;  %11852 = vmatprep.mubr.msk.f32.mxu0 %vm501_vm0, %v15427_v3  ;;  %v15930_v42 = vadd.f32 %v15729_v50, %v3998_v36  ;;  %v5534_v40 = vld [vmem:[#allocation2 + $0x348] sm:$0xff] }
 0x402   :  { %v11467_v14 = vpop.f32.mrf.mxu1  ;;  %11722 = vmatmul.mubr.msk.f32.gmra.mxu1 %vm501_vm0, %v15925_v60  ;;  %v15936_v25 = vpop.f32.mrf.mxu0  ;;  %v15949_v20 = vld [vmem:[#allocation2 + $0x262] sm:$0xff] }
 0x403   :  { %20482 = vst [vmem:[#allocation75_spill] sm:$0xff] %v15930_v42  ;;  %v4000_v2 = vadd.f32 %v11467_v14, %v15269_v6  ;;  %11724 = vmatprep.mubr.msk.f32.mxu1 %vm501_vm0, %v15934_v24  ;;  %v15942_v57 = vadd.f32 %v15743_v7, %v3997_v59  ;;  %v5535_v42 = vld [vmem:[#allocation2 + $0x350] sm:$0xff] }
 0x404   :  { %v3720_v3 = vpop.f32.mrf.mxu1  ;;  %v15944_v50 = vpop.f32.mrf.mxu0  ;;  %11853 = vmatmul.mubr.msk.f32.gmra.mxu0 %vm501_vm0, %v15441_v8  ;;  %v15957_v7 = vld [vmem:[#allocation2 + $0x272] sm:$0xff] }
 0x405   :  { %20483 = vst [vmem:[#allocation76_spill] sm:$0xff] %v15942_v57  ;;  %v3999_v36 = vadd.f32 %v3720_v3, %v15279_v41  ;;  %11855 = vmatprep.mubr.msk.f32.mxu0 %vm501_vm0, %v5534_v40  ;;  %v15953_v6 = vadd.f32 %v15751_v0, %v4000_v2  ;;  %v15971_v2 = vld [vmem:[#allocation2 + $0x27a] sm:$0xff] }
 0x406   :  { %v11470_v14 = vpop.f32.mrf.mxu1  ;;  %11725 = vmatmul.mubr.msk.f32.gmra.mxu1 %vm501_vm0, %v15949_v20  ;;  %v15959_v59 = vpop.f32.mrf.mxu0  ;;  %v20523_v57 = vld [vmem:[#allocation38_spill] sm:$0xff] }
 0x407   :  { %20484 = vst [vmem:[#allocation77_spill] sm:$0xff] %v15953_v6  ;;  %v4002_v8 = vadd.f32 %v11470_v14, %v15287_v63  ;;  %11727 = vmatprep.mubr.msk.f32.mxu1 %vm501_vm0, %v15957_v7  ;;  %v15965_v41 = vadd.f32 %v15765_v27, %v3999_v36  ;;  %v15980_v27 = vld [vmem:[#allocation2 + $0x28a] sm:$0xff]  ;;  %v16163_v6 = vld [vmem:[#allocation2 + $0x33a] sm:$0xff] }
 0x408   :  { %v3730_v40 = vpop.f32.mrf.mxu1  ;;  %v15967_v3 = vpop.f32.mrf.mxu0  ;;  %11856 = vmatmul.mubr.msk.f32.gmra.mxu0 %vm501_vm0, %v5535_v42 }
 0x409   :  { %20485 = vst [vmem:[#allocation78_spill] sm:$0xff] %v15965_v41  ;;  %v4001_v0 = vadd.f32 %v3730_v40, %v15300_v49  ;;  %11970 = vmatprep.mubr.msk.f32.mxu0 %vm501_vm0, %v15468_v30  ;;  %v15976_v63 = vadd.f32 %v15773_v12, %v4002_v8  ;;  %v15995_v8 = vld [vmem:[#allocation2 + $0x292] sm:$0xff] }
 0x40a   :  { %v11473_v14 = vpop.f32.mrf.mxu1  ;;  %11728 = vmatmul.mubr.msk.f32.gmra.mxu1 %vm501_vm0, %v15971_v2  ;;  %v15982_v36 = vpop.f32.mrf.mxu0  ;;  %v20515_v41 = vld [vmem:[#allocation33_spill] sm:$0xff] }
 0x40b   :  { %20486 = vst [vmem:[#allocation79_spill] sm:$0xff] %v15976_v63  ;;  %v4004_v42 = vadd.f32 %v11473_v14, %v15312_v56  ;;  %11730 = vmatprep.mubr.msk.f32.mxu1 %vm501_vm0, %v15980_v27  ;;  %v15988_v49 = vadd.f32 %v15787_v39, %v4001_v0  ;;  %v16004_v39 = vld [vmem:[#allocation2 + $0x2a2] sm:$0xff] }
 0x40c   :  { %v3740_v30 = vpop.f32.mrf.mxu1  ;;  %v15990_v40 = vpop.f32.mrf.mxu0  ;;  %11971 = vmatmul.mubr.msk.f32.vlgmr.msra.gmra.mxu0 %vm501_vm0, %v15486_v58  ;;  %v16139_v63 = vld [vmem:[#allocation2 + $0x322] sm:$0xff] }
 0x40d   :  { %20487 = vst [vmem:[#allocation80_spill] sm:$0xff] %v15988_v49  ;;  %v4003_v12 = vadd.f32 %v3740_v30, %v15322_v18  ;;  %11973 = vmatprep.mubr.msk.f32.mxu0 %vm501_vm0, %v15497_v26  ;;  %v16000_v56 = vadd.f32 %v15795_v48, %v4004_v42  ;;  %v16019_v42 = vld [vmem:[#allocation2 + $0x2aa] sm:$0xff]  ;;  %v20507_v49 = vld [vmem:[#allocation30_spill] sm:$0xff] }
 0x40e   :  { %v11476_v14 = vpop.f32.mrf.mxu1  ;;  %11731 = vmatmul.mubr.msk.f32.gmra.mxu1 %vm501_vm0, %v15995_v8  ;;  %v16006_v0 = vpop.f32.mrf.mxu0 }
 0x40f   :  { %20488 = vst [vmem:[#allocation81_spill] sm:$0xff] %v16000_v56  ;;  %v4006_v58 = vadd.f32 %v11476_v14, %v15333_v9  ;;  %11733 = vmatprep.mubr.msk.f32.mxu1 %vm501_vm0, %v16004_v39  ;;  %v16012_v18 = vadd.f32 %v15807_v5, %v4003_v12  ;;  %v16028_v5 = vld [vmem:[#allocation2 + $0x2ba] sm:$0xff]  ;;  %v16115_v56 = vld [vmem:[#allocation2 + $0x30a] sm:$0xff] }
 0x410   :  { %v3750_v26 = vpop.f32.mrf.mxu1  ;;  %v16014_v30 = vpop.f32.mrf.mxu0  ;;  %11974 = vmatmul.mubr.msk.f32.gmra.mxu0 %vm501_vm0, %v15511_v15 }
 0x411   :  { %20489 = vst [vmem:[#allocation82_spill] sm:$0xff] %v16012_v18  ;;  %v4005_v48 = vadd.f32 %v3750_v26, %v15343_v33  ;;  %11976 = vmatprep.mubr.msk.f32.mxu0 %vm501_vm0, %v15519_v28  ;;  %v16024_v9 = vadd.f32 %v15814_v19, %v4006_v58  ;;  %v16043_v58 = vld [vmem:[#allocation2 + $0x2c2] sm:$0xff]  ;;  %v20501_v18 = vld [vmem:[#allocation25_spill] sm:$0xff] }
 0x412   :  { %v11479_v14 = vpop.f32.mrf.mxu1  ;;  %11734 = vmatmul.mubr.msk.f32.gmra.mxu1 %vm501_vm0, %v16019_v42  ;;  %v16030_v12 = vpop.f32.mrf.mxu0 }
 0x413   :  { %20490 = vst [vmem:[#allocation83_spill] sm:$0xff] %v16024_v9  ;;  %v4008_v15 = vadd.f32 %v11479_v14, %v15351_v13  ;;  %11736 = vmatprep.mubr.msk.f32.mxu1 %vm501_vm0, %v16028_v5  ;;  %v16036_v33 = vadd.f32 %v15825_v38, %v4005_v48  ;;  %v16052_v38 = vld [vmem:[#allocation2 + $0x2d2] sm:$0xff] }
 0x414   :  { %v3760_v28 = vpop.f32.mrf.mxu1  ;;  %v16038_v26 = vpop.f32.mrf.mxu0  ;;  %11977 = vmatmul.mubr.msk.f32.gmra.mxu0 %vm501_vm0, %v15533_v35  ;;  %v16091_v9 = vld [vmem:[#allocation2 + $0x2f2] sm:$0xff] }
 0x415   :  { %20491 = vst [vmem:[#allocation84_spill] sm:$0xff] %v16036_v33  ;;  %v4007_v19 = vadd.f32 %v3760_v28, %v15361_v47  ;;  %11979 = vmatprep.mubr.msk.f32.mxu0 %vm501_vm0, %v15541_v44  ;;  %v16048_v13 = vadd.f32 %v15833_v61, %v4008_v15  ;;  %v20494_v61 = vld [vmem:[#allocation18_spill] sm:$0xff]  ;;  %v20495_v33 = vld [vmem:[#allocation49_spill] sm:$0xff] }
 0x416   :  { %v11482_v14 = vpop.f32.mrf.mxu1  ;;  %11737 = vmatmul.mubr.msk.f32.gmra.mxu1 %vm501_vm0, %v16043_v58  ;;  %v16054_v48 = vpop.f32.mrf.mxu0 }
 0x417   :  { %20492 = vst [vmem:[#allocation85_spill] sm:$0xff] %v16048_v13  ;;  %v4010_v35 = vadd.f32 %v11482_v14, %v15369_v29  ;;  %11739 = vmatprep.mubr.msk.f32.mxu1 %vm501_vm0, %v16052_v38  ;;  %v16060_v47 = vadd.f32 %v15847_v17, %v4007_v19  ;;  %v16067_v13 = vld [vmem:[#allocation2 + $0x2da] sm:$0xff]  ;;  %v16076_v17 = vld [vmem:[#allocation2 + $0x2ea] sm:$0xff] }
 0x418   :  { %v3770_v44 = vpop.f32.mrf.mxu1  ;;  %v16062_v28 = vpop.f32.mrf.mxu0  ;;  %11980 = vmatmul.mubr.msk.f32.gmra.mxu0 %vm501_vm0, %v15555_v23 }
 0x419   :  { %20493 = vst [vmem:[#allocation86_spill] sm:$0xff] %v16060_v47  ;;  %v4009_v15 = vadd.f32 %v3770_v44, %v20494_v61  ;;  %11982 = vmatprep.mubr.msk.f32.mxu0 %vm501_vm0, %v20495_v33  ;;  %v16072_v29 = vadd.f32 %v15855_v55, %v4010_v35  ;;  %v20497_v47 = vld [vmem:[#allocation19_spill] sm:$0xff]  ;;  %v20499_v55 = vld [vmem:[#allocation24_spill] sm:$0xff] }
 0x41a   :  { %v11485_v14 = vpop.f32.mrf.mxu1  ;;  %11740 = vmatmul.mubr.msk.f32.gmra.mxu1 %vm501_vm0, %v16067_v13  ;;  %v16078_v19 = vpop.f32.mrf.mxu0  ;;  %v20500_v35 = vld [vmem:[#allocation20_spill] sm:$0xff] }
 0x41b   :  { %20496 = vst [vmem:[#allocation18_spill] sm:$0xff] %v16072_v29  ;;  %v4012_v23 = vadd.f32 %v11485_v14, %v20497_v47  ;;  %11742 = vmatprep.mubr.msk.f32.mxu1 %vm501_vm0, %v16076_v17  ;;  %v16084_v44 = vadd.f32 %v15869_v11, %v4009_v15  ;;  %v16100_v11 = vld [vmem:[#allocation2 + $0x302] sm:$0xff] }
 0x41c   :  { %v3780_v33 = vpop.f32.mrf.mxu1  ;;  %v16086_v61 = vpop.f32.mrf.mxu0  ;;  %11983 = vmatmul.mubr.msk.f32.gmra.mxu0 %vm501_vm0, %v20499_v55 }
 0x41d   :  { %20498 = vst [vmem:[#allocation49_spill] sm:$0xff] %v16084_v44  ;;  %v4011_v29 = vadd.f32 %v3780_v33, %v20500_v35  ;;  %11985 = vmatprep.mubr.msk.f32.mxu0 %vm501_vm0, %v20501_v18  ;;  %v16096_v47 = vadd.f32 %v15877_v16, %v4012_v23  ;;  %v20503_v44 = vld [vmem:[#allocation27_spill] sm:$0xff]  ;;  %v20505_v16 = vld [vmem:[#allocation16_spill] sm:$0xff]  ;;  %v20506_v23 = vld [vmem:[#allocation29_spill] sm:$0xff] }
 0x41e   :  { %v11488_v14 = vpop.f32.mrf.mxu1  ;;  %11743 = vmatmul.mubr.msk.f32.gmra.mxu1 %vm501_vm0, %v16091_v9  ;;  %v16102_v15 = vpop.f32.mrf.mxu0  ;;  %20514 = vst [vmem:[#allocation16_spill] sm:$0xff] %v16139_v63 }
 0x41f   :  { %20502 = vst [vmem:[#allocation19_spill] sm:$0xff] %v16096_v47  ;;  %v4014_v55 = vadd.f32 %v11488_v14, %v20503_v44  ;;  %11745 = vmatprep.mubr.msk.f32.mxu1 %vm501_vm0, %v16100_v11  ;;  %v16108_v33 = vadd.f32 %v15891_v54, %v4011_v29  ;;  %v16124_v54 = vld [vmem:[#allocation2 + $0x31a] sm:$0xff] }
 0x420   :  { %v3790_v18 = vpop.f32.mrf.mxu1  ;;  %v16110_v35 = vpop.f32.mrf.mxu0  ;;  %11986 = vmatmul.mubr.msk.f32.gmra.mxu0 %vm501_vm0, %v20505_v16  ;;  %20509 = vst [vmem:[#allocation25_spill] sm:$0xff] %v16124_v54 }
 0x421   :  { %20504 = vst [vmem:[#allocation24_spill] sm:$0xff] %v16108_v33  ;;  %v4013_v47 = vadd.f32 %v3790_v18, %v20506_v23  ;;  %11988 = vmatprep.mubr.msk.f32.mxu0 %vm501_vm0, %v20507_v49  ;;  %v16120_v44 = vadd.f32 %v15899_v62, %v4014_v55  ;;  %v20510_v33 = vld [vmem:[#allocation15_spill] sm:$0xff]  ;;  %v20512_v62 = vld [vmem:[#allocation32_spill] sm:$0xff]  ;;  %v20513_v55 = vld [vmem:[#allocation6_spill] sm:$0xff] }
 0x422   :  { %v11491_v14 = vpop.f32.mrf.mxu1  ;;  %11746 = vmatmul.mubr.msk.f32.gmra.mxu1 %vm501_vm0, %v16115_v56  ;;  %v16126_v29 = vpop.f32.mrf.mxu0  ;;  %20522 = vst [vmem:[#allocation32_spill] sm:$0xff] %v16163_v6 }
 0x423   :  { %20508 = vst [vmem:[#allocation20_spill] sm:$0xff] %v16120_v44  ;;  %v4016_v16 = vadd.f32 %v11491_v14, %v20510_v33  ;;  %11748 = vmatprep.mubr.msk.f32.mxu1 %vm501_vm0, %v16124_v54  ;;  %v16132_v18 = vadd.f32 %v15913_v21, %v4013_v47  ;;  %v16148_v21 = vld [vmem:[#allocation2 + $0x332] sm:$0xff] }
 0x424   :  { %v3800_v49 = vpop.f32.mrf.mxu1  ;;  %v16134_v23 = vpop.f32.mrf.mxu0  ;;  %11989 = vmatmul.mubr.msk.f32.gmra.mxu0 %vm501_vm0, %v20512_v62  ;;  %20517 = vst [vmem:[#allocation30_spill] sm:$0xff] %v16148_v21 }
 0x425   :  { %20511 = vst [vmem:[#allocation27_spill] sm:$0xff] %v16132_v18  ;;  %v4015_v44 = vadd.f32 %v3800_v49, %v20513_v55  ;;  %11991 = vmatprep.mubr.msk.f32.mxu0 %vm501_vm0, %v20515_v41  ;;  %v16144_v33 = vadd.f32 %v15921_v45, %v4016_v16  ;;  %v20518_v18 = vld [vmem:[#allocation8_spill] sm:$0xff]  ;;  %v20521_v16 = vld [vmem:[#allocation7_spill] sm:$0xff] }
 0x426   :  { %v11494_v14 = vpop.f32.mrf.mxu1  ;;  %11749 = vmatmul.mubr.msk.f32.gmra.mxu1 %vm501_vm0, %v16139_v63  ;;  %v16150_v47 = vpop.f32.mrf.mxu0  ;;  %v20520_v45 = vld [vmem:[#allocation36_spill] sm:$0xff] }
 0x427   :  { %20516 = vst [vmem:[#allocation29_spill] sm:$0xff] %v16144_v33  ;;  %v4018_v62 = vadd.f32 %v11494_v14, %v20518_v18  ;;  %11751 = vmatprep.mubr.msk.f32.mxu1 %vm501_vm0, %v16148_v21  ;;  %v16156_v49 = vadd.f32 %v15936_v25, %v4015_v44  ;;  %v6181_v25 = vld [vmem:[#allocation2 + $0x31] sm:$0xff] }
 0x428   :  { %v3810_v41 = vpop.f32.mrf.mxu1  ;;  %v16158_v55 = vpop.f32.mrf.mxu0  ;;  %11992 = vmatmul.mubr.msk.f32.gmra.mxu0 %vm501_vm0, %v20520_v45 }
 0x429   :  { %20519 = vst [vmem:[#allocation15_spill] sm:$0xff] %v16156_v49  ;;  %v4017_v33 = vadd.f32 %v3810_v41, %v20521_v16  ;;  %11994 = vmatprep.mubr.msk.f32.mxu0 %vm501_vm0, %v20523_v57  ;;  %v16168_v18 = vadd.f32 %v15944_v50, %v4018_v62  ;;  %v20525_v49 = vld [vmem:[#allocation10_spill] sm:$0xff]  ;;  %v20527_v57 = vld [vmem:[#allocation40_spill] sm:$0xff]  ;;  %v20528_v50 = vld [vmem:[#allocation9_spill] sm:$0xff] }
 0x42a   :  { %v11497_v14 = vpop.f32.mrf.mxu1  ;;  %11752 = vmatmul.mubr.msk.f32.gmra.mxu1 %vm501_vm0, %v16163_v6  ;;  %v16172_v44 = vpop.f32.mrf.mxu0  ;;  %v20529_v6 = vld [vmem:[#allocation42_spill] sm:$0xff] }
 0x42b   :  { %20524 = vst [vmem:[#allocation6_spill] sm:$0xff] %v16168_v18  ;;  %v4020_v21 = vadd.f32 %v11497_v14, %v20525_v49  ;;  %11866 = vmatprep.mubr.msk.f32.mxu1 %vm501_vm0, %v6181_v25  ;;  %v16177_v41 = vadd.f32 %v15959_v59, %v4017_v33  ;;  %v6182_v18 = vld [vmem:[#allocation2 + $0x39] sm:$0xff]  ;;  %v6183_v59 = vld [vmem:[#allocation2 + $0x49] sm:$0xff] }
 0x42c   :  { %v3820_v45 = vpop.f32.mrf.mxu1  ;;  %v16179_v16 = vpop.f32.mrf.mxu0  ;;  %11995 = vmatmul.mubr.msk.f32.gmra.mxu0 %vm501_vm0, %v20527_v57  ;;  %v20531_v14 = vld [vmem:[#allocation12_spill] sm:$0xff] }
 0x42d   :  { %20526 = vst [vmem:[#allocation33_spill] sm:$0xff] %v16177_v41  ;;  %v4019_v62 = vadd.f32 %v3820_v45, %v20528_v50  ;;  %11997 = vmatprep.mubr.msk.f32.mxu0 %vm501_vm0, %v20529_v6  ;;  %v16187_v63 = vadd.f32 %v15967_v3, %v4020_v21  ;;  %v20533_v6 = vld [vmem:[#allocation43_spill] sm:$0xff]  ;;  %v20534_v3 = vld [vmem:[#allocation21_spill] sm:$0xff] }
 0x42e   :  { %v11500_v49 = vpop.f32.mrf.mxu1  ;;  %11867 = vmatmul.mubr.msk.f32.vlgmr.msra.gmra.mxu1 %vm501_vm0, %v6182_v18  ;;  %v16190_v33 = vpop.f32.mrf.mxu0  ;;  %v20535_v18 = vld [vmem:[#allocation44_spill] sm:$0xff] }
 0x42f   :  { %20530 = vst [vmem:[#allocation8_spill] sm:$0xff] %v16187_v63  ;;  %v4022_v25 = vadd.f32 %v11500_v49, %v20531_v14  ;;  %11869 = vmatprep.mubr.msk.f32.mxu1 %vm501_vm0, %v6183_v59  ;;  %v16195_v57 = vadd.f32 %v15982_v36, %v4019_v62  ;;  %v6184_v63 = vld [vmem:[#allocation2 + $0x51] sm:$0xff]  ;;  %v6185_v36 = vld [vmem:[#allocation2 + $0x61] sm:$0xff] }
 0x430   :  { %v3830_v45 = vpop.f32.mrf.mxu1  ;;  %v16197_v50 = vpop.f32.mrf.mxu0  ;;  %11998 = vmatmul.mubr.msk.f32.gmra.mxu0 %vm501_vm0, %v20533_v6  ;;  %v20537_v59 = vld [vmem:[#allocation11_spill] sm:$0xff] }
 0x431   :  { %20532 = vst [vmem:[#allocation36_spill] sm:$0xff] %v16195_v57  ;;  %v4021_v21 = vadd.f32 %v3830_v45, %v20534_v3  ;;  %12000 = vmatprep.mubr.msk.f32.mxu0 %vm501_vm0, %v20535_v18  ;;  %v16205_v41 = vadd.f32 %v15990_v40, %v4022_v25  ;;  %v20539_v18 = vld [vmem:[#allocation46_spill] sm:$0xff] }
 0x432   :  { %v11503_v49 = vpop.f32.mrf.mxu1  ;;  %11870 = vmatmul.mubr.msk.f32.gmra.mxu1 %vm501_vm0, %v6184_v63  ;;  %v16208_v62 = vpop.f32.mrf.mxu0  ;;  %v20540_v40 = vld [vmem:[#allocation22_spill] sm:$0xff] }
 0x433   :  { %20536 = vst [vmem:[#allocation7_spill] sm:$0xff] %v16205_v41  ;;  %v4024_v14 = vadd.f32 %v11503_v49, %v20537_v59  ;;  %11872 = vmatprep.mubr.msk.f32.mxu1 %vm501_vm0, %v6185_v36  ;;  %v16213_v6 = vadd.f32 %v16006_v0, %v4021_v21  ;;  %v6186_v41 = vld [vmem:[#allocation2 + $0x69] sm:$0xff]  ;;  %v20541_v63 = vld [vmem:[#allocation50_spill] sm:$0xff] }
 0x434   :  { %v3840_v45 = vpop.f32.mrf.mxu1  ;;  %v16215_v3 = vpop.f32.mrf.mxu0  ;;  %12001 = vmatmul.mubr.msk.f32.gmra.mxu0 %vm501_vm0, %v20539_v18  ;;  %v6187_v0 = vld [vmem:[#allocation2 + $0x79] sm:$0xff]  ;;  %v20543_v36 = vld [vmem:[#allocation23_spill] sm:$0xff] }
 0x435   :  { %20538 = vst [vmem:[#allocation38_spill] sm:$0xff] %v16213_v6  ;;  %v4023_v25 = vadd.f32 %v3840_v45, %v20540_v40  ;;  %12003 = vmatprep.mubr.msk.f32.mxu0 %vm501_vm0, %v20541_v63  ;;  %v16223_v57 = vadd.f32 %v16014_v30, %v4024_v14  ;;  %v20545_v63 = vld [vmem:[#allocation52_spill] sm:$0xff]  ;;  %v20546_v30 = vld [vmem:[#allocation47_spill] sm:$0xff] }
 0x436   :  { %v11506_v49 = vpop.f32.mrf.mxu1  ;;  %11873 = vmatmul.mubr.msk.f32.gmra.mxu1 %vm501_vm0, %v6186_v41  ;;  %v16226_v21 = vpop.f32.mrf.mxu0  ;;  %v20547_v41 = vld [vmem:[#allocation54_spill] sm:$0xff] }
 0x437   :  { %20542 = vst [vmem:[#allocation10_spill] sm:$0xff] %v16223_v57  ;;  %v4026_v59 = vadd.f32 %v11506_v49, %v20543_v36  ;;  %11875 = vmatprep.mubr.msk.f32.mxu1 %vm501_vm0, %v6187_v0  ;;  %v16231_v18 = vadd.f32 %v16030_v12, %v4023_v25  ;;  %v6188_v57 = vld [vmem:[#allocation2 + $0x81] sm:$0xff]  ;;  %v6189_v12 = vld [vmem:[#allocation2 + $0x91] sm:$0xff] }
 0x438   :  { %v3850_v45 = vpop.f32.mrf.mxu1  ;;  %v16233_v40 = vpop.f32.mrf.mxu0  ;;  %12004 = vmatmul.mubr.msk.f32.gmra.mxu0 %vm501_vm0, %v20545_v63  ;;  %v20549_v0 = vld [vmem:[#allocation14_spill] sm:$0xff] }
 0x439   :  { %20544 = vst [vmem:[#allocation40_spill] sm:$0xff] %v16231_v18  ;;  %v4025_v14 = vadd.f32 %v3850_v45, %v20546_v30  ;;  %12006 = vmatprep.mubr.msk.f32.mxu0 %vm501_vm0, %v20547_v41  ;;  %v16241_v6 = vadd.f32 %v16038_v26, %v4026_v59  ;;  %v20551_v41 = vld [vmem:[#allocation56_spill] sm:$0xff]  ;;  %v20552_v26 = vld [vmem:[#allocation26_spill] sm:$0xff] }
 0x43a   :  { %v11509_v49 = vpop.f32.mrf.mxu1  ;;  %11876 = vmatmul.mubr.msk.f32.gmra.mxu1 %vm501_vm0, %v6188_v57  ;;  %v16244_v25 = vpop.f32.mrf.mxu0  ;;  %v20553_v57 = vld [vmem:[#allocation58_spill] sm:$0xff] }
 0x43b   :  { %20548 = vst [vmem:[#allocation9_spill] sm:$0xff] %v16241_v6  ;;  %v4028_v36 = vadd.f32 %v11509_v49, %v20549_v0  ;;  %11878 = vmatprep.mubr.msk.f32.mxu1 %vm501_vm0, %v6189_v12  ;;  %v16249_v63 = vadd.f32 %v16054_v48, %v4025_v14  ;;  %v6190_v6 = vld [vmem:[#allocation2 + $0x99] sm:$0xff]  ;;  %v6191_v48 = vld [vmem:[#allocation2 + $0xa9] sm:$0xff] }
 0x43c   :  { %v3860_v45 = vpop.f32.mrf.mxu1  ;;  %v16251_v30 = vpop.f32.mrf.mxu0  ;;  %12007 = vmatmul.mubr.msk.f32.gmra.mxu0 %vm501_vm0, %v20551_v41  ;;  %v20555_v12 = vld [vmem:[#allocation17_spill] sm:$0xff] }
 0x43d   :  { %20550 = vst [vmem:[#allocation42_spill] sm:$0xff] %v16249_v63  ;;  %v4027_v59 = vadd.f32 %v3860_v45, %v20552_v26  ;;  %12009 = vmatprep.mubr.msk.f32.mxu0 %vm501_vm0, %v20553_v57  ;;  %v16259_v18 = vadd.f32 %v16062_v28, %v4028_v36  ;;  %v20557_v57 = vld [vmem:[#allocation60_spill] sm:$0xff] }
 0x43e   :  { %v11512_v49 = vpop.f32.mrf.mxu1  ;;  %11879 = vmatmul.mubr.msk.f32.gmra.mxu1 %vm501_vm0, %v6190_v6  ;;  %v16262_v14 = vpop.f32.mrf.mxu0  ;;  %v20558_v28 = vld [vmem:[#allocation28_spill] sm:$0xff]  ;;  %v20559_v6 = vld [vmem:[#allocation62_spill] sm:$0xff] }
 0x43f   :  { %20554 = vst [vmem:[#allocation12_spill] sm:$0xff] %v16259_v18  ;;  %v4030_v0 = vadd.f32 %v11512_v49, %v20555_v12  ;;  %11881 = vmatprep.mubr.msk.f32.mxu1 %vm501_vm0, %v6191_v48  ;;  %v16267_v41 = vadd.f32 %v16078_v19, %v4027_v59  ;;  %v6192_v18 = vld [vmem:[#allocation2 + $0xb1] sm:$0xff]  ;;  %v6193_v19 = vld [vmem:[#allocation2 + $0xc1] sm:$0xff] }
 0x440   :  { %v3870_v45 = vpop.f32.mrf.mxu1  ;;  %v16269_v26 = vpop.f32.mrf.mxu0  ;;  %12010 = vmatmul.mubr.msk.f32.gmra.mxu0 %vm501_vm0, %v20557_v57  ;;  %v6920_v48 = vld [vmem:[#allocation2 + $0x19a] sm:$0xff] }
 0x441   :  { %20556 = vst [vmem:[#allocation43_spill] sm:$0xff] %v16267_v41  ;;  %v4029_v36 = vadd.f32 %v3870_v45, %v20558_v28  ;;  %12012 = vmatprep.mubr.msk.f32.mxu0 %vm501_vm0, %v20559_v6  ;;  %v16277_v63 = vadd.f32 %v16086_v61, %v4030_v0  ;;  %v20561_v12 = vld [vmem:[#allocation13_spill] sm:$0xff]  ;;  %v20563_v61 = vld [vmem:[#allocation31_spill] sm:$0xff] }
 0x442   :  { %v11515_v49 = vpop.f32.mrf.mxu1  ;;  %11882 = vmatmul.mubr.msk.f32.gmra.mxu1 %vm501_vm0, %v6192_v18  ;;  %v16280_v59 = vpop.f32.mrf.mxu0  ;;  %v20562_v6 = vld [vmem:[#allocation65_spill] sm:$0xff]  ;;  %v6194_v18 = vld [vmem:[#allocation2 + $0xc9] sm:$0xff] }
 0x443   :  { %20560 = vst [vmem:[#allocation21_spill] sm:$0xff] %v16277_v63  ;;  %v4032_v41 = vadd.f32 %v11515_v49, %v20561_v12  ;;  %11884 = vmatprep.mubr.msk.f32.mxu1 %vm501_vm0, %v6193_v19  ;;  %v16285_v45 = vadd.f32 %v16102_v15, %v4029_v36  ;;  %v6921_v63 = vld [vmem:[#allocation2 + $0x1a2] sm:$0xff]  ;;  %v6195_v15 = vld [vmem:[#allocation2 + $0xd9] sm:$0xff] }
 0x444   :  { %v3880_v57 = vpop.f32.mrf.mxu1  ;;  %v16287_v28 = vpop.f32.mrf.mxu0  ;;  %12013 = vmatmul.mubr.msk.f32.gmra.mxu0 %vm501_vm0, %v20562_v6  ;;  %v20564_v19 = vld [vmem:[#allocation35_spill] sm:$0xff] }
 0x445   :  { %v4031_v0 = vadd.f32 %v3880_v57, %v20563_v61  ;;  %12015 = vmatprep.mubr.msk.f32.mxu0 %vm501_vm0, %v6920_v48  ;;  %v16294_v54 = vadd.f32 %v16110_v35, %v4032_v41  ;;  %v20565_v35 = vld [vmem:[#allocation34_spill] sm:$0xff] }
 0x446   :  { %v11518_v49 = vpop.f32.mrf.mxu1  ;;  %11885 = vmatmul.mubr.msk.f32.gmra.mxu1 %vm501_vm0, %v6194_v18  ;;  %v16297_v36 = vpop.f32.mrf.mxu0  ;;  %v6196_v48 = vld [vmem:[#allocation2 + $0xe1] sm:$0xff] }
 0x447   :  { %v4034_v12 = vadd.f32 %v11518_v49, %v20564_v19  ;;  %11887 = vmatprep.mubr.msk.f32.mxu1 %vm501_vm0, %v6195_v15  ;;  %v16302_v6 = vadd.f32 %v16126_v29, %v4031_v0  ;;  %v6197_v15 = vld [vmem:[#allocation2 + $0xf1] sm:$0xff] }
 0x448   :  { %v3890_v57 = vpop.f32.mrf.mxu1  ;;  %v16304_v61 = vpop.f32.mrf.mxu0  ;;  %12016 = vmatmul.mubr.msk.f32.gmra.mxu0 %vm501_vm0, %v6921_v63  ;;  %v20566_v0 = vld [vmem:[#allocation37_spill] sm:$0xff] }
 0x449   :  { %v4033_v41 = vadd.f32 %v3890_v57, %v20565_v35  ;;  %12018 = vmatprep.mubr.msk.f32.mxu0 %vm501_vm0, %v15823_v32  ;;  %v16311_v18 = vadd.f32 %v16134_v23, %v4034_v12  ;;  %v20567_v32 = vld [vmem:[#allocation39_spill] sm:$0xff]  ;;  %v6198_v12 = vld [vmem:[#allocation2 + $0xf9] sm:$0xff] }
 0x44a   :  { %v11521_v49 = vpop.f32.mrf.mxu1  ;;  %11888 = vmatmul.mubr.msk.f32.gmra.mxu1 %vm501_vm0, %v6196_v48  ;;  %v16314_v29 = vpop.f32.mrf.mxu0 }
 0x44b   :  { %v4036_v19 = vadd.f32 %v11521_v49, %v20566_v0  ;;  %11890 = vmatprep.mubr.msk.f32.mxu1 %vm501_vm0, %v6197_v15  ;;  %v16319_v63 = vadd.f32 %v16150_v47, %v4033_v41  ;;  %v6199_v47 = vld [vmem:[#allocation2 + $0x109] sm:$0xff]  ;;  %v20568_v15 = vld [vmem:[#allocation41_spill] sm:$0xff] }
 0x44c   :  { %v3900_v57 = vpop.f32.mrf.mxu1  ;;  %v16321_v35 = vpop.f32.mrf.mxu0  ;;  %12019 = vmatmul.mubr.msk.f32.gmra.mxu0 %vm501_vm0, %v15837_v4 }
 0x44d   :  { %v4035_v23 = vadd.f32 %v3900_v57, %v20567_v32  ;;  %12021 = vmatprep.mubr.msk.f32.mxu0 %vm501_vm0, %v15845_v34  ;;  %v16329_v48 = vadd.f32 %v16158_v55, %v4036_v19  ;;  %v20569_v34 = vld [vmem:[#allocation64_spill] sm:$0xff] }
 0x44e   :  { %v11524_v49 = vpop.f32.mrf.mxu1  ;;  %11891 = vmatmul.mubr.msk.f32.gmra.mxu1 %vm501_vm0, %v6198_v12  ;;  %v16332_v41 = vpop.f32.mrf.mxu0  ;;  %v6200_v19 = vld [vmem:[#allocation2 + $0x111] sm:$0xff] }
 0x44f   :  { %v4038_v0 = vadd.f32 %v11524_v49, %v20568_v15  ;;  %11893 = vmatprep.mubr.msk.f32.mxu1 %vm501_vm0, %v6199_v47  ;;  %v16337_v4 = vadd.f32 %v16172_v44, %v4035_v23  ;;  %v6201_v44 = vld [vmem:[#allocation2 + $0x121] sm:$0xff] }
 0x450   :  { %v3910_v57 = vpop.f32.mrf.mxu1  ;;  %v16339_v32 = vpop.f32.mrf.mxu0  ;;  %12022 = vmatmul.mubr.msk.f32.gmra.mxu0 %vm501_vm0, %v15859_v22  ;;  %v20570_v47 = vld [vmem:[#allocation66_spill] sm:$0xff] }
 0x451   :  { %v4037_v55 = vadd.f32 %v3910_v57, %v20569_v34  ;;  %12024 = vmatprep.mubr.msk.f32.mxu0 %vm501_vm0, %v15867_v46  ;;  %v16347_v12 = vadd.f32 %v16179_v16, %v4038_v0  ;;  %v20571_v46 = vld [vmem:[#allocation45_spill] sm:$0xff]  ;;  %v6202_v0 = vld [vmem:[#allocation2 + $0x129] sm:$0xff] }
 0x452   :  { %v11527_v49 = vpop.f32.mrf.mxu1  ;;  %11894 = vmatmul.mubr.msk.f32.gmra.mxu1 %vm501_vm0, %v6200_v19  ;;  %v16350_v23 = vpop.f32.mrf.mxu0 }
 0x453   :  { %v4040_v15 = vadd.f32 %v11527_v49, %v20570_v47  ;;  %11896 = vmatprep.mubr.msk.f32.mxu1 %vm501_vm0, %v6201_v44  ;;  %v16355_v22 = vadd.f32 %v16190_v33, %v4037_v55  ;;  %v6203_v33 = vld [vmem:[#allocation2 + $0x139] sm:$0xff]  ;;  %v20572_v44 = vld [vmem:[#allocation48_spill] sm:$0xff] }
 0x454   :  { %v3920_v57 = vpop.f32.mrf.mxu1  ;;  %v16357_v34 = vpop.f32.mrf.mxu0  ;;  %12025 = vmatmul.mubr.msk.f32.gmra.mxu0 %vm501_vm0, %v15881_v43 }
 0x455   :  { %v4039_v16 = vadd.f32 %v3920_v57, %v20571_v46  ;;  %12027 = vmatprep.mubr.msk.f32.mxu0 %vm501_vm0, %v15889_v37  ;;  %v16365_v19 = vadd.f32 %v16197_v50, %v4040_v15  ;;  %v20573_v37 = vld [vmem:[#allocation51_spill] sm:$0xff] }
 0x456   :  { %v11530_v49 = vpop.f32.mrf.mxu1  ;;  %11897 = vmatmul.mubr.msk.f32.gmra.mxu1 %vm501_vm0, %v6202_v0  ;;  %v16368_v55 = vpop.f32.mrf.mxu0  ;;  %v6204_v15 = vld [vmem:[#allocation2 + $0x141] sm:$0xff] }
 0x457   :  { %v4042_v47 = vadd.f32 %v11530_v49, %v20572_v44  ;;  %11899 = vmatprep.mubr.msk.f32.mxu1 %vm501_vm0, %v6203_v33  ;;  %v16373_v43 = vadd.f32 %v16208_v62, %v4039_v16  ;;  %v6205_v62 = vld [vmem:[#allocation2 + $0x151] sm:$0xff] }
 0x458   :  { %v3930_v57 = vpop.f32.mrf.mxu1  ;;  %v16375_v46 = vpop.f32.mrf.mxu0  ;;  %12028 = vmatmul.mubr.msk.f32.gmra.mxu0 %vm501_vm0, %v15903_v1  ;;  %v20574_v33 = vld [vmem:[#allocation53_spill] sm:$0xff] }
 0x459   :  { %v4041_v50 = vadd.f32 %v3930_v57, %v20573_v37  ;;  %12030 = vmatprep.mubr.msk.f32.mxu0 %vm501_vm0, %v15911_v10  ;;  %v16383_v0 = vadd.f32 %v16215_v3, %v4042_v47  ;;  %v20575_v10 = vld [vmem:[#allocation55_spill] sm:$0xff]  ;;  %v6206_v47 = vld [vmem:[#allocation2 + $0x159] sm:$0xff] }
 0x45a   :  { %v11533_v49 = vpop.f32.mrf.mxu1  ;;  %11900 = vmatmul.mubr.msk.f32.gmra.mxu1 %vm501_vm0, %v6204_v15  ;;  %v16386_v16 = vpop.f32.mrf.mxu0 }
 0x45b   :  { %v4044_v44 = vadd.f32 %v11533_v49, %v20574_v33  ;;  %11902 = vmatprep.mubr.msk.f32.mxu1 %vm501_vm0, %v6205_v62  ;;  %v16391_v1 = vadd.f32 %v16226_v21, %v4041_v50  ;;  %v6207_v21 = vld [vmem:[#allocation2 + $0x169] sm:$0xff]  ;;  %v20576_v62 = vld [vmem:[#allocation57_spill] sm:$0xff] }
 0x45c   :  { %v3940_v57 = vpop.f32.mrf.mxu1  ;;  %v16393_v37 = vpop.f32.mrf.mxu0  ;;  %12031 = vmatmul.mubr.msk.f32.gmra.mxu0 %vm501_vm0, %v15925_v60 }
 0x45d   :  { %v4043_v3 = vadd.f32 %v3940_v57, %v20575_v10  ;;  %12033 = vmatprep.mubr.msk.f32.mxu0 %vm501_vm0, %v15934_v24  ;;  %v16401_v15 = vadd.f32 %v16233_v40, %v4044_v44  ;;  %v20578_v24 = vld [vmem:[#allocation59_spill] sm:$0xff]  ;;  %v6208_v44 = vld [vmem:[#allocation2 + $0x171] sm:$0xff] }
 0x45e   :  { %v11536_v49 = vpop.f32.mrf.mxu1  ;;  %11903 = vmatmul.mubr.msk.f32.gmra.mxu1 %vm501_vm0, %v6206_v47  ;;  %v16404_v50 = vpop.f32.mrf.mxu0 }
 0x45f   :  { %v4046_v33 = vadd.f32 %v11536_v49, %v20576_v62  ;;  %11905 = vmatprep.mubr.msk.f32.mxu1 %vm501_vm0, %v6207_v21  ;;  %v16409_v60 = vadd.f32 %v16244_v25, %v4043_v3  ;;  %v6209_v25 = vld [vmem:[#allocation2 + $0x181] sm:$0xff]  ;;  %v20579_v21 = vld [vmem:[#allocation61_spill] sm:$0xff] }
 0x460   :  { %v3950_v57 = vpop.f32.mrf.mxu1  ;;  %v16411_v10 = vpop.f32.mrf.mxu0  ;;  %12034 = vmatmul.mubr.msk.f32.gmra.mxu0 %vm501_vm0, %v15949_v20 }
 0x461   :  { %20577 = vst [vmem:[#allocation44_spill] sm:$0xff] %v16409_v60  ;;  %v4045_v40 = vadd.f32 %v3950_v57, %v20578_v24  ;;  %12036 = vmatprep.mubr.msk.f32.mxu0 %vm501_vm0, %v15957_v7  ;;  %v16419_v47 = vadd.f32 %v16251_v30, %v4046_v33  ;;  %v6211_v24 = vld [vmem:[#allocation2 + $0x199] sm:$0xff]  ;;  %v20580_v7 = vld [vmem:[#allocation63_spill] sm:$0xff] }
 0x462   :  { %v11539_v49 = vpop.f32.mrf.mxu1  ;;  %11906 = vmatmul.mubr.msk.f32.gmra.mxu1 %vm501_vm0, %v6208_v44  ;;  %v16422_v3 = vpop.f32.mrf.mxu0  ;;  %v6210_v33 = vld [vmem:[#allocation2 + $0x189] sm:$0xff] }
 0x463   :  { %v4048_v62 = vadd.f32 %v11539_v49, %v20579_v21  ;;  %11908 = vmatprep.mubr.msk.f32.mxu1 %vm501_vm0, %v6209_v25  ;;  %v16427_v20 = vadd.f32 %v16262_v14, %v4045_v40  ;;  %v20581_v40 = vld [vmem:[#allocation69_spill] sm:$0xff]  ;;  %v6212_v21 = vld [vmem:[#allocation2 + $0x1a1] sm:$0xff] }
 0x464   :  { %v3960_v57 = vpop.f32.mrf.mxu1  ;;  %v16429_v60 = vpop.f32.mrf.mxu0  ;;  %12037 = vmatmul.mubr.msk.f32.gmra.mxu0 %vm501_vm0, %v15971_v2 }
 0x465   :  { %v4047_v30 = vadd.f32 %v3960_v57, %v20580_v7  ;;  %12039 = vmatprep.mubr.msk.f32.mxu0 %vm501_vm0, %v15980_v27  ;;  %v16437_v44 = vadd.f32 %v16269_v26, %v4048_v62 }
 0x466   :  { %v11542_v49 = vpop.f32.mrf.mxu1  ;;  %11909 = vmatmul.mubr.msk.f32.gmra.mxu1 %vm501_vm0, %v6210_v33  ;;  %v16440_v14 = vpop.f32.mrf.mxu0 }
 0x467   :  { %v4050_v25 = vadd.f32 %v11542_v49, %v20581_v40  ;;  %11911 = vmatprep.mubr.msk.f32.mxu1 %vm501_vm0, %v6211_v24  ;;  %v16445_v2 = vadd.f32 %v16280_v59, %v4047_v30  ;;  %v6213_v24 = vld [vmem:[#allocation2 + $0x1e1] sm:$0xff] }
 0x468   :  { %v3970_v57 = vpop.f32.mrf.mxu1  ;;  %v16447_v7 = vpop.f32.mrf.mxu0  ;;  %12040 = vmatmul.mubr.msk.f32.gmra.mxu0 %vm501_vm0, %v15995_v8 }
 0x469   :  { %v4049_v27 = vadd.f32 %v3970_v57, %v15812_v52  ;;  %12042 = vmatprep.mubr.msk.f32.mxu0 %vm501_vm0, %v16004_v39  ;;  %v16455_v26 = vadd.f32 %v16287_v28, %v4050_v25  ;;  %v6214_v28 = vld [vmem:[#allocation2 + $0x1e9] sm:$0xff] }
 0x46a   :  { %v11545_v62 = vpop.f32.mrf.mxu1  ;;  %11912 = vmatmul.mubr.msk.f32.gmra.mxu1 %vm501_vm0, %v6212_v21  ;;  %v16458_v59 = vpop.f32.mrf.mxu0  ;;  %v20582_v25 = vld [vmem:[#allocation67_spill] sm:$0xff] }
 0x46b   :  { %v4052_v30 = vadd.f32 %v11545_v62, %v15820_v31  ;;  %11914 = vmatprep.mubr.msk.f32.mxu1 %vm501_vm0, %v6213_v24  ;;  %v16463_v8 = vadd.f32 %v16297_v36, %v4049_v27  ;;  %v6215_v36 = vld [vmem:[#allocation2 + $0x1f9] sm:$0xff]  ;;  %v6216_v27 = vld [vmem:[#allocation2 + $0x201] sm:$0xff] }
 0x46c   :  { %v3980_v52 = vpop.f32.mrf.mxu1  ;;  %v16465_v33 = vpop.f32.mrf.mxu0  ;;  %12043 = vmatmul.mubr.msk.f32.gmra.mxu0 %vm501_vm0, %v16019_v42 }
 0x46d   :  { %v4051_v39 = vadd.f32 %v3980_v52, %v15831_v51  ;;  %12045 = vmatprep.mubr.msk.f32.mxu0 %vm501_vm0, %v16028_v5  ;;  %v16473_v49 = vadd.f32 %v16304_v61, %v4052_v30  ;;  %v20583_v5 = vld [vmem:[#allocation68_spill] sm:$0xff]  ;;  %v20584_v52 = vld [vmem:[#allocation70_spill] sm:$0xff] }
 0x46e   :  { %v11660_v31 = vpop.f32.mrf.mxu1  ;;  %11915 = vmatmul.mubr.msk.f32.gmra.mxu1 %vm501_vm0, %v6214_v28  ;;  %v16476_v40 = vpop.f32.mrf.mxu0 }
 0x46f   :  { %v5408_v21 = vadd.f32 %v11660_v31, %v20582_v25  ;;  %11917 = vmatprep.mubr.msk.f32.mxu1 %vm501_vm0, %v6215_v36  ;;  %v16481_v42 = vadd.f32 %v16314_v29, %v4051_v39  ;;  %v6217_v29 = vld [vmem:[#allocation2 + $0x211] sm:$0xff]  ;;  %v6218_v36 = vld [vmem:[#allocation2 + $0x219] sm:$0xff] }
 0x470   :  { %v5088_v51 = vpop.f32.mrf.mxu1  ;;  %v16483_v57 = vpop.f32.mrf.mxu0  ;;  %12046 = vmatmul.mubr.msk.f32.gmra.mxu0 %vm501_vm0, %v16043_v58 }
 0x471   :  { %v5407_v61 = vadd.f32 %v5088_v51, %v20583_v5  ;;  %12048 = vmatprep.mubr.msk.f32.mxu0 %vm501_vm0, %v16052_v38  ;;  %v16491_v62 = vadd.f32 %v16321_v35, %v5408_v21  ;;  %v20585_v38 = vld [vmem:[#allocation71_spill] sm:$0xff]  ;;  %v20586_v5 = vld [vmem:[#allocation72_spill] sm:$0xff] }
 0x472   :  { %v11663_v24 = vpop.f32.mrf.mxu1  ;;  %11918 = vmatmul.mubr.msk.f32.gmra.mxu1 %vm501_vm0, %v6216_v27  ;;  %v16494_v30 = vpop.f32.mrf.mxu0  ;;  %v6219_v21 = vld [vmem:[#allocation2 + $0x229] sm:$0xff] }
 0x473   :  { %v5410_v39 = vadd.f32 %v11663_v24, %v20584_v52  ;;  %11920 = vmatprep.mubr.msk.f32.mxu1 %vm501_vm0, %v6217_v29  ;;  %v16499_v58 = vadd.f32 %v16332_v41, %v5407_v61  ;;  %v6220_v29 = vld [vmem:[#allocation2 + $0x231] sm:$0xff]  ;;  %v6221_v52 = vld [vmem:[#allocation2 + $0x241] sm:$0xff] }
 0x474   :  { %v5098_v28 = vpop.f32.mrf.mxu1  ;;  %v16501_v31 = vpop.f32.mrf.mxu0  ;;  %12049 = vmatmul.mubr.msk.f32.gmra.mxu0 %vm501_vm0, %v16067_v13 }
 0x475   :  { %v5409_v35 = vadd.f32 %v5098_v28, %v20585_v38  ;;  %12051 = vmatprep.mubr.msk.f32.mxu0 %vm501_vm0, %v16076_v17  ;;  %v16512_v41 = vadd.f32 %v16339_v32, %v5410_v39 }
 0x476   :  { %v11666_v25 = vpop.f32.mrf.mxu1  ;;  %11921 = vmatmul.mubr.msk.f32.gmra.mxu1 %vm501_vm0, %v6218_v36  ;;  %v16509_v51 = vpop.f32.mrf.mxu0 }
 0x477   :  { %v5412_v61 = vadd.f32 %v11666_v25, %v20586_v5  ;;  %11923 = vmatprep.mubr.msk.f32.mxu1 %vm501_vm0, %v6219_v21  ;;  %v16517_v13 = vadd.f32 %v16350_v23, %v5409_v35  ;;  %v20587_v23 = vld [vmem:[#allocation73_spill] sm:$0xff]  ;;  %v6222_v25 = vld [vmem:[#allocation2 + $0x249] sm:$0xff] }
 0x478   :  { %v5108_v27 = vpop.f32.mrf.mxu1  ;;  %v16519_v24 = vpop.f32.mrf.mxu0  ;;  %12052 = vmatmul.mubr.msk.f32.gmra.mxu0 %vm501_vm0, %v16091_v9  ;;  %v20589_v21 = vld [vmem:[#allocation25_spill] sm:$0xff] }
 0x479   :  { %v5411_v17 = vadd.f32 %v5108_v27, %v15897_v53  ;;  %12054 = vmatprep.mubr.msk.f32.mxu0 %vm501_vm0, %v16100_v11  ;;  %v16536_v53 = vadd.f32 %v16357_v34, %v5412_v61  ;;  %v20588_v11 = vld [vmem:[#allocation74_spill] sm:$0xff]  ;;  %v20591_v34 = vld [vmem:[#allocation75_spill] sm:$0xff] }
 0x47a   :  { %v11669_v32 = vpop.f32.mrf.mxu1  ;;  %11924 = vmatmul.mubr.msk.f32.gmra.mxu1 %vm501_vm0, %v6220_v29  ;;  %v16527_v39 = vpop.f32.mrf.mxu0  ;;  %v6223_v27 = vld [vmem:[#allocation2 + $0x259] sm:$0xff] }
 0x47b   :  { %v5414_v28 = vadd.f32 %v11669_v32, %v20587_v23  ;;  %11926 = vmatprep.mubr.msk.f32.mxu1 %vm501_vm0, %v6221_v52  ;;  %v16539_v9 = vadd.f32 %v16368_v55, %v5411_v17  ;;  %v20593_v52 = vld [vmem:[#allocation16_spill] sm:$0xff] }
 0x47c   :  { %v5118_v38 = vpop.f32.mrf.mxu1  ;;  %v16531_v35 = vpop.f32.mrf.mxu0  ;;  %12055 = vmatmul.mubr.msk.f32.gmra.mxu0 %vm501_vm0, %v16115_v56  ;;  %v20594_v23 = vld [vmem:[#allocation76_spill] sm:$0xff] }
 0x47d   :  { %v5413_v36 = vadd.f32 %v5118_v38, %v20588_v11  ;;  %12057 = vmatprep.mubr.msk.f32.mxu0 %vm501_vm0, %v20589_v21  ;;  %v16548_v56 = vadd.f32 %v16375_v46, %v5414_v28  ;;  %v6224_v11 = vld [vmem:[#allocation2 + $0x261] sm:$0xff]  ;;  %v6225_v28 = vld [vmem:[#allocation2 + $0x271] sm:$0xff] }
 0x47e   :  { %v11672_v5 = vpop.f32.mrf.mxu1  ;;  %11927 = vmatmul.mubr.msk.f32.gmra.mxu1 %vm501_vm0, %v6222_v25  ;;  %v16545_v29 = vpop.f32.mrf.mxu0  ;;  %v20595_v25 = vld [vmem:[#allocation30_spill] sm:$0xff] }
 0x47f   :  { %20590 = vst [vmem:[#allocation11_spill] sm:$0xff] %v16548_v56  ;;  %v5416_v61 = vadd.f32 %v11672_v5, %v20591_v34  ;;  %11929 = vmatprep.mubr.msk.f32.mxu1 %vm501_vm0, %v6223_v27  ;;  %v16553_v55 = vadd.f32 %v16386_v16, %v5413_v36  ;;  %v6952_v16 = vld [vmem:[#allocation2 + $0x34a] sm:$0xff]  ;;  %v20597_v5 = vld [vmem:[#allocation77_spill] sm:$0xff] }
 0x480   :  { %v5128_v17 = vpop.f32.mrf.mxu1  ;;  %v16555_v32 = vpop.f32.mrf.mxu0  ;;  %12058 = vmatmul.mubr.msk.f32.gmra.mxu0 %vm501_vm0, %v20593_v52 }
 0x481   :  { %20592 = vst [vmem:[#allocation46_spill] sm:$0xff] %v16553_v55  ;;  %v5415_v38 = vadd.f32 %v5128_v17, %v20594_v23  ;;  %12060 = vmatprep.mubr.msk.f32.mxu0 %vm501_vm0, %v20595_v25  ;;  %v16566_v36 = vadd.f32 %v16393_v37, %v5416_v61  ;;  %v20599_v23 = vld [vmem:[#allocation32_spill] sm:$0xff]  ;;  %v6226_v55 = vld [vmem:[#allocation2 + $0x279] sm:$0xff] }
 0x482   :  { %v11675_v46 = vpop.f32.mrf.mxu1  ;;  %11930 = vmatmul.mubr.msk.f32.gmra.mxu1 %vm501_vm0, %v6224_v11  ;;  %v16563_v21 = vpop.f32.mrf.mxu0  ;;  %v20600_v11 = vld [vmem:[#allocation78_spill] sm:$0xff]  ;;  %v6953_v37 = vld [vmem:[#allocation2 + $0x352] sm:$0xff] }
 0x483   :  { %20596 = vst [vmem:[#allocation22_spill] sm:$0xff] %v16566_v36  ;;  %v5418_v27 = vadd.f32 %v11675_v46, %v20597_v5  ;;  %11932 = vmatprep.mubr.msk.f32.mxu1 %vm501_vm0, %v6225_v28  ;;  %v16571_v34 = vadd.f32 %v16404_v50, %v5415_v38  ;;  %v6227_v46 = vld [vmem:[#allocation2 + $0x289] sm:$0xff] }
 0x484   :  { %v5138_v17 = vpop.f32.mrf.mxu1  ;;  %v16573_v52 = vpop.f32.mrf.mxu0  ;;  %12061 = vmatmul.mubr.msk.f32.gmra.mxu0 %vm501_vm0, %v20599_v23  ;;  %v20602_v38 = vld [vmem:[#allocation79_spill] sm:$0xff] }
 0x485   :  { %20598 = vst [vmem:[#allocation50_spill] sm:$0xff] %v16571_v34  ;;  %v5417_v25 = vadd.f32 %v5138_v17, %v20600_v11  ;;  %12063 = vmatprep.mubr.msk.f32.mxu0 %vm501_vm0, %v6952_v16  ;;  %v16583_v50 = vadd.f32 %v16411_v10, %v5418_v27  ;;  %v20604_v16 = vld [vmem:[#allocation80_spill] sm:$0xff]  ;;  %v6229_v10 = vld [vmem:[#allocation2 + $0x2a1] sm:$0xff] }
 0x486   :  { %v11678_v61 = vpop.f32.mrf.mxu1  ;;  %11933 = vmatmul.mubr.msk.f32.gmra.mxu1 %vm501_vm0, %v6226_v55  ;;  %v16580_v28 = vpop.f32.mrf.mxu0  ;;  %v6228_v34 = vld [vmem:[#allocation2 + $0x291] sm:$0xff] }
 0x487   :  { %20601 = vst [vmem:[#allocation23_spill] sm:$0xff] %v16583_v50  ;;  %v5420_v5 = vadd.f32 %v11678_v61, %v20602_v38  ;;  %11935 = vmatprep.mubr.msk.f32.mxu1 %vm501_vm0, %v6227_v46  ;;  %v16588_v23 = vadd.f32 %v16422_v3, %v5417_v25  ;;  %v20606_v46 = vld [vmem:[#allocation81_spill] sm:$0xff] }
 0x488   :  { %v5148_v17 = vpop.f32.mrf.mxu1  ;;  %v16590_v11 = vpop.f32.mrf.mxu0  ;;  %12064 = vmatmul.mubr.msk.f32.gmra.mxu0 %vm501_vm0, %v6953_v37  ;;  %v6231_v50 = vld [vmem:[#allocation2 + $0x2b9] sm:$0xff] }
 0x489   :  { %20603 = vst [vmem:[#allocation52_spill] sm:$0xff] %v16588_v23  ;;  %v5419_v55 = vadd.f32 %v5148_v17, %v20604_v16  ;;  %v16598_v61 = vadd.f32 %v16429_v60, %v5420_v5  ;;  %v20608_v17 = vld [vmem:[#allocation82_spill] sm:$0xff]  ;;  %v6230_v23 = vld [vmem:[#allocation2 + $0x2a9] sm:$0xff] }
 0x48a   :  { %v11681_v36 = vpop.f32.mrf.mxu1  ;;  %11936 = vmatmul.mubr.msk.f32.gmra.mxu1 %vm501_vm0, %v6228_v34  ;;  %v16595_v27 = vpop.f32.mrf.mxu0 }
 0x48b   :  { %20605 = vst [vmem:[#allocation47_spill] sm:$0xff] %v16598_v61  ;;  %v5422_v3 = vadd.f32 %v11681_v36, %v20606_v46  ;;  %11938 = vmatprep.mubr.msk.f32.mxu1 %vm501_vm0, %v6229_v10  ;;  %v16603_v25 = vadd.f32 %v16440_v14, %v5419_v55  ;;  %v20610_v36 = vld [vmem:[#allocation83_spill] sm:$0xff]  ;;  %v20612_v46 = vld [vmem:[#allocation84_spill] sm:$0xff] }
 0x48c   :  { %v5158_v37 = vpop.f32.mrf.mxu1  ;;  %v16605_v38 = vpop.f32.mrf.mxu0 }
 0x48d   :  { %20607 = vst [vmem:[#allocation54_spill] sm:$0xff] %v16603_v25  ;;  %v5421_v16 = vadd.f32 %v5158_v37, %v20608_v17  ;;  %v16612_v60 = vadd.f32 %v16447_v7, %v5422_v3  ;;  %v6232_v17 = vld [vmem:[#allocation2 + $0x2c1] sm:$0xff]  ;;  %v6233_v25 = vld [vmem:[#allocation2 + $0x2d1] sm:$0xff] }
 0x48e   :  { %v11684_v34 = vpop.f32.mrf.mxu1  ;;  %11939 = vmatmul.mubr.msk.f32.gmra.mxu1 %vm501_vm0, %v6230_v23  ;;  %v16609_v56 = vpop.f32.mrf.mxu0  ;;  %v20614_v3 = vld [vmem:[#allocation85_spill] sm:$0xff] }
 0x48f   :  { %20609 = vst [vmem:[#allocation14_spill] sm:$0xff] %v16612_v60  ;;  %v5424_v5 = vadd.f32 %v11684_v34, %v20610_v36  ;;  %11941 = vmatprep.mubr.msk.f32.mxu1 %vm501_vm0, %v6231_v50  ;;  %v16617_v14 = vadd.f32 %v16458_v59, %v5421_v16  ;;  %v20616_v36 = vld [vmem:[#allocation86_spill] sm:$0xff] }
 0x490   :  { %v5168_v55 = vpop.f32.mrf.mxu1  ;;  %v16619_v10 = vpop.f32.mrf.mxu0 }
 0x491   :  { %20611 = vst [vmem:[#allocation56_spill] sm:$0xff] %v16617_v14  ;;  %v5423_v37 = vadd.f32 %v5168_v55, %v20612_v46  ;;  %v16626_v7 = vadd.f32 %v16465_v33, %v5424_v5  ;;  %v6234_v46 = vld [vmem:[#allocation2 + $0x2d9] sm:$0xff]  ;;  %v6235_v14 = vld [vmem:[#allocation2 + $0x2e9] sm:$0xff] }
 0x492   :  { %v11687_v23 = vpop.f32.mrf.mxu1  ;;  %11942 = vmatmul.mubr.msk.f32.gmra.mxu1 %vm501_vm0, %v6232_v17  ;;  %v16623_v61 = vpop.f32.mrf.mxu0  ;;  %v20618_v5 = vld [vmem:[#allocation18_spill] sm:$0xff] }
 0x493   :  { %20613 = vst [vmem:[#allocation26_spill] sm:$0xff] %v16626_v7  ;;  %v5426_v50 = vadd.f32 %v11687_v23, %v20614_v3  ;;  %11944 = vmatprep.mubr.msk.f32.mxu1 %vm501_vm0, %v6233_v25  ;;  %v16631_v59 = vadd.f32 %v16476_v40, %v5423_v37  ;;  %v20620_v3 = vld [vmem:[#allocation49_spill] sm:$0xff] }
 0x494   :  { %v5178_v16 = vpop.f32.mrf.mxu1  ;;  %v16633_v34 = vpop.f32.mrf.mxu0 }
 0x495   :  { %20615 = vst [vmem:[#allocation58_spill] sm:$0xff] %v16631_v59  ;;  %v5425_v55 = vadd.f32 %v5178_v16, %v20616_v36  ;;  %v16640_v33 = vadd.f32 %v16483_v57, %v5426_v50  ;;  %v6236_v36 = vld [vmem:[#allocation2 + $0x2f1] sm:$0xff]  ;;  %v6237_v59 = vld [vmem:[#allocation2 + $0x301] sm:$0xff] }
 0x496   :  { %v11690_v17 = vpop.f32.mrf.mxu1  ;;  %11945 = vmatmul.mubr.msk.f32.gmra.mxu1 %vm501_vm0, %v6234_v46  ;;  %v16637_v60 = vpop.f32.mrf.mxu0  ;;  %v20622_v50 = vld [vmem:[#allocation19_spill] sm:$0xff] }
 0x497   :  { %20617 = vst [vmem:[#allocation17_spill] sm:$0xff] %v16640_v33  ;;  %v5428_v25 = vadd.f32 %v11690_v17, %v20618_v5  ;;  %11947 = vmatprep.mubr.msk.f32.mxu1 %vm501_vm0, %v6235_v14  ;;  %v16645_v40 = vadd.f32 %v16494_v30, %v5425_v55  ;;  %v20624_v5 = vld [vmem:[#allocation24_spill] sm:$0xff] }
 0x498   :  { %v5188_v37 = vpop.f32.mrf.mxu1  ;;  %v16647_v23 = vpop.f32.mrf.mxu0 }
 0x499   :  { %20619 = vst [vmem:[#allocation60_spill] sm:$0xff] %v16645_v40  ;;  %v5427_v16 = vadd.f32 %v5188_v37, %v20620_v3  ;;  %v16654_v57 = vadd.f32 %v16501_v31, %v5428_v25  ;;  %v6238_v3 = vld [vmem:[#allocation2 + $0x309] sm:$0xff]  ;;  %v6239_v40 = vld [vmem:[#allocation2 + $0x319] sm:$0xff] }
 0x49a   :  { %v11693_v46 = vpop.f32.mrf.mxu1  ;;  %11948 = vmatmul.mubr.msk.f32.gmra.mxu1 %vm501_vm0, %v6236_v36  ;;  %v16651_v7 = vpop.f32.mrf.mxu0  ;;  %v20626_v25 = vld [vmem:[#allocation20_spill] sm:$0xff] }
 0x49b   :  { %20621 = vst [vmem:[#allocation28_spill] sm:$0xff] %v16654_v57  ;;  %v5430_v14 = vadd.f32 %v11693_v46, %v20622_v50  ;;  %11950 = vmatprep.mubr.msk.f32.mxu1 %vm501_vm0, %v6237_v59  ;;  %v16659_v30 = vadd.f32 %v16509_v51, %v5427_v16  ;;  %v20628_v50 = vld [vmem:[#allocation27_spill] sm:$0xff] }
 0x49c   :  { %v5198_v55 = vpop.f32.mrf.mxu1  ;;  %v16661_v17 = vpop.f32.mrf.mxu0 }
 0x49d   :  { %20623 = vst [vmem:[#allocation62_spill] sm:$0xff] %v16659_v30  ;;  %v5429_v37 = vadd.f32 %v5198_v55, %v20624_v5  ;;  %v16668_v31 = vadd.f32 %v16519_v24, %v5430_v14  ;;  %v6240_v5 = vld [vmem:[#allocation2 + $0x321] sm:$0xff]  ;;  %v6241_v30 = vld [vmem:[#allocation2 + $0x331] sm:$0xff] }
 0x49e   :  { %v11696_v36 = vpop.f32.mrf.mxu1  ;;  %11951 = vmatmul.mubr.msk.f32.gmra.mxu1 %vm501_vm0, %v6238_v3  ;;  %v16665_v33 = vpop.f32.mrf.mxu0  ;;  %v20630_v14 = vld [vmem:[#allocation29_spill] sm:$0xff] }
 0x49f   :  { %20625 = vst [vmem:[#allocation13_spill] sm:$0xff] %v16668_v31  ;;  %v5432_v59 = vadd.f32 %v11696_v36, %v20626_v25  ;;  %11953 = vmatprep.mubr.msk.f32.mxu1 %vm501_vm0, %v6239_v40  ;;  %v16673_v51 = vadd.f32 %v16527_v39, %v5429_v37  ;;  %v6243_v36 = vld [vmem:[#allocation2 + $0x349] sm:$0xff] }
 0x4a0   :  { %v5208_v16 = vpop.f32.mrf.mxu1  ;;  %v16675_v46 = vpop.f32.mrf.mxu0 }
 0x4a1   :  { %20627 = vst [vmem:[#allocation65_spill] sm:$0xff] %v16673_v51  ;;  %v5431_v55 = vadd.f32 %v5208_v16, %v20628_v50  ;;  %v16682_v24 = vadd.f32 %v16531_v35, %v5432_v59  ;;  %v20632_v16 = vld [vmem:[#allocation15_spill] sm:$0xff]  ;;  %v20634_v59 = vld [vmem:[#allocation6_spill] sm:$0xff] }
 0x4a2   :  { %v11699_v3 = vpop.f32.mrf.mxu1  ;;  %11954 = vmatmul.mubr.msk.f32.gmra.mxu1 %vm501_vm0, %v6240_v5  ;;  %v16679_v57 = vpop.f32.mrf.mxu0  ;;  %v6242_v5 = vld [vmem:[#allocation2 + $0x339] sm:$0xff] }
 0x4a3   :  { %20629 = vst [vmem:[#allocation31_spill] sm:$0xff] %v16682_v24  ;;  %v5434_v40 = vadd.f32 %v11699_v3, %v20630_v14  ;;  %11956 = vmatprep.mubr.msk.f32.mxu1 %vm501_vm0, %v6241_v30  ;;  %v16687_v39 = vadd.f32 %v16545_v29, %v5431_v55  ;;  %v6244_v29 = vld [vmem:[#allocation2 + $0x351] sm:$0xff] }
 0x4a4   :  { %v5218_v37 = vpop.f32.mrf.mxu1  ;;  %v16689_v25 = vpop.f32.mrf.mxu0 }
 0x4a5   :  { %20631 = vst [vmem:[#allocation35_spill] sm:$0xff] %v16687_v39  ;;  %v5433_v50 = vadd.f32 %v5218_v37, %v20632_v16  ;;  %v16696_v35 = vadd.f32 %v16555_v32, %v5434_v40  ;;  %v20636_v37 = vld [vmem:[#allocation33_spill] sm:$0xff] }
 0x4a6   :  { %v11702_v51 = vpop.f32.mrf.mxu1  ;;  %11957 = vmatmul.mubr.msk.f32.gmra.mxu1 %vm501_vm0, %v6242_v5  ;;  %v16693_v31 = vpop.f32.mrf.mxu0 }
 0x4a7   :  { %20633 = vst [vmem:[#allocation34_spill] sm:$0xff] %v16696_v35  ;;  %v5436_v30 = vadd.f32 %v11702_v51, %v20634_v59  ;;  %11959 = vmatprep.mubr.msk.f32.mxu1 %vm501_vm0, %v6243_v36  ;;  %v16701_v55 = vadd.f32 %v16563_v21, %v5433_v50  ;;  %v20638_v51 = vld [vmem:[#allocation8_spill] sm:$0xff] }
 0x4a8   :  { %v5228_v3 = vpop.f32.mrf.mxu1  ;;  %v16703_v14 = vpop.f32.mrf.mxu0  ;;  %v20640_v59 = vld [vmem:[#allocation36_spill] sm:$0xff] }
 0x4a9   :  { %20635 = vst [vmem:[#allocation37_spill] sm:$0xff] %v16701_v55  ;;  %v5435_v16 = vadd.f32 %v5228_v3, %v20636_v37  ;;  %v16710_v32 = vadd.f32 %v16573_v52, %v5436_v30  ;;  %v20642_v37 = vld [vmem:[#allocation7_spill] sm:$0xff] }
 0x4aa   :  { %v11705_v39 = vpop.f32.mrf.mxu1  ;;  %11960 = vmatmul.mubr.msk.f32.gmra.mxu1 %vm501_vm0, %v6244_v29  ;;  %v16707_v5 = vpop.f32.mrf.mxu0 }
 0x4ab   :  { %20637 = vst [vmem:[#allocation39_spill] sm:$0xff] %v16710_v32  ;;  %v5438_v40 = vadd.f32 %v11705_v39, %v20638_v51  ;;  %v16714_v36 = vadd.f32 %v16580_v28, %v5435_v16  ;;  %v20644_v28 = vld [vmem:[#allocation38_spill] sm:$0xff] }
 0x4ac   :  { %v5238_v21 = vpop.f32.mrf.mxu1  ;;  %v16716_v50 = vpop.f32.mrf.mxu0 }
 0x4ad   :  { %20639 = vst [vmem:[#allocation41_spill] sm:$0xff] %v16714_v36  ;;  %v5437_v55 = vadd.f32 %v5238_v21, %v20640_v59  ;;  %v16722_v29 = vadd.f32 %v16590_v11, %v5438_v40  ;;  %v20646_v59 = vld [vmem:[#allocation10_spill] sm:$0xff] }
 0x4ae   :  { %v11708_v35 = vpop.f32.mrf.mxu1  ;;  %v16719_v3 = vpop.f32.mrf.mxu0 }
 0x4af   :  { %20641 = vst [vmem:[#allocation64_spill] sm:$0xff] %v16722_v29  ;;  %v5440_v24 = vadd.f32 %v11708_v35, %v20642_v37  ;;  %v16726_v52 = vadd.f32 %v16595_v27, %v5437_v55  ;;  %v20648_v27 = vld [vmem:[#allocation40_spill] sm:$0xff] }
 0x4b0   :  { %v5248_v39 = vpop.f32.mrf.mxu1  ;;  %v16728_v30 = vpop.f32.mrf.mxu0 }
 0x4b1   :  { %20643 = vst [vmem:[#allocation66_spill] sm:$0xff] %v16726_v52  ;;  %v5439_v16 = vadd.f32 %v5248_v39, %v20644_v28  ;;  %v16734_v21 = vadd.f32 %v16605_v38, %v5440_v24  ;;  %v20650_v28 = vld [vmem:[#allocation9_spill] sm:$0xff] }
 0x4b2   :  { %v11711_v51 = vpop.f32.mrf.mxu1  ;;  %v16731_v36 = vpop.f32.mrf.mxu0 }
 0x4b3   :  { %20645 = vst [vmem:[#allocation45_spill] sm:$0xff] %v16734_v21  ;;  %v5442_v32 = vadd.f32 %v11711_v51, %v20646_v59  ;;  %v16738_v11 = vadd.f32 %v16609_v56, %v5439_v16  ;;  %v20652_v56 = vld [vmem:[#allocation42_spill] sm:$0xff] }
 0x4b4   :  { %v5258_v35 = vpop.f32.mrf.mxu1  ;;  %v16740_v40 = vpop.f32.mrf.mxu0 }
 0x4b5   :  { %20647 = vst [vmem:[#allocation48_spill] sm:$0xff] %v16738_v11  ;;  %v5441_v55 = vadd.f32 %v5258_v35, %v20648_v27  ;;  %v16746_v39 = vadd.f32 %v16619_v10, %v5442_v32  ;;  %v20653_v27 = vld [vmem:[#allocation12_spill] sm:$0xff] }
 0x4b6   :  { %v11714_v37 = vpop.f32.mrf.mxu1  ;;  %v16743_v52 = vpop.f32.mrf.mxu0 }
 0x4b7   :  { %20649 = vst [vmem:[#allocation51_spill] sm:$0xff] %v16746_v39  ;;  %v5444_v29 = vadd.f32 %v11714_v37, %v20650_v28  ;;  %v16750_v38 = vadd.f32 %v16623_v61, %v5441_v55  ;;  %v20654_v61 = vld [vmem:[#allocation43_spill] sm:$0xff] }
 0x4b8   :  { %v5268_v24 = vpop.f32.mrf.mxu1  ;;  %v16752_v51 = vpop.f32.mrf.mxu0 }
 0x4b9   :  { %20651 = vst [vmem:[#allocation53_spill] sm:$0xff] %v16750_v38  ;;  %v5443_v16 = vadd.f32 %v5268_v24, %v20652_v56  ;;  %v16758_v35 = vadd.f32 %v16633_v34, %v5444_v29  ;;  %v20655_v56 = vld [vmem:[#allocation21_spill] sm:$0xff] }
 0x4ba   :  { %v11717_v59 = vpop.f32.mrf.mxu1  ;;  %v16755_v11 = vpop.f32.mrf.mxu0 }
 0x4bb   :  { %v5446_v21 = vadd.f32 %v11717_v59, %v20653_v27  ;;  %v16762_v10 = vadd.f32 %v16637_v60, %v5443_v16 }
 0x4bc   :  { %v5278_v32 = vpop.f32.mrf.mxu1  ;;  %v16764_v37 = vpop.f32.mrf.mxu0 }
 0x4bd   :  { %v5445_v55 = vadd.f32 %v5278_v32, %v20654_v61  ;;  %v16770_v24 = vadd.f32 %v16647_v23, %v5446_v21 }
 0x4be   :  { %v11720_v28 = vpop.f32.mrf.mxu1  ;;  %v16767_v38 = vpop.f32.mrf.mxu0 }
 0x4bf   :  { %v5448_v39 = vadd.f32 %v11720_v28, %v20655_v56  ;;  %v16774_v34 = vadd.f32 %v16651_v7, %v5445_v55 }
 0x4c0   :  { %v5288_v29 = vpop.f32.mrf.mxu1  ;;  %v16776_v59 = vpop.f32.mrf.mxu0 }
 0x4c1   :  { %v5447_v60 = vadd.f32 %v5288_v29, %v16285_v45  ;;  %v16782_v32 = vadd.f32 %v16661_v17, %v5448_v39 }
 0x4c2   :  { %v11723_v16 = vpop.f32.mrf.mxu1  ;;  %v16779_v27 = vpop.f32.mrf.mxu0 }
 0x4c3   :  { %v5450_v61 = vadd.f32 %v11723_v16, %v16294_v54  ;;  %v16786_v23 = vadd.f32 %v16665_v33, %v5447_v60 }
 0x4c4   :  { %v5298_v21 = vpop.f32.mrf.mxu1  ;;  %v16788_v28 = vpop.f32.mrf.mxu0 }
 0x4c5   :  { %v5449_v7 = vadd.f32 %v5298_v21, %v16302_v6  ;;  %v16794_v45 = vadd.f32 %v16675_v46, %v5450_v61 }
 0x4c6   :  { %v11726_v55 = vpop.f32.mrf.mxu1  ;;  %v16791_v56 = vpop.f32.mrf.mxu0 }
 0x4c7   :  { %v5452_v29 = vadd.f32 %v11726_v55, %v16311_v18  ;;  %v16798_v17 = vadd.f32 %v16679_v57, %v5449_v7 }
 0x4c8   :  { %v5308_v54 = vpop.f32.mrf.mxu1  ;;  %v16800_v39 = vpop.f32.mrf.mxu0 }
 0x4c9   :  { %v5451_v33 = vadd.f32 %v5308_v54, %v16319_v63  ;;  %v16806_v6 = vadd.f32 %v16689_v25, %v5452_v29 }
 0x4ca   :  { %v11729_v60 = vpop.f32.mrf.mxu1  ;;  %v16803_v16 = vpop.f32.mrf.mxu0 }
 0x4cb   :  { %v5454_v21 = vadd.f32 %v11729_v60, %v16329_v48  ;;  %v16810_v46 = vadd.f32 %v16693_v31, %v5451_v33 }
 0x4cc   :  { %v5318_v18 = vpop.f32.mrf.mxu1  ;;  %v16812_v61 = vpop.f32.mrf.mxu0 }
 0x4cd   :  { %v5453_v57 = vadd.f32 %v5318_v18, %v16337_v4  ;;  %v16818_v63 = vadd.f32 %v16703_v14, %v5454_v21 }
 0x4ce   :  { %v11732_v7 = vpop.f32.mrf.mxu1  ;;  %v16815_v55 = vpop.f32.mrf.mxu0 }
 0x4cf   :  { %v5456_v54 = vadd.f32 %v11732_v7, %v16347_v12  ;;  %v16822_v25 = vadd.f32 %v16707_v5, %v5453_v57 }
 0x4d0   :  { %v5328_v48 = vpop.f32.mrf.mxu1  ;;  %v16824_v29 = vpop.f32.mrf.mxu0 }
 0x4d1   :  { %v5455_v31 = vadd.f32 %v5328_v48, %v16355_v22  ;;  %v16830_v4 = vadd.f32 %v16716_v50, %v5456_v54 }
 0x4d2   :  { %v11735_v33 = vpop.f32.mrf.mxu1  ;;  %v16827_v60 = vpop.f32.mrf.mxu0 }
 0x4d3   :  { %v5458_v18 = vadd.f32 %v11735_v33, %v16365_v19  ;;  %v16834_v14 = vadd.f32 %v16719_v3, %v5455_v31 }
 0x4d4   :  { %v5338_v12 = vpop.f32.mrf.mxu1  ;;  %v16836_v21 = vpop.f32.mrf.mxu0 }
 0x4d5   :  { %v5457_v5 = vadd.f32 %v5338_v12, %v16373_v43  ;;  %v16842_v22 = vadd.f32 %v16728_v30, %v5458_v18 }
 0x4d6   :  { %v11738_v57 = vpop.f32.mrf.mxu1  ;;  %v16839_v7 = vpop.f32.mrf.mxu0 }
 0x4d7   :  { %v5460_v48 = vadd.f32 %v11738_v57, %v16383_v0  ;;  %v16846_v50 = vadd.f32 %v16731_v36, %v5457_v5  ;;  %v20657_v36 = vld [vmem:[#allocation44_spill] sm:$0xff] }
 0x4d8   :  { %v5348_v19 = vpop.f32.mrf.mxu1  ;;  %v16848_v54 = vpop.f32.mrf.mxu0 }
 0x4d9   :  { %20656 = vst [vmem:[#allocation55_spill] sm:$0xff] %v16846_v50  ;;  %v5459_v3 = vadd.f32 %v5348_v19, %v16391_v1  ;;  %v16854_v43 = vadd.f32 %v16740_v40, %v5460_v48 }
 0x4da   :  { %v11741_v31 = vpop.f32.mrf.mxu1  ;;  %v16851_v33 = vpop.f32.mrf.mxu0 }
 0x4db   :  { %v5462_v12 = vadd.f32 %v11741_v31, %v16401_v15  ;;  %v16858_v30 = vadd.f32 %v16743_v52, %v5459_v3 }
 0x4dc   :  { %v5358_v0 = vpop.f32.mrf.mxu1  ;;  %v16860_v18 = vpop.f32.mrf.mxu0 }
 0x4dd   :  { %v5461_v5 = vadd.f32 %v5358_v0, %v20657_v36  ;;  %v16866_v1 = vadd.f32 %v16752_v51, %v5462_v12 }
 0x4de   :  { %v11744_v57 = vpop.f32.mrf.mxu1  ;;  %v16863_v50 = vpop.f32.mrf.mxu0 }
 0x4df   :  { %v5464_v19 = vadd.f32 %v11744_v57, %v16419_v47  ;;  %v16870_v40 = vadd.f32 %v16755_v11, %v5461_v5 }
 0x4e0   :  { %v5368_v15 = vpop.f32.mrf.mxu1  ;;  %v16872_v48 = vpop.f32.mrf.mxu0 }
 0x4e1   :  { %v5463_v52 = vadd.f32 %v5368_v15, %v16427_v20  ;;  %v16878_v0 = vadd.f32 %v16764_v37, %v5464_v19 }
 0x4e2   :  { %v11747_v3 = vpop.f32.mrf.mxu1  ;;  %v16875_v31 = vpop.f32.mrf.mxu0 }
 0x4e3   :  { %v5466_v36 = vadd.f32 %v11747_v3, %v16437_v44  ;;  %v16882_v51 = vadd.f32 %v16767_v38, %v5463_v52 }
 0x4e4   :  { %v5378_v47 = vpop.f32.mrf.mxu1  ;;  %v16884_v12 = vpop.f32.mrf.mxu0 }
 0x4e5   :  { %v5465_v11 = vadd.f32 %v5378_v47, %v16445_v2  ;;  %v16890_v20 = vadd.f32 %v16776_v59, %v5466_v36 }
 0x4e6   :  { %v11750_v5 = vpop.f32.mrf.mxu1  ;;  %v16887_v57 = vpop.f32.mrf.mxu0 }
 0x4e7   :  { %v5468_v15 = vadd.f32 %v11750_v5, %v16455_v26  ;;  %v16894_v37 = vadd.f32 %v16779_v27, %v5465_v11 }
 0x4e8   :  { %v5388_v44 = vpop.f32.mrf.mxu1  ;;  %v16896_v19 = vpop.f32.mrf.mxu0 }
 0x4e9   :  { %v5467_v38 = vadd.f32 %v5388_v44, %v16463_v8  ;;  %v16902_v2 = vadd.f32 %v16788_v28, %v5468_v15 }
 0x4ea   :  { %v11753_v52 = vpop.f32.mrf.mxu1  ;;  %v16899_v3 = vpop.f32.mrf.mxu0 }
 0x4eb   :  { %v5470_v47 = vadd.f32 %v11753_v52, %v16473_v49  ;;  %v16906_v59 = vadd.f32 %v16791_v56, %v5467_v38 }
 0x4ec   :  { %v5398_v26 = vpop.f32.mrf.mxu1  ;;  %v16908_v36 = vpop.f32.mrf.mxu0 }
 0x4ed   :  { %v5469_v27 = vadd.f32 %v5398_v26, %v16481_v42  ;;  %v16914_v8 = vadd.f32 %v16800_v39, %v5470_v47 }
 0x4ee   :  { %v11868_v11 = vpop.f32.mrf.mxu1  ;;  %v16911_v5 = vpop.f32.mrf.mxu0 }
 0x4ef   :  { %v6827_v44 = vadd.f32 %v11868_v11, %v16491_v62  ;;  %v16918_v28 = vadd.f32 %v16803_v16, %v5469_v27 }
 0x4f0   :  { %v6507_v49 = vpop.f32.mrf.mxu1  ;;  %v16920_v15 = vpop.f32.mrf.mxu0 }
 0x4f1   :  { %20658 = vst [vmem:[#allocation57_spill] sm:$0xff] %v16918_v28  ;;  %v6826_v56 = vadd.f32 %v6507_v49, %v16499_v58  ;;  %v16926_v42 = vadd.f32 %v16812_v61, %v6827_v44 }
 0x4f2   :  { %v11871_v38 = vpop.f32.mrf.mxu1  ;;  %v16923_v52 = vpop.f32.mrf.mxu0 }
 0x4f3   :  { %20659 = vst [vmem:[#allocation59_spill] sm:$0xff] %v16926_v42  ;;  %v16929_v26 = vadd.f32 %v16815_v55, %v6826_v56  ;;  %v6829_v39 = vadd.f32 %v11871_v38, %v16512_v41  ;;  %v7600_v61 = vsel %vm501_vm0, %v16926_v42, 0.0 }
 0x4f4   :  { %v6517_v62 = vpop.f32.mrf.mxu1  ;;  %v16932_v47 = vpop.f32.mrf.mxu0 }
 0x4f5   :  { %20660 = vst [vmem:[#allocation61_spill] sm:$0xff] %v16929_v26  ;;  %v7599_v16 = vsel %vm501_vm0, %v16929_v26, 0.0  ;;  %v6828_v27 = vadd.f32 %v6517_v62, %v16517_v13  ;;  %v16942_v44 = vadd.f32 %v16824_v29, %v6829_v39  ;;  %v20665_v39 = vld [vmem:[#allocation11_spill] sm:$0xff] }
 0x4f6   :  { %v11874_v58 = vpop.f32.mrf.mxu1  ;;  %v16937_v11 = vpop.f32.mrf.mxu0  ;;  %v7601_v49 = vadd.f32 %v7600_v61, %v7599_v16 }
 0x4f7   :  { %20661 = vst [vmem:[#allocation63_spill] sm:$0xff] %v16942_v44  ;;  %v16945_v55 = vadd.f32 %v16827_v60, %v6828_v27  ;;  %v6831_v41 = vadd.f32 %v11874_v58, %v16536_v53  ;;  %v7604_v29 = vsel %vm501_vm0, %v16942_v44, 0.0 }
 0x4f8   :  { %v6527_v56 = vpop.f32.mrf.mxu1  ;;  %v16948_v38 = vpop.f32.mrf.mxu0 }
 0x4f9   :  { %20662 = vst [vmem:[#allocation69_spill] sm:$0xff] %v16945_v55  ;;  %v7602_v13 = vsel %vm501_vm0, %v16945_v55, 0.0  ;;  %v6830_v62 = vadd.f32 %v6527_v56, %v16539_v9  ;;  %v16958_v60 = vadd.f32 %v16836_v21, %v6831_v41 }
 0x4fa   :  { %v7603_v26 = vadd.f32 %v7602_v13, %v7601_v49  ;;  %v11877_v28 = vpop.f32.mrf.mxu1  ;;  %v16953_v42 = vpop.f32.mrf.mxu0  ;;  %v20666_v49 = vld [vmem:[#allocation46_spill] sm:$0xff] }
 0x4fb   :  { %20663 = vst [vmem:[#allocation67_spill] sm:$0xff] %v16958_v60  ;;  %v16961_v53 = vadd.f32 %v16839_v7, %v6830_v62  ;;  %v6833_v16 = vadd.f32 %v11877_v28, %v20665_v39  ;;  %v7608_v21 = vsel %vm501_vm0, %v16958_v60, 0.0 }
 0x4fc   :  { %v7605_v27 = vadd.f32 %v7604_v29, %v7603_v26  ;;  %v6537_v58 = vpop.f32.mrf.mxu1  ;;  %v16964_v61 = vpop.f32.mrf.mxu0  ;;  %v20669_v26 = vld [vmem:[#allocation22_spill] sm:$0xff] }
 0x4fd   :  { %20664 = vst [vmem:[#allocation68_spill] sm:$0xff] %v16961_v53  ;;  %v7606_v9 = vsel %vm501_vm0, %v16961_v53, 0.0  ;;  %v6832_v56 = vadd.f32 %v6537_v58, %v20666_v49  ;;  %v16974_v7 = vadd.f32 %v16848_v54, %v6833_v16  ;;  %v20670_v58 = vld [vmem:[#allocation50_spill] sm:$0xff]  ;;  %v20673_v16 = vld [vmem:[#allocation23_spill] sm:$0xff] }
 0x4fe   :  { %v7607_v13 = vadd.f32 %v7606_v9, %v7605_v27  ;;  %v11880_v55 = vpop.f32.mrf.mxu1  ;;  %v16969_v44 = vpop.f32.mrf.mxu0 }
 0x4ff   :  { %20667 = vst [vmem:[#allocation70_spill] sm:$0xff] %v16974_v7  ;;  %v16977_v28 = vadd.f32 %v16851_v33, %v6832_v56  ;;  %v6835_v41 = vadd.f32 %v11880_v55, %v20669_v26  ;;  %v7612_v54 = vsel %vm501_vm0, %v16974_v7, 0.0 }
 0x500   :  { %v7609_v62 = vadd.f32 %v7608_v21, %v7607_v13  ;;  %v6547_v29 = vpop.f32.mrf.mxu1  ;;  %v16980_v39 = vpop.f32.mrf.mxu0 }
 0x501   :  { %20668 = vst [vmem:[#allocation71_spill] sm:$0xff] %v16977_v28  ;;  %v7610_v27 = vsel %vm501_vm0, %v16977_v28, 0.0  ;;  %v6834_v9 = vadd.f32 %v6547_v29, %v20670_v58  ;;  %v16990_v33 = vadd.f32 %v16860_v18, %v6835_v41  ;;  %v20674_v29 = vld [vmem:[#allocation52_spill] sm:$0xff]  ;;  %v20677_v41 = vld [vmem:[#allocation47_spill] sm:$0xff] }
 0x502   :  { %v7611_v49 = vadd.f32 %v7610_v27, %v7609_v62  ;;  %v11883_v53 = vpop.f32.mrf.mxu1  ;;  %v16985_v60 = vpop.f32.mrf.mxu0 }
 0x503   :  { %20671 = vst [vmem:[#allocation72_spill] sm:$0xff] %v16990_v33  ;;  %v16993_v55 = vadd.f32 %v16863_v50, %v6834_v9  ;;  %v6837_v56 = vadd.f32 %v11883_v53, %v20673_v16  ;;  %v7616_v18 = vsel %vm501_vm0, %v16990_v33, 0.0 }
 0x504   :  { %v7613_v13 = vadd.f32 %v7612_v54, %v7611_v49  ;;  %v6557_v21 = vpop.f32.mrf.mxu1  ;;  %v16996_v26 = vpop.f32.mrf.mxu0 }
 0x505   :  { %20672 = vst [vmem:[#allocation73_spill] sm:$0xff] %v16993_v55  ;;  %v7614_v62 = vsel %vm501_vm0, %v16993_v55, 0.0  ;;  %v6836_v27 = vadd.f32 %v6557_v21, %v20674_v29  ;;  %v17006_v50 = vadd.f32 %v16872_v48, %v6837_v56  ;;  %v20678_v21 = vld [vmem:[#allocation54_spill] sm:$0xff] }
 0x506   :  { %v7615_v58 = vadd.f32 %v7614_v62, %v7613_v13  ;;  %v11886_v28 = vpop.f32.mrf.mxu1  ;;  %v17001_v7 = vpop.f32.mrf.mxu0  ;;  %v20681_v56 = vld [vmem:[#allocation14_spill] sm:$0xff] }
 0x507   :  { %20675 = vst [vmem:[#allocation74_spill] sm:$0xff] %v17006_v50  ;;  %v17009_v53 = vadd.f32 %v16875_v31, %v6836_v27  ;;  %v6839_v9 = vadd.f32 %v11886_v28, %v20677_v41  ;;  %v7620_v48 = vsel %vm501_vm0, %v17006_v50, 0.0 }
 0x508   :  { %v7617_v49 = vadd.f32 %v7616_v18, %v7615_v58  ;;  %v6567_v54 = vpop.f32.mrf.mxu1  ;;  %v17012_v16 = vpop.f32.mrf.mxu0 }
 0x509   :  { %20676 = vst [vmem:[#allocation25_spill] sm:$0xff] %v17009_v53  ;;  %v7618_v13 = vsel %vm501_vm0, %v17009_v53, 0.0  ;;  %v6838_v62 = vadd.f32 %v6567_v54, %v20678_v21  ;;  %v17022_v31 = vadd.f32 %v16884_v12, %v6839_v9  ;;  %v20682_v54 = vld [vmem:[#allocation56_spill] sm:$0xff]  ;;  %v20685_v9 = vld [vmem:[#allocation26_spill] sm:$0xff] }
 0x50a   :  { %v7619_v29 = vadd.f32 %v7618_v13, %v7617_v49  ;;  %v11889_v55 = vpop.f32.mrf.mxu1  ;;  %v17017_v33 = vpop.f32.mrf.mxu0 }
 0x50b   :  { %20679 = vst [vmem:[#allocation75_spill] sm:$0xff] %v17022_v31  ;;  %v17025_v28 = vadd.f32 %v16887_v57, %v6838_v62  ;;  %v6841_v27 = vadd.f32 %v11889_v55, %v20681_v56  ;;  %v7624_v12 = vsel %vm501_vm0, %v17022_v31, 0.0 }
 0x50c   :  { %v7621_v58 = vadd.f32 %v7620_v48, %v7619_v29  ;;  %v6577_v18 = vpop.f32.mrf.mxu1  ;;  %v17028_v41 = vpop.f32.mrf.mxu0 }
 0x50d   :  { %20680 = vst [vmem:[#allocation16_spill] sm:$0xff] %v17025_v28  ;;  %v7622_v49 = vsel %vm501_vm0, %v17025_v28, 0.0  ;;  %v6840_v13 = vadd.f32 %v6577_v18, %v20682_v54  ;;  %v17038_v57 = vadd.f32 %v16896_v19, %v6841_v27  ;;  %v20686_v18 = vld [vmem:[#allocation58_spill] sm:$0xff]  ;;  %v20689_v27 = vld [vmem:[#allocation17_spill] sm:$0xff] }
 0x50e   :  { %v7623_v21 = vadd.f32 %v7622_v49, %v7621_v58  ;;  %v11892_v53 = vpop.f32.mrf.mxu1  ;;  %v17033_v50 = vpop.f32.mrf.mxu0 }
 0x50f   :  { %20683 = vst [vmem:[#allocation76_spill] sm:$0xff] %v17038_v57  ;;  %v17041_v55 = vadd.f32 %v16899_v3, %v6840_v13  ;;  %v6843_v62 = vadd.f32 %v11892_v53, %v20685_v9  ;;  %v7628_v19 = vsel %vm501_vm0, %v17038_v57, 0.0 }
 0x510   :  { %v7625_v29 = vadd.f32 %v7624_v12, %v7623_v21  ;;  %v6587_v48 = vpop.f32.mrf.mxu1  ;;  %v17044_v56 = vpop.f32.mrf.mxu0 }
 0x511   :  { %20684 = vst [vmem:[#allocation30_spill] sm:$0xff] %v17041_v55  ;;  %v7626_v58 = vsel %vm501_vm0, %v17041_v55, 0.0  ;;  %v6842_v49 = vadd.f32 %v6587_v48, %v20686_v18  ;;  %v17054_v3 = vadd.f32 %v16908_v36, %v6843_v62  ;;  %v20690_v48 = vld [vmem:[#allocation60_spill] sm:$0xff] }
 0x512   :  { %v7627_v54 = vadd.f32 %v7626_v58, %v7625_v29  ;;  %v11895_v28 = vpop.f32.mrf.mxu1  ;;  %v17049_v31 = vpop.f32.mrf.mxu0  ;;  %v20693_v62 = vld [vmem:[#allocation28_spill] sm:$0xff] }
 0x513   :  { %20687 = vst [vmem:[#allocation77_spill] sm:$0xff] %v17054_v3  ;;  %v17057_v53 = vadd.f32 %v16911_v5, %v6842_v49  ;;  %v6845_v13 = vadd.f32 %v11895_v28, %v20689_v27  ;;  %v7632_v36 = vsel %vm501_vm0, %v17054_v3, 0.0 }
 0x514   :  { %v7629_v21 = vadd.f32 %v7628_v19, %v7627_v54  ;;  %v6597_v12 = vpop.f32.mrf.mxu1  ;;  %v17060_v9 = vpop.f32.mrf.mxu0 }
 0x515   :  { %20688 = vst [vmem:[#allocation32_spill] sm:$0xff] %v17057_v53  ;;  %v7630_v29 = vsel %vm501_vm0, %v17057_v53, 0.0  ;;  %v6844_v58 = vadd.f32 %v6597_v12, %v20690_v48  ;;  %v17070_v5 = vadd.f32 %v16920_v15, %v6845_v13  ;;  %v20694_v12 = vld [vmem:[#allocation62_spill] sm:$0xff]  ;;  %v20697_v13 = vld [vmem:[#allocation13_spill] sm:$0xff] }
 0x516   :  { %v7631_v18 = vadd.f32 %v7630_v29, %v7629_v21  ;;  %v11898_v55 = vpop.f32.mrf.mxu1  ;;  %v17065_v57 = vpop.f32.mrf.mxu0 }
 0x517   :  { %20691 = vst [vmem:[#allocation78_spill] sm:$0xff] %v17070_v5  ;;  %v17073_v28 = vadd.f32 %v16923_v52, %v6844_v58  ;;  %v6847_v49 = vadd.f32 %v11898_v55, %v20693_v62  ;;  %v7636_v15 = vsel %vm501_vm0, %v17070_v5, 0.0 }
 0x518   :  { %v7633_v54 = vadd.f32 %v7632_v36, %v7631_v18  ;;  %v6607_v19 = vpop.f32.mrf.mxu1  ;;  %v17076_v27 = vpop.f32.mrf.mxu0 }
 0x519   :  { %20692 = vst [vmem:[#allocation79_spill] sm:$0xff] %v17073_v28  ;;  %v7634_v21 = vsel %vm501_vm0, %v17073_v28, 0.0  ;;  %v6846_v29 = vadd.f32 %v6607_v19, %v20694_v12  ;;  %v17086_v52 = vadd.f32 %v16932_v47, %v6847_v49  ;;  %v20698_v19 = vld [vmem:[#allocation65_spill] sm:$0xff]  ;;  %v20700_v49 = vld [vmem:[#allocation31_spill] sm:$0xff] }
 0x51a   :  { %v7635_v48 = vadd.f32 %v7634_v21, %v7633_v54  ;;  %v11901_v53 = vpop.f32.mrf.mxu1  ;;  %v17081_v3 = vpop.f32.mrf.mxu0 }
 0x51b   :  { %20695 = vst [vmem:[#allocation80_spill] sm:$0xff] %v17086_v52  ;;  %v17089_v55 = vadd.f32 %v16937_v11, %v6846_v29  ;;  %v6849_v58 = vadd.f32 %v11901_v53, %v20697_v13  ;;  %v7640_v47 = vsel %vm501_vm0, %v17086_v52, 0.0 }
 0x51c   :  { %v7637_v18 = vadd.f32 %v7636_v15, %v7635_v48  ;;  %v6617_v36 = vpop.f32.mrf.mxu1  ;;  %v17092_v62 = vpop.f32.mrf.mxu0 }
 0x51d   :  { %20696 = vst [vmem:[#allocation81_spill] sm:$0xff] %v17089_v55  ;;  %v7638_v54 = vsel %vm501_vm0, %v17089_v55, 0.0  ;;  %v6848_v21 = vadd.f32 %v6617_v36, %v20698_v19  ;;  %v17102_v11 = vadd.f32 %v16948_v38, %v6849_v58  ;;  %v20701_v36 = vld [vmem:[#allocation35_spill] sm:$0xff]  ;;  %v20703_v58 = vld [vmem:[#allocation34_spill] sm:$0xff] }
 0x51e   :  { %v7639_v12 = vadd.f32 %v7638_v54, %v7637_v18  ;;  %v11904_v28 = vpop.f32.mrf.mxu1  ;;  %v17097_v5 = vpop.f32.mrf.mxu0 }
 0x51f   :  { %v17105_v53 = vadd.f32 %v16953_v42, %v6848_v21  ;;  %v6851_v29 = vadd.f32 %v11904_v28, %v20700_v49  ;;  %v7644_v38 = vsel %vm501_vm0, %v17102_v11, 0.0 }
 0x520   :  { %v7641_v48 = vadd.f32 %v7640_v47, %v7639_v12  ;;  %v6627_v15 = vpop.f32.mrf.mxu1  ;;  %v17108_v13 = vpop.f32.mrf.mxu0 }
 0x521   :  { %20699 = vst [vmem:[#allocation82_spill] sm:$0xff] %v17105_v53  ;;  %v7642_v18 = vsel %vm501_vm0, %v17105_v53, 0.0  ;;  %v6850_v54 = vadd.f32 %v6627_v15, %v20701_v36  ;;  %v17118_v42 = vadd.f32 %v16964_v61, %v6851_v29  ;;  %v20704_v15 = vld [vmem:[#allocation37_spill] sm:$0xff] }
 0x522   :  { %v7643_v19 = vadd.f32 %v7642_v18, %v7641_v48  ;;  %v11907_v55 = vpop.f32.mrf.mxu1  ;;  %v17113_v52 = vpop.f32.mrf.mxu0 }
 0x523   :  { %v17121_v28 = vadd.f32 %v16969_v44, %v6850_v54  ;;  %v6853_v21 = vadd.f32 %v11907_v55, %v20703_v58  ;;  %v7648_v61 = vsel %vm501_vm0, %v17118_v42, 0.0  ;;  %v20706_v55 = vld [vmem:[#allocation39_spill] sm:$0xff] }
 0x524   :  { %v7645_v12 = vadd.f32 %v7644_v38, %v7643_v19  ;;  %v6637_v47 = vpop.f32.mrf.mxu1  ;;  %v17124_v49 = vpop.f32.mrf.mxu0 }
 0x525   :  { %20702 = vst [vmem:[#allocation83_spill] sm:$0xff] %v17121_v28  ;;  %v7646_v48 = vsel %vm501_vm0, %v17121_v28, 0.0  ;;  %v6852_v18 = vadd.f32 %v6637_v47, %v20704_v15  ;;  %v17132_v29 = vadd.f32 %v16980_v39, %v6853_v21 }
 0x526   :  { %v7647_v36 = vadd.f32 %v7646_v48, %v7645_v12  ;;  %v11910_v53 = vpop.f32.mrf.mxu1  ;;  %v17138_v58 = vpop.f32.mrf.mxu0  ;;  %v20707_v12 = vld [vmem:[#allocation41_spill] sm:$0xff] }
 0x527   :  { %v17135_v44 = vadd.f32 %v16985_v60, %v6852_v18  ;;  %v6855_v54 = vadd.f32 %v11910_v53, %v20706_v55  ;;  %v7652_v39 = vsel %vm501_vm0, %v17132_v29, 0.0  ;;  %v20709_v53 = vld [vmem:[#allocation64_spill] sm:$0xff] }
 0x528   :  { %v7649_v19 = vadd.f32 %v7648_v61, %v7647_v36  ;;  %v6647_v38 = vpop.f32.mrf.mxu1  ;;  %v17152_v55 = vpop.f32.mrf.mxu0 }
 0x529   :  { %20705 = vst [vmem:[#allocation84_spill] sm:$0xff] %v17135_v44  ;;  %v7650_v47 = vsel %vm501_vm0, %v17135_v44, 0.0  ;;  %v6854_v48 = vadd.f32 %v6647_v38, %v20707_v12  ;;  %v17146_v21 = vadd.f32 %v16996_v26, %v6855_v54 }
 0x52a   :  { %v7651_v15 = vadd.f32 %v7650_v47, %v7649_v19  ;;  %v11913_v28 = vpop.f32.mrf.mxu1  ;;  %v20710_v19 = vld [vmem:[#allocation66_spill] sm:$0xff] }
 0x52b   :  { %v17149_v60 = vadd.f32 %v17001_v7, %v6854_v48  ;;  %v6857_v18 = vadd.f32 %v11913_v28, %v20709_v53  ;;  %v7656_v26 = vsel %vm501_vm0, %v17146_v21, 0.0  ;;  %v20712_v28 = vld [vmem:[#allocation45_spill] sm:$0xff]  ;;  %v17166_v53 = vpop.f32.mrf.mxu0 }
 0x52c   :  { %v7653_v36 = vadd.f32 %v7652_v39, %v7651_v15  ;;  %v6657_v61 = vpop.f32.mrf.mxu1 }
 0x52d   :  { %20708 = vst [vmem:[#allocation85_spill] sm:$0xff] %v17149_v60  ;;  %v7654_v38 = vsel %vm501_vm0, %v17149_v60, 0.0  ;;  %v6856_v47 = vadd.f32 %v6657_v61, %v20710_v19  ;;  %v17160_v54 = vadd.f32 %v17012_v16, %v6857_v18 }
 0x52e   :  { %v7655_v12 = vadd.f32 %v7654_v38, %v7653_v36  ;;  %v11916_v44 = vpop.f32.mrf.mxu1  ;;  %v20713_v36 = vld [vmem:[#allocation48_spill] sm:$0xff] }
 0x52f   :  { %v17163_v7 = vadd.f32 %v17017_v33, %v6856_v47  ;;  %v6859_v48 = vadd.f32 %v11916_v44, %v20712_v28  ;;  %v7660_v16 = vsel %vm501_vm0, %v17160_v54, 0.0  ;;  %v20714_v44 = vld [vmem:[#allocation51_spill] sm:$0xff] }
 0x530   :  { %v7657_v15 = vadd.f32 %v7656_v26, %v7655_v12  ;;  %v6667_v39 = vpop.f32.mrf.mxu1  ;;  %v17180_v26 = vpop.f32.mrf.mxu0 }
 0x531   :  { %20711 = vst [vmem:[#allocation86_spill] sm:$0xff] %v17163_v7  ;;  %v7658_v61 = vsel %vm501_vm0, %v17163_v7, 0.0  ;;  %v6858_v38 = vadd.f32 %v6667_v39, %v20713_v36  ;;  %v17174_v18 = vadd.f32 %v17028_v41, %v6859_v48 }
 0x532   :  { %v7659_v19 = vadd.f32 %v7658_v61, %v7657_v15  ;;  %v11919_v60 = vpop.f32.mrf.mxu1  ;;  %v20715_v15 = vld [vmem:[#allocation53_spill] sm:$0xff] }
 0x533   :  { %v17177_v33 = vadd.f32 %v17033_v50, %v6858_v38  ;;  %v6861_v47 = vadd.f32 %v11919_v60, %v20714_v44  ;;  %v7664_v41 = vsel %vm501_vm0, %v17174_v18, 0.0 }
 0x534   :  { %v7661_v12 = vadd.f32 %v7660_v16, %v7659_v19  ;;  %v6677_v28 = vpop.f32.mrf.mxu1  ;;  %v17194_v19 = vpop.f32.mrf.mxu0 }
 0x535   :  { %v7662_v39 = vsel %vm501_vm0, %v17177_v33, 0.0  ;;  %v6860_v61 = vadd.f32 %v6677_v28, %v20715_v15  ;;  %v17188_v48 = vadd.f32 %v17044_v56, %v6861_v47 }
 0x536   :  { %v7663_v36 = vadd.f32 %v7662_v39, %v7661_v12  ;;  %v11922_v7 = vpop.f32.mrf.mxu1 }
 0x537   :  { %v17191_v50 = vadd.f32 %v17049_v31, %v6860_v61  ;;  %v6863_v60 = vadd.f32 %v11922_v7, %v16758_v35  ;;  %v7668_v56 = vsel %vm501_vm0, %v17188_v48, 0.0  ;;  %v17208_v7 = vpop.f32.mrf.mxu0 }
 0x538   :  { %v7665_v38 = vadd.f32 %v7664_v41, %v7663_v36  ;;  %v6687_v16 = vpop.f32.mrf.mxu1 }
 0x539   :  { %v7666_v44 = vsel %vm501_vm0, %v17191_v50, 0.0  ;;  %v6862_v12 = vadd.f32 %v6687_v16, %v16762_v10  ;;  %v17202_v47 = vadd.f32 %v17060_v9, %v6863_v60  ;;  %v17222_v16 = vpop.f32.mrf.mxu0 }
 0x53a   :  { %v7667_v28 = vadd.f32 %v7666_v44, %v7665_v38  ;;  %v11925_v39 = vpop.f32.mrf.mxu1 }
 0x53b   :  { %v17205_v31 = vadd.f32 %v17065_v57, %v6862_v12  ;;  %v6865_v35 = vadd.f32 %v11925_v39, %v16770_v24  ;;  %v7672_v9 = vsel %vm501_vm0, %v17202_v47, 0.0 }
 0x53c   :  { %v7669_v15 = vadd.f32 %v7668_v56, %v7667_v28  ;;  %v6697_v61 = vpop.f32.mrf.mxu1 }
 0x53d   :  { %v7670_v10 = vsel %vm501_vm0, %v17205_v31, 0.0  ;;  %v6864_v36 = vadd.f32 %v6697_v61, %v16774_v34  ;;  %v17216_v60 = vadd.f32 %v17076_v27, %v6865_v35 }
 0x53e   :  { %v7671_v41 = vadd.f32 %v7670_v10, %v7669_v15  ;;  %v11928_v38 = vpop.f32.mrf.mxu1  ;;  %v17236_v15 = vpop.f32.mrf.mxu0 }
 0x53f   :  { %v17219_v57 = vadd.f32 %v17081_v3, %v6864_v36  ;;  %v6867_v24 = vadd.f32 %v11928_v38, %v16782_v32  ;;  %v7676_v27 = vsel %vm501_vm0, %v17216_v60, 0.0 }
 0x540   :  { %v7673_v44 = vadd.f32 %v7672_v9, %v7671_v41  ;;  %v6707_v12 = vpop.f32.mrf.mxu1 }
 0x541   :  { %v7674_v34 = vsel %vm501_vm0, %v17219_v57, 0.0  ;;  %v6866_v28 = vadd.f32 %v6707_v12, %v16786_v23  ;;  %v17230_v35 = vadd.f32 %v17092_v62, %v6867_v24  ;;  %v7476_v24 = vpop.f32.mrf.mxu0 }
 0x542   :  { %v7675_v39 = vadd.f32 %v7674_v34, %v7673_v44  ;;  %v11931_v56 = vpop.f32.mrf.mxu1 }
 0x543   :  { %v17233_v3 = vadd.f32 %v17097_v5, %v6866_v28  ;;  %v6869_v32 = vadd.f32 %v11931_v56, %v16794_v45  ;;  %v7680_v62 = vsel %vm501_vm0, %v17230_v35, 0.0 }
 0x544   :  { %v7677_v61 = vadd.f32 %v7676_v27, %v7675_v39  ;;  %v6717_v10 = vpop.f32.mrf.mxu1  ;;  %v12053_v27 = vpop.f32.mrf.mxu0 }
 0x545   :  { %v7678_v23 = vsel %vm501_vm0, %v17233_v3, 0.0  ;;  %v6868_v36 = vadd.f32 %v6717_v10, %v16798_v17  ;;  %v17244_v9 = vadd.f32 %v17108_v13, %v6869_v32 }
 0x546   :  { %v7679_v41 = vadd.f32 %v7678_v23, %v7677_v61  ;;  %v11934_v38 = vpop.f32.mrf.mxu1 }
 0x547   :  { %v17247_v5 = vadd.f32 %v17113_v52, %v6868_v36  ;;  %v6871_v45 = vadd.f32 %v11934_v38, %v16806_v6  ;;  %v7684_v56 = vsel %vm501_vm0, %v17244_v9, 0.0  ;;  %v7486_v38 = vpop.f32.mrf.mxu0 }
 0x548   :  { %v7681_v44 = vadd.f32 %v7680_v62, %v7679_v41  ;;  %v6727_v12 = vpop.f32.mrf.mxu1 }
 0x549   :  { %v7682_v34 = vsel %vm501_vm0, %v17247_v5, 0.0  ;;  %v6870_v17 = vadd.f32 %v6727_v12, %v16810_v46  ;;  %v17256_v13 = vadd.f32 %v17124_v49, %v6871_v45 }
 0x54a   :  { %v7683_v28 = vadd.f32 %v7682_v34, %v7681_v44  ;;  %v11937_v39 = vpop.f32.mrf.mxu1 }
 0x54b   :  { %v17259_v52 = vadd.f32 %v17138_v58, %v6870_v17  ;;  %v6873_v6 = vadd.f32 %v11937_v39, %v16818_v63  ;;  %v7688_v41 = vsel %vm501_vm0, %v17256_v13, 0.0 }
 0x54c   :  { %v7685_v32 = vadd.f32 %v7684_v56, %v7683_v28  ;;  %v6737_v61 = vpop.f32.mrf.mxu1  ;;  %v12056_v28 = vpop.f32.mrf.mxu0 }
 0x54d   :  { %v7686_v10 = vsel %vm501_vm0, %v17259_v52, 0.0  ;;  %v6872_v46 = vadd.f32 %v6737_v61, %v16822_v25  ;;  %v17268_v49 = vadd.f32 %v17152_v55, %v6873_v6 }
 0x54e   :  { %v7687_v23 = vadd.f32 %v7686_v10, %v7685_v32  ;;  %v11940_v36 = vpop.f32.mrf.mxu1 }
 0x54f   :  { %v17271_v58 = vadd.f32 %v17166_v53, %v6872_v46  ;;  %v6875_v63 = vadd.f32 %v11940_v36, %v16830_v4  ;;  %v7692_v17 = vsel %vm501_vm0, %v17268_v49, 0.0 }
 0x550   :  { %v7689_v62 = vadd.f32 %v7688_v41, %v7687_v23  ;;  %v6747_v45 = vpop.f32.mrf.mxu1  ;;  %v7496_v23 = vpop.f32.mrf.mxu0 }
 0x551   :  { %v7690_v44 = vsel %vm501_vm0, %v17271_v58, 0.0  ;;  %v6874_v25 = vadd.f32 %v6747_v45, %v16834_v14  ;;  %v17280_v55 = vadd.f32 %v17180_v26, %v6875_v63  ;;  %v20716_v14 = vld [vmem:[#allocation55_spill] sm:$0xff] }
 0x552   :  { %v7691_v12 = vadd.f32 %v7690_v44, %v7689_v62  ;;  %v11943_v34 = vpop.f32.mrf.mxu1 }
 0x553   :  { %v17283_v53 = vadd.f32 %v17194_v19, %v6874_v25  ;;  %v6877_v4 = vadd.f32 %v11943_v34, %v16842_v22  ;;  %v7696_v46 = vsel %vm501_vm0, %v17280_v55, 0.0 }
 0x554   :  { %v7693_v39 = vadd.f32 %v7692_v17, %v7691_v12  ;;  %v6757_v56 = vpop.f32.mrf.mxu1  ;;  %v12059_v12 = vpop.f32.mrf.mxu0 }
 0x555   :  { %v7694_v6 = vsel %vm501_vm0, %v17283_v53, 0.0  ;;  %v6876_v32 = vadd.f32 %v6757_v56, %v20716_v14  ;;  %v17292_v26 = vadd.f32 %v17208_v7, %v6877_v4 }
 0x556   :  { %v7695_v61 = vadd.f32 %v7694_v6, %v7693_v39  ;;  %v11946_v10 = vpop.f32.mrf.mxu1 }
 0x557   :  { %v17295_v19 = vadd.f32 %v17222_v16, %v6876_v32  ;;  %v6879_v22 = vadd.f32 %v11946_v10, %v16854_v43  ;;  %v7700_v25 = vsel %vm501_vm0, %v17292_v26, 0.0 }
 0x558   :  { %v7697_v36 = vadd.f32 %v7696_v46, %v7695_v61  ;;  %v6767_v41 = vpop.f32.mrf.mxu1 }
 0x559   :  { %v7698_v63 = vsel %vm501_vm0, %v17295_v19, 0.0  ;;  %v6878_v62 = vadd.f32 %v6767_v41, %v16858_v30  ;;  %v17304_v7 = vadd.f32 %v17236_v15, %v6879_v22 }
 0x55a   :  { %v7699_v45 = vadd.f32 %v7698_v63, %v7697_v36  ;;  %v11949_v44 = vpop.f32.mrf.mxu1 }
 0x55b   :  { %v17306_v16 = vadd.f32 %v7476_v24, %v6878_v62  ;;  %v6881_v43 = vadd.f32 %v11949_v44, %v16866_v1  ;;  %v7704_v6 = vsel %vm501_vm0, %v17304_v7, 0.0  ;;  %v7506_v1 = vpop.f32.mrf.mxu0 }
 0x55c   :  { %v7701_v34 = vadd.f32 %v7700_v25, %v7699_v45  ;;  %v6777_v17 = vpop.f32.mrf.mxu1 }
 0x55d   :  { %v7702_v4 = vsel %vm501_vm0, %v17306_v16, 0.0  ;;  %v6880_v30 = vadd.f32 %v6777_v17, %v16870_v40  ;;  %v17314_v14 = vadd.f32 %v12053_v27, %v6881_v43  ;;  %v12062_v63 = vpop.f32.mrf.mxu0 }
 0x55e   :  { %v7703_v39 = vadd.f32 %v7702_v4, %v7701_v34  ;;  %v11952_v56 = vpop.f32.mrf.mxu1 }
 0x55f   :  { %v17316_v15 = vadd.f32 %v7486_v38, %v6880_v30  ;;  %v6883_v24 = vadd.f32 %v11952_v56, %v16878_v0  ;;  %v7708_v36 = vsel %vm501_vm0, %v17314_v14, 0.0  ;;  %v7516_v30 = vpop.f32.mrf.mxu0 }
 0x560   :  { %v7705_v32 = vadd.f32 %v7704_v6, %v7703_v39  ;;  %v6787_v61 = vpop.f32.mrf.mxu1 }
 0x561   :  { %v7706_v10 = vsel %vm501_vm0, %v17316_v15, 0.0  ;;  %v6882_v46 = vadd.f32 %v6787_v61, %v16882_v51  ;;  %v7592_v41 = vadd.f32 %v12056_v28, %v6883_v24  ;;  %v12065_v24 = vpop.f32.mrf.mxu0 }
 0x562   :  { %v7707_v40 = vadd.f32 %v7706_v10, %v7705_v32  ;;  %v11955_v22 = vpop.f32.mrf.mxu1 }
 0x563   :  { %v7591_v27 = vadd.f32 %v7496_v23, %v6882_v46  ;;  %v6885_v38 = vadd.f32 %v11955_v22, %v16890_v20  ;;  %v7712_v51 = vsel %vm501_vm0, %v7592_v41, 0.0  ;;  %v20717_v46 = vld [vmem:[#allocation57_spill] sm:$0xff] }
 0x564   :  { %v7709_v62 = vadd.f32 %v7708_v36, %v7707_v40  ;;  %v6797_v0 = vpop.f32.mrf.mxu1  ;;  %v7526_v36 = vpop.f32.mrf.mxu0 }
 0x565   :  { %v7710_v45 = vsel %vm501_vm0, %v7591_v27, 0.0  ;;  %v6884_v44 = vadd.f32 %v6797_v0, %v16894_v37  ;;  %v7594_v34 = vadd.f32 %v12059_v12, %v6885_v38 }
 0x566   :  { %v7711_v25 = vadd.f32 %v7710_v45, %v7709_v62  ;;  %v11958_v43 = vpop.f32.mrf.mxu1 }
 0x567   :  { %v7593_v17 = vadd.f32 %v7506_v1, %v6884_v44  ;;  %v6887_v4 = vadd.f32 %v11958_v43, %v16902_v2  ;;  %v7716_v37 = vsel %vm501_vm0, %v7594_v34, 0.0 }
 0x568   :  { %v7713_v28 = vadd.f32 %v7712_v51, %v7711_v25  ;;  %v6807_v23 = vpop.f32.mrf.mxu1 }
 0x569   :  { %v7714_v20 = vsel %vm501_vm0, %v7593_v17, 0.0  ;;  %v6886_v39 = vadd.f32 %v6807_v23, %v16906_v59  ;;  %v7596_v32 = vadd.f32 %v12062_v63, %v6887_v4 }
 0x56a   :  { %v7715_v56 = vadd.f32 %v7714_v20, %v7713_v28  ;;  %v11961_v6 = vpop.f32.mrf.mxu1 }
 0x56b   :  { %v7595_v61 = vadd.f32 %v7516_v30, %v6886_v39  ;;  %v6889_v10 = vadd.f32 %v11961_v6, %v16914_v8  ;;  %v7720_v38 = vsel %vm501_vm0, %v7596_v32, 0.0 }
 0x56c   :  { %v7717_v12 = vadd.f32 %v7716_v37, %v7715_v56  ;;  %v6817_v1 = vpop.f32.mrf.mxu1 }
 0x56d   :  { %v7718_v2 = vsel %vm501_vm0, %v7595_v61, 0.0  ;;  %v6888_v40 = vadd.f32 %v6817_v1, %v20717_v46  ;;  %v7598_v59 = vadd.f32 %v12065_v24, %v6889_v10 }
 0x56e   :  { %v7719_v22 = vadd.f32 %v7718_v2, %v7717_v12 }
 0x56f   :  { %v7597_v62 = vadd.f32 %v7526_v36, %v6888_v40  ;;  %v7724_v63 = vsel %vm501_vm0, %v7598_v59, 0.0 }
 0x570   :  { %v7721_v0 = vadd.f32 %v7720_v38, %v7719_v22  ;;  %v20722_v22 = vld [vmem:[#allocation68_spill] sm:$0xff] }
 0x571   :  { %v7722_v45 = vsel %vm501_vm0, %v7597_v62, 0.0 }
 0x572   :  { %v7723_v44 = vadd.f32 %v7722_v45, %v7721_v0 }
 0x574   :  { %v7725_v25 = vadd.f32 %v7724_v63, %v7723_v44 }
 0x576   :  { %v7726_v8 = vrot.slane %v7725_v25, 4 }
 0x578   :  { %v7727_v43 = vadd.f32 %v7726_v8, %v7725_v25  ;;  %v20724_v25 = vld [vmem:[#allocation71_spill] sm:$0xff] }
 0x57a   :  { %v7728_v51 = vrot.slane %v7727_v43, 2 }
 0x57c   :  { %v7729_v4 = vadd.f32 %v7728_v51, %v7727_v43 }
 0x57e   :  { %v7730_v30 = vrot.slane %v7729_v4, 1 }
 0x580   :  { %v7731_v28 = vadd.f32 %v7730_v30, %v7729_v4  ;;  %v20725_v30 = vld [vmem:[#allocation70_spill] sm:$0xff] }
 0x582   :  { %v17338_v23 = vmul.f32 0.001953125, %v7731_v28 }
 0x584   :  { %v17342_v20 = vsub.f32 %v17271_v58, %v17338_v23  ;;  %v17346_v39 = vsub.f32 %v17268_v49, %v17338_v23  ;;  %v17350_v56 = vsub.f32 %v17283_v53, %v17338_v23  ;;  %v17354_v6 = vsub.f32 %v17280_v55, %v17338_v23 }
 0x585   :  { %v17358_v24 = vsub.f32 %v17295_v19, %v17338_v23  ;;  %v17362_v58 = vsub.f32 %v17292_v26, %v17338_v23  ;;  %v17366_v49 = vsub.f32 %v17306_v16, %v17338_v23  ;;  %v17370_v53 = vsub.f32 %v17304_v7, %v17338_v23 }
 0x586   :  { %v17374_v55 = vsub.f32 %v17316_v15, %v17338_v23  ;;  %v17378_v19 = vsub.f32 %v17314_v14, %v17338_v23  ;;  %v17381_v37 = vsub.f32 %v7591_v27, %v17338_v23  ;;  %v17384_v26 = vsub.f32 %v7592_v41, %v17338_v23  ;;  %v20718_v41 = vld [vmem:[#allocation61_spill] sm:$0xff] }
 0x587   :  { %v17387_v16 = vsub.f32 %v7593_v17, %v17338_v23  ;;  %v17390_v7 = vsub.f32 %v7594_v34, %v17338_v23  ;;  %v17393_v10 = vsub.f32 %v7595_v61, %v17338_v23  ;;  %v17396_v15 = vsub.f32 %v7596_v32, %v17338_v23  ;;  %v20719_v17 = vld [vmem:[#allocation59_spill] sm:$0xff]  ;;  %v20720_v61 = vld [vmem:[#allocation69_spill] sm:$0xff] }
 0x588   :  { %v17399_v14 = vsub.f32 %v7597_v62, %v17338_v23  ;;  %v17402_v27 = vsub.f32 %v7598_v59, %v17338_v23  ;;  %v17406_v12 = vsub.f32 %v20718_v41, %v17338_v23  ;;  %v17410_v34 = vsub.f32 %v20719_v17, %v17338_v23  ;;  %v20721_v32 = vld [vmem:[#allocation63_spill] sm:$0xff] }
 0x589   :  { %v17414_v1 = vsub.f32 %v20720_v61, %v17338_v23  ;;  %v17418_v2 = vsub.f32 %v20721_v32, %v17338_v23  ;;  %v17426_v36 = vsub.f32 %v20722_v22, %v17338_v23  ;;  %v20723_v59 = vld [vmem:[#allocation67_spill] sm:$0xff]  ;;  %v17440_v8 = vsub.f32 %v20724_v25, %v17338_v23  ;;  %v20726_v32 = vld [vmem:[#allocation73_spill] sm:$0xff] }
 0x58a   :  { %v7797_v46 = vmul.f32 %v17406_v12, %v17406_v12  ;;  %v7798_v40 = vmul.f32 %v17410_v34, %v17410_v34  ;;  %v17432_v62 = vsub.f32 %v20723_v59, %v17338_v23  ;;  %v17447_v28 = vsub.f32 %v20725_v30, %v17338_v23  ;;  %v20727_v59 = vld [vmem:[#allocation72_spill] sm:$0xff]  ;;  %v20728_v25 = vld [vmem:[#allocation25_spill] sm:$0xff] }
 0x58b   :  { %v7799_v38 = vmul.f32 %v17414_v1, %v17414_v1  ;;  %v7800_v0 = vmul.f32 %v17418_v2, %v17418_v2  ;;  %v7801_v43 = vmul.f32 %v17426_v36, %v17426_v36 }
 0x58c   :  { %v7861_v45 = vsel %vm501_vm0, %v7797_v46, 0.0  ;;  %v7862_v44 = vsel %vm501_vm0, %v7798_v40, 0.0  ;;  %v7802_v41 = vmul.f32 %v17432_v62, %v17432_v62  ;;  %v17454_v46 = vsub.f32 %v20726_v32, %v17338_v23 }
 0x58d   :  { %v7863_v63 = vadd.f32 %v7862_v44, %v7861_v45  ;;  %v7864_v51 = vsel %vm501_vm0, %v7799_v38, 0.0  ;;  %v7866_v17 = vsel %vm501_vm0, %v7800_v0, 0.0  ;;  %v7803_v40 = vmul.f32 %v17440_v8, %v17440_v8 }
 0x58e   :  { %v7868_v22 = vsel %vm501_vm0, %v7801_v43, 0.0  ;;  %v17461_v45 = vsub.f32 %v20727_v59, %v17338_v23  ;;  %v7804_v44 = vmul.f32 %v17447_v28, %v17447_v28  ;;  %v7870_v0 = vsel %vm501_vm0, %v7802_v41, 0.0 }
 0x58f   :  { %v7865_v4 = vadd.f32 %v7864_v51, %v7863_v63  ;;  %v17468_v51 = vsub.f32 %v20728_v25, %v17338_v23  ;;  %v7872_v43 = vsel %vm501_vm0, %v7803_v40, 0.0  ;;  %v20734_v25 = vld [vmem:[#allocation75_spill] sm:$0xff] }
 0x590   :  { %v7806_v32 = vmul.f32 %v17461_v45, %v17461_v45  ;;  %v7874_v41 = vsel %vm501_vm0, %v7804_v44, 0.0 }
 0x591   :  { %v7867_v61 = vadd.f32 %v7866_v17, %v7865_v4  ;;  %20729 = vst [vmem:[#allocation18_spill] sm:$0xff] %v17468_v51  ;;  %v7805_v4 = vmul.f32 %v17454_v46, %v17454_v46  ;;  %v20730_v17 = vld [vmem:[#allocation74_spill] sm:$0xff] }
 0x592   :  { %v7878_v44 = vsel %vm501_vm0, %v7806_v32, 0.0 }
 0x593   :  { %v7869_v38 = vadd.f32 %v7868_v22, %v7867_v61  ;;  %v17475_v61 = vsub.f32 %v20730_v17, %v17338_v23  ;;  %v7876_v40 = vsel %vm501_vm0, %v7805_v4, 0.0 }
 0x595   :  { %v7871_v63 = vadd.f32 %v7870_v0, %v7869_v38  ;;  %20731 = vst [vmem:[#allocation49_spill] sm:$0xff] %v17475_v61  ;;  %v20732_v38 = vld [vmem:[#allocation16_spill] sm:$0xff]  ;;  %v7807_v0 = vmul.f32 %v17468_v51, %v17468_v51  ;;  %v7808_v17 = vmul.f32 %v17475_v61, %v17475_v61 }
 0x596   :  { %v17482_v59 = vsub.f32 %v20732_v38, %v17338_v23 }
 0x597   :  { %v7873_v30 = vadd.f32 %v7872_v43, %v7871_v63  ;;  %v17489_v43 = vsub.f32 %v20734_v25, %v17338_v23  ;;  %v7880_v4 = vsel %vm501_vm0, %v7807_v0, 0.0  ;;  %v7882_v32 = vsel %vm501_vm0, %v7808_v17, 0.0 }
 0x598   :  { %20733 = vst [vmem:[#allocation19_spill] sm:$0xff] %v17482_v59  ;;  %v7809_v51 = vmul.f32 %v17482_v59, %v17482_v59 }
 0x599   :  { %v7875_v22 = vadd.f32 %v7874_v41, %v7873_v30  ;;  %20735 = vst [vmem:[#allocation24_spill] sm:$0xff] %v17489_v43  ;;  %v20736_v41 = vld [vmem:[#allocation30_spill] sm:$0xff]  ;;  %v7810_v61 = vmul.f32 %v17489_v43, %v17489_v43 }
 0x59a   :  { %v17496_v38 = vsub.f32 %v20736_v41, %v17338_v23  ;;  %v7884_v0 = vsel %vm501_vm0, %v7809_v51, 0.0 }
 0x59b   :  { %v7877_v63 = vadd.f32 %v7876_v40, %v7875_v22  ;;  %v20738_v40 = vld [vmem:[#allocation76_spill] sm:$0xff]  ;;  %v7886_v17 = vsel %vm501_vm0, %v7810_v61, 0.0 }
 0x59c   :  { %20737 = vst [vmem:[#allocation20_spill] sm:$0xff] %v17496_v38  ;;  %v17503_v25 = vsub.f32 %v20738_v40, %v17338_v23  ;;  %v7811_v59 = vmul.f32 %v17496_v38, %v17496_v38 }
 0x59d   :  { %v7879_v30 = vadd.f32 %v7878_v44, %v7877_v63  ;;  %v20740_v44 = vld [vmem:[#allocation32_spill] sm:$0xff] }
 0x59e   :  { %20739 = vst [vmem:[#allocation27_spill] sm:$0xff] %v17503_v25  ;;  %v17510_v41 = vsub.f32 %v20740_v44, %v17338_v23  ;;  %v7812_v43 = vmul.f32 %v17503_v25, %v17503_v25  ;;  %v7888_v51 = vsel %vm501_vm0, %v7811_v59, 0.0 }
 0x59f   :  { %v7881_v22 = vadd.f32 %v7880_v4, %v7879_v30  ;;  %v20742_v4 = vld [vmem:[#allocation77_spill] sm:$0xff] }
 0x5a0   :  { %20741 = vst [vmem:[#allocation29_spill] sm:$0xff] %v17510_v41  ;;  %v17517_v40 = vsub.f32 %v20742_v4, %v17338_v23  ;;  %v7813_v38 = vmul.f32 %v17510_v41, %v17510_v41  ;;  %v7890_v61 = vsel %vm501_vm0, %v7812_v43, 0.0 }
 0x5a1   :  { %v7883_v63 = vadd.f32 %v7882_v32, %v7881_v22  ;;  %v20744_v32 = vld [vmem:[#allocation79_spill] sm:$0xff] }
 0x5a2   :  { %20743 = vst [vmem:[#allocation15_spill] sm:$0xff] %v17517_v40  ;;  %v17524_v44 = vsub.f32 %v20744_v32, %v17338_v23  ;;  %v7814_v25 = vmul.f32 %v17517_v40, %v17517_v40  ;;  %v7892_v59 = vsel %vm501_vm0, %v7813_v38, 0.0 }
 0x5a3   :  { %v7885_v30 = vadd.f32 %v7884_v0, %v7883_v63  ;;  %v20746_v0 = vld [vmem:[#allocation78_spill] sm:$0xff] }
 0x5a4   :  { %20745 = vst [vmem:[#allocation6_spill] sm:$0xff] %v17524_v44  ;;  %v17531_v4 = vsub.f32 %v20746_v0, %v17338_v23  ;;  %v7815_v41 = vmul.f32 %v17524_v44, %v17524_v44  ;;  %v7894_v43 = vsel %vm501_vm0, %v7814_v25, 0.0 }
 0x5a5   :  { %v7887_v22 = vadd.f32 %v7886_v17, %v7885_v30  ;;  %v20747_v17 = vld [vmem:[#allocation81_spill] sm:$0xff] }
 0x5a6   :  { %v17538_v32 = vsub.f32 %v20747_v17, %v17338_v23  ;;  %v7816_v40 = vmul.f32 %v17531_v4, %v17531_v4  ;;  %v7896_v38 = vsel %vm501_vm0, %v7815_v41, 0.0 }
 0x5a7   :  { %v7889_v63 = vadd.f32 %v7888_v51, %v7887_v22  ;;  %v20749_v51 = vld [vmem:[#allocation80_spill] sm:$0xff] }
 0x5a8   :  { %20748 = vst [vmem:[#allocation33_spill] sm:$0xff] %v17538_v32  ;;  %v17545_v0 = vsub.f32 %v20749_v51, %v17338_v23  ;;  %v7817_v44 = vmul.f32 %v17538_v32, %v17538_v32  ;;  %v7898_v25 = vsel %vm501_vm0, %v7816_v40, 0.0 }
 0x5a9   :  { %v7891_v30 = vadd.f32 %v7890_v61, %v7889_v63  ;;  %v20750_v61 = vld [vmem:[#allocation82_spill] sm:$0xff] }
 0x5aa   :  { %v17552_v17 = vsub.f32 %v20750_v61, %v17338_v23  ;;  %v7818_v51 = vmul.f32 %v17545_v0, %v17545_v0  ;;  %v7900_v41 = vsel %vm501_vm0, %v7817_v44, 0.0 }
 0x5ab   :  { %v7893_v22 = vadd.f32 %v7892_v59, %v7891_v30  ;;  %v17559_v59 = vsub.f32 %v17102_v11, %v17338_v23  ;;  %v17573_v11 = vsub.f32 %v17118_v42, %v17338_v23  ;;  %v17587_v42 = vsub.f32 %v17132_v29, %v17338_v23 }
 0x5ac   :  { %20751 = vst [vmem:[#allocation8_spill] sm:$0xff] %v17552_v17  ;;  %v7819_v32 = vmul.f32 %v17552_v17, %v17552_v17  ;;  %v7902_v40 = vsel %vm501_vm0, %v7818_v51, 0.0  ;;  %v17601_v29 = vsub.f32 %v17146_v21, %v17338_v23  ;;  %v17615_v21 = vsub.f32 %v17160_v54, %v17338_v23 }
 0x5ad   :  { %v7895_v63 = vadd.f32 %v7894_v43, %v7893_v22  ;;  %v20752_v43 = vld [vmem:[#allocation83_spill] sm:$0xff]  ;;  %20756 = vst [vmem:[#allocation38_spill] sm:$0xff] %v17587_v42  ;;  %v17629_v54 = vsub.f32 %v17174_v18, %v17338_v23  ;;  %v17643_v18 = vsub.f32 %v17188_v48, %v17338_v23  ;;  %v17657_v48 = vsub.f32 %v17202_v47, %v17338_v23 }
 0x5ae   :  { %v17566_v61 = vsub.f32 %v20752_v43, %v17338_v23  ;;  %v7904_v44 = vsel %vm501_vm0, %v7819_v32, 0.0  ;;  %20759 = vst [vmem:[#allocation40_spill] sm:$0xff] %v17601_v29  ;;  %20762 = vst [vmem:[#allocation42_spill] sm:$0xff] %v17615_v21  ;;  %v17671_v47 = vsub.f32 %v17216_v60, %v17338_v23  ;;  %v17685_v60 = vsub.f32 %v17230_v35, %v17338_v23 }
 0x5af   :  { %v7897_v30 = vadd.f32 %v7896_v38, %v7895_v63  ;;  %v7820_v38 = vmul.f32 %v17559_v59, %v17559_v59  ;;  %v17699_v35 = vsub.f32 %v17244_v9, %v17338_v23 }
 0x5b0   :  { %20753 = vst [vmem:[#allocation36_spill] sm:$0xff] %v17566_v61  ;;  %v7821_v17 = vmul.f32 %v17566_v61, %v17566_v61 }
 0x5b1   :  { %v7899_v22 = vadd.f32 %v7898_v25, %v7897_v30  ;;  %v20754_v25 = vld [vmem:[#allocation84_spill] sm:$0xff]  ;;  %v7906_v51 = vsel %vm501_vm0, %v7820_v38, 0.0 }
 0x5b2   :  { %v17580_v43 = vsub.f32 %v20754_v25, %v17338_v23  ;;  %v7908_v32 = vsel %vm501_vm0, %v7821_v17, 0.0 }
 0x5b3   :  { %v7901_v63 = vadd.f32 %v7900_v41, %v7899_v22  ;;  %v7822_v41 = vmul.f32 %v17573_v11, %v17573_v11 }
 0x5b4   :  { %20755 = vst [vmem:[#allocation7_spill] sm:$0xff] %v17580_v43  ;;  %v7823_v61 = vmul.f32 %v17580_v43, %v17580_v43 }
 0x5b5   :  { %v7903_v30 = vadd.f32 %v7902_v40, %v7901_v63  ;;  %v20757_v40 = vld [vmem:[#allocation85_spill] sm:$0xff]  ;;  %v7910_v38 = vsel %vm501_vm0, %v7822_v41, 0.0 }
 0x5b6   :  { %v17594_v25 = vsub.f32 %v20757_v40, %v17338_v23  ;;  %v7912_v17 = vsel %vm501_vm0, %v7823_v61, 0.0 }
 0x5b7   :  { %v7905_v22 = vadd.f32 %v7904_v44, %v7903_v30  ;;  %v7824_v44 = vmul.f32 %v17587_v42, %v17587_v42 }
 0x5b8   :  { %20758 = vst [vmem:[#allocation10_spill] sm:$0xff] %v17594_v25  ;;  %v7825_v43 = vmul.f32 %v17594_v25, %v17594_v25 }
 0x5b9   :  { %v7907_v63 = vadd.f32 %v7906_v51, %v7905_v22  ;;  %v20760_v51 = vld [vmem:[#allocation86_spill] sm:$0xff]  ;;  %v7914_v41 = vsel %vm501_vm0, %v7824_v44, 0.0 }
 0x5ba   :  { %v17608_v40 = vsub.f32 %v20760_v51, %v17338_v23  ;;  %v7916_v61 = vsel %vm501_vm0, %v7825_v43, 0.0 }
 0x5bb   :  { %v7909_v30 = vadd.f32 %v7908_v32, %v7907_v63  ;;  %v7826_v32 = vmul.f32 %v17601_v29, %v17601_v29 }
 0x5bc   :  { %20761 = vst [vmem:[#allocation9_spill] sm:$0xff] %v17608_v40  ;;  %v7827_v51 = vmul.f32 %v17608_v40, %v17608_v40 }
 0x5bd   :  { %v7911_v22 = vadd.f32 %v7910_v38, %v7909_v30  ;;  %v17622_v38 = vsub.f32 %v17177_v33, %v17338_v23  ;;  %v7918_v44 = vsel %vm501_vm0, %v7826_v32, 0.0  ;;  %v17636_v33 = vsub.f32 %v17191_v50, %v17338_v23 }
 0x5be   :  { %v7920_v43 = vsel %vm501_vm0, %v7827_v51, 0.0  ;;  %v17650_v50 = vsub.f32 %v17205_v31, %v17338_v23  ;;  %v17664_v31 = vsub.f32 %v17219_v57, %v17338_v23  ;;  %v17678_v57 = vsub.f32 %v17233_v3, %v17338_v23 }
 0x5bf   :  { %v7913_v63 = vadd.f32 %v7912_v17, %v7911_v22  ;;  %20763 = vst [vmem:[#allocation12_spill] sm:$0xff] %v17622_v38  ;;  %v7828_v17 = vmul.f32 %v17615_v21, %v17615_v21  ;;  %v17692_v3 = vsub.f32 %v17247_v5, %v17338_v23  ;;  %v8270_v5 = vld [vmem:[%s19997_s3 + $0x18] sm:$0xff]  ;;  %v7844_v21 = vmul.f32 %v17346_v39, %v17346_v39 }
 0x5c0   :  { %12066 = vmatprep.subr.mxu1 %v8270_v5 }
 0x5c1   :  { %v7915_v30 = vadd.f32 %v7914_v41, %v7913_v63  ;;  %v7829_v41 = vmul.f32 %v17622_v38, %v17622_v38  ;;  %v7922_v32 = vsel %vm501_vm0, %v7828_v17, 0.0  ;;  %v7839_v9 = vmul.f32 %v17692_v3, %v17692_v3  ;;  %12067 = vmatpush3.msra.mxu1 %v8270_v5 }
 0x5c2   :  { %v7843_v38 = vmul.f32 %v17342_v20, %v17342_v20 }
 0x5c3   :  { %v7917_v22 = vadd.f32 %v7916_v61, %v7915_v30  ;;  %v7830_v61 = vmul.f32 %v17629_v54, %v17629_v54  ;;  %v7924_v51 = vsel %vm501_vm0, %v7829_v41, 0.0 }
 0x5c5   :  { %v7919_v63 = vadd.f32 %v7918_v44, %v7917_v22  ;;  %v7831_v44 = vmul.f32 %v17636_v33, %v17636_v33  ;;  %v7926_v17 = vsel %vm501_vm0, %v7830_v61, 0.0 }
 0x5c7   :  { %v7921_v30 = vadd.f32 %v7920_v43, %v7919_v63  ;;  %v7832_v43 = vmul.f32 %v17643_v18, %v17643_v18  ;;  %v7928_v41 = vsel %vm501_vm0, %v7831_v44, 0.0 }
 0x5c9   :  { %v7923_v22 = vadd.f32 %v7922_v32, %v7921_v30  ;;  %v7833_v32 = vmul.f32 %v17650_v50, %v17650_v50  ;;  %v7930_v61 = vsel %vm501_vm0, %v7832_v43, 0.0 }
 0x5cb   :  { %v7925_v63 = vadd.f32 %v7924_v51, %v7923_v22  ;;  %v7834_v51 = vmul.f32 %v17657_v48, %v17657_v48  ;;  %v7932_v44 = vsel %vm501_vm0, %v7833_v32, 0.0 }
 0x5cd   :  { %v7927_v30 = vadd.f32 %v7926_v17, %v7925_v63  ;;  %v7835_v17 = vmul.f32 %v17664_v31, %v17664_v31  ;;  %v7934_v43 = vsel %vm501_vm0, %v7834_v51, 0.0 }
 0x5cf   :  { %v7929_v22 = vadd.f32 %v7928_v41, %v7927_v30  ;;  %v7836_v41 = vmul.f32 %v17671_v47, %v17671_v47  ;;  %v7936_v32 = vsel %vm501_vm0, %v7835_v17, 0.0  ;;  %v17712_v17 = vsub.f32 %v17259_v52, %v17338_v23 }
 0x5d0   :  { %v7840_v52 = vmul.f32 %v17699_v35, %v17699_v35 }
 0x5d1   :  { %v7931_v63 = vadd.f32 %v7930_v61, %v7929_v22  ;;  %v7837_v61 = vmul.f32 %v17678_v57, %v17678_v57  ;;  %v7938_v51 = vsel %vm501_vm0, %v7836_v41, 0.0  ;;  %v8268_v41 = vld [vmem:[%s19997_s3 + $0x8] sm:$0xff] }
 0x5d3   :  { %v7933_v30 = vadd.f32 %v7932_v44, %v7931_v63  ;;  %v7838_v44 = vmul.f32 %v17685_v60, %v17685_v60 }
 0x5d5   :  { %v7935_v22 = vadd.f32 %v7934_v43, %v7933_v30  ;;  %v8269_v30 = vld [vmem:[%s19997_s3 + $0x10] sm:$0xff] }
 0x5d6   :  { %12068 = vmatprep.subr.mxu1 %v8269_v30 }
 0x5d7   :  { %v7937_v63 = vadd.f32 %v7936_v32, %v7935_v22  ;;  %v7940_v22 = vsel %vm501_vm0, %v7837_v61, 0.0  ;;  %12069 = vmatpush3.msra.mxu1 %v8269_v30  ;;  %v8267_v61 = vld [vmem:[%s19997_s3] sm:$0xff] }
 0x5d8   :  { %12070 = vmatprep.subr.mxu1 %v8268_v41 }
 0x5d9   :  { %v7939_v43 = vadd.f32 %v7938_v51, %v7937_v63  ;;  %v17722_v63 = vsub.f32 %v17256_v13, %v17338_v23  ;;  %v7942_v51 = vsel %vm501_vm0, %v7838_v44, 0.0  ;;  %12071 = vmatpush3.msra.mxu1 %v8268_v41  ;;  %v7946_v44 = vsel %vm501_vm0, %v7840_v52, 0.0 }
 0x5da   :  { %12072 = vmatprep.subr.mxu1 %v8267_v61 }
 0x5db   :  { %v7941_v32 = vadd.f32 %v7940_v22, %v7939_v43  ;;  %v7841_v43 = vmul.f32 %v17712_v17, %v17712_v17  ;;  %v7944_v22 = vsel %vm501_vm0, %v7839_v9, 0.0  ;;  %v7842_v23 = vmul.f32 %v17722_v63, %v17722_v63  ;;  %12073 = vmatpush3.msra.mxu1 %v8267_v61 }
 0x5dc   :  { %v7846_v61 = vmul.f32 %v17354_v6, %v17354_v6 }
 0x5dd   :  { %v7943_v5 = vadd.f32 %v7942_v51, %v7941_v32  ;;  %v7948_v32 = vsel %vm501_vm0, %v7841_v43, 0.0  ;;  %v7950_v9 = vsel %vm501_vm0, %v7842_v23, 0.0  ;;  %v7847_v43 = vmul.f32 %v17358_v24, %v17358_v24 }
 0x5de   :  { %v7848_v23 = vmul.f32 %v17362_v58, %v17362_v58 }
 0x5df   :  { %v7945_v13 = vadd.f32 %v7944_v22, %v7943_v5  ;;  %v7845_v5 = vmul.f32 %v17350_v56, %v17350_v56  ;;  %v7952_v22 = vsel %vm501_vm0, %v7843_v38, 0.0  ;;  %v7849_v38 = vmul.f32 %v17366_v49, %v17366_v49 }
 0x5e1   :  { %v7947_v30 = vadd.f32 %v7946_v44, %v7945_v13  ;;  %v7954_v13 = vsel %vm501_vm0, %v7844_v21, 0.0  ;;  %v7850_v21 = vmul.f32 %v17370_v53, %v17370_v53 }
 0x5e3   :  { %v7949_v51 = vadd.f32 %v7948_v32, %v7947_v30  ;;  %v7956_v30 = vsel %vm501_vm0, %v7845_v5, 0.0  ;;  %v7851_v5 = vmul.f32 %v17374_v55, %v17374_v55 }
 0x5e5   :  { %v7951_v41 = vadd.f32 %v7950_v9, %v7949_v51  ;;  %v7958_v51 = vsel %vm501_vm0, %v7846_v61, 0.0  ;;  %v7852_v61 = vmul.f32 %v17378_v19, %v17378_v19 }
 0x5e7   :  { %v7953_v52 = vadd.f32 %v7952_v22, %v7951_v41  ;;  %v7960_v41 = vsel %vm501_vm0, %v7847_v43, 0.0  ;;  %v7853_v43 = vmul.f32 %v17381_v37, %v17381_v37 }
 0x5e9   :  { %v7955_v44 = vadd.f32 %v7954_v13, %v7953_v52  ;;  %v7962_v52 = vsel %vm501_vm0, %v7848_v23, 0.0  ;;  %v7854_v23 = vmul.f32 %v17384_v26, %v17384_v26 }
 0x5eb   :  { %v7957_v32 = vadd.f32 %v7956_v30, %v7955_v44  ;;  %v7964_v44 = vsel %vm501_vm0, %v7849_v38, 0.0  ;;  %v7855_v38 = vmul.f32 %v17387_v16, %v17387_v16 }
 0x5ed   :  { %v7959_v9 = vadd.f32 %v7958_v51, %v7957_v32  ;;  %v7966_v32 = vsel %vm501_vm0, %v7850_v21, 0.0  ;;  %v7856_v21 = vmul.f32 %v17390_v7, %v17390_v7 }
 0x5ef   :  { %v7961_v22 = vadd.f32 %v7960_v41, %v7959_v9  ;;  %v7968_v9 = vsel %vm501_vm0, %v7851_v5, 0.0  ;;  %v7857_v5 = vmul.f32 %v17393_v10, %v17393_v10 }
 0x5f1   :  { %v7963_v13 = vadd.f32 %v7962_v52, %v7961_v22  ;;  %v7970_v22 = vsel %vm501_vm0, %v7852_v61, 0.0  ;;  %v7858_v61 = vmul.f32 %v17396_v15, %v17396_v15 }
 0x5f3   :  { %v7965_v30 = vadd.f32 %v7964_v44, %v7963_v13  ;;  %v7972_v13 = vsel %vm501_vm0, %v7853_v43, 0.0  ;;  %v7859_v43 = vmul.f32 %v17399_v14, %v17399_v14 }
 0x5f5   :  { %v7967_v51 = vadd.f32 %v7966_v32, %v7965_v30  ;;  %v7974_v30 = vsel %vm501_vm0, %v7854_v23, 0.0  ;;  %v7860_v23 = vmul.f32 %v17402_v27, %v17402_v27 }
 0x5f7   :  { %v7969_v41 = vadd.f32 %v7968_v9, %v7967_v51  ;;  %v7976_v51 = vsel %vm501_vm0, %v7855_v38, 0.0  ;;  %v7984_v38 = vsel %vm501_vm0, %v7859_v43, 0.0 }
 0x5f9   :  { %v7971_v52 = vadd.f32 %v7970_v22, %v7969_v41  ;;  %v7978_v41 = vsel %vm501_vm0, %v7856_v21, 0.0 }
 0x5fb   :  { %v7973_v44 = vadd.f32 %v7972_v13, %v7971_v52  ;;  %v7980_v52 = vsel %vm501_vm0, %v7857_v5, 0.0 }
 0x5fd   :  { %v7975_v32 = vadd.f32 %v7974_v30, %v7973_v44  ;;  %v7982_v44 = vsel %vm501_vm0, %v7858_v61, 0.0  ;;  %v17797_v61 = vld [vmem:[%s20000_s6] ss:$0 sm:$0xff] }
 0x5ff   :  { %v7977_v9 = vadd.f32 %v7976_v51, %v7975_v32  ;;  %v7986_v51 = vsel %vm501_vm0, %v7860_v23, 0.0 }
 0x601   :  { %v7979_v22 = vadd.f32 %v7978_v41, %v7977_v9 }
 0x603   :  { %v7981_v13 = vadd.f32 %v7980_v52, %v7979_v22 }
 0x605   :  { %v7983_v30 = vadd.f32 %v7982_v44, %v7981_v13 }
 0x607   :  { %v7985_v32 = vadd.f32 %v7984_v38, %v7983_v30 }
 0x609   :  { %v7987_v40 = vadd.f32 %v7986_v51, %v7985_v32 }
 0x60b   :  { %v7988_v21 = vrot.slane %v7987_v40, 4 }
 0x60d   :  { %v7989_v9 = vadd.f32 %v7988_v21, %v7987_v40 }
 0x60f   :  { %v7990_v41 = vrot.slane %v7989_v9, 2 }
 0x611   :  { %v7991_v29 = vadd.f32 %v7990_v41, %v7989_v9 }
 0x613   :  { %v7992_v25 = vrot.slane %v7991_v29, 1 }
 0x615   :  { %v7993_v42 = vadd.f32 %v7992_v25, %v7991_v29 }
 0x617   :  { %v7994_v5 = vmul.f32 0.001953125, %v7993_v42 }
 0x619   :  { %v7995_v22 = vadd.f32 1e-05, %v7994_v5 }
 0x61b   :  { %12184 = vrsqrt.f32 %v7995_v22 }
 0x628   :  { %v17792_v52 = vpop.eup %12184 }
 0x629   :  { %v8059_v43 = vmul.f32 %v17792_v52, %v17399_v14  ;;  %v8030_v40 = vmul.f32 %v17792_v52, %v17629_v54  ;;  %v8031_v42 = vmul.f32 %v17792_v52, %v17636_v33  ;;  %v8032_v25 = vmul.f32 %v17792_v52, %v17643_v18 }
 0x62a   :  { %v8033_v29 = vmul.f32 %v17792_v52, %v17650_v50  ;;  %v8034_v23 = vmul.f32 %v17792_v52, %v17657_v48  ;;  %v8035_v14 = vmul.f32 %v17792_v52, %v17664_v31  ;;  %v8036_v44 = vmul.f32 %v17792_v52, %v17671_v47 }
 0x62b   :  { %v17802_v13 = vmul.f32 %v17797_v61, %v8059_v43  ;;  %v8037_v54 = vmul.f32 %v17792_v52, %v17678_v57  ;;  %v8038_v33 = vmul.f32 %v17792_v52, %v17685_v60  ;;  %v8039_v18 = vmul.f32 %v17792_v52, %v17692_v3 }
 0x62c   :  { %v8040_v50 = vmul.f32 %v17792_v52, %v17699_v35  ;;  %v8041_v48 = vmul.f32 %v17792_v52, %v17712_v17  ;;  %v8042_v31 = vmul.f32 %v17792_v52, %v17722_v63  ;;  %v8043_v47 = vmul.f32 %v17792_v52, %v17342_v20 }
 0x62d   :  { %v8044_v57 = vmul.f32 %v17792_v52, %v17346_v39  ;;  %v8045_v60 = vmul.f32 %v17792_v52, %v17350_v56  ;;  %v8046_v3 = vmul.f32 %v17792_v52, %v17354_v6  ;;  %v8047_v35 = vmul.f32 %v17792_v52, %v17358_v24 }
 0x62e   :  { %v8048_v17 = vmul.f32 %v17792_v52, %v17362_v58  ;;  %v8049_v63 = vmul.f32 %v17792_v52, %v17366_v49  ;;  %v8050_v20 = vmul.f32 %v17792_v52, %v17370_v53  ;;  %v8051_v39 = vmul.f32 %v17792_v52, %v17374_v55 }
 0x62f   :  { %v8052_v56 = vmul.f32 %v17792_v52, %v17378_v19  ;;  %v8053_v6 = vmul.f32 %v17792_v52, %v17381_v37  ;;  %v8054_v24 = vmul.f32 %v17792_v52, %v17384_v26  ;;  %v8055_v58 = vmul.f32 %v17792_v52, %v17387_v16 }
 0x630   :  { %v8056_v49 = vmul.f32 %v17792_v52, %v17390_v7  ;;  %v8057_v53 = vmul.f32 %v17792_v52, %v17393_v10  ;;  %v8058_v55 = vmul.f32 %v17792_v52, %v17396_v15  ;;  %v8060_v19 = vmul.f32 %v17792_v52, %v17402_v27 }
 0x631   :  { %v8101_v37 = vmul.f32 %v17797_v61, %v8030_v40  ;;  %v17866_v30 = vmul.f32 %v17797_v61, %v8031_v42  ;;  %v8103_v26 = vmul.f32 %v17797_v61, %v8032_v25  ;;  %v17870_v16 = vmul.f32 %v17797_v61, %v8033_v29 }
 0x632   :  { %v8105_v7 = vmul.f32 %v17797_v61, %v8034_v23  ;;  %v17874_v10 = vmul.f32 %v17797_v61, %v8035_v14  ;;  %v8107_v15 = vmul.f32 %v17797_v61, %v8036_v44  ;;  %v17878_v38 = vmul.f32 %v17797_v61, %v8037_v54 }
 0x633   :  { %v8109_v27 = vmul.f32 %v17797_v61, %v8038_v33  ;;  %v17882_v32 = vmul.f32 %v17797_v61, %v8039_v18  ;;  %v8111_v51 = vmul.f32 %v17797_v61, %v8040_v50  ;;  %v17886_v21 = vmul.f32 %v17797_v61, %v8041_v48 }
 0x634   :  { %v8113_v9 = vmul.f32 %v17797_v61, %v8042_v31  ;;  %v17890_v41 = vmul.f32 %v17797_v61, %v8043_v47  ;;  %v8115_v5 = vmul.f32 %v17797_v61, %v8044_v57  ;;  %v17894_v22 = vmul.f32 %v17797_v61, %v8045_v60  ;;  %v17925_v47 = vld [vmem:[%s20001_s7] ss:$0 sm:$0xff] }
 0x635   :  { %v8117_v43 = vmul.f32 %v17797_v61, %v8046_v3  ;;  %v17898_v40 = vmul.f32 %v17797_v61, %v8047_v35  ;;  %v8119_v42 = vmul.f32 %v17797_v61, %v8048_v17  ;;  %v17902_v25 = vmul.f32 %v17797_v61, %v8049_v63 }
 0x636   :  { %v8121_v29 = vmul.f32 %v17797_v61, %v8050_v20  ;;  %v17906_v23 = vmul.f32 %v17797_v61, %v8051_v39  ;;  %v8123_v14 = vmul.f32 %v17797_v61, %v8052_v56  ;;  %v17910_v44 = vmul.f32 %v17797_v61, %v8053_v6 }
 0x637   :  { %v8125_v54 = vmul.f32 %v17797_v61, %v8054_v24  ;;  %v17914_v33 = vmul.f32 %v17797_v61, %v8055_v58  ;;  %v8127_v18 = vmul.f32 %v17797_v61, %v8056_v49  ;;  %v17918_v50 = vmul.f32 %v17797_v61, %v8057_v53 }
 0x638   :  { %v8129_v48 = vmul.f32 %v17797_v61, %v8058_v55  ;;  %v8131_v31 = vmul.f32 %v17797_v61, %v8060_v19  ;;  %v7998_v57 = vmul.f32 %v17792_v52, %v17410_v34  ;;  %v17930_v60 = vadd.f32 %v17925_v47, %v8101_v37 }
 0x639   :  { %v17933_v3 = vadd.f32 %v17925_v47, %v8103_v26  ;;  %v17936_v35 = vadd.f32 %v17925_v47, %v8105_v7  ;;  %v17939_v17 = vadd.f32 %v17925_v47, %v8107_v15  ;;  %v17942_v63 = vadd.f32 %v17925_v47, %v8109_v27 }
 0x63a   :  { %v17945_v20 = vadd.f32 %v17925_v47, %v8111_v51  ;;  %v17948_v34 = vadd.f32 %v17925_v47, %v8113_v9  ;;  %v17951_v39 = vadd.f32 %v17925_v47, %v8115_v5  ;;  %v17954_v56 = vadd.f32 %v17925_v47, %v8117_v43 }
 0x63b   :  { %v17957_v6 = vadd.f32 %v17925_v47, %v8119_v42  ;;  %v17960_v24 = vadd.f32 %v17925_v47, %v8121_v29  ;;  %v17963_v58 = vadd.f32 %v17925_v47, %v8123_v14  ;;  %v17966_v49 = vadd.f32 %v17925_v47, %v8125_v54 }
 0x63c   :  { %v17969_v53 = vadd.f32 %v17925_v47, %v8127_v18  ;;  %v17972_v55 = vadd.f32 %v17925_v47, %v8129_v48  ;;  %v17975_v19 = vadd.f32 %v17925_v47, %v8131_v31  ;;  %v7997_v37 = vmul.f32 %v17792_v52, %v17406_v12 }
 0x63d   :  { %v7999_v26 = vmul.f32 %v17792_v52, %v17414_v1  ;;  %v8069_v7 = vmul.f32 %v17797_v61, %v7998_v57  ;;  %v8000_v15 = vmul.f32 %v17792_v52, %v17418_v2  ;;  %v8001_v27 = vmul.f32 %v17792_v52, %v17426_v36 }
 0x63e   :  { %v8068_v51 = vmul.f32 %v17797_v61, %v7997_v37  ;;  %v8002_v12 = vmul.f32 %v17792_v52, %v17432_v62  ;;  %v8003_v1 = vmul.f32 %v17792_v52, %v17440_v8  ;;  %v8004_v14 = vmul.f32 %v17792_v52, %v17447_v28  ;;  %v20764_v37 = vld [vmem:[#allocation18_spill] sm:$0xff] }
 0x63f   :  { %v8070_v9 = vmul.f32 %v17797_v61, %v7999_v26  ;;  %v8140_v5 = vadd.f32 %v17925_v47, %v8069_v7  ;;  %v8071_v43 = vmul.f32 %v17797_v61, %v8000_v15  ;;  %v8072_v42 = vmul.f32 %v17797_v61, %v8001_v27 }
 0x640   :  { %v8139_v2 = vadd.f32 %v17925_v47, %v8068_v51  ;;  %v8005_v18 = vmul.f32 %v17792_v52, %v17454_v46  ;;  %v8073_v62 = vmul.f32 %v17797_v61, %v8002_v12  ;;  %v8074_v8 = vmul.f32 %v17797_v61, %v8003_v1 }
 0x641   :  { %v8141_v36 = vadd.f32 %v17925_v47, %v8070_v9  ;;  %v8204_v29 = vmax.f32 %v8140_v5, 0.0  ;;  %v8142_v48 = vadd.f32 %v17925_v47, %v8071_v43  ;;  %v8143_v57 = vadd.f32 %v17925_v47, %v8072_v42 }
 0x642   :  { %v8203_v54 = vmax.f32 %v8139_v2, 0.0  ;;  %v8006_v28 = vmul.f32 %v17792_v52, %v17461_v45  ;;  %v8007_v26 = vmul.f32 %v17792_v52, %v20764_v37  ;;  %v8075_v46 = vmul.f32 %v17797_v61, %v8004_v14  ;;  %v20766_v2 = vld [vmem:[#allocation19_spill] sm:$0xff] }
 0x643   :  { %v8205_v31 = vmax.f32 %v8141_v36, 0.0  ;;  %v8076_v7 = vmul.f32 %v17797_v61, %v8005_v18  ;;  %v8144_v15 = vadd.f32 %v17925_v47, %v8073_v62  ;;  %v8206_v27 = vmax.f32 %v8142_v48, 0.0 }
 0x644   :  { %12074 = vmatprep.mubr.msk.f32.mxu1 %vm501_vm0, %v8203_v54  ;;  %v8145_v51 = vadd.f32 %v17925_v47, %v8074_v8  ;;  %v8207_v9 = vmax.f32 %v8143_v57, 0.0  ;;  %v18018_v5 = vadd.f32 %v17925_v47, %v17866_v30  ;;  %v18022_v45 = vadd.f32 %v17925_v47, %v17870_v16 }
 0x645   :  { %12075 = vmatmul.mubr.msk.f32.vlgmr.msra.gmra.mxu1 %vm501_vm0, %v8204_v29  ;;  %v18026_v12 = vadd.f32 %v17925_v47, %v17874_v10  ;;  %v18031_v1 = vadd.f32 %v17925_v47, %v17878_v38  ;;  %v18035_v43 = vadd.f32 %v17925_v47, %v17882_v32  ;;  %v18039_v30 = vadd.f32 %v17925_v47, %v17886_v21  ;;  %v20765_v10 = vld [vmem:[#allocation49_spill] sm:$0xff] }
 0x646   :  { %12077 = vmatprep.mubr.msk.f32.mxu1 %vm501_vm0, %v8205_v31  ;;  %v18043_v16 = vadd.f32 %v17925_v47, %v17890_v41  ;;  %v8008_v42 = vmul.f32 %v17792_v52, %v20765_v10  ;;  %v8009_v36 = vmul.f32 %v17792_v52, %v20766_v2  ;;  %v8077_v38 = vmul.f32 %v17797_v61, %v8006_v28 }
 0x647   :  { %v8078_v29 = vmul.f32 %v17797_v61, %v8007_v26  ;;  %v8146_v32 = vadd.f32 %v17925_v47, %v8075_v46  ;;  %v8208_v21 = vmax.f32 %v8144_v15, 0.0  ;;  %v8209_v14 = vmax.f32 %v8145_v51, 0.0 }
 0x648   :  { %v8147_v54 = vadd.f32 %v17925_v47, %v8076_v7  ;;  %v18056_v41 = vadd.f32 %v17925_v47, %v17894_v22  ;;  %v18060_v18 = vadd.f32 %v17925_v47, %v17898_v40  ;;  %v18064_v62 = vadd.f32 %v17925_v47, %v17902_v25 }
 0x649   :  { %12078 = vmatmul.mubr.msk.f32.gmra.mxu1 %vm501_vm0, %v8206_v27  ;;  %v18068_v8 = vadd.f32 %v17925_v47, %v17906_v23  ;;  %v18073_v48 = vadd.f32 %v17925_v47, %v17910_v44  ;;  %v18077_v22 = vadd.f32 %v17925_v47, %v17914_v33  ;;  %v18081_v40 = vadd.f32 %v17925_v47, %v17918_v50  ;;  %v20767_v23 = vld [vmem:[#allocation24_spill] sm:$0xff] }
 0x64a   :  { %12080 = vmatprep.mubr.msk.f32.mxu1 %vm501_vm0, %v8207_v9  ;;  %v18085_v25 = vadd.f32 %v17925_v47, %v17802_v13  ;;  %v8010_v31 = vmul.f32 %v17792_v52, %v20767_v23  ;;  %v8079_v44 = vmul.f32 %v17797_v61, %v8008_v42  ;;  %v8148_v57 = vadd.f32 %v17925_v47, %v8077_v38  ;;  %v20768_v33 = vld [vmem:[#allocation20_spill] sm:$0xff]  ;;  %v20769_v13 = vld [vmem:[#allocation27_spill] sm:$0xff]  ;;  %v20770_v9 = vld [vmem:[#allocation29_spill] sm:$0xff] }
 0x64b   :  { %v8210_v28 = vmax.f32 %v8146_v32, 0.0  ;;  %v8011_v37 = vmul.f32 %v17792_v52, %v20768_v33  ;;  %v8080_v50 = vmul.f32 %v17797_v61, %v8009_v36  ;;  %v8211_v26 = vmax.f32 %v8147_v54, 0.0  ;;  %v20771_v38 = vld [vmem:[#allocation15_spill] sm:$0xff]  ;;  %v20772_v54 = vld [vmem:[#allocation6_spill] sm:$0xff] }
 0x64c   :  { %v8149_v46 = vadd.f32 %v17925_v47, %v8078_v29  ;;  %v8012_v7 = vmul.f32 %v17792_v52, %v20769_v13  ;;  %v8081_v15 = vmul.f32 %v17797_v61, %v8010_v31  ;;  %v8150_v27 = vadd.f32 %v17925_v47, %v8079_v44 }
 0x64d   :  { %12081 = vmatmul.mubr.msk.f32.gmra.mxu1 %vm501_vm0, %v8208_v21  ;;  %v8212_v51 = vmax.f32 %v8148_v57, 0.0  ;;  %v8013_v10 = vmul.f32 %v17792_v52, %v20770_v9  ;;  %v8082_v42 = vmul.f32 %v17797_v61, %v8011_v37  ;;  %v8151_v36 = vadd.f32 %v17925_v47, %v8080_v50 }
 0x64e   :  { %12083 = vmatprep.mubr.msk.f32.mxu1 %vm501_vm0, %v8209_v14  ;;  %v8213_v2 = vmax.f32 %v8149_v46, 0.0  ;;  %v8014_v29 = vmul.f32 %v17792_v52, %v20771_v38  ;;  %v8083_v32 = vmul.f32 %v17797_v61, %v8012_v7  ;;  %v8152_v21 = vadd.f32 %v17925_v47, %v8081_v15 }
 0x64f   :  { %v8214_v14 = vmax.f32 %v8150_v27, 0.0  ;;  %v8015_v23 = vmul.f32 %v17792_v52, %v20772_v54  ;;  %v8084_v31 = vmul.f32 %v17797_v61, %v8013_v10  ;;  %v8215_v44 = vmax.f32 %v8151_v36, 0.0  ;;  %v20774_v10 = vld [vmem:[#allocation8_spill] sm:$0xff] }
 0x650   :  { %v8153_v57 = vadd.f32 %v17925_v47, %v8082_v42  ;;  %v8085_v33 = vmul.f32 %v17797_v61, %v8014_v29  ;;  %v8154_v37 = vadd.f32 %v17925_v47, %v8083_v32  ;;  %v8216_v50 = vmax.f32 %v8152_v21, 0.0 }
 0x651   :  { %12084 = vmatmul.mubr.msk.f32.gmra.mxu1 %vm501_vm0, %v8210_v28  ;;  %v8016_v28 = vmul.f32 %v17792_v52, %v17531_v4  ;;  %v8086_v13 = vmul.f32 %v17797_v61, %v8015_v23  ;;  %v8155_v15 = vadd.f32 %v17925_v47, %v8084_v31  ;;  %v8018_v4 = vmul.f32 %v17792_v52, %v17545_v0 }
 0x652   :  { %12086 = vmatprep.mubr.msk.f32.mxu1 %vm501_vm0, %v8211_v26  ;;  %v20773_v26 = vld [vmem:[#allocation33_spill] sm:$0xff]  ;;  %v8217_v7 = vmax.f32 %v8153_v57, 0.0  ;;  %v8218_v9 = vmax.f32 %v8154_v37, 0.0  ;;  %v8019_v42 = vmul.f32 %v17792_v52, %v20774_v10  ;;  %v8020_v0 = vmul.f32 %v17792_v52, %v17559_v59  ;;  %v20776_v37 = vld [vmem:[#allocation7_spill] sm:$0xff] }
 0x653   :  { %v8017_v46 = vmul.f32 %v17792_v52, %v20773_v26  ;;  %v8087_v27 = vmul.f32 %v17797_v61, %v8016_v28  ;;  %v8219_v36 = vmax.f32 %v8155_v15, 0.0  ;;  %v8157_v38 = vadd.f32 %v17925_v47, %v8086_v13 }
 0x654   :  { %v8089_v29 = vmul.f32 %v17797_v61, %v8018_v4  ;;  %v8090_v23 = vmul.f32 %v17797_v61, %v8019_v42  ;;  %v8022_v59 = vmul.f32 %v17792_v52, %v17573_v11  ;;  %v8091_v57 = vmul.f32 %v17797_v61, %v8020_v0 }
 0x655   :  { %12087 = vmatmul.mubr.msk.f32.gmra.mxu1 %vm501_vm0, %v8212_v51  ;;  %v8156_v51 = vadd.f32 %v17925_v47, %v8085_v33  ;;  %v8158_v32 = vadd.f32 %v17925_v47, %v8087_v27  ;;  %v8221_v31 = vmax.f32 %v8157_v38, 0.0 }
 0x656   :  { %12089 = vmatprep.mubr.msk.f32.mxu1 %vm501_vm0, %v8213_v2  ;;  %v8088_v2 = vmul.f32 %v17797_v61, %v8017_v46  ;;  %v8160_v28 = vadd.f32 %v17925_v47, %v8089_v29  ;;  %v8161_v13 = vadd.f32 %v17925_v47, %v8090_v23  ;;  %v8093_v15 = vmul.f32 %v17797_v61, %v8022_v59 }
 0x657   :  { %v8220_v21 = vmax.f32 %v8156_v51, 0.0  ;;  %v8222_v33 = vmax.f32 %v8158_v32, 0.0  ;;  %v8162_v4 = vadd.f32 %v17925_v47, %v8091_v57  ;;  %v20778_v51 = vld [vmem:[#allocation10_spill] sm:$0xff] }
 0x658   :  { %v8224_v27 = vmax.f32 %v8160_v28, 0.0  ;;  %v8225_v42 = vmax.f32 %v8161_v13, 0.0  ;;  %v8164_v29 = vadd.f32 %v17925_v47, %v8093_v15 }
 0x659   :  { %12090 = vmatmul.mubr.msk.f32.gmra.mxu1 %vm501_vm0, %v8214_v14  ;;  %v20775_v14 = vld [vmem:[#allocation36_spill] sm:$0xff]  ;;  %v8226_v32 = vmax.f32 %v8162_v4, 0.0 }
 0x65a   :  { %12092 = vmatprep.mubr.msk.f32.mxu1 %vm501_vm0, %v8215_v44  ;;  %v8021_v54 = vmul.f32 %v17792_v52, %v20775_v14  ;;  %v8159_v44 = vadd.f32 %v17925_v47, %v8088_v2 }
 0x65c   :  { %v8092_v26 = vmul.f32 %v17797_v61, %v8021_v54  ;;  %v8223_v46 = vmax.f32 %v8159_v44, 0.0  ;;  %v20781_v44 = vld [vmem:[#allocation42_spill] sm:$0xff] }
 0x65d   :  { %12093 = vmatmul.mubr.msk.f32.gmra.mxu1 %vm501_vm0, %v8216_v50  ;;  %v8023_v50 = vmul.f32 %v17792_v52, %v20776_v37  ;;  %v8028_v59 = vmul.f32 %v17792_v52, %v20781_v44  ;;  %v20782_v37 = vld [vmem:[#allocation12_spill] sm:$0xff] }
 0x65e   :  { %12095 = vmatprep.mubr.msk.f32.mxu1 %vm501_vm0, %v8217_v7  ;;  %v20777_v7 = vld [vmem:[#allocation38_spill] sm:$0xff]  ;;  %v8163_v2 = vadd.f32 %v17925_v47, %v8092_v26 }
 0x65f   :  { %v8024_v11 = vmul.f32 %v17792_v52, %v20777_v7  ;;  %v8094_v10 = vmul.f32 %v17797_v61, %v8023_v50  ;;  %v8029_v50 = vmul.f32 %v17792_v52, %v20782_v37  ;;  %v8099_v7 = vmul.f32 %v17797_v61, %v8028_v59 }
 0x660   :  { %v8227_v23 = vmax.f32 %v8163_v2, 0.0 }
 0x661   :  { %12096 = vmatmul.mubr.msk.f32.gmra.mxu1 %vm501_vm0, %v8218_v9  ;;  %v8025_v9 = vmul.f32 %v17792_v52, %v20778_v51  ;;  %v8095_v0 = vmul.f32 %v17797_v61, %v8024_v11  ;;  %v8100_v4 = vmul.f32 %v17797_v61, %v8029_v50 }
 0x662   :  { %12098 = vmatprep.mubr.msk.f32.mxu1 %vm501_vm0, %v8219_v36  ;;  %v20779_v36 = vld [vmem:[#allocation40_spill] sm:$0xff] }
 0x663   :  { %v8026_v38 = vmul.f32 %v17792_v52, %v20779_v36  ;;  %v8096_v54 = vmul.f32 %v17797_v61, %v8025_v9  ;;  %v8166_v28 = vadd.f32 %v17925_v47, %v8095_v0  ;;  %v8239_v0 = vmax.f32 %v18022_v45, 0.0 }
 0x664   :  { %v8245_v45 = vmax.f32 %v18035_v43, 0.0  ;;  %v8251_v43 = vmax.f32 %v18056_v41, 0.0  ;;  %v8257_v41 = vmax.f32 %v18068_v8, 0.0  ;;  %v8263_v8 = vmax.f32 %v18081_v40, 0.0 }
 0x665   :  { %12099 = vmatmul.mubr.msk.f32.gmra.mxu1 %vm501_vm0, %v8220_v21  ;;  %v20780_v21 = vld [vmem:[#allocation9_spill] sm:$0xff]  ;;  %v8097_v57 = vmul.f32 %v17797_v61, %v8026_v38  ;;  %v8167_v13 = vadd.f32 %v17925_v47, %v8096_v54  ;;  %v8230_v15 = vmax.f32 %v8166_v28, 0.0  ;;  %v8237_v38 = vmax.f32 %v18018_v5, 0.0 }
 0x666   :  { %12101 = vmatprep.mubr.msk.f32.mxu1 %vm501_vm0, %v8221_v31  ;;  %v8027_v14 = vmul.f32 %v17792_v52, %v20780_v21  ;;  %v8165_v31 = vadd.f32 %v17925_v47, %v8094_v10  ;;  %v8170_v52 = vadd.f32 %v17925_v47, %v8099_v7  ;;  %v8243_v5 = vmax.f32 %v18031_v1, 0.0 }
 0x667   :  { %v8168_v11 = vadd.f32 %v17925_v47, %v8097_v57  ;;  %v8249_v1 = vmax.f32 %v18043_v16, 0.0  ;;  %v8255_v16 = vmax.f32 %v18064_v62, 0.0  ;;  %v8261_v62 = vmax.f32 %v18077_v22, 0.0 }
 0x668   :  { %v8098_v26 = vmul.f32 %v17797_v61, %v8027_v14  ;;  %v8234_v2 = vmax.f32 %v8170_v52, 0.0  ;;  %v8236_v61 = vmax.f32 %v17930_v60, 0.0  ;;  %v8242_v60 = vmax.f32 %v17939_v17, 0.0 }
 0x669   :  { %12102 = vmatmul.mubr.msk.f32.gmra.mxu1 %vm501_vm0, %v8222_v33  ;;  %v8228_v33 = vmax.f32 %v8164_v29, 0.0  ;;  %v8232_v9 = vmax.f32 %v8168_v11, 0.0  ;;  %v8240_v29 = vmax.f32 %v17936_v35, 0.0  ;;  %v8246_v35 = vmax.f32 %v17945_v20, 0.0 }
 0x66a   :  { %12104 = vmatprep.mubr.msk.f32.mxu1 %vm501_vm0, %v8223_v46  ;;  %v8229_v46 = vmax.f32 %v8165_v31, 0.0  ;;  %v8169_v51 = vadd.f32 %v17925_v47, %v8098_v26  ;;  %v8248_v17 = vmax.f32 %v17948_v34, 0.0  ;;  %v8252_v20 = vmax.f32 %v17954_v56, 0.0 }
 0x66b   :  { %v8254_v34 = vmax.f32 %v17957_v6, 0.0  ;;  %v8258_v56 = vmax.f32 %v17963_v58, 0.0  ;;  %v8260_v6 = vmax.f32 %v17966_v49, 0.0  ;;  %v8264_v58 = vmax.f32 %v17972_v55, 0.0 }
 0x66c   :  { %v8233_v10 = vmax.f32 %v8169_v51, 0.0  ;;  %v8266_v49 = vmax.f32 %v17975_v19, 0.0 }
 0x66d   :  { %12105 = vmatmul.mubr.msk.f32.gmra.mxu1 %vm501_vm0, %v8224_v27  ;;  %v8231_v27 = vmax.f32 %v8167_v13, 0.0 }
 0x66e   :  { %12107 = vmatprep.mubr.msk.f32.mxu1 %vm501_vm0, %v8225_v42  ;;  %v8171_v42 = vadd.f32 %v17925_v47, %v8100_v4  ;;  %v8238_v47 = vmax.f32 %v17933_v3, 0.0  ;;  %v8244_v3 = vmax.f32 %v17942_v63, 0.0  ;;  %v8250_v63 = vmax.f32 %v17951_v39, 0.0 }
 0x66f   :  { %v8256_v39 = vmax.f32 %v17960_v24, 0.0  ;;  %v8262_v24 = vmax.f32 %v17969_v53, 0.0 }
 0x670   :  { %v8235_v36 = vmax.f32 %v8171_v42, 0.0 }
 0x671   :  { %12108 = vmatmul.mubr.msk.f32.gmra.mxu1 %vm501_vm0, %v8226_v32  ;;  %v8241_v32 = vmax.f32 %v18026_v12, 0.0  ;;  %v8247_v12 = vmax.f32 %v18039_v30, 0.0  ;;  %v8253_v30 = vmax.f32 %v18060_v18, 0.0  ;;  %v8259_v18 = vmax.f32 %v18073_v48, 0.0 }
 0x672   :  { %12110 = vmatprep.mubr.msk.f32.mxu1 %vm501_vm0, %v8227_v23  ;;  %v8265_v48 = vmax.f32 %v18085_v25, 0.0 }
 0x675   :  { %12111 = vmatmul.mubr.msk.f32.gmra.mxu1 %vm501_vm0, %v8228_v33 }
 0x676   :  { %12113 = vmatprep.mubr.msk.f32.mxu1 %vm501_vm0, %v8229_v46 }
 0x679   :  { %12114 = vmatmul.mubr.msk.f32.gmra.mxu1 %vm501_vm0, %v8230_v15 }
 0x67a   :  { %12116 = vmatprep.mubr.msk.f32.mxu1 %vm501_vm0, %v8231_v27 }
 0x67d   :  { %12117 = vmatmul.mubr.msk.f32.gmra.mxu1 %vm501_vm0, %v8232_v9 }
 0x67e   :  { %12119 = vmatprep.mubr.msk.f32.mxu1 %vm501_vm0, %v8233_v10 }
 0x681   :  { %12120 = vmatmul.mubr.msk.f32.gmra.mxu1 %vm501_vm0, %v8234_v2 }
 0x682   :  { %12122 = vmatprep.mubr.msk.f32.mxu1 %vm501_vm0, %v8235_v36 }
 0x685   :  { %12123 = vmatmul.mubr.msk.f32.gmra.mxu1 %vm501_vm0, %v8236_v61 }
 0x686   :  { %12125 = vmatprep.mubr.msk.f32.mxu1 %vm501_vm0, %v8237_v38 }
 0x689   :  { %12126 = vmatmul.mubr.msk.f32.gmra.mxu1 %vm501_vm0, %v8238_v47 }
 0x68a   :  { %12128 = vmatprep.mubr.msk.f32.mxu1 %vm501_vm0, %v8239_v0 }
 0x68d   :  { %12129 = vmatmul.mubr.msk.f32.gmra.mxu1 %vm501_vm0, %v8240_v29 }
 0x68e   :  { %12131 = vmatprep.mubr.msk.f32.mxu1 %vm501_vm0, %v8241_v32 }
 0x691   :  { %12132 = vmatmul.mubr.msk.f32.gmra.mxu1 %vm501_vm0, %v8242_v60 }
 0x692   :  { %12134 = vmatprep.mubr.msk.f32.mxu1 %vm501_vm0, %v8243_v5 }
 0x695   :  { %12135 = vmatmul.mubr.msk.f32.gmra.mxu1 %vm501_vm0, %v8244_v3 }
 0x696   :  { %12137 = vmatprep.mubr.msk.f32.mxu1 %vm501_vm0, %v8245_v45 }
 0x699   :  { %12138 = vmatmul.mubr.msk.f32.gmra.mxu1 %vm501_vm0, %v8246_v35 }
 0x69a   :  { %12140 = vmatprep.mubr.msk.f32.mxu1 %vm501_vm0, %v8247_v12 }
 0x69d   :  { %12141 = vmatmul.mubr.msk.f32.gmra.mxu1 %vm501_vm0, %v8248_v17 }
 0x69e   :  { %12143 = vmatprep.mubr.msk.f32.mxu1 %vm501_vm0, %v8249_v1 }
 0x6a1   :  { %12144 = vmatmul.mubr.msk.f32.gmra.mxu1 %vm501_vm0, %v8250_v63 }
 0x6a2   :  { %12146 = vmatprep.mubr.msk.f32.mxu1 %vm501_vm0, %v8251_v43 }
 0x6a5   :  { %12147 = vmatmul.mubr.msk.f32.gmra.mxu1 %vm501_vm0, %v8252_v20 }
 0x6a6   :  { %12149 = vmatprep.mubr.msk.f32.mxu1 %vm501_vm0, %v8253_v30 }
 0x6a9   :  { %12150 = vmatmul.mubr.msk.f32.gmra.mxu1 %vm501_vm0, %v8254_v34 }
 0x6aa   :  { %12152 = vmatprep.mubr.msk.f32.mxu1 %vm501_vm0, %v8255_v16 }
 0x6ad   :  { %12153 = vmatmul.mubr.msk.f32.gmra.mxu1 %vm501_vm0, %v8256_v39 }
 0x6ae   :  { %12155 = vmatprep.mubr.msk.f32.mxu1 %vm501_vm0, %v8257_v41 }
 0x6b1   :  { %12156 = vmatmul.mubr.msk.f32.gmra.mxu1 %vm501_vm0, %v8258_v56 }
 0x6b2   :  { %12158 = vmatprep.mubr.msk.f32.mxu1 %vm501_vm0, %v8259_v18 }
 0x6b5   :  { %12159 = vmatmul.mubr.msk.f32.gmra.mxu1 %vm501_vm0, %v8260_v6 }
 0x6b6   :  { %12161 = vmatprep.mubr.msk.f32.mxu1 %vm501_vm0, %v8261_v62 }
 0x6b9   :  { %12162 = vmatmul.mubr.msk.f32.gmra.mxu1 %vm501_vm0, %v8262_v24 }
 0x6ba   :  { %12164 = vmatprep.mubr.msk.f32.mxu1 %vm501_vm0, %v8263_v8 }
 0x6bd   :  { %12165 = vmatmul.mubr.msk.f32.gmra.mxu1 %vm501_vm0, %v8264_v58 }
 0x6be   :  { %12167 = vmatprep.mubr.msk.f32.mxu1 %vm501_vm0, %v8265_v48 }
 0x6c1   :  { %12168 = vmatmul.mubr.msk.f32.gmra.mxu1 %vm501_vm0, %v8266_v49 }
 0x705   :  { %v18262_v22 = vpop.f32.mrf.mxu1 }
 0x707   :  { %v18264_v53 = vpop.f32.mrf.mxu1 }
 0x708   :  { %v8848_v21 = vadd.f32 %v18262_v22, %v18264_v53 }
 0x709   :  { %v18266_v40 = vpop.f32.mrf.mxu1 }
 0x70b   :  { %v18270_v55 = vpop.f32.mrf.mxu1 }
 0x70c   :  { %v8849_v25 = vadd.f32 %v8848_v21, %v18270_v55 }
 0x70d   :  { %v18273_v14 = vpop.f32.mrf.mxu1 }
 0x70e   :  { %v8850_v54 = vadd.f32 %v18266_v40, %v8849_v25 }
 0x70f   :  { %v18276_v19 = vpop.f32.mrf.mxu1 }
 0x710   :  { %v8851_v23 = vadd.f32 %v8850_v54, %v18276_v19 }
 0x711   :  { %v18279_v31 = vpop.f32.mrf.mxu1 }
 0x712   :  { %v8852_v44 = vadd.f32 %v18273_v14, %v8851_v23 }
 0x713   :  { %v18282_v59 = vpop.f32.mrf.mxu1 }
 0x714   :  { %v8853_v57 = vadd.f32 %v8852_v44, %v18282_v59 }
 0x715   :  { %v18285_v28 = vpop.f32.mrf.mxu1 }
 0x716   :  { %v8854_v33 = vadd.f32 %v18279_v31, %v8853_v57 }
 0x717   :  { %v18288_v37 = vpop.f32.mrf.mxu1 }
 0x718   :  { %v8855_v50 = vadd.f32 %v8854_v33, %v18288_v37 }
 0x719   :  { %v18291_v26 = vpop.f32.mrf.mxu1 }
 0x71a   :  { %v8856_v46 = vadd.f32 %v18285_v28, %v8855_v50 }
 0x71b   :  { %v18294_v13 = vpop.f32.mrf.mxu1 }
 0x71c   :  { %v8857_v7 = vadd.f32 %v8856_v46, %v18294_v13 }
 0x71d   :  { %v18297_v11 = vpop.f32.mrf.mxu1 }
 0x71e   :  { %v8858_v15 = vadd.f32 %v18291_v26, %v8857_v7 }
 0x71f   :  { %v18300_v4 = vpop.f32.mrf.mxu1 }
 0x720   :  { %v8859_v27 = vadd.f32 %v8858_v15, %v18300_v4 }
 0x721   :  { %v18303_v51 = vpop.f32.mrf.mxu1 }
 0x722   :  { %v8860_v52 = vadd.f32 %v18297_v11, %v8859_v27 }
 0x723   :  { %v18306_v9 = vpop.f32.mrf.mxu1 }
 0x724   :  { %v8861_v10 = vadd.f32 %v8860_v52, %v18306_v9 }
 0x725   :  { %v18309_v42 = vpop.f32.mrf.mxu1 }
 0x726   :  { %v8862_v2 = vadd.f32 %v18303_v51, %v8861_v10 }
 0x727   :  { %v18312_v36 = vpop.f32.mrf.mxu1 }
 0x728   :  { %v8863_v61 = vadd.f32 %v8862_v2, %v18312_v36 }
 0x729   :  { %v18315_v38 = vpop.f32.mrf.mxu1 }
 0x72a   :  { %v8864_v47 = vadd.f32 %v18309_v42, %v8863_v61 }
 0x72b   :  { %v18318_v0 = vpop.f32.mrf.mxu1 }
 0x72c   :  { %v8865_v29 = vadd.f32 %v8864_v47, %v18318_v0 }
 0x72d   :  { %v18321_v32 = vpop.f32.mrf.mxu1 }
 0x72e   :  { %v8866_v60 = vadd.f32 %v18315_v38, %v8865_v29 }
 0x72f   :  { %v18324_v5 = vpop.f32.mrf.mxu1 }
 0x730   :  { %v8867_v3 = vadd.f32 %v8866_v60, %v18324_v5 }
 0x731   :  { %v18327_v45 = vpop.f32.mrf.mxu1 }
 0x732   :  { %v8868_v35 = vadd.f32 %v18321_v32, %v8867_v3 }
 0x733   :  { %v18330_v12 = vpop.f32.mrf.mxu1 }
 0x734   :  { %v8869_v17 = vadd.f32 %v8868_v35, %v18330_v12 }
 0x735   :  { %v18333_v1 = vpop.f32.mrf.mxu1 }
 0x736   :  { %v8870_v63 = vadd.f32 %v18327_v45, %v8869_v17 }
 0x737   :  { %v18336_v43 = vpop.f32.mrf.mxu1 }
 0x738   :  { %v8871_v20 = vadd.f32 %v8870_v63, %v18336_v43 }
 0x739   :  { %v18339_v30 = vpop.f32.mrf.mxu1 }
 0x73a   :  { %v8872_v34 = vadd.f32 %v18333_v1, %v8871_v20 }
 0x73b   :  { %v18342_v16 = vpop.f32.mrf.mxu1 }
 0x73c   :  { %v8873_v39 = vadd.f32 %v8872_v34, %v18342_v16 }
 0x73d   :  { %v18345_v41 = vpop.f32.mrf.mxu1 }
 0x73e   :  { %v8874_v56 = vadd.f32 %v18339_v30, %v8873_v39 }
 0x73f   :  { %v18348_v18 = vpop.f32.mrf.mxu1 }
 0x740   :  { %v8875_v6 = vadd.f32 %v8874_v56, %v18348_v18 }
 0x741   :  { %v18351_v62 = vpop.f32.mrf.mxu1 }
 0x742   :  { %20783 = vst [vmem:[#allocation43_spill] sm:$0xff] %v18351_v62  ;;  %v8876_v24 = vadd.f32 %v18345_v41, %v8875_v6 }
 0x743   :  { %v18354_v8 = vpop.f32.mrf.mxu1 }
 0x744   :  { %v8877_v58 = vadd.f32 %v8876_v24, %v18354_v8 }
 0x745   :  { %v18357_v48 = vpop.f32.mrf.mxu1 }
 0x746   :  { %20784 = vst [vmem:[#allocation21_spill] sm:$0xff] %v18357_v48  ;;  %v8878_v49 = vadd.f32 %v18351_v62, %v8877_v58 }
 0x747   :  { %v18360_v21 = vpop.f32.mrf.mxu1 }
 0x748   :  { %20785 = vst [vmem:[#allocation44_spill] sm:$0xff] %v18360_v21  ;;  %v8879_v25 = vadd.f32 %v8878_v49, %v18360_v21 }
 0x749   :  { %v18363_v54 = vpop.f32.mrf.mxu1 }
 0x74a   :  { %20786 = vst [vmem:[#allocation11_spill] sm:$0xff] %v18363_v54  ;;  %v8880_v23 = vadd.f32 %v18357_v48, %v8879_v25 }
 0x74b   :  { %v18366_v44 = vpop.f32.mrf.mxu1 }
 0x74c   :  { %20787 = vst [vmem:[#allocation46_spill] sm:$0xff] %v18366_v44  ;;  %v8881_v57 = vadd.f32 %v8880_v23, %v18366_v44 }
 0x74d   :  { %v18369_v33 = vpop.f32.mrf.mxu1 }
 0x74e   :  { %20788 = vst [vmem:[#allocation22_spill] sm:$0xff] %v18369_v33  ;;  %v8882_v50 = vadd.f32 %v18363_v54, %v8881_v57 }
 0x74f   :  { %v18372_v46 = vpop.f32.mrf.mxu1 }
 0x750   :  { %20789 = vst [vmem:[#allocation50_spill] sm:$0xff] %v18372_v46  ;;  %v8883_v7 = vadd.f32 %v8882_v50, %v18372_v46 }
 0x751   :  { %v18375_v15 = vpop.f32.mrf.mxu1 }
 0x752   :  { %20790 = vst [vmem:[#allocation23_spill] sm:$0xff] %v18375_v15  ;;  %v8884_v27 = vadd.f32 %v18369_v33, %v8883_v7 }
 0x753   :  { %v18378_v52 = vpop.f32.mrf.mxu1 }
 0x754   :  { %20791 = vst [vmem:[#allocation52_spill] sm:$0xff] %v18378_v52  ;;  %v8885_v10 = vadd.f32 %v8884_v27, %v18378_v52 }
 0x755   :  { %v18381_v2 = vpop.f32.mrf.mxu1 }
 0x756   :  { %20792 = vst [vmem:[#allocation47_spill] sm:$0xff] %v18381_v2  ;;  %v8886_v61 = vadd.f32 %v18375_v15, %v8885_v10 }
 0x757   :  { %v18384_v47 = vpop.f32.mrf.mxu1 }
 0x758   :  { %20793 = vst [vmem:[#allocation54_spill] sm:$0xff] %v18384_v47  ;;  %v8887_v29 = vadd.f32 %v8886_v61, %v18384_v47 }
 0x759   :  { %v18387_v60 = vpop.f32.mrf.mxu1 }
 0x75a   :  { %20794 = vst [vmem:[#allocation14_spill] sm:$0xff] %v18387_v60  ;;  %v8888_v3 = vadd.f32 %v18381_v2, %v8887_v29 }
 0x75b   :  { %v18390_v35 = vpop.f32.mrf.mxu1 }
 0x75c   :  { %20795 = vst [vmem:[#allocation56_spill] sm:$0xff] %v18390_v35  ;;  %v8889_v17 = vadd.f32 %v8888_v3, %v18390_v35 }
 0x75d   :  { %v18393_v63 = vpop.f32.mrf.mxu1 }
 0x75e   :  { %20796 = vst [vmem:[#allocation26_spill] sm:$0xff] %v18393_v63  ;;  %v8890_v20 = vadd.f32 %v18387_v60, %v8889_v17 }
 0x75f   :  { %v18396_v34 = vpop.f32.mrf.mxu1 }
 0x760   :  { %20797 = vst [vmem:[#allocation58_spill] sm:$0xff] %v18396_v34  ;;  %v8891_v39 = vadd.f32 %v8890_v20, %v18396_v34 }
 0x761   :  { %v12145_v56 = vpop.f32.mrf.mxu1 }
 0x762   :  { %v8892_v6 = vadd.f32 %v18393_v63, %v8891_v39 }
 0x763   :  { %v8759_v24 = vpop.f32.mrf.mxu1 }
 0x764   :  { %v8893_v58 = vadd.f32 %v8892_v6, %v8759_v24 }
 0x765   :  { %v12148_v49 = vpop.f32.mrf.mxu1 }
 0x766   :  { %v8894_v25 = vadd.f32 %v12145_v56, %v8893_v58 }
 0x767   :  { %v8769_v23 = vpop.f32.mrf.mxu1 }
 0x768   :  { %v8895_v57 = vadd.f32 %v8894_v25, %v8769_v23 }
 0x769   :  { %v12151_v50 = vpop.f32.mrf.mxu1 }
 0x76a   :  { %v8896_v7 = vadd.f32 %v12148_v49, %v8895_v57 }
 0x76b   :  { %v8779_v27 = vpop.f32.mrf.mxu1 }
 0x76c   :  { %v8897_v10 = vadd.f32 %v8896_v7, %v8779_v27 }
 0x76d   :  { %v12154_v61 = vpop.f32.mrf.mxu1 }
 0x76e   :  { %v8898_v29 = vadd.f32 %v12151_v50, %v8897_v10 }
 0x76f   :  { %v8789_v3 = vpop.f32.mrf.mxu1 }
 0x770   :  { %v8899_v17 = vadd.f32 %v8898_v29, %v8789_v3 }
 0x771   :  { %v12157_v60 = vpop.f32.mrf.mxu1 }
 0x772   :  { %v8900_v35 = vadd.f32 %v12154_v61, %v8899_v17 }
 0x773   :  { %v8799_v20 = vpop.f32.mrf.mxu1 }
 0x774   :  { %v8901_v34 = vadd.f32 %v8900_v35, %v8799_v20 }
 0x775   :  { %v12160_v2 = vpop.f32.mrf.mxu1 }
 0x776   :  { %v8902_v39 = vadd.f32 %v12157_v60, %v8901_v34 }
 0x777   :  { %v8809_v63 = vpop.f32.mrf.mxu1 }
 0x778   :  { %v8903_v6 = vadd.f32 %v8902_v39, %v8809_v63 }
 0x779   :  { %v12163_v47 = vpop.f32.mrf.mxu1 }
 0x77a   :  { %v8904_v58 = vadd.f32 %v12160_v2, %v8903_v6 }
 0x77b   :  { %v8819_v15 = vpop.f32.mrf.mxu1 }
 0x77c   :  { %v8905_v25 = vadd.f32 %v8904_v58, %v8819_v15 }
 0x77d   :  { %v12166_v52 = vpop.f32.mrf.mxu1 }
 0x77e   :  { %v8906_v57 = vadd.f32 %v12163_v47, %v8905_v25 }
 0x77f   :  { %v8829_v33 = vpop.f32.mrf.mxu1 }
 0x780   :  { %v8907_v7 = vadd.f32 %v8906_v57, %v8829_v33 }
 0x781   :  { %v12169_v46 = vpop.f32.mrf.mxu1 }
 0x782   :  { %v8908_v10 = vadd.f32 %v12166_v52, %v8907_v7 }
 0x783   :  { %v8839_v54 = vpop.f32.mrf.mxu1 }
 0x784   :  { %v8909_v29 = vadd.f32 %v8908_v10, %v8839_v54 }
 0x786   :  { %v8910_v44 = vadd.f32 %v12169_v46, %v8909_v29 }
 0x788   :  { %v8911_v17 = vrot.slane %v8910_v44, 4 }
 0x78a   :  { %v8912_v48 = vadd.f32 %v8911_v17, %v8910_v44 }
 0x78c   :  { %v8913_v35 = vrot.slane %v8912_v48, 2 }
 0x78e   :  { %v8914_v21 = vadd.f32 %v8913_v35, %v8912_v48 }
 0x790   :  { %v8915_v34 = vrot.slane %v8914_v21, 1 }
 0x792   :  { %v8916_v62 = vadd.f32 %v8915_v34, %v8914_v21 }
 0x794   :  { %v18400_v39 = vmul.f32 0.001953125, %v8916_v62 }
 0x796   :  { %v18403_v6 = vsub.f32 %v8759_v24, %v18400_v39  ;;  %v18406_v58 = vsub.f32 %v12145_v56, %v18400_v39  ;;  %v18409_v25 = vsub.f32 %v8769_v23, %v18400_v39  ;;  %v18412_v57 = vsub.f32 %v12148_v49, %v18400_v39 }
 0x797   :  { %v18415_v44 = vsub.f32 %v8779_v27, %v18400_v39  ;;  %v18418_v48 = vsub.f32 %v12151_v50, %v18400_v39  ;;  %v18421_v62 = vsub.f32 %v8789_v3, %v18400_v39  ;;  %v18424_v21 = vsub.f32 %v12154_v61, %v18400_v39 }
 0x798   :  { %v18427_v56 = vsub.f32 %v8799_v20, %v18400_v39  ;;  %v18430_v24 = vsub.f32 %v12157_v60, %v18400_v39  ;;  %v18433_v49 = vsub.f32 %v8809_v63, %v18400_v39  ;;  %v18436_v23 = vsub.f32 %v12160_v2, %v18400_v39 }
 0x799   :  { %v18439_v50 = vsub.f32 %v8819_v15, %v18400_v39  ;;  %v18442_v27 = vsub.f32 %v12163_v47, %v18400_v39  ;;  %v18445_v61 = vsub.f32 %v8829_v33, %v18400_v39  ;;  %v18448_v3 = vsub.f32 %v12166_v52, %v18400_v39 }
 0x79a   :  { %20798 = vst [vmem:[#allocation17_spill] sm:$0xff] %v18436_v23  ;;  %v18451_v60 = vsub.f32 %v8839_v54, %v18400_v39  ;;  %v18454_v63 = vsub.f32 %v12169_v46, %v18400_v39  ;;  %v18458_v2 = vsub.f32 %v18264_v53, %v18400_v39  ;;  %v18462_v15 = vsub.f32 %v18262_v22, %v18400_v39 }
 0x79b   :  { %20799 = vst [vmem:[#allocation60_spill] sm:$0xff] %v18439_v50  ;;  %20800 = vst [vmem:[#allocation28_spill] sm:$0xff] %v18442_v27  ;;  %v18466_v33 = vsub.f32 %v18270_v55, %v18400_v39  ;;  %v18474_v46 = vsub.f32 %v18266_v40, %v18400_v39  ;;  %v18478_v53 = vsub.f32 %v18276_v19, %v18400_v39 }
 0x79c   :  { %20801 = vst [vmem:[#allocation62_spill] sm:$0xff] %v18445_v61  ;;  %20802 = vst [vmem:[#allocation13_spill] sm:$0xff] %v18448_v3  ;;  %v8982_v52 = vmul.f32 %v18458_v2, %v18458_v2  ;;  %v8983_v54 = vmul.f32 %v18462_v15, %v18462_v15  ;;  %v18484_v55 = vsub.f32 %v18273_v14, %v18400_v39 }
 0x79d   :  { %v8984_v22 = vmul.f32 %v18466_v33, %v18466_v33  ;;  %v8985_v20 = vmul.f32 %v18474_v46, %v18474_v46  ;;  %v18490_v40 = vsub.f32 %v18282_v59, %v18400_v39  ;;  %v8986_v19 = vmul.f32 %v18478_v53, %v18478_v53 }
 0x79e   :  { %v9046_v47 = vadd.f32 %v8983_v54, %v8982_v52  ;;  %v18496_v29 = vsub.f32 %v18279_v31, %v18400_v39  ;;  %v8987_v14 = vmul.f32 %v18484_v55, %v18484_v55  ;;  %v18502_v35 = vsub.f32 %v18288_v37, %v18400_v39 }
 0x79f   :  { %v8988_v59 = vmul.f32 %v18490_v40, %v18490_v40  ;;  %v18508_v52 = vsub.f32 %v18285_v28, %v18400_v39 }
 0x7a0   :  { %v9047_v7 = vadd.f32 %v9046_v47, %v8984_v22  ;;  %v8989_v31 = vmul.f32 %v18496_v29, %v18496_v29  ;;  %v18514_v22 = vsub.f32 %v18294_v13, %v18400_v39  ;;  %v8990_v37 = vmul.f32 %v18502_v35, %v18502_v35 }
 0x7a1   :  { %v8991_v28 = vmul.f32 %v18508_v52, %v18508_v52 }
 0x7a2   :  { %v9048_v10 = vadd.f32 %v9047_v7, %v8985_v20  ;;  %v18520_v20 = vsub.f32 %v18291_v26, %v18400_v39  ;;  %v8992_v13 = vmul.f32 %v18514_v22, %v18514_v22 }
 0x7a4   :  { %v9049_v17 = vadd.f32 %v9048_v10, %v8986_v19  ;;  %v18526_v19 = vsub.f32 %v18300_v4, %v18400_v39  ;;  %v8993_v26 = vmul.f32 %v18520_v20, %v18520_v20 }
 0x7a6   :  { %v9050_v34 = vadd.f32 %v9049_v17, %v8987_v14  ;;  %v18532_v14 = vsub.f32 %v18297_v11, %v18400_v39  ;;  %v8994_v4 = vmul.f32 %v18526_v19, %v18526_v19 }
 0x7a8   :  { %v9051_v54 = vadd.f32 %v9050_v34, %v8988_v59  ;;  %v18538_v59 = vsub.f32 %v18306_v9, %v18400_v39  ;;  %v8995_v11 = vmul.f32 %v18532_v14, %v18532_v14 }
 0x7aa   :  { %v9052_v47 = vadd.f32 %v9051_v54, %v8989_v31  ;;  %v18544_v31 = vsub.f32 %v18303_v51, %v18400_v39  ;;  %v8996_v9 = vmul.f32 %v18538_v59, %v18538_v59 }
 0x7ac   :  { %v9053_v7 = vadd.f32 %v9052_v47, %v8990_v37  ;;  %v18550_v37 = vsub.f32 %v18312_v36, %v18400_v39  ;;  %v8997_v51 = vmul.f32 %v18544_v31, %v18544_v31 }
 0x7ae   :  { %v9054_v10 = vadd.f32 %v9053_v7, %v8991_v28  ;;  %v18556_v28 = vsub.f32 %v18309_v42, %v18400_v39  ;;  %v8998_v36 = vmul.f32 %v18550_v37, %v18550_v37 }
 0x7b0   :  { %v9055_v17 = vadd.f32 %v9054_v10, %v8992_v13  ;;  %v18562_v13 = vsub.f32 %v18318_v0, %v18400_v39  ;;  %v8999_v42 = vmul.f32 %v18556_v28, %v18556_v28 }
 0x7b2   :  { %v9056_v34 = vadd.f32 %v9055_v17, %v8993_v26  ;;  %v18568_v26 = vsub.f32 %v18315_v38, %v18400_v39  ;;  %v9000_v0 = vmul.f32 %v18562_v13, %v18562_v13 }
 0x7b4   :  { %v9057_v54 = vadd.f32 %v9056_v34, %v8994_v4  ;;  %v18574_v4 = vsub.f32 %v18324_v5, %v18400_v39  ;;  %v9001_v38 = vmul.f32 %v18568_v26, %v18568_v26 }
 0x7b6   :  { %v9058_v47 = vadd.f32 %v9057_v54, %v8995_v11  ;;  %v18580_v11 = vsub.f32 %v18321_v32, %v18400_v39  ;;  %v9002_v5 = vmul.f32 %v18574_v4, %v18574_v4 }
 0x7b8   :  { %v9059_v7 = vadd.f32 %v9058_v47, %v8996_v9  ;;  %v18586_v9 = vsub.f32 %v18330_v12, %v18400_v39  ;;  %v9003_v32 = vmul.f32 %v18580_v11, %v18580_v11 }
 0x7ba   :  { %v9060_v10 = vadd.f32 %v9059_v7, %v8997_v51  ;;  %v18592_v51 = vsub.f32 %v18327_v45, %v18400_v39  ;;  %v9004_v12 = vmul.f32 %v18586_v9, %v18586_v9 }
 0x7bc   :  { %v9061_v17 = vadd.f32 %v9060_v10, %v8998_v36  ;;  %v18598_v36 = vsub.f32 %v18336_v43, %v18400_v39  ;;  %v9005_v45 = vmul.f32 %v18592_v51, %v18592_v51 }
 0x7be   :  { %v9062_v34 = vadd.f32 %v9061_v17, %v8999_v42  ;;  %v18604_v42 = vsub.f32 %v18333_v1, %v18400_v39  ;;  %v9006_v43 = vmul.f32 %v18598_v36, %v18598_v36 }
 0x7c0   :  { %v9063_v54 = vadd.f32 %v9062_v34, %v9000_v0  ;;  %v18610_v0 = vsub.f32 %v18342_v16, %v18400_v39  ;;  %v9007_v1 = vmul.f32 %v18604_v42, %v18604_v42 }
 0x7c2   :  { %v9064_v47 = vadd.f32 %v9063_v54, %v9001_v38  ;;  %v18616_v38 = vsub.f32 %v18339_v30, %v18400_v39  ;;  %v9008_v16 = vmul.f32 %v18610_v0, %v18610_v0 }
 0x7c4   :  { %v9065_v7 = vadd.f32 %v9064_v47, %v9002_v5  ;;  %v18622_v5 = vsub.f32 %v18348_v18, %v18400_v39  ;;  %v9009_v30 = vmul.f32 %v18616_v38, %v18616_v38 }
 0x7c6   :  { %v9066_v10 = vadd.f32 %v9065_v7, %v9003_v32  ;;  %v18628_v32 = vsub.f32 %v18345_v41, %v18400_v39  ;;  %v9010_v18 = vmul.f32 %v18622_v5, %v18622_v5 }
 0x7c8   :  { %v9067_v17 = vadd.f32 %v9066_v10, %v9004_v12  ;;  %20803 = vst [vmem:[#allocation65_spill] sm:$0xff] %v18628_v32  ;;  %v18634_v12 = vsub.f32 %v18354_v8, %v18400_v39  ;;  %v9011_v41 = vmul.f32 %v18628_v32, %v18628_v32 }
 0x7ca   :  { %v9068_v34 = vadd.f32 %v9067_v17, %v9005_v45  ;;  %20804 = vst [vmem:[#allocation31_spill] sm:$0xff] %v18634_v12  ;;  %v20805_v45 = vld [vmem:[#allocation43_spill] sm:$0xff]  ;;  %v9012_v8 = vmul.f32 %v18634_v12, %v18634_v12 }
 0x7cb   :  { %v18640_v17 = vsub.f32 %v20805_v45, %v18400_v39  ;;  %v20811_v45 = vld [vmem:[#allocation46_spill] sm:$0xff] }
 0x7cc   :  { %v9069_v54 = vadd.f32 %v9068_v34, %v9006_v43  ;;  %v20807_v34 = vld [vmem:[#allocation44_spill] sm:$0xff]  ;;  %v18658_v32 = vsub.f32 %v20811_v45, %v18400_v39  ;;  %v20817_v45 = vld [vmem:[#allocation22_spill] sm:$0xff] }
 0x7cd   :  { %20806 = vst [vmem:[#allocation35_spill] sm:$0xff] %v18640_v17 }
 0x7ce   :  { %v9070_v47 = vadd.f32 %v9069_v54, %v9007_v1  ;;  %v18646_v1 = vsub.f32 %v20807_v34, %v18400_v39  ;;  %20812 = vst [vmem:[#allocation39_spill] sm:$0xff] %v18658_v32  ;;  %v20813_v34 = vld [vmem:[#allocation11_spill] sm:$0xff] }
 0x7cf   :  { %v18664_v12 = vsub.f32 %v20813_v34, %v18400_v39  ;;  %v20819_v34 = vld [vmem:[#allocation52_spill] sm:$0xff] }
 0x7d0   :  { %v9071_v7 = vadd.f32 %v9070_v47, %v9008_v16  ;;  %20808 = vst [vmem:[#allocation34_spill] sm:$0xff] %v18646_v1  ;;  %v20809_v16 = vld [vmem:[#allocation21_spill] sm:$0xff] }
 0x7d1   :  { %v18652_v47 = vsub.f32 %v20809_v16, %v18400_v39  ;;  %20814 = vst [vmem:[#allocation41_spill] sm:$0xff] %v18664_v12  ;;  %v20815_v16 = vld [vmem:[#allocation50_spill] sm:$0xff] }
 0x7d2   :  { %v9072_v10 = vadd.f32 %v9071_v7, %v9009_v30  ;;  %v9013_v30 = vmul.f32 %v18640_v17, %v18640_v17  ;;  %v18670_v17 = vsub.f32 %v20815_v16, %v18400_v39  ;;  %v20821_v16 = vld [vmem:[#allocation23_spill] sm:$0xff] }
 0x7d3   :  { %20810 = vst [vmem:[#allocation37_spill] sm:$0xff] %v18652_v47 }
 0x7d4   :  { %v9073_v43 = vadd.f32 %v9072_v10, %v9010_v18  ;;  %v9014_v18 = vmul.f32 %v18646_v1, %v18646_v1  ;;  %20816 = vst [vmem:[#allocation64_spill] sm:$0xff] %v18670_v17  ;;  %v18676_v1 = vsub.f32 %v20817_v45, %v18400_v39  ;;  %v20823_v45 = vld [vmem:[#allocation54_spill] sm:$0xff] }
 0x7d6   :  { %v9074_v54 = vadd.f32 %v9073_v43, %v9011_v41  ;;  %v9015_v41 = vmul.f32 %v18652_v47, %v18652_v47  ;;  %20818 = vst [vmem:[#allocation66_spill] sm:$0xff] %v18676_v1  ;;  %v18682_v47 = vsub.f32 %v20819_v34, %v18400_v39  ;;  %v20825_v34 = vld [vmem:[#allocation47_spill] sm:$0xff] }
 0x7d8   :  { %v9075_v7 = vadd.f32 %v9074_v54, %v9012_v8  ;;  %v9016_v8 = vmul.f32 %v18658_v32, %v18658_v32  ;;  %20820 = vst [vmem:[#allocation45_spill] sm:$0xff] %v18682_v47  ;;  %v18688_v32 = vsub.f32 %v20821_v16, %v18400_v39  ;;  %v20826_v16 = vld [vmem:[#allocation56_spill] sm:$0xff] }
 0x7da   :  { %v9076_v10 = vadd.f32 %v9075_v7, %v9013_v30  ;;  %v9017_v30 = vmul.f32 %v18664_v12, %v18664_v12  ;;  %20822 = vst [vmem:[#allocation48_spill] sm:$0xff] %v18688_v32  ;;  %v18694_v12 = vsub.f32 %v20823_v45, %v18400_v39  ;;  %v20828_v45 = vld [vmem:[#allocation14_spill] sm:$0xff] }
 0x7dc   :  { %v9077_v43 = vadd.f32 %v9076_v10, %v9014_v18  ;;  %v9018_v18 = vmul.f32 %v18670_v17, %v18670_v17  ;;  %20824 = vst [vmem:[#allocation51_spill] sm:$0xff] %v18694_v12  ;;  %v18700_v17 = vsub.f32 %v20825_v34, %v18400_v39  ;;  %v20829_v34 = vld [vmem:[#allocation58_spill] sm:$0xff] }
 0x7de   :  { %v9078_v54 = vadd.f32 %v9077_v43, %v9015_v41  ;;  %v9019_v41 = vmul.f32 %v18676_v1, %v18676_v1  ;;  %v18706_v1 = vsub.f32 %v20826_v16, %v18400_v39  ;;  %v20830_v16 = vld [vmem:[#allocation26_spill] sm:$0xff] }
 0x7e0   :  { %v9079_v7 = vadd.f32 %v9078_v54, %v9016_v8  ;;  %v9020_v8 = vmul.f32 %v18682_v47, %v18682_v47  ;;  %20827 = vst [vmem:[#allocation53_spill] sm:$0xff] %v18706_v1  ;;  %v18712_v47 = vsub.f32 %v20828_v45, %v18400_v39 }
 0x7e2   :  { %v9080_v10 = vadd.f32 %v9079_v7, %v9017_v30  ;;  %v9021_v30 = vmul.f32 %v18688_v32, %v18688_v32  ;;  %v18718_v32 = vsub.f32 %v20829_v34, %v18400_v39 }
 0x7e4   :  { %v9081_v43 = vadd.f32 %v9080_v10, %v9018_v18  ;;  %v9022_v18 = vmul.f32 %v18694_v12, %v18694_v12  ;;  %v18724_v12 = vsub.f32 %v20830_v16, %v18400_v39  ;;  %v9026_v45 = vmul.f32 %v18718_v32, %v18718_v32 }
 0x7e5   :  { %v9029_v39 = vmul.f32 %v18406_v58, %v18406_v58  ;;  %v9030_v16 = vmul.f32 %v18409_v25, %v18409_v25 }
 0x7e6   :  { %v9082_v54 = vadd.f32 %v9081_v43, %v9019_v41  ;;  %v9023_v41 = vmul.f32 %v18700_v17, %v18700_v17 }
 0x7e8   :  { %v9083_v7 = vadd.f32 %v9082_v54, %v9020_v8  ;;  %v9024_v8 = vmul.f32 %v18706_v1, %v18706_v1  ;;  %v9028_v1 = vmul.f32 %v18403_v6, %v18403_v6 }
 0x7ea   :  { %v9084_v10 = vadd.f32 %v9083_v7, %v9021_v30  ;;  %v9025_v30 = vmul.f32 %v18712_v47, %v18712_v47 }
 0x7ec   :  { %v9085_v43 = vadd.f32 %v9084_v10, %v9022_v18  ;;  %v9027_v10 = vmul.f32 %v18724_v12, %v18724_v12 }
 0x7ee   :  { %v9086_v54 = vadd.f32 %v9085_v43, %v9023_v41 }
 0x7f0   :  { %v9087_v7 = vadd.f32 %v9086_v54, %v9024_v8  ;;  %v9031_v54 = vmul.f32 %v18412_v57, %v18412_v57 }
 0x7f2   :  { %v9088_v18 = vadd.f32 %v9087_v7, %v9025_v30  ;;  %v9032_v7 = vmul.f32 %v18415_v44, %v18415_v44 }
 0x7f4   :  { %v9089_v34 = vadd.f32 %v9088_v18, %v9026_v45  ;;  %v9033_v18 = vmul.f32 %v18418_v48, %v18418_v48 }
 0x7f6   :  { %v9090_v41 = vadd.f32 %v9089_v34, %v9027_v10  ;;  %v9034_v34 = vmul.f32 %v18421_v62, %v18421_v62 }
 0x7f8   :  { %v9091_v43 = vadd.f32 %v9090_v41, %v9028_v1  ;;  %v9035_v41 = vmul.f32 %v18424_v21, %v18424_v21 }
 0x7fa   :  { %v9092_v8 = vadd.f32 %v9091_v43, %v9029_v39  ;;  %v9036_v43 = vmul.f32 %v18427_v56, %v18427_v56 }
 0x7fc   :  { %v9093_v30 = vadd.f32 %v9092_v8, %v9030_v16  ;;  %v9037_v8 = vmul.f32 %v18430_v24, %v18430_v24 }
 0x7fe   :  { %v9094_v45 = vadd.f32 %v9093_v30, %v9031_v54  ;;  %v9038_v30 = vmul.f32 %v18433_v49, %v18433_v49 }
 0x800   :  { %v9095_v10 = vadd.f32 %v9094_v45, %v9032_v7  ;;  %v9039_v45 = vmul.f32 %v18436_v23, %v18436_v23 }
 0x802   :  { %v9096_v1 = vadd.f32 %v9095_v10, %v9033_v18  ;;  %v9040_v10 = vmul.f32 %v18439_v50, %v18439_v50 }
 0x804   :  { %v9097_v39 = vadd.f32 %v9096_v1, %v9034_v34  ;;  %v9041_v1 = vmul.f32 %v18442_v27, %v18442_v27 }
 0x806   :  { %v9098_v16 = vadd.f32 %v9097_v39, %v9035_v41  ;;  %v9042_v39 = vmul.f32 %v18445_v61, %v18445_v61 }
 0x808   :  { %v9099_v54 = vadd.f32 %v9098_v16, %v9036_v43  ;;  %v9043_v16 = vmul.f32 %v18448_v3, %v18448_v3 }
 0x80a   :  { %v9100_v7 = vadd.f32 %v9099_v54, %v9037_v8  ;;  %v9044_v54 = vmul.f32 %v18451_v60, %v18451_v60 }
 0x80c   :  { %v9101_v18 = vadd.f32 %v9100_v7, %v9038_v30  ;;  %v9045_v7 = vmul.f32 %v18454_v63, %v18454_v63 }
 0x80e   :  { %v9102_v34 = vadd.f32 %v9101_v18, %v9039_v45 }
 0x810   :  { %v9103_v41 = vadd.f32 %v9102_v34, %v9040_v10 }
 0x812   :  { %v9104_v43 = vadd.f32 %v9103_v41, %v9041_v1 }
 0x814   :  { %v9105_v8 = vadd.f32 %v9104_v43, %v9042_v39  ;;  %v18773_v39 = vld [vmem:[%s20002_s8] ss:$0 sm:$0xff] }
 0x816   :  { %v9106_v30 = vadd.f32 %v9105_v8, %v9043_v16 }
 0x818   :  { %v9107_v45 = vadd.f32 %v9106_v30, %v9044_v54 }
 0x81a   :  { %v9108_v18 = vadd.f32 %v9107_v45, %v9045_v7 }
 0x81c   :  { %v9109_v50 = vrot.slane %v9108_v18, 4 }
 0x81e   :  { %v9110_v27 = vadd.f32 %v9109_v50, %v9108_v18  ;;  %v20832_v18 = vld [vmem:[#allocation65_spill] sm:$0xff] }
 0x820   :  { %v9111_v10 = vrot.slane %v9110_v27, 2 }
 0x822   :  { %v9112_v34 = vadd.f32 %v9111_v10, %v9110_v27  ;;  %v20833_v10 = vld [vmem:[#allocation31_spill] sm:$0xff] }
 0x824   :  { %v9113_v23 = vrot.slane %v9112_v34, 1 }
 0x826   :  { %v9114_v61 = vadd.f32 %v9113_v23, %v9112_v34  ;;  %v20834_v34 = vld [vmem:[#allocation35_spill] sm:$0xff] }
 0x828   :  { %v9115_v1 = vmul.f32 0.001953125, %v9114_v61  ;;  %v18792_v61 = vld [vmem:[%s20003_s9] ss:$0 sm:$0xff] }
 0x829   :  { %20831 = vst [vmem:[#allocation55_spill] sm:$0xff] %v18792_v61 }
 0x82a   :  { %v9116_v41 = vadd.f32 1e-05, %v9115_v1  ;;  %v20835_v1 = vld [vmem:[#allocation34_spill] sm:$0xff] }
 0x82c   :  { %12186 = vrsqrt.f32 %v9116_v41  ;;  %v20836_v41 = vld [vmem:[#allocation37_spill] sm:$0xff] }
 0x839   :  { %v18768_v3 = vpop.eup %12186 }
 0x83a   :  { %v9180_v43 = vmul.f32 %v18768_v3, %v18451_v60  ;;  %v18779_v50 = vmul.f32 %v18768_v3, %v18458_v2  ;;  %v18783_v23 = vmul.f32 %v18768_v3, %v18462_v15  ;;  %v18787_v27 = vmul.f32 %v18768_v3, %v18466_v33 }
 0x83b   :  { %v18796_v60 = vmul.f32 %v18768_v3, %v18474_v46  ;;  %v18800_v2 = vmul.f32 %v18768_v3, %v18478_v53  ;;  %v18804_v15 = vmul.f32 %v18768_v3, %v18484_v55  ;;  %v18808_v33 = vmul.f32 %v18768_v3, %v18490_v40  ;;  %v9386_v55 = vld [vmem:[%s19994_s0 + $0x1f0] sm:$0xff] }
 0x83c   :  { %v9251_v16 = vmul.f32 %v18773_v39, %v9180_v43  ;;  %v18813_v8 = vmul.f32 %v18768_v3, %v18496_v29  ;;  %v18817_v46 = vmul.f32 %v18768_v3, %v18502_v35  ;;  %v18821_v53 = vmul.f32 %v18768_v3, %v18508_v52  ;;  %v20837_v43 = vld [vmem:[#allocation39_spill] sm:$0xff] }
 0x83d   :  { %v18828_v40 = vmul.f32 %v18768_v3, %v18514_v22  ;;  %v18832_v29 = vmul.f32 %v18768_v3, %v18520_v20  ;;  %v18836_v35 = vmul.f32 %v18768_v3, %v18526_v19  ;;  %v18840_v52 = vmul.f32 %v18768_v3, %v18532_v14 }
 0x83e   :  { %v9322_v54 = vadd.f32 %v18792_v61, %v9251_v16  ;;  %v18845_v30 = vmul.f32 %v18768_v3, %v18538_v59  ;;  %v18849_v22 = vmul.f32 %v18768_v3, %v18544_v31  ;;  %v18853_v20 = vmul.f32 %v18768_v3, %v18550_v37  ;;  %v20843_v61 = vld [vmem:[#allocation48_spill] sm:$0xff] }
 0x83f   :  { %v18857_v19 = vmul.f32 %v18768_v3, %v18556_v28  ;;  %v18861_v14 = vmul.f32 %v18768_v3, %v18562_v13  ;;  %v18865_v59 = vmul.f32 %v18768_v3, %v18568_v26  ;;  %v18869_v31 = vmul.f32 %v18768_v3, %v18574_v4 }
 0x840   :  { %v9450_v7 = vadd.f32 %v9386_v55, %v9322_v54  ;;  %v18873_v37 = vmul.f32 %v18768_v3, %v18580_v11  ;;  %v18877_v28 = vmul.f32 %v18768_v3, %v18586_v9  ;;  %v18881_v13 = vmul.f32 %v18768_v3, %v18592_v51  ;;  %v20838_v55 = vld [vmem:[#allocation41_spill] sm:$0xff] }
 0x841   :  { %v18885_v26 = vmul.f32 %v18768_v3, %v18598_v36  ;;  %v18889_v4 = vmul.f32 %v18768_v3, %v18604_v42  ;;  %v18893_v11 = vmul.f32 %v18768_v3, %v18610_v0  ;;  %v18897_v9 = vmul.f32 %v18768_v3, %v18616_v38 }
 0x842   :  { %v9514_v45 = vmax.f32 %v9450_v7, 0.0  ;;  %v18901_v51 = vmul.f32 %v18768_v3, %v18622_v5  ;;  %v18905_v36 = vmul.f32 %v18768_v3, %v20832_v18  ;;  %v18909_v42 = vmul.f32 %v18768_v3, %v20833_v10  ;;  %v20839_v7 = vld [vmem:[#allocation64_spill] sm:$0xff]  ;;  %v20841_v10 = vld [vmem:[#allocation66_spill] sm:$0xff] }
 0x843   :  { %v18913_v0 = vmul.f32 %v18768_v3, %v20834_v34  ;;  %v18917_v38 = vmul.f32 %v18768_v3, %v20835_v1  ;;  %v18921_v5 = vmul.f32 %v18768_v3, %v20836_v41  ;;  %v18925_v16 = vmul.f32 %v18768_v3, %v20837_v43  ;;  %v20842_v1 = vld [vmem:[#allocation45_spill] sm:$0xff] }
 0x844   :  { %9578 = vst [vmem:[#allocation3 + $0x1f0] sm:$0xff] %v9514_v45  ;;  %v18929_v54 = vmul.f32 %v18768_v3, %v20838_v55  ;;  %v18933_v18 = vmul.f32 %v18768_v3, %v20839_v7  ;;  %v18937_v34 = vmul.f32 %v18768_v3, %v20841_v10  ;;  %v18941_v41 = vmul.f32 %v18768_v3, %v20842_v1  ;;  %v20844_v45 = vld [vmem:[#allocation51_spill] sm:$0xff] }
 0x845   :  { %v18945_v43 = vmul.f32 %v18768_v3, %v20843_v61  ;;  %v18949_v55 = vmul.f32 %v18768_v3, %v20844_v45  ;;  %v18953_v7 = vmul.f32 %v18768_v3, %v18700_v17  ;;  %v18961_v1 = vmul.f32 %v18768_v3, %v18712_v47 }
 0x846   :  { %20840 = vst [vmem:[#allocation57_spill] sm:$0xff] %v18933_v18  ;;  %v20845_v18 = vld [vmem:[#allocation53_spill] sm:$0xff]  ;;  %v18965_v61 = vmul.f32 %v18768_v3, %v18718_v32  ;;  %v18969_v45 = vmul.f32 %v18768_v3, %v18724_v12  ;;  %v18973_v17 = vmul.f32 %v18768_v3, %v18403_v6  ;;  %v18981_v47 = vmul.f32 %v18768_v3, %v18409_v25 }
 0x847   :  { %v18957_v10 = vmul.f32 %v18768_v3, %v20845_v18  ;;  %v18977_v18 = vmul.f32 %v18768_v3, %v18406_v58  ;;  %v18985_v32 = vmul.f32 %v18768_v3, %v18412_v57  ;;  %v18989_v12 = vmul.f32 %v18768_v3, %v18415_v44 }
 0x848   :  { %v18993_v6 = vmul.f32 %v18768_v3, %v18418_v48  ;;  %v18997_v58 = vmul.f32 %v18768_v3, %v18421_v62  ;;  %v19001_v25 = vmul.f32 %v18768_v3, %v18424_v21  ;;  %v19005_v57 = vmul.f32 %v18768_v3, %v18427_v56 }
 0x849   :  { %v19009_v44 = vmul.f32 %v18768_v3, %v18430_v24  ;;  %v19013_v48 = vmul.f32 %v18768_v3, %v18433_v49 }
 0x84a   :  { %20846 = vst [vmem:[#allocation61_spill] sm:$0xff] %v18993_v6  ;;  %20847 = vst [vmem:[#allocation59_spill] sm:$0xff] %v18997_v58  ;;  %v20851_v6 = vld [vmem:[#allocation17_spill] sm:$0xff]  ;;  %v20852_v58 = vld [vmem:[#allocation60_spill] sm:$0xff] }
 0x84b   :  { %20848 = vst [vmem:[#allocation69_spill] sm:$0xff] %v19001_v25  ;;  %20849 = vst [vmem:[#allocation63_spill] sm:$0xff] %v19005_v57  ;;  %v19017_v62 = vmul.f32 %v18768_v3, %v20851_v6  ;;  %v19021_v21 = vmul.f32 %v18768_v3, %v20852_v58  ;;  %v20853_v25 = vld [vmem:[#allocation28_spill] sm:$0xff]  ;;  %v20854_v57 = vld [vmem:[#allocation62_spill] sm:$0xff]  ;;  %v19037_v6 = vmul.f32 %v18768_v3, %v18454_v63 }
 0x84c   :  { %20850 = vst [vmem:[#allocation68_spill] sm:$0xff] %v19009_v44  ;;  %v19025_v56 = vmul.f32 %v18768_v3, %v20853_v25  ;;  %v19029_v24 = vmul.f32 %v18768_v3, %v20854_v57  ;;  %v20855_v44 = vld [vmem:[#allocation13_spill] sm:$0xff]  ;;  %v19041_v58 = vmul.f32 %v18773_v39, %v18779_v50  ;;  %v19045_v25 = vmul.f32 %v18773_v39, %v18783_v23 }
 0x84d   :  { %v19033_v49 = vmul.f32 %v18768_v3, %v20855_v44  ;;  %v19049_v57 = vmul.f32 %v18773_v39, %v18787_v27  ;;  %v19053_v44 = vmul.f32 %v18773_v39, %v18796_v60  ;;  %v19057_v3 = vmul.f32 %v18773_v39, %v18800_v2 }
 0x84e   :  { %v19061_v63 = vmul.f32 %v18773_v39, %v18804_v15  ;;  %v19065_v50 = vmul.f32 %v18773_v39, %v18808_v33  ;;  %v19069_v23 = vmul.f32 %v18773_v39, %v18813_v8  ;;  %v19073_v27 = vmul.f32 %v18773_v39, %v18817_v46 }
 0x84f   :  { %v19077_v60 = vmul.f32 %v18773_v39, %v18821_v53  ;;  %v19081_v2 = vmul.f32 %v18773_v39, %v18828_v40  ;;  %v19085_v15 = vmul.f32 %v18773_v39, %v18832_v29  ;;  %v19089_v33 = vmul.f32 %v18773_v39, %v18836_v35 }
 0x850   :  { %v19093_v8 = vmul.f32 %v18773_v39, %v18840_v52  ;;  %v19097_v46 = vmul.f32 %v18773_v39, %v18845_v30  ;;  %v19101_v53 = vmul.f32 %v18773_v39, %v18849_v22  ;;  %v19105_v40 = vmul.f32 %v18773_v39, %v18853_v20 }
 0x851   :  { %v19109_v29 = vmul.f32 %v18773_v39, %v18857_v19  ;;  %v19113_v35 = vmul.f32 %v18773_v39, %v18861_v14  ;;  %v19117_v52 = vmul.f32 %v18773_v39, %v18865_v59  ;;  %v19121_v30 = vmul.f32 %v18773_v39, %v18869_v31 }
 0x852   :  { %v19125_v22 = vmul.f32 %v18773_v39, %v18873_v37  ;;  %v19129_v20 = vmul.f32 %v18773_v39, %v18877_v28  ;;  %v19133_v19 = vmul.f32 %v18773_v39, %v18881_v13  ;;  %v19137_v14 = vmul.f32 %v18773_v39, %v18885_v26 }
 0x853   :  { %v19141_v59 = vmul.f32 %v18773_v39, %v18889_v4  ;;  %v19145_v31 = vmul.f32 %v18773_v39, %v18893_v11  ;;  %v19149_v37 = vmul.f32 %v18773_v39, %v18897_v9  ;;  %v19153_v28 = vmul.f32 %v18773_v39, %v18901_v51 }
 0x854   :  { %v19157_v13 = vmul.f32 %v18773_v39, %v18905_v36  ;;  %v19161_v26 = vmul.f32 %v18773_v39, %v18909_v42  ;;  %v19165_v4 = vmul.f32 %v18773_v39, %v18913_v0  ;;  %v19169_v11 = vmul.f32 %v18773_v39, %v18917_v38  ;;  %v20856_v42 = vld [vmem:[#allocation57_spill] sm:$0xff] }
 0x855   :  { %v19173_v9 = vmul.f32 %v18773_v39, %v18921_v5  ;;  %v19177_v51 = vmul.f32 %v18773_v39, %v18925_v16  ;;  %v19181_v36 = vmul.f32 %v18773_v39, %v18929_v54  ;;  %v19185_v0 = vmul.f32 %v18773_v39, %v20856_v42 }
 0x856   :  { %v19189_v38 = vmul.f32 %v18773_v39, %v18937_v34  ;;  %v19193_v5 = vmul.f32 %v18773_v39, %v18941_v41  ;;  %v19197_v16 = vmul.f32 %v18773_v39, %v18945_v43  ;;  %v19201_v54 = vmul.f32 %v18773_v39, %v18949_v55 }
 0x857   :  { %v19205_v42 = vmul.f32 %v18773_v39, %v18953_v7  ;;  %v19209_v34 = vmul.f32 %v18773_v39, %v18957_v10  ;;  %v19213_v41 = vmul.f32 %v18773_v39, %v18961_v1  ;;  %v19217_v43 = vmul.f32 %v18773_v39, %v18965_v61 }
 0x858   :  { %v19221_v55 = vmul.f32 %v18773_v39, %v18969_v45  ;;  %v19225_v7 = vmul.f32 %v18773_v39, %v18973_v17  ;;  %v19229_v10 = vmul.f32 %v18773_v39, %v18977_v18  ;;  %v19233_v1 = vmul.f32 %v18773_v39, %v18981_v47 }
 0x859   :  { %v19237_v61 = vmul.f32 %v18773_v39, %v18985_v32  ;;  %v19241_v45 = vmul.f32 %v18773_v39, %v18989_v12 }
 0x85a   :  { %20857 = vst [vmem:[#allocation67_spill] sm:$0xff] %v19221_v55  ;;  %20858 = vst [vmem:[#allocation71_spill] sm:$0xff] %v19225_v7  ;;  %v20862_v55 = vld [vmem:[#allocation61_spill] sm:$0xff]  ;;  %v20863_v7 = vld [vmem:[#allocation59_spill] sm:$0xff] }
 0x85b   :  { %20859 = vst [vmem:[#allocation70_spill] sm:$0xff] %v19229_v10  ;;  %20860 = vst [vmem:[#allocation73_spill] sm:$0xff] %v19233_v1  ;;  %v19245_v17 = vmul.f32 %v18773_v39, %v20862_v55  ;;  %v19249_v18 = vmul.f32 %v18773_v39, %v20863_v7  ;;  %v20864_v10 = vld [vmem:[#allocation69_spill] sm:$0xff]  ;;  %v20865_v1 = vld [vmem:[#allocation63_spill] sm:$0xff]  ;;  %v19265_v55 = vmul.f32 %v18773_v39, %v19013_v48 }
 0x85c   :  { %20861 = vst [vmem:[#allocation72_spill] sm:$0xff] %v19237_v61  ;;  %v19253_v47 = vmul.f32 %v18773_v39, %v20864_v10  ;;  %v19257_v32 = vmul.f32 %v18773_v39, %v20865_v1  ;;  %v20866_v61 = vld [vmem:[#allocation68_spill] sm:$0xff]  ;;  %v19269_v7 = vmul.f32 %v18773_v39, %v19017_v62  ;;  %v19273_v10 = vmul.f32 %v18773_v39, %v19021_v21 }
 0x85d   :  { %v19261_v12 = vmul.f32 %v18773_v39, %v20866_v61  ;;  %v19277_v1 = vmul.f32 %v18773_v39, %v19025_v56  ;;  %v19281_v61 = vmul.f32 %v18773_v39, %v19029_v24  ;;  %v19285_v48 = vmul.f32 %v18773_v39, %v19033_v49 }
 0x85e   :  { %20867 = vst [vmem:[#allocation25_spill] sm:$0xff] %v19269_v7  ;;  %v19289_v62 = vmul.f32 %v18773_v39, %v19037_v6  ;;  %v20868_v7 = vld [vmem:[#allocation55_spill] sm:$0xff] }
 0x85f   :  { %v19293_v21 = vadd.f32 %v20868_v7, %v19041_v58  ;;  %v19297_v56 = vadd.f32 %v20868_v7, %v19045_v25  ;;  %v19301_v24 = vadd.f32 %v20868_v7, %v19049_v57  ;;  %v19305_v49 = vadd.f32 %v20868_v7, %v19053_v44 }
 0x860   :  { %v19309_v39 = vadd.f32 %v20868_v7, %v19057_v3  ;;  %v19313_v6 = vadd.f32 %v20868_v7, %v19061_v63  ;;  %v19317_v58 = vadd.f32 %v20868_v7, %v19065_v50  ;;  %v19321_v25 = vadd.f32 %v20868_v7, %v19069_v23 }
 0x861   :  { %v19325_v57 = vadd.f32 %v20868_v7, %v19073_v27  ;;  %v19329_v44 = vadd.f32 %v20868_v7, %v19077_v60  ;;  %v19333_v3 = vadd.f32 %v20868_v7, %v19081_v2  ;;  %v19337_v63 = vadd.f32 %v20868_v7, %v19085_v15 }
 0x862   :  { %v19341_v50 = vadd.f32 %v20868_v7, %v19089_v33  ;;  %v19345_v23 = vadd.f32 %v20868_v7, %v19093_v8  ;;  %v19349_v27 = vadd.f32 %v20868_v7, %v19097_v46  ;;  %v19353_v60 = vadd.f32 %v20868_v7, %v19101_v53 }
 0x863   :  { %v19357_v2 = vadd.f32 %v20868_v7, %v19105_v40  ;;  %v19361_v15 = vadd.f32 %v20868_v7, %v19109_v29  ;;  %v19365_v33 = vadd.f32 %v20868_v7, %v19113_v35  ;;  %v19369_v8 = vadd.f32 %v20868_v7, %v19117_v52 }
 0x864   :  { %v19373_v46 = vadd.f32 %v20868_v7, %v19121_v30  ;;  %v19377_v53 = vadd.f32 %v20868_v7, %v19125_v22  ;;  %v19381_v40 = vadd.f32 %v20868_v7, %v19129_v20  ;;  %v19385_v29 = vadd.f32 %v20868_v7, %v19133_v19 }
 0x865   :  { %v19389_v35 = vadd.f32 %v20868_v7, %v19137_v14  ;;  %v19393_v52 = vadd.f32 %v20868_v7, %v19141_v59  ;;  %v19397_v30 = vadd.f32 %v20868_v7, %v19145_v31  ;;  %v19401_v22 = vadd.f32 %v20868_v7, %v19149_v37 }
 0x866   :  { %v19405_v20 = vadd.f32 %v20868_v7, %v19153_v28  ;;  %v19409_v19 = vadd.f32 %v20868_v7, %v19157_v13  ;;  %v19413_v14 = vadd.f32 %v20868_v7, %v19161_v26  ;;  %v19417_v59 = vadd.f32 %v20868_v7, %v19165_v4 }
 0x867   :  { %v19421_v31 = vadd.f32 %v20868_v7, %v19169_v11  ;;  %v19425_v37 = vadd.f32 %v20868_v7, %v19173_v9  ;;  %v19429_v28 = vadd.f32 %v20868_v7, %v19177_v51  ;;  %v19433_v13 = vadd.f32 %v20868_v7, %v19181_v36  ;;  %v9325_v36 = vld [vmem:[%s19994_s0 + $0x8] sm:$0xff] }
 0x868   :  { %v19437_v26 = vadd.f32 %v20868_v7, %v19185_v0  ;;  %v19441_v4 = vadd.f32 %v20868_v7, %v19189_v38  ;;  %v19445_v11 = vadd.f32 %v20868_v7, %v19193_v5  ;;  %v19449_v9 = vadd.f32 %v20868_v7, %v19197_v16  ;;  %v9324_v0 = vld [vmem:[%s19994_s0] sm:$0xff] }
 0x869   :  { %20869 = vst [vmem:[#allocation74_spill] sm:$0xff] %v19425_v37  ;;  %20870 = vst [vmem:[#allocation16_spill] sm:$0xff] %v19429_v28  ;;  %v19453_v51 = vadd.f32 %v20868_v7, %v19201_v54  ;;  %v19463_v38 = vadd.f32 %v20868_v7, %v19205_v42  ;;  %v19467_v5 = vadd.f32 %v20868_v7, %v19209_v34  ;;  %v9326_v42 = vld [vmem:[%s19994_s0 + $0x10] sm:$0xff]  ;;  %v9329_v34 = vld [vmem:[%s19994_s0 + $0x28] sm:$0xff] }
 0x86a   :  { %20871 = vst [vmem:[#allocation75_spill] sm:$0xff] %v19433_v13  ;;  %20872 = vst [vmem:[#allocation30_spill] sm:$0xff] %v19437_v26  ;;  %v19471_v16 = vadd.f32 %v20868_v7, %v19213_v41  ;;  %v19475_v54 = vadd.f32 %v20868_v7, %v19217_v43  ;;  %v9328_v41 = vld [vmem:[%s19994_s0 + $0x20] sm:$0xff]  ;;  %v9331_v26 = vld [vmem:[%s19994_s0 + $0x38] sm:$0xff] }
 0x86b   :  { %20873 = vst [vmem:[#allocation76_spill] sm:$0xff] %v19441_v4  ;;  %20874 = vst [vmem:[#allocation32_spill] sm:$0xff] %v19445_v11  ;;  %v20887_v11 = vld [vmem:[#allocation73_spill] sm:$0xff]  ;;  %v9346_v37 = vld [vmem:[%s19994_s0 + $0xb0] sm:$0xff] }
 0x86c   :  { %20875 = vst [vmem:[#allocation77_spill] sm:$0xff] %v19449_v9  ;;  %20876 = vst [vmem:[#allocation79_spill] sm:$0xff] %v19453_v51  ;;  %v9327_v51 = vld [vmem:[%s19994_s0 + $0x18] sm:$0xff]  ;;  %v19503_v4 = vadd.f32 %v20868_v7, %v20887_v11 }
 0x86d   :  { %20877 = vst [vmem:[#allocation78_spill] sm:$0xff] %v19463_v38  ;;  %20878 = vst [vmem:[#allocation81_spill] sm:$0xff] %v19467_v5  ;;  %v20885_v38 = vld [vmem:[#allocation70_spill] sm:$0xff]  ;;  %v9335_v13 = vld [vmem:[%s19994_s0 + $0x58] sm:$0xff] }
 0x86e   :  { %20879 = vst [vmem:[#allocation80_spill] sm:$0xff] %v19471_v16  ;;  %20880 = vst [vmem:[#allocation82_spill] sm:$0xff] %v19475_v54  ;;  %v20881_v16 = vld [vmem:[#allocation67_spill] sm:$0xff]  ;;  %v19499_v9 = vadd.f32 %v20868_v7, %v20885_v38  ;;  %v9332_v38 = vld [vmem:[%s19994_s0 + $0x40] sm:$0xff] }
 0x86f   :  { %v19491_v43 = vadd.f32 %v20868_v7, %v20881_v16  ;;  %v20883_v54 = vld [vmem:[#allocation71_spill] sm:$0xff]  ;;  %20888 = vst [vmem:[#allocation86_spill] sm:$0xff] %v19503_v4  ;;  %v9330_v16 = vld [vmem:[%s19994_s0 + $0x30] sm:$0xff]  ;;  %v19523_v4 = vadd.f32 %v20868_v7, %v19241_v45  ;;  %v9343_v28 = vld [vmem:[%s19994_s0 + $0x98] sm:$0xff] }
 0x870   :  { %v19495_v5 = vadd.f32 %v20868_v7, %v20883_v54  ;;  %20886 = vst [vmem:[#allocation85_spill] sm:$0xff] %v19499_v9  ;;  %v9333_v54 = vld [vmem:[%s19994_s0 + $0x48] sm:$0xff]  ;;  %v20889_v9 = vld [vmem:[#allocation72_spill] sm:$0xff] }
 0x871   :  { %20882 = vst [vmem:[#allocation83_spill] sm:$0xff] %v19491_v43  ;;  %v19519_v11 = vadd.f32 %v20868_v7, %v20889_v9  ;;  %20891 = vst [vmem:[#allocation49_spill] sm:$0xff] %v19523_v4  ;;  %v19531_v43 = vadd.f32 %v20868_v7, %v19249_v18  ;;  %v9334_v9 = vld [vmem:[%s19994_s0 + $0x50] sm:$0xff]  ;;  %v9337_v45 = vld [vmem:[%s19994_s0 + $0x68] sm:$0xff]  ;;  %v19547_v18 = vadd.f32 %v20868_v7, %v19253_v47 }
 0x872   :  { %20884 = vst [vmem:[#allocation84_spill] sm:$0xff] %v19495_v5  ;;  %v19527_v5 = vadd.f32 %v20868_v7, %v19245_v17  ;;  %v9336_v17 = vld [vmem:[%s19994_s0 + $0x60] sm:$0xff]  ;;  %v19559_v4 = vadd.f32 %v20868_v7, %v19265_v55  ;;  %v9338_v47 = vld [vmem:[%s19994_s0 + $0x70] sm:$0xff] }
 0x873   :  { %20890 = vst [vmem:[#allocation18_spill] sm:$0xff] %v19519_v11  ;;  %20893 = vst [vmem:[#allocation24_spill] sm:$0xff] %v19531_v43  ;;  %v19551_v43 = vadd.f32 %v20868_v7, %v19257_v32  ;;  %v9339_v11 = vld [vmem:[%s19994_s0 + $0x78] sm:$0xff]  ;;  %v9341_v32 = vld [vmem:[%s19994_s0 + $0x88] sm:$0xff] }
 0x874   :  { %20892 = vst [vmem:[#allocation19_spill] sm:$0xff] %v19527_v5  ;;  %20894 = vst [vmem:[#allocation20_spill] sm:$0xff] %v19547_v18  ;;  %v19555_v5 = vadd.f32 %v20868_v7, %v19261_v12  ;;  %v9340_v12 = vld [vmem:[%s19994_s0 + $0x80] sm:$0xff]  ;;  %v19587_v18 = vadd.f32 %v20868_v7, %v19281_v61  ;;  %v19603_v61 = vadd.f32 %v20868_v7, %v19285_v48  ;;  %v9349_v48 = vld [vmem:[%s19994_s0 + $0xc8] sm:$0xff] }
 0x875   :  { %20895 = vst [vmem:[#allocation27_spill] sm:$0xff] %v19551_v43  ;;  %20897 = vst [vmem:[#allocation15_spill] sm:$0xff] %v19559_v4  ;;  %v19579_v4 = vadd.f32 %v20868_v7, %v19273_v10  ;;  %v19583_v43 = vadd.f32 %v20868_v7, %v19277_v1  ;;  %v9345_v10 = vld [vmem:[%s19994_s0 + $0xa8] sm:$0xff]  ;;  %v9344_v1 = vld [vmem:[%s19994_s0 + $0xa0] sm:$0xff] }
 0x876   :  { %20896 = vst [vmem:[#allocation29_spill] sm:$0xff] %v19555_v5  ;;  %v20898_v5 = vld [vmem:[#allocation25_spill] sm:$0xff]  ;;  %20902 = vst [vmem:[#allocation36_spill] sm:$0xff] %v19587_v18  ;;  %v19607_v18 = vadd.f32 %v20868_v7, %v19289_v62  ;;  %v19628_v62 = vadd.f32 %v9326_v42, %v19301_v24  ;;  %v9353_v24 = vld [vmem:[%s19994_s0 + $0xe8] sm:$0xff]  ;;  %v19661_v42 = vadd.f32 %v9333_v54, %v19329_v44 }
 0x877   :  { %v19575_v55 = vadd.f32 %v20868_v7, %v20898_v5  ;;  %20900 = vst [vmem:[#allocation33_spill] sm:$0xff] %v19579_v4  ;;  %20901 = vst [vmem:[#allocation8_spill] sm:$0xff] %v19583_v43  ;;  %v9342_v5 = vld [vmem:[%s19994_s0 + $0x90] sm:$0xff]  ;;  %v19610_v43 = vadd.f32 %v9324_v0, %v19293_v21  ;;  %v19613_v4 = vadd.f32 %v9325_v36, %v19297_v56  ;;  %v9348_v7 = vld [vmem:[%s19994_s0 + $0xc0] sm:$0xff] }
 0x878   :  { %v19631_v21 = vadd.f32 %v9327_v51, %v19305_v49  ;;  %v19634_v56 = vadd.f32 %v9328_v41, %v19309_v39  ;;  %v19637_v36 = vadd.f32 %v9329_v34, %v19313_v6  ;;  %v9351_v0 = vld [vmem:[%s19994_s0 + $0xd8] sm:$0xff]  ;;  %v9352_v49 = vld [vmem:[%s19994_s0 + $0xe0] sm:$0xff]  ;;  %v19652_v39 = vadd.f32 %v9330_v16, %v19317_v58  ;;  %v9354_v41 = vld [vmem:[%s19994_s0 + $0xf0] sm:$0xff] }
 0x879   :  { %20899 = vst [vmem:[#allocation6_spill] sm:$0xff] %v19575_v55  ;;  %20903 = vst [vmem:[#allocation7_spill] sm:$0xff] %v19613_v4  ;;  %v9347_v55 = vld [vmem:[%s19994_s0 + $0xb8] sm:$0xff]  ;;  %v9350_v4 = vld [vmem:[%s19994_s0 + $0xd0] sm:$0xff]  ;;  %v19655_v6 = vadd.f32 %v9331_v26, %v19321_v25  ;;  %v19658_v51 = vadd.f32 %v9332_v38, %v19325_v57  ;;  %v19676_v57 = vadd.f32 %v9334_v9, %v19333_v3 }
 0x87a   :  { %v9355_v34 = vld [vmem:[%s19994_s0 + $0xf8] sm:$0xff]  ;;  %v9357_v58 = vld [vmem:[%s19994_s0 + $0x108] sm:$0xff]  ;;  %v9356_v25 = vld [vmem:[%s19994_s0 + $0x100] sm:$0xff]  ;;  %v19679_v44 = vadd.f32 %v9335_v13, %v19337_v63  ;;  %v19682_v26 = vadd.f32 %v9336_v17, %v19341_v50  ;;  %v19685_v16 = vadd.f32 %v9337_v45, %v19345_v23  ;;  %v19700_v50 = vadd.f32 %v9338_v47, %v19349_v27 }
 0x87b   :  { %v9359_v54 = vld [vmem:[%s19994_s0 + $0x118] sm:$0xff]  ;;  %v9358_v38 = vld [vmem:[%s19994_s0 + $0x110] sm:$0xff]  ;;  %v9361_v3 = vld [vmem:[%s19994_s0 + $0x128] sm:$0xff]  ;;  %v19703_v23 = vadd.f32 %v9339_v11, %v19353_v60  ;;  %v19706_v13 = vadd.f32 %v9340_v12, %v19357_v2  ;;  %v19709_v9 = vadd.f32 %v9341_v32, %v19361_v15  ;;  %v19721_v60 = vadd.f32 %v9342_v5, %v19365_v33 }
 0x87c   :  { %v9360_v63 = vld [vmem:[%s19994_s0 + $0x120] sm:$0xff]  ;;  %v9363_v45 = vld [vmem:[%s19994_s0 + $0x138] sm:$0xff]  ;;  %v9362_v17 = vld [vmem:[%s19994_s0 + $0x130] sm:$0xff]  ;;  %v19724_v2 = vadd.f32 %v9343_v28, %v19369_v8  ;;  %v19727_v15 = vadd.f32 %v9344_v1, %v19373_v46  ;;  %v19730_v11 = vadd.f32 %v9345_v10, %v19377_v53  ;;  %v19742_v8 = vadd.f32 %v9346_v37, %v19381_v40 }
 0x87d   :  { %v9365_v27 = vld [vmem:[%s19994_s0 + $0x148] sm:$0xff]  ;;  %v9364_v47 = vld [vmem:[%s19994_s0 + $0x140] sm:$0xff]  ;;  %v9367_v32 = vld [vmem:[%s19994_s0 + $0x158] sm:$0xff]  ;;  %v19745_v46 = vadd.f32 %v9347_v55, %v19385_v29  ;;  %v19748_v53 = vadd.f32 %v9348_v7, %v19389_v35  ;;  %v19751_v28 = vadd.f32 %v9349_v48, %v19393_v52  ;;  %v19763_v29 = vadd.f32 %v9350_v4, %v19397_v30 }
 0x87e   :  { %v9366_v33 = vld [vmem:[%s19994_s0 + $0x150] sm:$0xff]  ;;  %v9369_v12 = vld [vmem:[%s19994_s0 + $0x168] sm:$0xff]  ;;  %v9368_v5 = vld [vmem:[%s19994_s0 + $0x160] sm:$0xff]  ;;  %v19766_v35 = vadd.f32 %v9351_v0, %v19401_v22  ;;  %v19769_v52 = vadd.f32 %v9352_v49, %v19405_v20  ;;  %v19772_v37 = vadd.f32 %v9353_v24, %v19409_v19  ;;  %v19784_v22 = vadd.f32 %v9354_v41, %v19413_v14 }
 0x87f   :  { %v9371_v40 = vld [vmem:[%s19994_s0 + $0x178] sm:$0xff]  ;;  %v9370_v55 = vld [vmem:[%s19994_s0 + $0x170] sm:$0xff]  ;;  %v9373_v10 = vld [vmem:[%s19994_s0 + $0x188] sm:$0xff]  ;;  %v19787_v20 = vadd.f32 %v9355_v34, %v19417_v59  ;;  %v19790_v19 = vadd.f32 %v9356_v25, %v19421_v31 }
 0x880   :  { %v9372_v30 = vld [vmem:[%s19994_s0 + $0x180] sm:$0xff]  ;;  %v9375_v48 = vld [vmem:[%s19994_s0 + $0x198] sm:$0xff]  ;;  %v9374_v7 = vld [vmem:[%s19994_s0 + $0x190] sm:$0xff] }
 0x881   :  { %v20904_v4 = vld [vmem:[#allocation74_spill] sm:$0xff]  ;;  %v9377_v14 = vld [vmem:[%s19994_s0 + $0x1a8] sm:$0xff]  ;;  %v20905_v59 = vld [vmem:[#allocation16_spill] sm:$0xff] }
 0x882   :  { %v19793_v1 = vadd.f32 %v9357_v58, %v20904_v4  ;;  %v19805_v0 = vadd.f32 %v9358_v38, %v20905_v59  ;;  %v20907_v31 = vld [vmem:[#allocation75_spill] sm:$0xff]  ;;  %v20909_v49 = vld [vmem:[#allocation30_spill] sm:$0xff]  ;;  %v20911_v41 = vld [vmem:[#allocation76_spill] sm:$0xff] }
 0x883   :  { %v19808_v24 = vadd.f32 %v9359_v54, %v20907_v31  ;;  %v19811_v34 = vadd.f32 %v9360_v63, %v20909_v49  ;;  %v19814_v58 = vadd.f32 %v9361_v3, %v20911_v41  ;;  %v9376_v25 = vld [vmem:[%s19994_s0 + $0x1a0] sm:$0xff]  ;;  %v9379_v4 = vld [vmem:[%s19994_s0 + $0x1b8] sm:$0xff]  ;;  %v9378_v38 = vld [vmem:[%s19994_s0 + $0x1b0] sm:$0xff] }
 0x884   :  { %20906 = vst [vmem:[#allocation38_spill] sm:$0xff] %v19805_v0  ;;  %v20913_v54 = vld [vmem:[#allocation32_spill] sm:$0xff]  ;;  %v20915_v63 = vld [vmem:[#allocation77_spill] sm:$0xff]  ;;  %v20917_v3 = vld [vmem:[#allocation79_spill] sm:$0xff] }
 0x885   :  { %20908 = vst [vmem:[#allocation10_spill] sm:$0xff] %v19808_v24  ;;  %20910 = vst [vmem:[#allocation40_spill] sm:$0xff] %v19811_v34  ;;  %v19826_v59 = vadd.f32 %v9362_v17, %v20913_v54  ;;  %v19829_v31 = vadd.f32 %v9363_v45, %v20915_v63  ;;  %v19832_v49 = vadd.f32 %v9364_v47, %v20917_v3  ;;  %v20919_v41 = vld [vmem:[#allocation78_spill] sm:$0xff]  ;;  %v9381_v34 = vld [vmem:[%s19994_s0 + $0x1c8] sm:$0xff] }
 0x886   :  { %20912 = vst [vmem:[#allocation9_spill] sm:$0xff] %v19814_v58  ;;  %v19835_v58 = vadd.f32 %v9365_v27, %v20919_v41  ;;  %v9380_v24 = vld [vmem:[%s19994_s0 + $0x1c0] sm:$0xff]  ;;  %v9383_v17 = vld [vmem:[%s19994_s0 + $0x1d8] sm:$0xff]  ;;  %v20923_v47 = vld [vmem:[#allocation80_spill] sm:$0xff] }
 0x887   :  { %20914 = vst [vmem:[#allocation42_spill] sm:$0xff] %v19826_v59  ;;  %20916 = vst [vmem:[#allocation12_spill] sm:$0xff] %v19829_v31  ;;  %v20921_v45 = vld [vmem:[#allocation81_spill] sm:$0xff]  ;;  %v19850_v63 = vadd.f32 %v9367_v32, %v20923_v47  ;;  %v20925_v27 = vld [vmem:[#allocation82_spill] sm:$0xff] }
 0x888   :  { %20918 = vst [vmem:[#allocation43_spill] sm:$0xff] %v19832_v49  ;;  %20920 = vst [vmem:[#allocation44_spill] sm:$0xff] %v19835_v58  ;;  %v19847_v54 = vadd.f32 %v9366_v33, %v20921_v45  ;;  %v19853_v3 = vadd.f32 %v9368_v5, %v20925_v27  ;;  %v20927_v41 = vld [vmem:[#allocation83_spill] sm:$0xff]  ;;  %v9382_v49 = vld [vmem:[%s19994_s0 + $0x1d0] sm:$0xff] }
 0x889   :  { %20924 = vst [vmem:[#allocation46_spill] sm:$0xff] %v19850_v63  ;;  %v19856_v58 = vadd.f32 %v9369_v12, %v20927_v41  ;;  %v9385_v31 = vld [vmem:[%s19994_s0 + $0x1e8] sm:$0xff]  ;;  %v9384_v33 = vld [vmem:[%s19994_s0 + $0x1e0] sm:$0xff]  ;;  %v20929_v32 = vld [vmem:[#allocation84_spill] sm:$0xff] }
 0x88a   :  { %20922 = vst [vmem:[#allocation21_spill] sm:$0xff] %v19847_v54  ;;  %20926 = vst [vmem:[#allocation11_spill] sm:$0xff] %v19853_v3  ;;  %v19868_v45 = vadd.f32 %v9370_v55, %v20929_v32  ;;  %v20930_v5 = vld [vmem:[#allocation85_spill] sm:$0xff]  ;;  %v20931_v12 = vld [vmem:[#allocation86_spill] sm:$0xff] }
 0x88b   :  { %20928 = vst [vmem:[#allocation50_spill] sm:$0xff] %v19856_v58  ;;  %v19871_v47 = vadd.f32 %v9371_v40, %v20930_v5  ;;  %v19874_v27 = vadd.f32 %v9372_v30, %v20931_v12  ;;  %v20933_v41 = vld [vmem:[#allocation18_spill] sm:$0xff]  ;;  %v9387_v3 = vld [vmem:[%s19994_s0 + $0x1f8] sm:$0xff]  ;;  %v20936_v59 = vld [vmem:[#allocation19_spill] sm:$0xff]  ;;  %s12211_s0 = smov [#allocation3]  }
 0x88c   :  { %v19877_v58 = vadd.f32 %v9373_v10, %v20933_v41  ;;  %v20935_v63 = vld [vmem:[#allocation49_spill] sm:$0xff]  ;;  %v19886_v0 = vadd.f32 %v9375_v48, %v20936_v59  ;;  %v20937_v55 = vld [vmem:[#allocation24_spill] sm:$0xff]  ;;  %v20939_v30 = vld [vmem:[#allocation27_spill] sm:$0xff]  ;;  %s9585_s13 = sshll.u32 %s12211_s0, 4  ;;  %s19980_s13 = int_to_ptr.vmem [resolvable:$true] %s9585_s13 }
 0x88d   :  { %20932 = vst [vmem:[#allocation22_spill] sm:$0xff] %v19874_v27  ;;  %v19883_v54 = vadd.f32 %v9374_v7, %v20935_v63  ;;  %v19889_v32 = vadd.f32 %v9376_v25, %v20937_v55  ;;  %v20938_v40 = vld [vmem:[#allocation20_spill] sm:$0xff]  ;;  %v19895_v12 = vadd.f32 %v9378_v38, %v20939_v30  ;;  %v20940_v10 = vld [vmem:[#allocation29_spill] sm:$0xff]  ;;  %v20942_v7 = vld [vmem:[#allocation6_spill] sm:$0xff]  ;;  %v19916_v38 = vadd.f32 %v9385_v31, %v19603_v61  ;;  %s12188_s2 = scalar_lea.vmem %s19980_s13, 8192  ;;  %p12193_p1 = scmp.lt.s32.totalorder %s19980_s13, %s19980_s13 }
 0x88e   :  { %20934 = vst [vmem:[#allocation52_spill] sm:$0xff] %v19877_v58  ;;  %v19892_v5 = vadd.f32 %v9377_v14, %v20938_v40  ;;  %v19898_v41 = vadd.f32 %v9379_v4, %v20940_v10  ;;  %v20941_v58 = vld [vmem:[#allocation15_spill] sm:$0xff]  ;;  %v19904_v63 = vadd.f32 %v9381_v34, %v20942_v7  ;;  %v20943_v48 = vld [vmem:[#allocation33_spill] sm:$0xff]  ;;  %v20944_v25 = vld [vmem:[#allocation8_spill] sm:$0xff]  ;;  %v19919_v4 = vadd.f32 %v9387_v3, %v19607_v18  ;;  %p12189_p0 = scmp.ne.s32.totalorder %s19980_s13, %s12188_s2  ;;  %p12194_p2 = scmp.lt.s32.totalorder %s12188_s2, %s12188_s2 }
 0x88f   :  { %v19901_v27 = vadd.f32 %v9380_v24, %v20941_v58  ;;  %v19907_v59 = vadd.f32 %v9382_v49, %v20943_v48  ;;  %v19910_v55 = vadd.f32 %v9383_v17, %v20944_v25  ;;  %v20945_v14 = vld [vmem:[#allocation36_spill] sm:$0xff]  ;;  %v9452_v24 = vmax.f32 %v19610_v43, 0.0  ;;  %v20946_v58 = vld [vmem:[#allocation7_spill] sm:$0xff]  ;;  %v20950_v3 = vld [vmem:[#allocation9_spill] sm:$0xff] }
 0x890   :  { %v19913_v40 = vadd.f32 %v9384_v33, %v20945_v14  ;;  %v9453_v34 = vmax.f32 %v20946_v58, 0.0  ;;  %v9454_v30 = vmax.f32 %v19628_v62, 0.0  ;;  %v9455_v49 = vmax.f32 %v19631_v21, 0.0  ;;  %v20951_v48 = vld [vmem:[#allocation42_spill] sm:$0xff]  ;;  %p12195_p3 = por %p12194_p2, %p12193_p1 }
 0x891   :  { %v9456_v17 = vmax.f32 %v19634_v56, 0.0  ;;  %v9457_v10 = vmax.f32 %v19637_v36, 0.0  ;;  %v9458_v33 = vmax.f32 %v19652_v39, 0.0  ;;  %v9459_v61 = vmax.f32 %v19655_v6, 0.0  ;;  %9516 = vst [vmem:[#allocation3] sm:$0xff] %v9452_v24  ;;  %v20954_v24 = vld [vmem:[#allocation44_spill] sm:$0xff] }
 0x892   :  { %v9460_v31 = vmax.f32 %v19658_v51, 0.0  ;;  %v9461_v18 = vmax.f32 %v19661_v42, 0.0  ;;  %v9462_v43 = vmax.f32 %v19676_v57, 0.0  ;;  %9517 = vst [vmem:[#allocation3 + $0x8] sm:$0xff] %v9453_v34  ;;  %9518 = vst [vmem:[#allocation3 + $0x10] sm:$0xff] %v9454_v30  ;;  %v9463_v62 = vmax.f32 %v19679_v44, 0.0  ;;  %p12196_p4 = pnand %p12195_p3, %p12189_p0 }
 0x893   :  { %v9464_v21 = vmax.f32 %v19682_v26, 0.0  ;;  %v9465_v56 = vmax.f32 %v19685_v16, 0.0  ;;  %v9466_v36 = vmax.f32 %v19700_v50, 0.0  ;;  %9519 = vst [vmem:[#allocation3 + $0x18] sm:$0xff] %v9455_v49  ;;  %9520 = vst [vmem:[#allocation3 + $0x20] sm:$0xff] %v9456_v17  ;;  %v9467_v39 = vmax.f32 %v19703_v23, 0.0 }
 0x894   :  { %9521 = vst [vmem:[#allocation3 + $0x28] sm:$0xff] %v9457_v10  ;;  %9522 = vst [vmem:[#allocation3 + $0x30] sm:$0xff] %v9458_v33  ;;  %v9468_v6 = vmax.f32 %v19706_v13, 0.0  ;;  %v9469_v51 = vmax.f32 %v19709_v9, 0.0  ;;  %v9470_v42 = vmax.f32 %v19721_v60, 0.0  ;;  %v9471_v57 = vmax.f32 %v19724_v2, 0.0 }
 0x895   :  { %9523 = vst [vmem:[#allocation3 + $0x38] sm:$0xff] %v9459_v61  ;;  %9524 = vst [vmem:[#allocation3 + $0x40] sm:$0xff] %v9460_v31  ;;  %v9472_v44 = vmax.f32 %v19727_v15, 0.0  ;;  %v9473_v26 = vmax.f32 %v19730_v11, 0.0  ;;  %v9474_v16 = vmax.f32 %v19742_v8, 0.0  ;;  %v9475_v50 = vmax.f32 %v19745_v46, 0.0 }
 0x896   :  { %9525 = vst [vmem:[#allocation3 + $0x48] sm:$0xff] %v9461_v18  ;;  %9526 = vst [vmem:[#allocation3 + $0x50] sm:$0xff] %v9462_v43  ;;  %v9476_v23 = vmax.f32 %v19748_v53, 0.0  ;;  %v9477_v13 = vmax.f32 %v19751_v28, 0.0  ;;  %v9478_v9 = vmax.f32 %v19763_v29, 0.0  ;;  %v9479_v60 = vmax.f32 %v19766_v35, 0.0 }
 0x897   :  { %9527 = vst [vmem:[#allocation3 + $0x58] sm:$0xff] %v9463_v62  ;;  %9528 = vst [vmem:[#allocation3 + $0x60] sm:$0xff] %v9464_v21  ;;  %v9480_v2 = vmax.f32 %v19769_v52, 0.0  ;;  %v9481_v15 = vmax.f32 %v19772_v37, 0.0  ;;  %v9482_v11 = vmax.f32 %v19784_v22, 0.0  ;;  %v9483_v8 = vmax.f32 %v19787_v20, 0.0 }
 0x898   :  { %9529 = vst [vmem:[#allocation3 + $0x68] sm:$0xff] %v9465_v56  ;;  %9530 = vst [vmem:[#allocation3 + $0x70] sm:$0xff] %v9466_v36  ;;  %v9484_v46 = vmax.f32 %v19790_v19, 0.0  ;;  %v9485_v53 = vmax.f32 %v19793_v1, 0.0  ;;  %v20947_v28 = vld [vmem:[#allocation38_spill] sm:$0xff]  ;;  %v20949_v37 = vld [vmem:[#allocation40_spill] sm:$0xff] }
 0x899   :  { %9531 = vst [vmem:[#allocation3 + $0x78] sm:$0xff] %v9467_v39  ;;  %9532 = vst [vmem:[#allocation3 + $0x80] sm:$0xff] %v9468_v6  ;;  %v9486_v29 = vmax.f32 %v20947_v28, 0.0  ;;  %v20948_v35 = vld [vmem:[#allocation10_spill] sm:$0xff]  ;;  %v9488_v22 = vmax.f32 %v20949_v37, 0.0  ;;  %v9489_v7 = vmax.f32 %v20950_v3, 0.0 }
 0x89a   :  { %9533 = vst [vmem:[#allocation3 + $0x88] sm:$0xff] %v9469_v51  ;;  %9534 = vst [vmem:[#allocation3 + $0x90] sm:$0xff] %v9470_v42  ;;  %v9487_v52 = vmax.f32 %v20948_v35, 0.0  ;;  %v9490_v25 = vmax.f32 %v20951_v48, 0.0  ;;  %v20952_v20 = vld [vmem:[#allocation12_spill] sm:$0xff]  ;;  %v20953_v1 = vld [vmem:[#allocation43_spill] sm:$0xff] }
 0x89b   :  { %9535 = vst [vmem:[#allocation3 + $0x98] sm:$0xff] %v9471_v57  ;;  %9536 = vst [vmem:[#allocation3 + $0xa0] sm:$0xff] %v9472_v44  ;;  %v9491_v19 = vmax.f32 %v20952_v20, 0.0  ;;  %v9492_v14 = vmax.f32 %v20953_v1, 0.0  ;;  %v9493_v58 = vmax.f32 %v20954_v24, 0.0  ;;  %v20955_v34 = vld [vmem:[#allocation21_spill] sm:$0xff] }
 0x89c   :  { %9537 = vst [vmem:[#allocation3 + $0xa8] sm:$0xff] %v9473_v26  ;;  %9538 = vst [vmem:[#allocation3 + $0xb0] sm:$0xff] %v9474_v16  ;;  %v9494_v30 = vmax.f32 %v20955_v34, 0.0  ;;  %v20956_v49 = vld [vmem:[#allocation46_spill] sm:$0xff]  ;;  %v20957_v10 = vld [vmem:[#allocation11_spill] sm:$0xff]  ;;  %v9498_v18 = vmax.f32 %v19868_v45, 0.0 }
 0x89d   :  { %9539 = vst [vmem:[#allocation3 + $0xb8] sm:$0xff] %v9475_v50  ;;  %9540 = vst [vmem:[#allocation3 + $0xc0] sm:$0xff] %v9476_v23  ;;  %v9495_v17 = vmax.f32 %v20956_v49, 0.0  ;;  %v9496_v33 = vmax.f32 %v20957_v10, 0.0  ;;  %v20958_v61 = vld [vmem:[#allocation50_spill] sm:$0xff]  ;;  %v9499_v43 = vmax.f32 %v19871_v47, 0.0 }
 0x89e   :  { %9541 = vst [vmem:[#allocation3 + $0xc8] sm:$0xff] %v9477_v13  ;;  %9542 = vst [vmem:[#allocation3 + $0xd0] sm:$0xff] %v9478_v9  ;;  %v9497_v31 = vmax.f32 %v20958_v61, 0.0  ;;  %v20959_v62 = vld [vmem:[#allocation22_spill] sm:$0xff]  ;;  %v20960_v56 = vld [vmem:[#allocation52_spill] sm:$0xff]  ;;  %v9502_v39 = vmax.f32 %v19883_v54, 0.0 }
 0x89f   :  { %9543 = vst [vmem:[#allocation3 + $0xd8] sm:$0xff] %v9479_v60  ;;  %9544 = vst [vmem:[#allocation3 + $0xe0] sm:$0xff] %v9480_v2  ;;  %v9500_v21 = vmax.f32 %v20959_v62, 0.0  ;;  %v9501_v36 = vmax.f32 %v20960_v56, 0.0  ;;  %v9503_v45 = vmax.f32 %v19886_v0, 0.0  ;;  %v9504_v6 = vmax.f32 %v19889_v32, 0.0 }
 0x8a0   :  { %9545 = vst [vmem:[#allocation3 + $0xe8] sm:$0xff] %v9481_v15  ;;  %9546 = vst [vmem:[#allocation3 + $0xf0] sm:$0xff] %v9482_v11  ;;  %v9505_v51 = vmax.f32 %v19892_v5, 0.0  ;;  %v9506_v42 = vmax.f32 %v19895_v12, 0.0  ;;  %v9507_v47 = vmax.f32 %v19898_v41, 0.0  ;;  %v9508_v54 = vmax.f32 %v19901_v27, 0.0 }
 0x8a1   :  { %9547 = vst [vmem:[#allocation3 + $0xf8] sm:$0xff] %v9483_v8  ;;  %9548 = vst [vmem:[#allocation3 + $0x100] sm:$0xff] %v9484_v46  ;;  %v9509_v57 = vmax.f32 %v19904_v63, 0.0  ;;  %v9510_v44 = vmax.f32 %v19907_v59, 0.0  ;;  %v9511_v0 = vmax.f32 %v19910_v55, 0.0  ;;  %v9512_v32 = vmax.f32 %v19913_v40, 0.0 }
 0x8a2   :  { %9549 = vst [vmem:[#allocation3 + $0x108] sm:$0xff] %v9485_v53  ;;  %9550 = vst [vmem:[#allocation3 + $0x110] sm:$0xff] %v9486_v29  ;;  %v9513_v5 = vmax.f32 %v19916_v38, 0.0  ;;  %v9515_v27 = vmax.f32 %v19919_v4, 0.0 }
 0x8a3   :  { %9551 = vst [vmem:[#allocation3 + $0x118] sm:$0xff] %v9487_v52  ;;  %9552 = vst [vmem:[#allocation3 + $0x120] sm:$0xff] %v9488_v22 }
 0x8a4   :  { %9553 = vst [vmem:[#allocation3 + $0x128] sm:$0xff] %v9489_v7  ;;  %9554 = vst [vmem:[#allocation3 + $0x130] sm:$0xff] %v9490_v25 }
 0x8a5   :  { %9555 = vst [vmem:[#allocation3 + $0x138] sm:$0xff] %v9491_v19  ;;  %9556 = vst [vmem:[#allocation3 + $0x140] sm:$0xff] %v9492_v14 }
 0x8a6   :  { %9557 = vst [vmem:[#allocation3 + $0x148] sm:$0xff] %v9493_v58  ;;  %9558 = vst [vmem:[#allocation3 + $0x150] sm:$0xff] %v9494_v30 }
 0x8a7   :  { %9559 = vst [vmem:[#allocation3 + $0x158] sm:$0xff] %v9495_v17  ;;  %9560 = vst [vmem:[#allocation3 + $0x160] sm:$0xff] %v9496_v33 }
 0x8a8   :  { %9561 = vst [vmem:[#allocation3 + $0x168] sm:$0xff] %v9497_v31  ;;  %9562 = vst [vmem:[#allocation3 + $0x170] sm:$0xff] %v9498_v18 }
 0x8a9   :  { %9563 = vst [vmem:[#allocation3 + $0x178] sm:$0xff] %v9499_v43  ;;  %9564 = vst [vmem:[#allocation3 + $0x180] sm:$0xff] %v9500_v21 }
 0x8aa   :  { %9565 = vst [vmem:[#allocation3 + $0x188] sm:$0xff] %v9501_v36  ;;  %9566 = vst [vmem:[#allocation3 + $0x190] sm:$0xff] %v9502_v39 }
 0x8ab   :  { %9567 = vst [vmem:[#allocation3 + $0x198] sm:$0xff] %v9503_v45  ;;  %9568 = vst [vmem:[#allocation3 + $0x1a0] sm:$0xff] %v9504_v6 }
 0x8ac   :  { %9569 = vst [vmem:[#allocation3 + $0x1a8] sm:$0xff] %v9505_v51  ;;  %9570 = vst [vmem:[#allocation3 + $0x1b0] sm:$0xff] %v9506_v42 }
 0x8ad   :  { %9571 = vst [vmem:[#allocation3 + $0x1b8] sm:$0xff] %v9507_v47  ;;  %9572 = vst [vmem:[#allocation3 + $0x1c0] sm:$0xff] %v9508_v54 }
 0x8ae   :  { %9573 = vst [vmem:[#allocation3 + $0x1c8] sm:$0xff] %v9509_v57  ;;  %9574 = vst [vmem:[#allocation3 + $0x1d0] sm:$0xff] %v9510_v44 }
 0x8af   :  { %9575 = vst [vmem:[#allocation3 + $0x1d8] sm:$0xff] %v9511_v0  ;;  %9576 = vst [vmem:[#allocation3 + $0x1e0] sm:$0xff] %v9512_v32 }
 0x8b0   :  { %9577 = vst [vmem:[#allocation3 + $0x1e8] sm:$0xff] %v9513_v5  ;;  %9579 = vst [vmem:[#allocation3 + $0x1f8] sm:$0xff] %v9515_v27 }
 0x8b1   :  { %12199 = shalt.err (!%p12196_p4)
}
 0x8b2   :  { %s12212_s1 = smov 128   ;;  %s12213_s14 = smov 8  }
 0x8b3   :  { %9591 = dma.vmem_to_hbm [thread:$0]  %s19980_s13, 8192, %s20004_s10, [#allocation4], %s12212_s1, %s12212_s1, %s12213_s14  }
 0x8b4   :  { %12208 = dma.done.wait [#allocation4], 8192  }
 0x8b5   :  { %12209 = vsyncadd [#allocation4], 4294959104 }
 0x8b6   :  { %9595 = vsyncpa [#allocation4], 1 }

</bundles_post_ra>
